<compile_context>
chip_gen: v7x
topology: tpu7x:2x2x1
jax: 0.10.0
libtpu: 0.0.40
codegen_flags: <defaults>
</compile_context>

<pallas_src>
import functools
import math

import jax
import jax.numpy as jnp
from jax import lax
from jax.experimental import pallas as pl
from jax.experimental.pallas import tpu as pltpu

# ----------------------------------------------------------------------------- config
CFG = dict(
    in_chans=3, img_size=16, stages=2,
    embed_dims=[16, 16], token_dims=[16, 32],
    downsample=[4, 2], kernel_size=[7, 3],
    RC_heads=[1, 1], NC_heads=[4, 4],
    dilations=[[1, 2, 3, 4], [1, 2, 3]],
    NC_depth=[2, 2],
    mlp_ratio=4, rc_mlp_ratio=1,
    window_size=2, ln_eps=1e-6, bn_eps=1e-5,
)

_F32 = jnp.float32
_BF16 = jnp.bfloat16
_VMEM_LIMIT = 32 * 1024 * 1024          # explicit scoped-VMEM budget (safe on v5e/v6e/v7x)


def _round_up(a, m):
    return (a + m - 1) // m * m


# ----------------------------------------------------------------------------- kernels
def _mm_kernel(x_ref, w_ref, b_ref, o_ref, *, act):
    """y = act(x @ w + b) — conv/linear matmul with BN already folded into w/b."""
    y = jnp.dot(x_ref[...].astype(_BF16), w_ref[...].astype(_BF16),
                preferred_element_type=_F32)
    y = y + b_ref[...]
    if act == "gelu":
        y = jax.nn.gelu(y)
    elif act == "silu":
        y = y * jax.nn.sigmoid(y)
    o_ref[...] = y.astype(o_ref.dtype)


def _cell_kernel(x_ref, c_ref,
                 ln1g_ref, ln1b_ref, qkvw_ref, qkvb_ref, projw_ref, projb_ref,
                 ln2g_ref, ln2b_ref, fc1w_ref, fc1b_ref, fc2w_ref, fc2b_ref,
                 o_ref, *, heads, head_dim, scale, add_shortcut, eps, wg, sp, s_real):
    """Fused transformer part of a ReductionCell / NormalCell for one window-chunk.

    Tokens arrive window-major, each window zero-padded to `sp` (multiple of 8) rows:
      t    = LN1(x)
      qkv  = t @ Wqkv + b                       (packed, lane-dense 3*Cout)
      attn = per-window multi-head attention, batched over the `wg` windows of the block
      y    = concat(heads) @ Wproj + bproj + pcm_c (+ x if NormalCell)
      out  = y + fc2(gelu(fc1(LN2(y))))
    """
    cout = o_ref.shape[-1]

    x = x_ref[...].astype(_F32)                                   # (wg*sp, Cin)

    # ---- LN1 (f32 statistics) ----
    mu = jnp.mean(x, axis=-1, keepdims=True)
    xc = x - mu
    var = jnp.mean(xc * xc, axis=-1, keepdims=True)
    t = xc * lax.rsqrt(var + eps) * ln1g_ref[...] + ln1b_ref[...]

    # ---- packed qkv projection (one MXU matmul, full lane width 3*Cout) ----
    qkv = jnp.dot(t.astype(_BF16), qkvw_ref[...].astype(_BF16),
                  preferred_element_type=_F32) + qkvb_ref[...]

    # key-padding mask (only when windows were padded to sp rows); hoisted out of the loop
    if sp != s_real:
        kmask = lax.broadcasted_iota(jnp.int32, (1, 1, sp), 2) < s_real

    # ---- window attention, batched over all wg windows of this block ----
    heads_out = []
    for h in range(heads):                                        # heads <= 4
        q = qkv[:, h * head_dim:(h + 1) * head_dim].reshape(wg, sp, head_dim)
        k = qkv[:, cout + h * head_dim:cout + (h + 1) * head_dim].reshape(wg, sp, head_dim)
        v = qkv[:, 2 * cout + h * head_dim:2 * cout + (h + 1) * head_dim].reshape(
            wg, sp, head_dim)
        s = jnp.einsum('wqd,wkd->wqk', q.astype(_BF16), k.astype(_BF16),
                       preferred_element_type=_F32) * scale
        if sp != s_real:
            s = jnp.where(kmask, s, -1e9)
        s = s - jnp.max(s, axis=-1, keepdims=True)
        p = jnp.exp(s)
        p = p * pl.reciprocal(jnp.sum(p, axis=-1, keepdims=True), approx=True)
        o_h = jnp.einsum('wqk,wkd->wqd', p.astype(_BF16), v.astype(_BF16),
                         preferred_element_type=_F32)
        heads_out.append(o_h.reshape(wg * sp, head_dim))

    attn = heads_out[0] if heads == 1 else jnp.concatenate(heads_out, axis=-1)

    # ---- single output projection with K = Cout ----
    y = jnp.dot(attn.astype(_BF16), projw_ref[...].astype(_BF16),
                preferred_element_type=_F32) + projb_ref[...]
    y = y + c_ref[...].astype(_F32)                               # PCM conv path
    if add_shortcut:
        y = y + x

    # ---- LN2 + MLP + residual ----
    mu2 = jnp.mean(y, axis=-1, keepdims=True)
    yc = y - mu2
    var2 = jnp.mean(yc * yc, axis=-1, keepdims=True)
    t2 = yc * lax.rsqrt(var2 + eps) * ln2g_ref[...] + ln2b_ref[...]
    m = jnp.dot(t2.astype(_BF16), fc1w_ref[...].astype(_BF16),
                preferred_element_type=_F32) + fc1b_ref[...]
    m = jax.nn.gelu(m)
    m = jnp.dot(m.astype(_BF16), fc2w_ref[...].astype(_BF16),
                preferred_element_type=_F32) + fc2b_ref[...]
    o_ref[...] = (y + m).astype(o_ref.dtype)


# ----------------------------------------------------------------------------- wrappers
def pallas_matmul(x, w, b, act="none", out_dtype=_BF16, tile_m=512):
    """act(x @ w + b), tiled over M (parallel grid); bf16 MXU inputs, f32 accumulation."""
    M, K = x.shape
    N = w.shape[1]
    Mp = _round_up(M, 8)
    if Mp != M:                                   # rare: at most 7 padding rows
        x = jnp.pad(x, ((0, Mp - M), (0, 0)))
    tm = min(tile_m, Mp)
    grid_m = (Mp + tm - 1) // tm                  # partial final block handled by Pallas
    y = pl.pallas_call(
        functools.partial(_mm_kernel, act=act),
        out_shape=jax.ShapeDtypeStruct((Mp, N), out_dtype),
        grid=(grid_m,),
        in_specs=[pl.BlockSpec((tm, K), lambda i: (i, 0)),
                  pl.BlockSpec((K, N), lambda i: (0, 0)),
                  pl.BlockSpec((1, N), lambda i: (0, 0))],
        out_specs=pl.BlockSpec((tm, N), lambda i: (i, 0)),
        compiler_params=pltpu.CompilerParams(
            dimension_semantics=("parallel",),
            vmem_limit_bytes=_VMEM_LIMIT),
    )(x, w, b.reshape(1, N))
    return y if Mp == M else y[:M]


def _choose_wg(num_windows, sp, tok_target=1024):
    """Windows per fused-cell grid step: largest divisor of num_windows whose token
    footprint stays under tok_target (VMEM bound) while keeping >= 2 parallel grid
    steps whenever possible (so both v7x TensorCores get work even at batch=1/2)."""
    best = 1
    for wg in range(1, num_windows + 1):
        if num_windows % wg:
            continue
        if wg * sp > tok_target:
            break
        if num_windows // wg >= 2 or num_windows == 1:
            best = wg
    return best


def fused_cell(x_tok, c_tok, p, heads, add_shortcut, num_windows, sp, s_real):
    """Fused LN/attention/proj/residual/MLP for one cell on window-major tokens.

    x_tok: (num_windows * sp, Cin), c_tok: (num_windows * sp, Cout) — whole batch folded
    into one pallas_call; the grid iterates window-chunks ("parallel")."""
    Tt, Cin = x_tok.shape
    Cout = c_tok.shape[-1]
    head_dim = Cout // heads
    hid = p["fc1"]["w"].shape[1]
    three = 3 * Cout
    wg = _choose_wg(num_windows, sp)
    rows = wg * sp                                 # always a multiple of 8
    grid = (num_windows // wg,)
    kern = functools.partial(
        _cell_kernel, heads=heads, head_dim=head_dim, scale=head_dim ** -0.5,
        add_shortcut=add_shortcut, eps=CFG["ln_eps"], wg=wg, sp=sp, s_real=s_real)
    in_specs = [
        pl.BlockSpec((rows, Cin), lambda i: (i, 0)),     # x tokens (window-major)
        pl.BlockSpec((rows, Cout), lambda i: (i, 0)),    # pcm conv path
        pl.BlockSpec((1, Cin), lambda i: (0, 0)),        # ln1 g
        pl.BlockSpec((1, Cin), lambda i: (0, 0)),        # ln1 b
        pl.BlockSpec((Cin, three), lambda i: (0, 0)),    # qkv w
        pl.BlockSpec((1, three), lambda i: (0, 0)),      # qkv b
        pl.BlockSpec((Cout, Cout), lambda i: (0, 0)),    # proj w
        pl.BlockSpec((1, Cout), lambda i: (0, 0)),       # proj b
        pl.BlockSpec((1, Cout), lambda i: (0, 0)),       # ln2 g
        pl.BlockSpec((1, Cout), lambda i: (0, 0)),       # ln2 b
        pl.BlockSpec((Cout, hid), lambda i: (0, 0)),     # fc1 w
        pl.BlockSpec((1, hid), lambda i: (0, 0)),        # fc1 b
        pl.BlockSpec((hid, Cout), lambda i: (0, 0)),     # fc2 w
        pl.BlockSpec((1, Cout), lambda i: (0, 0)),       # fc2 b
    ]
    return pl.pallas_call(
        kern,
        out_shape=jax.ShapeDtypeStruct((Tt, Cout), _BF16),
        grid=grid,
        in_specs=in_specs,
        out_specs=pl.BlockSpec((rows, Cout), lambda i: (i, 0)),
        compiler_params=pltpu.CompilerParams(
            dimension_semantics=("parallel",),
            vmem_limit_bytes=_VMEM_LIMIT),
    )(x_tok, c_tok,
      p["norm1"]["g"].reshape(1, Cin), p["norm1"]["b"].reshape(1, Cin),
      p["attn"]["qkv"]["w"], p["attn"]["qkv"]["b"].reshape(1, three),
      p["attn"]["proj"]["w"], p["attn"]["proj"]["b"].reshape(1, Cout),
      p["norm2"]["g"].reshape(1, Cout), p["norm2"]["b"].reshape(1, Cout),
      p["fc1"]["w"], p["fc1"]["b"].reshape(1, hid),
      p["fc2"]["w"], p["fc2"]["b"].reshape(1, Cout))


# ----------------------------------------------------------------------------- conv glue
def _im2col(x, kh, kw, stride, padding, dilation):
    # TODO(synk): host-side im2col expands activations by k^2 through HBM; a halo-tiled
    # in-kernel patch extraction would avoid this but is not implemented.
    B, H, W, C = x.shape
    xp = jnp.pad(x, ((0, 0), (padding, padding), (padding, padding), (0, 0)))
    Hp, Wp = H + 2 * padding, W + 2 * padding
    Ho = (Hp - dilation * (kh - 1) - 1) // stride + 1
    Wo = (Wp - dilation * (kw - 1) - 1) // stride + 1
    cols = []
    for i in range(kh):
        for j in range(kw):
            patch = lax.slice(
                xp,
                (0, i * dilation, j * dilation, 0),
                (B, i * dilation + (Ho - 1) * stride + 1,
                 j * dilation + (Wo - 1) * stride + 1, C),
                (1, stride, stride, 1))
            cols.append(patch)
    patches = jnp.stack(cols, axis=3)                      # (B, Ho, Wo, kh*kw, C)
    return patches.reshape(B * Ho * Wo, kh * kw * C), (Ho, Wo)


def conv2d(x, cp, stride, padding, dilation, act="none"):
    """x: NHWC bf16, cp: {'w': (kh,kw,Cin,Cout), 'b': (Cout,)} (BN already folded)."""
    kh, kw, cin, cout = cp["w"].shape
    B = x.shape[0]
    patches, (Ho, Wo) = _im2col(x, kh, kw, stride, padding, dilation)
    y = pallas_matmul(patches, cp["w"].reshape(kh * kw * cin, cout), cp["b"], act=act)
    return y.reshape(B, Ho, Wo, cout)


# ----------------------------------------------------------------------------- windowing
def window_partition(x, ws, sp):
    """(B, H, W, C) -> (B*nw*sp, C) window-major tokens, each window padded to sp rows."""
    B, H, W, C = x.shape
    # TODO(synk): ragged H/W (non-multiples of window_size) are not padded like reference VSA.
    assert H % ws == 0 and W % ws == 0, "spatial size must be a multiple of window_size"
    nh, nw = H // ws, W // ws
    t = jnp.transpose(x.reshape(B, nh, ws, nw, ws, C), (0, 1, 3, 2, 4, 5))
    t = t.reshape(B * nh * nw, ws * ws, C)
    if sp != ws * ws:
        t = jnp.pad(t, ((0, 0), (0, sp - ws * ws), (0, 0)))
    return t.reshape(B * nh * nw * sp, C)


def window_reverse(tok, ws, sp, B, H, W):
    """Inverse of window_partition (drops the per-window padding rows)."""
    C = tok.shape[-1]
    nh, nw = H // ws, W // ws
    t = tok.reshape(B * nh * nw, sp, C)[:, :ws * ws, :]
    t = t.reshape(B, nh, nw, ws, ws, C)
    return jnp.transpose(t, (0, 1, 3, 2, 4, 5)).reshape(B, H, W, C)


# ----------------------------------------------------------------------------- cells
def reduction_cell_forward(x, size, p, i):
    H, W = size
    ds, k = CFG["downsample"][i], CFG["kernel_size"][i]
    dils = CFG["dilations"][i]
    emb = CFG["embed_dims"][i]
    heads = CFG["RC_heads"][i]
    ws = CFG["window_size"]
    S = ws * ws
    Sp = _round_up(S, 8)
    B, Cin = x.shape[0], x.shape[-1]
    shortcut = x

    # PRM: all dilated convs fused into ONE lane-dense, M-tiled matmul by concatenating
    # the im2col patches along K and using a block-diagonal weight (single full-width store).
    patches = []
    Ho = Wo = None
    for d in dils:
        pad = math.ceil(((k - 1) * d + 1 - ds) / 2)
        pcols, (Ho, Wo) = _im2col(x, k, k, ds, pad, d)
        patches.append(pcols)
    x_cat = jnp.concatenate(patches, axis=1)               # (M, nb*K)
    K = k * k * Cin
    nb = len(dils)
    wbd = jnp.zeros((nb * K, nb * emb), _F32)
    for d in range(nb):
        wbd = wbd.at[d * K:(d + 1) * K, d * emb:(d + 1) * emb].set(
            p["prm"][d]["w"].reshape(K, emb))
    bcat = jnp.concatenate([p["prm"][d]["b"] for d in range(nb)])
    prm = pallas_matmul(x_cat, wbd, bcat, act="gelu")       # (B*Ho*Wo, nb*emb) bf16
    prm_sp = prm.reshape(B, Ho, Wo, nb * emb)

    # PCM: 3 convs (BN folded, SiLU); total stride == downsample ratio
    # TODO(synk): the 3-conv PCM chain is not fused into a single Pallas kernel.
    strides = (2, 2, 1) if ds == 4 else (2, 1, 1)
    c = conv2d(shortcut, p["pcm1"], strides[0], 1, 1, act="silu")
    c = conv2d(c, p["pcm2"], strides[1], 1, 1, act="silu")
    c = conv2d(c, p["pcm3"], strides[2], 1, 1, act="silu")

    # fused LN1 -> window attention -> proj -> (+PCM) -> LN2 -> MLP -> residual
    num_windows = B * (Ho // ws) * (Wo // ws)
    xw = window_partition(prm_sp, ws, Sp)
    cw = window_partition(c, ws, Sp)
    yw = fused_cell(xw, cw, p, heads, add_shortcut=False,
                    num_windows=num_windows, sp=Sp, s_real=S)
    y = window_reverse(yw, ws, Sp, B, Ho, Wo)
    return y, (Ho, Wo)


def normal_cell_forward(x_sp, p, heads, ws):
    B, H, W, C = x_sp.shape
    S = ws * ws
    Sp = _round_up(S, 8)
    c = conv2d(x_sp, p["pcm1"], 1, 1, 1, act="silu")
    c = conv2d(c, p["pcm2"], 1, 1, 1, act="silu")
    c = conv2d(c, p["pcm3"], 1, 1, 1, act="silu")
    num_windows = B * (H // ws) * (W // ws)
    xw = window_partition(x_sp, ws, Sp)
    cw = window_partition(c, ws, Sp)
    yw = fused_cell(xw, cw, p, heads, add_shortcut=True,
                    num_windows=num_windows, sp=Sp, s_real=S)
    return window_reverse(yw, ws, Sp, B, H, W)


def vitaev2_vsa_forward(params, x_nchw):
    x = jnp.transpose(x_nchw, (0, 2, 3, 1)).astype(_BF16)   # NCHW -> NHWC, bf16 activations
    B, h, w = x.shape[0], x.shape[1], x.shape[2]
    outs = []
    cur = x
    for i in range(CFG["stages"]):
        cur, (h, w) = reduction_cell_forward(cur, (h, w), params[i]["rc"], i)
        for d in range(CFG["NC_depth"][i]):
            cur = normal_cell_forward(cur, params[i]["nc"][d],
                                      CFG["NC_heads"][i], CFG["window_size"])
        outs.append(jnp.transpose(cur, (0, 3, 1, 2)).astype(_F32))  # back to NCHW, f32
    return tuple(outs)


# ----------------------------------------------------------------------------- params
class _KeyGen:
    def __init__(self, key):
        self.key = key

    def __call__(self):
        self.key, sub = jax.random.split(self.key)
        return sub


def _init_conv(kg, kh, kw, cin, cout, fold_bn=False):
    w = 0.02 * jax.random.normal(kg(), (kh, kw, cin, cout), _F32)
    b = jnp.zeros((cout,), _F32)
    if fold_bn:
        # eval-mode BN (gamma=1, beta=0, running mean=0, var=1) folded into w/b.
        s = (1.0 + CFG["bn_eps"]) ** -0.5
        w, b = w * s, b * s
    return dict(w=w, b=b)


def _init_linear(kg, cin, cout):
    return dict(w=0.02 * jax.random.normal(kg(), (cin, cout), _F32),
                b=jnp.zeros((cout,), _F32))


def _init_ln(c):
    return dict(g=jnp.ones((c,), _F32), b=jnp.zeros((c,), _F32))


def _init_attn(kg, cin, cout):
    return dict(qkv=_init_linear(kg, cin, 3 * cout), proj=_init_linear(kg, cout, cout))


def init_params():
    kg = _KeyGen(jax.random.PRNGKey(0))
    layers = []
    in_ch = CFG["in_chans"]
    for i in range(CFG["stages"]):
        emb = CFG["embed_dims"][i]
        tok = CFG["token_dims"][i]
        k = CFG["kernel_size"][i]
        dils = CFG["dilations"][i]
        cprm = emb * len(dils)
        rc_hid = tok * CFG["rc_mlp_ratio"]
        rc = dict(
            prm=[_init_conv(kg, k, k, in_ch, emb) for _ in dils],
            pcm1=_init_conv(kg, 3, 3, in_ch, emb, fold_bn=True),
            pcm2=_init_conv(kg, 3, 3, emb, emb, fold_bn=True),
            pcm3=_init_conv(kg, 3, 3, emb, tok),
            norm1=_init_ln(cprm),
            attn=_init_attn(kg, cprm, tok),
            norm2=_init_ln(tok),
            fc1=_init_linear(kg, tok, rc_hid),
            fc2=_init_linear(kg, rc_hid, tok),
        )
        ncs = []
        hid = tok * CFG["mlp_ratio"]
        for _ in range(CFG["NC_depth"][i]):
            ncs.append(dict(
                norm1=_init_ln(tok),
                attn=_init_attn(kg, tok, tok),
                pcm1=_init_conv(kg, 3, 3, tok, hid, fold_bn=True),
                pcm2=_init_conv(kg, 3, 3, hid, tok, fold_bn=True),
                pcm3=_init_conv(kg, 3, 3, tok, tok),
                norm2=_init_ln(tok),
                fc1=_init_linear(kg, tok, hid),
                fc2=_init_linear(kg, hid, tok),
            ))
        layers.append(dict(rc=rc, nc=ncs))
        in_ch = tok
    return layers


# ----------------------------------------------------------------------------- main
if __name__ == "__main__":
    params = init_params()
    x = jax.random.normal(jax.random.PRNGKey(0),
                          (2, CFG["in_chans"], CFG["img_size"], CFG["img_size"]),
                          dtype=_F32)
    fwd = jax.jit(vitaev2_vsa_forward)
    outs = jax.block_until_ready(fwd(params, x))
    # stage outputs are NCHW: (B, token_dims[i], img/prod(ds), img/prod(ds))
    assert outs[0].shape == (2, CFG["token_dims"][0], 4, 4), outs[0].shape
    assert outs[1].shape == (2, CFG["token_dims"][1], 2, 2), outs[1].shape
    assert all(bool(jnp.all(jnp.isfinite(o))) for o in outs)
    print("KERNEL_OK")
</pallas_src>

<mosaic_0001>
module attributes {stable_mosaic.version = 11 : i64} {
  func.func @_mm_kernel(%arg0: i32, %arg1: memref<128x27xbf16, #tpu.memory_space<vmem>>, %arg2: memref<27x16xf32, #tpu.memory_space<vmem>>, %arg3: memref<1x16xf32, #tpu.memory_space<vmem>>, %arg4: memref<128x16xbf16, #tpu.memory_space<vmem>>) attributes {dimension_semantics = [#tpu.dimension_semantics<parallel>], iteration_bounds = array<i64: 1>, scalar_prefetch = 0 : i64, scratch_operands = 0 : i64, tpu.core_type = #tpu.core_type<tc>, window_params = [{transform_indices = @transform_0, window_bounds = array<i64: 128, 27>}, {pipeline_mode = #tpu.pipeline_mode<synchronous>, transform_indices = @transform_1, window_bounds = array<i64: 27, 16>}, {pipeline_mode = #tpu.pipeline_mode<synchronous>, transform_indices = @transform_2, window_bounds = array<i64: 1, 16>}, {transform_indices = @transform_3, window_bounds = array<i64: 128, 16>}]} {
    %c0 = arith.constant 0 : index
    %c0_0 = arith.constant 0 : index
    %0 = vector.load %arg1[%c0, %c0_0] : memref<128x27xbf16, #tpu.memory_space<vmem>>, vector<128x27xbf16>
    %c0_1 = arith.constant 0 : index
    %c0_2 = arith.constant 0 : index
    %1 = vector.load %arg2[%c0_1, %c0_2] : memref<27x16xf32, #tpu.memory_space<vmem>>, vector<27x16xf32>
    %2 = arith.truncf %1 : vector<27x16xf32> to vector<27x16xbf16>
    %cst = arith.constant dense<0.000000e+00> : vector<128x16xf32>
    %3 = tpu.matmul %0, %2, %cst {dimension_numbers = #tpu.dot_dimension_numbers<[1], [0], [0], [1], [0, 0, 1, 1], [], []>} : vector<128x27xbf16>, vector<27x16xbf16>, vector<128x16xf32> -> vector<128x16xf32>
    %c0_3 = arith.constant 0 : index
    %c0_4 = arith.constant 0 : index
    %4 = vector.load %arg3[%c0_3, %c0_4] : memref<1x16xf32, #tpu.memory_space<vmem>>, vector<1x16xf32>
    %5 = vector.broadcast %4 : vector<1x16xf32> to vector<128x16xf32>
    %6 = arith.addf %3, %5 : vector<128x16xf32>
    %7 = arith.negf %6 : vector<128x16xf32>
    %8 = math.exp %7 : vector<128x16xf32>
    %cst_5 = arith.constant 1.000000e+00 : f32
    %9 = vector.broadcast %cst_5 : f32 to vector<128x16xf32>
    %10 = arith.addf %9, %8 : vector<128x16xf32>
    %11 = arith.divf %9, %10 : vector<128x16xf32>
    %12 = arith.mulf %6, %11 : vector<128x16xf32>
    %13 = arith.truncf %12 : vector<128x16xf32> to vector<128x16xbf16>
    %c0_6 = arith.constant 0 : index
    %c0_7 = arith.constant 0 : index
    %14 = vector.load %arg4[%c0_6, %c0_7] : memref<128x16xbf16, #tpu.memory_space<vmem>>, vector<128x16xbf16>
    tpu.vector_store %arg4[%c0_6, %c0_7], %13 {strides = array<i32>} : memref<128x16xbf16, #tpu.memory_space<vmem>>, vector<128x16xbf16>,
    return
  }
  func.func @transform_0(%arg0: i32) -> (i32, i32) {
    %c0_i32 = arith.constant 0 : i32
    %c0_i32_0 = arith.constant 0 : i32
    return %arg0, %c0_i32 : i32, i32
  }
  func.func @transform_1(%arg0: i32) -> (i32, i32) {
    %c0_i32 = arith.constant 0 : i32
    %c0_i32_0 = arith.constant 0 : i32
    %c0_i32_1 = arith.constant 0 : i32
    return %c0_i32, %c0_i32_0 : i32, i32
  }
  func.func @transform_2(%arg0: i32) -> (i32, i32) {
    %c0_i32 = arith.constant 0 : i32
    %c0_i32_0 = arith.constant 0 : i32
    %c0_i32_1 = arith.constant 0 : i32
    return %c0_i32, %c0_i32_0 : i32, i32
  }
  func.func @transform_3(%arg0: i32) -> (i32, i32) {
    %c0_i32 = arith.constant 0 : i32
    %c0_i32_0 = arith.constant 0 : i32
    return %arg0, %c0_i32 : i32, i32
  }
}

module attributes {stable_mosaic.version = 11 : i64} {
  func.func @_mm_kernel(%arg0: i32, %arg1: memref<32x144xbf16, #tpu.memory_space<vmem>>, %arg2: memref<144x16xf32, #tpu.memory_space<vmem>>, %arg3: memref<1x16xf32, #tpu.memory_space<vmem>>, %arg4: memref<32x16xbf16, #tpu.memory_space<vmem>>) attributes {dimension_semantics = [#tpu.dimension_semantics<parallel>], iteration_bounds = array<i64: 1>, scalar_prefetch = 0 : i64, scratch_operands = 0 : i64, tpu.core_type = #tpu.core_type<tc>, window_params = [{transform_indices = @transform_0, window_bounds = array<i64: 32, 144>}, {pipeline_mode = #tpu.pipeline_mode<synchronous>, transform_indices = @transform_1, window_bounds = array<i64: 144, 16>}, {pipeline_mode = #tpu.pipeline_mode<synchronous>, transform_indices = @transform_2, window_bounds = array<i64: 1, 16>}, {transform_indices = @transform_3, window_bounds = array<i64: 32, 16>}]} {
    %c0 = arith.constant 0 : index
    %c0_0 = arith.constant 0 : index
    %0 = vector.load %arg1[%c0, %c0_0] : memref<32x144xbf16, #tpu.memory_space<vmem>>, vector<32x144xbf16>
    %c0_1 = arith.constant 0 : index
    %c0_2 = arith.constant 0 : index
    %1 = vector.load %arg2[%c0_1, %c0_2] : memref<144x16xf32, #tpu.memory_space<vmem>>, vector<144x16xf32>
    %2 = arith.truncf %1 : vector<144x16xf32> to vector<144x16xbf16>
    %cst = arith.constant dense<0.000000e+00> : vector<32x16xf32>
    %3 = tpu.matmul %0, %2, %cst {dimension_numbers = #tpu.dot_dimension_numbers<[1], [0], [0], [1], [0, 0, 1, 1], [], []>} : vector<32x144xbf16>, vector<144x16xbf16>, vector<32x16xf32> -> vector<32x16xf32>
    %c0_3 = arith.constant 0 : index
    %c0_4 = arith.constant 0 : index
    %4 = vector.load %arg3[%c0_3, %c0_4] : memref<1x16xf32, #tpu.memory_space<vmem>>, vector<1x16xf32>
    %5 = vector.broadcast %4 : vector<1x16xf32> to vector<32x16xf32>
    %6 = arith.addf %3, %5 : vector<32x16xf32>
    %7 = arith.negf %6 : vector<32x16xf32>
    %8 = math.exp %7 : vector<32x16xf32>
    %cst_5 = arith.constant 1.000000e+00 : f32
    %9 = vector.broadcast %cst_5 : f32 to vector<32x16xf32>
    %10 = arith.addf %9, %8 : vector<32x16xf32>
    %11 = arith.divf %9, %10 : vector<32x16xf32>
    %12 = arith.mulf %6, %11 : vector<32x16xf32>
    %13 = arith.truncf %12 : vector<32x16xf32> to vector<32x16xbf16>
    %c0_6 = arith.constant 0 : index
    %c0_7 = arith.constant 0 : index
    %14 = vector.load %arg4[%c0_6, %c0_7] : memref<32x16xbf16, #tpu.memory_space<vmem>>, vector<32x16xbf16>
    tpu.vector_store %arg4[%c0_6, %c0_7], %13 {strides = array<i32>} : memref<32x16xbf16, #tpu.memory_space<vmem>>, vector<32x16xbf16>,
    return
  }
  func.func @transform_0(%arg0: i32) -> (i32, i32) {
    %c0_i32 = arith.constant 0 : i32
    %c0_i32_0 = arith.constant 0 : i32
    return %arg0, %c0_i32 : i32, i32
  }
  func.func @transform_1(%arg0: i32) -> (i32, i32) {
    %c0_i32 = arith.constant 0 : i32
    %c0_i32_0 = arith.constant 0 : i32
    %c0_i32_1 = arith.constant 0 : i32
    return %c0_i32, %c0_i32_0 : i32, i32
  }
  func.func @transform_2(%arg0: i32) -> (i32, i32) {
    %c0_i32 = arith.constant 0 : i32
    %c0_i32_0 = arith.constant 0 : i32
    %c0_i32_1 = arith.constant 0 : i32
    return %c0_i32, %c0_i32_0 : i32, i32
  }
  func.func @transform_3(%arg0: i32) -> (i32, i32) {
    %c0_i32 = arith.constant 0 : i32
    %c0_i32_0 = arith.constant 0 : i32
    return %arg0, %c0_i32 : i32, i32
  }
}

module attributes {stable_mosaic.version = 11 : i64} {
  func.func @_mm_kernel(%arg0: i32, %arg1: memref<32x588xbf16, #tpu.memory_space<vmem>>, %arg2: memref<588x64xf32, #tpu.memory_space<vmem>>, %arg3: memref<1x64xf32, #tpu.memory_space<vmem>>, %arg4: memref<32x64xbf16, #tpu.memory_space<vmem>>) attributes {dimension_semantics = [#tpu.dimension_semantics<parallel>], iteration_bounds = array<i64: 1>, scalar_prefetch = 0 : i64, scratch_operands = 0 : i64, tpu.core_type = #tpu.core_type<tc>, window_params = [{transform_indices = @transform_0, window_bounds = array<i64: 32, 588>}, {pipeline_mode = #tpu.pipeline_mode<synchronous>, transform_indices = @transform_1, window_bounds = array<i64: 588, 64>}, {pipeline_mode = #tpu.pipeline_mode<synchronous>, transform_indices = @transform_2, window_bounds = array<i64: 1, 64>}, {transform_indices = @transform_3, window_bounds = array<i64: 32, 64>}]} {
    %c0 = arith.constant 0 : index
    %c0_0 = arith.constant 0 : index
    %0 = vector.load %arg1[%c0, %c0_0] : memref<32x588xbf16, #tpu.memory_space<vmem>>, vector<32x588xbf16>
    %c0_1 = arith.constant 0 : index
    %c0_2 = arith.constant 0 : index
    %1 = vector.load %arg2[%c0_1, %c0_2] : memref<588x64xf32, #tpu.memory_space<vmem>>, vector<588x64xf32>
    %2 = arith.truncf %1 : vector<588x64xf32> to vector<588x64xbf16>
    %cst = arith.constant dense<0.000000e+00> : vector<32x64xf32>
    %3 = tpu.matmul %0, %2, %cst {dimension_numbers = #tpu.dot_dimension_numbers<[1], [0], [0], [1], [0, 0, 1, 1], [], []>} : vector<32x588xbf16>, vector<588x64xbf16>, vector<32x64xf32> -> vector<32x64xf32>
    %c0_3 = arith.constant 0 : index
    %c0_4 = arith.constant 0 : index
    %4 = vector.load %arg3[%c0_3, %c0_4] : memref<1x64xf32, #tpu.memory_space<vmem>>, vector<1x64xf32>
    %5 = vector.broadcast %4 : vector<1x64xf32> to vector<32x64xf32>
    %6 = arith.addf %3, %5 : vector<32x64xf32>
    %7 = arith.mulf %6, %6 : vector<32x64xf32>
    %8 = arith.mulf %6, %7 : vector<32x64xf32>
    %cst_5 = arith.constant 4.471500e-02 : f32
    %9 = vector.broadcast %cst_5 : f32 to vector<32x64xf32>
    %10 = arith.mulf %9, %8 : vector<32x64xf32>
    %11 = arith.addf %6, %10 : vector<32x64xf32>
    %cst_6 = arith.constant 0.797884583 : f32
    %12 = vector.broadcast %cst_6 : f32 to vector<32x64xf32>
    %13 = arith.mulf %12, %11 : vector<32x64xf32>
    %14 = math.tanh %13 : vector<32x64xf32>
    %cst_7 = arith.constant 1.000000e+00 : f32
    %15 = vector.broadcast %cst_7 : f32 to vector<32x64xf32>
    %16 = arith.addf %15, %14 : vector<32x64xf32>
    %cst_8 = arith.constant 5.000000e-01 : f32
    %17 = vector.broadcast %cst_8 : f32 to vector<32x64xf32>
    %18 = arith.mulf %17, %16 : vector<32x64xf32>
    %19 = arith.mulf %6, %18 : vector<32x64xf32>
    %20 = arith.truncf %19 : vector<32x64xf32> to vector<32x64xbf16>
    %c0_9 = arith.constant 0 : index
    %c0_10 = arith.constant 0 : index
    %21 = vector.load %arg4[%c0_9, %c0_10] : memref<32x64xbf16, #tpu.memory_space<vmem>>, vector<32x64xbf16>
    tpu.vector_store %arg4[%c0_9, %c0_10], %20 {strides = array<i32>} : memref<32x64xbf16, #tpu.memory_space<vmem>>, vector<32x64xbf16>,
    return
  }
  func.func @transform_0(%arg0: i32) -> (i32, i32) {
    %c0_i32 = arith.constant 0 : i32
    %c0_i32_0 = arith.constant 0 : i32
    return %arg0, %c0_i32 : i32, i32
  }
  func.func @transform_1(%arg0: i32) -> (i32, i32) {
    %c0_i32 = arith.constant 0 : i32
    %c0_i32_0 = arith.constant 0 : i32
    %c0_i32_1 = arith.constant 0 : i32
    return %c0_i32, %c0_i32_0 : i32, i32
  }
  func.func @transform_2(%arg0: i32) -> (i32, i32) {
    %c0_i32 = arith.constant 0 : i32
    %c0_i32_0 = arith.constant 0 : i32
    %c0_i32_1 = arith.constant 0 : i32
    return %c0_i32, %c0_i32_0 : i32, i32
  }
  func.func @transform_3(%arg0: i32) -> (i32, i32) {
    %c0_i32 = arith.constant 0 : i32
    %c0_i32_0 = arith.constant 0 : i32
    return %arg0, %c0_i32 : i32, i32
  }
}

module attributes {stable_mosaic.version = 11 : i64} {
  func.func @_cell_kernel(%arg0: i32, %arg1: memref<32x64xbf16, #tpu.memory_space<vmem>>, %arg2: memref<32x16xbf16, #tpu.memory_space<vmem>>, %arg3: memref<1x64xf32, #tpu.memory_space<vmem>>, %arg4: memref<1x64xf32, #tpu.memory_space<vmem>>, %arg5: memref<64x48xf32, #tpu.memory_space<vmem>>, %arg6: memref<1x48xf32, #tpu.memory_space<vmem>>, %arg7: memref<16x16xf32, #tpu.memory_space<vmem>>, %arg8: memref<1x16xf32, #tpu.memory_space<vmem>>, %arg9: memref<1x16xf32, #tpu.memory_space<vmem>>, %arg10: memref<1x16xf32, #tpu.memory_space<vmem>>, %arg11: memref<16x16xf32, #tpu.memory_space<vmem>>, %arg12: memref<1x16xf32, #tpu.memory_space<vmem>>, %arg13: memref<16x16xf32, #tpu.memory_space<vmem>>, %arg14: memref<1x16xf32, #tpu.memory_space<vmem>>, %arg15: memref<32x16xbf16, #tpu.memory_space<vmem>>) attributes {dimension_semantics = [#tpu.dimension_semantics<parallel>], iteration_bounds = array<i64: 2>, scalar_prefetch = 0 : i64, scratch_operands = 0 : i64, tpu.core_type = #tpu.core_type<tc>, window_params = [{transform_indices = @transform_0, window_bounds = array<i64: 32, 64>}, {transform_indices = @transform_1, window_bounds = array<i64: 32, 16>}, {pipeline_mode = #tpu.pipeline_mode<synchronous>, transform_indices = @transform_2, window_bounds = array<i64: 1, 64>}, {pipeline_mode = #tpu.pipeline_mode<synchronous>, transform_indices = @transform_3, window_bounds = array<i64: 1, 64>}, {pipeline_mode = #tpu.pipeline_mode<synchronous>, transform_indices = @transform_4, window_bounds = array<i64: 64, 48>}, {pipeline_mode = #tpu.pipeline_mode<synchronous>, transform_indices = @transform_5, window_bounds = array<i64: 1, 48>}, {pipeline_mode = #tpu.pipeline_mode<synchronous>, transform_indices = @transform_6, window_bounds = array<i64: 16, 16>}, {pipeline_mode = #tpu.pipeline_mode<synchronous>, transform_indices = @transform_7, window_bounds = array<i64: 1, 16>}, {pipeline_mode = #tpu.pipeline_mode<synchronous>, transform_indices = @transform_8, window_bounds = array<i64: 1, 16>}, {pipeline_mode = #tpu.pipeline_mode<synchronous>, transform_indices = @transform_9, window_bounds = array<i64: 1, 16>}, {pipeline_mode = #tpu.pipeline_mode<synchronous>, transform_indices = @transform_10, window_bounds = array<i64: 16, 16>}, {pipeline_mode = #tpu.pipeline_mode<synchronous>, transform_indices = @transform_11, window_bounds = array<i64: 1, 16>}, {pipeline_mode = #tpu.pipeline_mode<synchronous>, transform_indices = @transform_12, window_bounds = array<i64: 16, 16>}, {pipeline_mode = #tpu.pipeline_mode<synchronous>, transform_indices = @transform_13, window_bounds = array<i64: 1, 16>}, {transform_indices = @transform_14, window_bounds = array<i64: 32, 16>}]} {
    %c0 = arith.constant 0 : index
    %c0_0 = arith.constant 0 : index
    %0 = vector.load %arg1[%c0, %c0_0] : memref<32x64xbf16, #tpu.memory_space<vmem>>, vector<32x64xbf16>
    %1 = arith.extf %0 : vector<32x64xbf16> to vector<32x64xf32>
    %cst = arith.constant dense<0.000000e+00> : vector<32xf32>
    %2 = vector.multi_reduction <add>, %1, %cst [1] : vector<32x64xf32> to vector<32xf32>
    %3 = vector.shape_cast %2 : vector<32xf32> to vector<32x1xf32>
    %cst_1 = arith.constant 6.400000e+01 : f32
    %4 = vector.broadcast %cst_1 : f32 to vector<32x1xf32>
    %5 = arith.divf %3, %4 : vector<32x1xf32>
    %6 = vector.broadcast %5 : vector<32x1xf32> to vector<32x64xf32>
    %7 = arith.subf %1, %6 : vector<32x64xf32>
    %8 = arith.mulf %7, %7 : vector<32x64xf32>
    %cst_2 = arith.constant dense<0.000000e+00> : vector<32xf32>
    %9 = vector.multi_reduction <add>, %8, %cst_2 [1] : vector<32x64xf32> to vector<32xf32>
    %10 = vector.shape_cast %9 : vector<32xf32> to vector<32x1xf32>
    %cst_3 = arith.constant 6.400000e+01 : f32
    %11 = vector.broadcast %cst_3 : f32 to vector<32x1xf32>
    %12 = arith.divf %10, %11 : vector<32x1xf32>
    %cst_4 = arith.constant 9.99999997E-7 : f32
    %13 = vector.broadcast %cst_4 : f32 to vector<32x1xf32>
    %14 = arith.addf %12, %13 : vector<32x1xf32>
    %15 = math.rsqrt %14 : vector<32x1xf32>
    %16 = vector.broadcast %15 : vector<32x1xf32> to vector<32x64xf32>
    %17 = arith.mulf %7, %16 : vector<32x64xf32>
    %c0_5 = arith.constant 0 : index
    %c0_6 = arith.constant 0 : index
    %18 = vector.load %arg3[%c0_5, %c0_6] : memref<1x64xf32, #tpu.memory_space<vmem>>, vector<1x64xf32>
    %19 = vector.broadcast %18 : vector<1x64xf32> to vector<32x64xf32>
    %20 = arith.mulf %17, %19 : vector<32x64xf32>
    %c0_7 = arith.constant 0 : index
    %c0_8 = arith.constant 0 : index
    %21 = vector.load %arg4[%c0_7, %c0_8] : memref<1x64xf32, #tpu.memory_space<vmem>>, vector<1x64xf32>
    %22 = vector.broadcast %21 : vector<1x64xf32> to vector<32x64xf32>
    %23 = arith.addf %20, %22 : vector<32x64xf32>
    %24 = arith.truncf %23 : vector<32x64xf32> to vector<32x64xbf16>
    %c0_9 = arith.constant 0 : index
    %c0_10 = arith.constant 0 : index
    %25 = vector.load %arg5[%c0_9, %c0_10] : memref<64x48xf32, #tpu.memory_space<vmem>>, vector<64x48xf32>
    %26 = arith.truncf %25 : vector<64x48xf32> to vector<64x48xbf16>
    %cst_11 = arith.constant dense<0.000000e+00> : vector<32x48xf32>
    %27 = tpu.matmul %24, %26, %cst_11 {dimension_numbers = #tpu.dot_dimension_numbers<[1], [0], [0], [1], [0, 0, 1, 1], [], []>} : vector<32x64xbf16>, vector<64x48xbf16>, vector<32x48xf32> -> vector<32x48xf32>
    %c0_12 = arith.constant 0 : index
    %c0_13 = arith.constant 0 : index
    %28 = vector.load %arg6[%c0_12, %c0_13] : memref<1x48xf32, #tpu.memory_space<vmem>>, vector<1x48xf32>
    %29 = vector.broadcast %28 : vector<1x48xf32> to vector<32x48xf32>
    %30 = arith.addf %27, %29 : vector<32x48xf32>
    %31 = tpu.iota {dimensions = array<i32: 2>} : vector<1x1x8xi32>
    %c4_i32 = arith.constant 4 : i32
    %32 = vector.broadcast %c4_i32 : i32 to vector<1x1x8xi32>
    %33 = arith.cmpi slt, %31, %32 : vector<1x1x8xi32>
    %34 = vector.extract_strided_slice %30 {offsets = [0, 0], sizes = [32, 16], strides = [1, 1]} : vector<32x48xf32> to vector<32x16xf32>
    %35 = vector.shape_cast %34 : vector<32x16xf32> to vector<4x8x16xf32>
    %36 = vector.extract_strided_slice %30 {offsets = [0, 16], sizes = [32, 16], strides = [1, 1]} : vector<32x48xf32> to vector<32x16xf32>
    %37 = vector.shape_cast %36 : vector<32x16xf32> to vector<4x8x16xf32>
    %38 = vector.extract_strided_slice %30 {offsets = [0, 32], sizes = [32, 16], strides = [1, 1]} : vector<32x48xf32> to vector<32x16xf32>
    %39 = vector.shape_cast %38 : vector<32x16xf32> to vector<4x8x16xf32>
    %40 = arith.truncf %35 : vector<4x8x16xf32> to vector<4x8x16xbf16>
    %41 = arith.truncf %37 : vector<4x8x16xf32> to vector<4x8x16xbf16>
    "tpu.trace_start"() <{level = 10 : i32, message = "wqd,wkd->wqk"}> : () -> ()
    %cst_14 = arith.constant dense<0.000000e+00> : vector<4x8x8xf32>
    %42 = tpu.matmul %40, %41, %cst_14 {dimension_numbers = #tpu.dot_dimension_numbers<[2], [2], [1], [1], [0, 0, 0, 1, 1, 1], [0], [0]>} : vector<4x8x16xbf16>, vector<4x8x16xbf16>, vector<4x8x8xf32> -> vector<4x8x8xf32>
    "tpu.trace_stop"() : () -> ()
    %cst_15 = arith.constant 2.500000e-01 : f32
    %43 = vector.broadcast %cst_15 : f32 to vector<4x8x8xf32>
    %44 = arith.mulf %42, %43 : vector<4x8x8xf32>
    %cst_16 = arith.constant -1.000000e+09 : f32
    %45 = vector.shape_cast %33 : vector<1x1x8xi1> to vector<1x1x8xi1>
    %46 = vector.broadcast %45 : vector<1x1x8xi1> to vector<4x8x8xi1>
    %47 = vector.broadcast %cst_16 : f32 to vector<4x8x8xf32>
    %48 = arith.select %46, %44, %47 : vector<4x8x8xi1>, vector<4x8x8xf32>
    %cst_17 = arith.constant dense<0xFF800000> : vector<4x8xf32>
    %49 = vector.multi_reduction <maximumf>, %48, %cst_17 [2] : vector<4x8x8xf32> to vector<4x8xf32>
    %50 = vector.shape_cast %49 : vector<4x8xf32> to vector<4x8x1xf32>
    %51 = vector.broadcast %50 : vector<4x8x1xf32> to vector<4x8x8xf32>
    %52 = arith.subf %48, %51 : vector<4x8x8xf32>
    %53 = math.exp %52 : vector<4x8x8xf32>
    %cst_18 = arith.constant dense<0.000000e+00> : vector<4x8xf32>
    %54 = vector.multi_reduction <add>, %53, %cst_18 [2] : vector<4x8x8xf32> to vector<4x8xf32>
    %55 = vector.shape_cast %54 : vector<4x8xf32> to vector<4x8x1xf32>
    %56 = tpu.reciprocal %55 {approx = true} : vector<4x8x1xf32> -> vector<4x8x1xf32>
    %57 = vector.broadcast %56 : vector<4x8x1xf32> to vector<4x8x8xf32>
    %58 = arith.mulf %53, %57 : vector<4x8x8xf32>
    %59 = arith.truncf %58 : vector<4x8x8xf32> to vector<4x8x8xbf16>
    %60 = arith.truncf %39 : vector<4x8x16xf32> to vector<4x8x16xbf16>
    "tpu.trace_start"() <{level = 10 : i32, message = "wqk,wkd->wqd"}> : () -> ()
    %cst_19 = arith.constant dense<0.000000e+00> : vector<4x8x16xf32>
    %61 = tpu.matmul %59, %60, %cst_19 {dimension_numbers = #tpu.dot_dimension_numbers<[2], [1], [1], [2], [0, 0, 0, 1, 1, 2], [0], [0]>} : vector<4x8x8xbf16>, vector<4x8x16xbf16>, vector<4x8x16xf32> -> vector<4x8x16xf32>
    "tpu.trace_stop"() : () -> ()
    %62 = vector.shape_cast %61 : vector<4x8x16xf32> to vector<32x16xf32>
    %63 = arith.truncf %62 : vector<32x16xf32> to vector<32x16xbf16>
    %c0_20 = arith.constant 0 : index
    %c0_21 = arith.constant 0 : index
    %64 = vector.load %arg7[%c0_20, %c0_21] : memref<16x16xf32, #tpu.memory_space<vmem>>, vector<16x16xf32>
    %65 = arith.truncf %64 : vector<16x16xf32> to vector<16x16xbf16>
    %cst_22 = arith.constant dense<0.000000e+00> : vector<32x16xf32>
    %66 = tpu.matmul %63, %65, %cst_22 {dimension_numbers = #tpu.dot_dimension_numbers<[1], [0], [0], [1], [0, 0, 1, 1], [], []>} : vector<32x16xbf16>, vector<16x16xbf16>, vector<32x16xf32> -> vector<32x16xf32>
    %c0_23 = arith.constant 0 : index
    %c0_24 = arith.constant 0 : index
    %67 = vector.load %arg8[%c0_23, %c0_24] : memref<1x16xf32, #tpu.memory_space<vmem>>, vector<1x16xf32>
    %68 = vector.broadcast %67 : vector<1x16xf32> to vector<32x16xf32>
    %69 = arith.addf %66, %68 : vector<32x16xf32>
    %c0_25 = arith.constant 0 : index
    %c0_26 = arith.constant 0 : index
    %70 = vector.load %arg2[%c0_25, %c0_26] : memref<32x16xbf16, #tpu.memory_space<vmem>>, vector<32x16xbf16>
    %71 = arith.extf %70 : vector<32x16xbf16> to vector<32x16xf32>
    %72 = arith.addf %69, %71 : vector<32x16xf32>
    %cst_27 = arith.constant dense<0.000000e+00> : vector<32xf32>
    %73 = vector.multi_reduction <add>, %72, %cst_27 [1] : vector<32x16xf32> to vector<32xf32>
    %74 = vector.shape_cast %73 : vector<32xf32> to vector<32x1xf32>
    %cst_28 = arith.constant 1.600000e+01 : f32
    %75 = vector.broadcast %cst_28 : f32 to vector<32x1xf32>
    %76 = arith.divf %74, %75 : vector<32x1xf32>
    %77 = vector.broadcast %76 : vector<32x1xf32> to vector<32x16xf32>
    %78 = arith.subf %72, %77 : vector<32x16xf32>
    %79 = arith.mulf %78, %78 : vector<32x16xf32>
    %cst_29 = arith.constant dense<0.000000e+00> : vector<32xf32>
    %80 = vector.multi_reduction <add>, %79, %cst_29 [1] : vector<32x16xf32> to vector<32xf32>
    %81 = vector.shape_cast %80 : vector<32xf32> to vector<32x1xf32>
    %cst_30 = arith.constant 1.600000e+01 : f32
    %82 = vector.broadcast %cst_30 : f32 to vector<32x1xf32>
    %83 = arith.divf %81, %82 : vector<32x1xf32>
    %cst_31 = arith.constant 9.99999997E-7 : f32
    %84 = vector.broadcast %cst_31 : f32 to vector<32x1xf32>
    %85 = arith.addf %83, %84 : vector<32x1xf32>
    %86 = math.rsqrt %85 : vector<32x1xf32>
    %87 = vector.broadcast %86 : vector<32x1xf32> to vector<32x16xf32>
    %88 = arith.mulf %78, %87 : vector<32x16xf32>
    %c0_32 = arith.constant 0 : index
    %c0_33 = arith.constant 0 : index
    %89 = vector.load %arg9[%c0_32, %c0_33] : memref<1x16xf32, #tpu.memory_space<vmem>>, vector<1x16xf32>
    %90 = vector.broadcast %89 : vector<1x16xf32> to vector<32x16xf32>
    %91 = arith.mulf %88, %90 : vector<32x16xf32>
    %c0_34 = arith.constant 0 : index
    %c0_35 = arith.constant 0 : index
    %92 = vector.load %arg10[%c0_34, %c0_35] : memref<1x16xf32, #tpu.memory_space<vmem>>, vector<1x16xf32>
    %93 = vector.broadcast %92 : vector<1x16xf32> to vector<32x16xf32>
    %94 = arith.addf %91, %93 : vector<32x16xf32>
    %95 = arith.truncf %94 : vector<32x16xf32> to vector<32x16xbf16>
    %c0_36 = arith.constant 0 : index
    %c0_37 = arith.constant 0 : index
    %96 = vector.load %arg11[%c0_36, %c0_37] : memref<16x16xf32, #tpu.memory_space<vmem>>, vector<16x16xf32>
    %97 = arith.truncf %96 : vector<16x16xf32> to vector<16x16xbf16>
    %cst_38 = arith.constant dense<0.000000e+00> : vector<32x16xf32>
    %98 = tpu.matmul %95, %97, %cst_38 {dimension_numbers = #tpu.dot_dimension_numbers<[1], [0], [0], [1], [0, 0, 1, 1], [], []>} : vector<32x16xbf16>, vector<16x16xbf16>, vector<32x16xf32> -> vector<32x16xf32>
    %c0_39 = arith.constant 0 : index
    %c0_40 = arith.constant 0 : index
    %99 = vector.load %arg12[%c0_39, %c0_40] : memref<1x16xf32, #tpu.memory_space<vmem>>, vector<1x16xf32>
    %100 = vector.broadcast %99 : vector<1x16xf32> to vector<32x16xf32>
    %101 = arith.addf %98, %100 : vector<32x16xf32>
    %102 = arith.mulf %101, %101 : vector<32x16xf32>
    %103 = arith.mulf %101, %102 : vector<32x16xf32>
    %cst_41 = arith.constant 4.471500e-02 : f32
    %104 = vector.broadcast %cst_41 : f32 to vector<32x16xf32>
    %105 = arith.mulf %104, %103 : vector<32x16xf32>
    %106 = arith.addf %101, %105 : vector<32x16xf32>
    %cst_42 = arith.constant 0.797884583 : f32
    %107 = vector.broadcast %cst_42 : f32 to vector<32x16xf32>
    %108 = arith.mulf %107, %106 : vector<32x16xf32>
    %109 = math.tanh %108 : vector<32x16xf32>
    %cst_43 = arith.constant 1.000000e+00 : f32
    %110 = vector.broadcast %cst_43 : f32 to vector<32x16xf32>
    %111 = arith.addf %110, %109 : vector<32x16xf32>
    %cst_44 = arith.constant 5.000000e-01 : f32
    %112 = vector.broadcast %cst_44 : f32 to vector<32x16xf32>
    %113 = arith.mulf %112, %111 : vector<32x16xf32>
    %114 = arith.mulf %101, %113 : vector<32x16xf32>
    %115 = arith.truncf %114 : vector<32x16xf32> to vector<32x16xbf16>
    %c0_45 = arith.constant 0 : index
    %c0_46 = arith.constant 0 : index
    %116 = vector.load %arg13[%c0_45, %c0_46] : memref<16x16xf32, #tpu.memory_space<vmem>>, vector<16x16xf32>
    %117 = arith.truncf %116 : vector<16x16xf32> to vector<16x16xbf16>
    %cst_47 = arith.constant dense<0.000000e+00> : vector<32x16xf32>
    %118 = tpu.matmul %115, %117, %cst_47 {dimension_numbers = #tpu.dot_dimension_numbers<[1], [0], [0], [1], [0, 0, 1, 1], [], []>} : vector<32x16xbf16>, vector<16x16xbf16>, vector<32x16xf32> -> vector<32x16xf32>
    %c0_48 = arith.constant 0 : index
    %c0_49 = arith.constant 0 : index
    %119 = vector.load %arg14[%c0_48, %c0_49] : memref<1x16xf32, #tpu.memory_space<vmem>>, vector<1x16xf32>
    %120 = vector.broadcast %119 : vector<1x16xf32> to vector<32x16xf32>
    %121 = arith.addf %118, %120 : vector<32x16xf32>
    %122 = arith.addf %72, %121 : vector<32x16xf32>
    %123 = arith.truncf %122 : vector<32x16xf32> to vector<32x16xbf16>
    %c0_50 = arith.constant 0 : index
    %c0_51 = arith.constant 0 : index
    %124 = vector.load %arg15[%c0_50, %c0_51] : memref<32x16xbf16, #tpu.memory_space<vmem>>, vector<32x16xbf16>
    tpu.vector_store %arg15[%c0_50, %c0_51], %123 {strides = array<i32>} : memref<32x16xbf16, #tpu.memory_space<vmem>>, vector<32x16xbf16>,
    return
  }
  func.func @transform_0(%arg0: i32) -> (i32, i32) {
    %c0_i32 = arith.constant 0 : i32
    %c0_i32_0 = arith.constant 0 : i32
    return %arg0, %c0_i32 : i32, i32
  }
  func.func @transform_1(%arg0: i32) -> (i32, i32) {
    %c0_i32 = arith.constant 0 : i32
    %c0_i32_0 = arith.constant 0 : i32
    return %arg0, %c0_i32 : i32, i32
  }
  func.func @transform_2(%arg0: i32) -> (i32, i32) {
    %c0_i32 = arith.constant 0 : i32
    %c0_i32_0 = arith.constant 0 : i32
    %c0_i32_1 = arith.constant 0 : i32
    return %c0_i32, %c0_i32_0 : i32, i32
  }
  func.func @transform_3(%arg0: i32) -> (i32, i32) {
    %c0_i32 = arith.constant 0 : i32
    %c0_i32_0 = arith.constant 0 : i32
    %c0_i32_1 = arith.constant 0 : i32
    return %c0_i32, %c0_i32_0 : i32, i32
  }
  func.func @transform_4(%arg0: i32) -> (i32, i32) {
    %c0_i32 = arith.constant 0 : i32
    %c0_i32_0 = arith.constant 0 : i32
    %c0_i32_1 = arith.constant 0 : i32
    return %c0_i32, %c0_i32_0 : i32, i32
  }
  func.func @transform_5(%arg0: i32) -> (i32, i32) {
    %c0_i32 = arith.constant 0 : i32
    %c0_i32_0 = arith.constant 0 : i32
    %c0_i32_1 = arith.constant 0 : i32
    return %c0_i32, %c0_i32_0 : i32, i32
  }
  func.func @transform_6(%arg0: i32) -> (i32, i32) {
    %c0_i32 = arith.constant 0 : i32
    %c0_i32_0 = arith.constant 0 : i32
    %c0_i32_1 = arith.constant 0 : i32
    return %c0_i32, %c0_i32_0 : i32, i32
  }
  func.func @transform_7(%arg0: i32) -> (i32, i32) {
    %c0_i32 = arith.constant 0 : i32
    %c0_i32_0 = arith.constant 0 : i32
    %c0_i32_1 = arith.constant 0 : i32
    return %c0_i32, %c0_i32_0 : i32, i32
  }
  func.func @transform_8(%arg0: i32) -> (i32, i32) {
    %c0_i32 = arith.constant 0 : i32
    %c0_i32_0 = arith.constant 0 : i32
    %c0_i32_1 = arith.constant 0 : i32
    return %c0_i32, %c0_i32_0 : i32, i32
  }
  func.func @transform_9(%arg0: i32) -> (i32, i32) {
    %c0_i32 = arith.constant 0 : i32
    %c0_i32_0 = arith.constant 0 : i32
    %c0_i32_1 = arith.constant 0 : i32
    return %c0_i32, %c0_i32_0 : i32, i32
  }
  func.func @transform_10(%arg0: i32) -> (i32, i32) {
    %c0_i32 = arith.constant 0 : i32
    %c0_i32_0 = arith.constant 0 : i32
    %c0_i32_1 = arith.constant 0 : i32
    return %c0_i32, %c0_i32_0 : i32, i32
  }
  func.func @transform_11(%arg0: i32) -> (i32, i32) {
    %c0_i32 = arith.constant 0 : i32
    %c0_i32_0 = arith.constant 0 : i32
    %c0_i32_1 = arith.constant 0 : i32
    return %c0_i32, %c0_i32_0 : i32, i32
  }
  func.func @transform_12(%arg0: i32) -> (i32, i32) {
    %c0_i32 = arith.constant 0 : i32
    %c0_i32_0 = arith.constant 0 : i32
    %c0_i32_1 = arith.constant 0 : i32
    return %c0_i32, %c0_i32_0 : i32, i32
  }
  func.func @transform_13(%arg0: i32) -> (i32, i32) {
    %c0_i32 = arith.constant 0 : i32
    %c0_i32_0 = arith.constant 0 : i32
    %c0_i32_1 = arith.constant 0 : i32
    return %c0_i32, %c0_i32_0 : i32, i32
  }
  func.func @transform_14(%arg0: i32) -> (i32, i32) {
    %c0_i32 = arith.constant 0 : i32
    %c0_i32_0 = arith.constant 0 : i32
    return %arg0, %c0_i32 : i32, i32
  }
}

module attributes {stable_mosaic.version = 11 : i64} {
  func.func @_mm_kernel(%arg0: i32, %arg1: memref<32x144xbf16, #tpu.memory_space<vmem>>, %arg2: memref<144x64xf32, #tpu.memory_space<vmem>>, %arg3: memref<1x64xf32, #tpu.memory_space<vmem>>, %arg4: memref<32x64xbf16, #tpu.memory_space<vmem>>) attributes {dimension_semantics = [#tpu.dimension_semantics<parallel>], iteration_bounds = array<i64: 1>, scalar_prefetch = 0 : i64, scratch_operands = 0 : i64, tpu.core_type = #tpu.core_type<tc>, window_params = [{transform_indices = @transform_0, window_bounds = array<i64: 32, 144>}, {pipeline_mode = #tpu.pipeline_mode<synchronous>, transform_indices = @transform_1, window_bounds = array<i64: 144, 64>}, {pipeline_mode = #tpu.pipeline_mode<synchronous>, transform_indices = @transform_2, window_bounds = array<i64: 1, 64>}, {transform_indices = @transform_3, window_bounds = array<i64: 32, 64>}]} {
    %c0 = arith.constant 0 : index
    %c0_0 = arith.constant 0 : index
    %0 = vector.load %arg1[%c0, %c0_0] : memref<32x144xbf16, #tpu.memory_space<vmem>>, vector<32x144xbf16>
    %c0_1 = arith.constant 0 : index
    %c0_2 = arith.constant 0 : index
    %1 = vector.load %arg2[%c0_1, %c0_2] : memref<144x64xf32, #tpu.memory_space<vmem>>, vector<144x64xf32>
    %2 = arith.truncf %1 : vector<144x64xf32> to vector<144x64xbf16>
    %cst = arith.constant dense<0.000000e+00> : vector<32x64xf32>
    %3 = tpu.matmul %0, %2, %cst {dimension_numbers = #tpu.dot_dimension_numbers<[1], [0], [0], [1], [0, 0, 1, 1], [], []>} : vector<32x144xbf16>, vector<144x64xbf16>, vector<32x64xf32> -> vector<32x64xf32>
    %c0_3 = arith.constant 0 : index
    %c0_4 = arith.constant 0 : index
    %4 = vector.load %arg3[%c0_3, %c0_4] : memref<1x64xf32, #tpu.memory_space<vmem>>, vector<1x64xf32>
    %5 = vector.broadcast %4 : vector<1x64xf32> to vector<32x64xf32>
    %6 = arith.addf %3, %5 : vector<32x64xf32>
    %7 = arith.negf %6 : vector<32x64xf32>
    %8 = math.exp %7 : vector<32x64xf32>
    %cst_5 = arith.constant 1.000000e+00 : f32
    %9 = vector.broadcast %cst_5 : f32 to vector<32x64xf32>
    %10 = arith.addf %9, %8 : vector<32x64xf32>
    %11 = arith.divf %9, %10 : vector<32x64xf32>
    %12 = arith.mulf %6, %11 : vector<32x64xf32>
    %13 = arith.truncf %12 : vector<32x64xf32> to vector<32x64xbf16>
    %c0_6 = arith.constant 0 : index
    %c0_7 = arith.constant 0 : index
    %14 = vector.load %arg4[%c0_6, %c0_7] : memref<32x64xbf16, #tpu.memory_space<vmem>>, vector<32x64xbf16>
    tpu.vector_store %arg4[%c0_6, %c0_7], %13 {strides = array<i32>} : memref<32x64xbf16, #tpu.memory_space<vmem>>, vector<32x64xbf16>,
    return
  }
  func.func @transform_0(%arg0: i32) -> (i32, i32) {
    %c0_i32 = arith.constant 0 : i32
    %c0_i32_0 = arith.constant 0 : i32
    return %arg0, %c0_i32 : i32, i32
  }
  func.func @transform_1(%arg0: i32) -> (i32, i32) {
    %c0_i32 = arith.constant 0 : i32
    %c0_i32_0 = arith.constant 0 : i32
    %c0_i32_1 = arith.constant 0 : i32
    return %c0_i32, %c0_i32_0 : i32, i32
  }
  func.func @transform_2(%arg0: i32) -> (i32, i32) {
    %c0_i32 = arith.constant 0 : i32
    %c0_i32_0 = arith.constant 0 : i32
    %c0_i32_1 = arith.constant 0 : i32
    return %c0_i32, %c0_i32_0 : i32, i32
  }
  func.func @transform_3(%arg0: i32) -> (i32, i32) {
    %c0_i32 = arith.constant 0 : i32
    %c0_i32_0 = arith.constant 0 : i32
    return %arg0, %c0_i32 : i32, i32
  }
}

module attributes {stable_mosaic.version = 11 : i64} {
  func.func @_mm_kernel(%arg0: i32, %arg1: memref<32x576xbf16, #tpu.memory_space<vmem>>, %arg2: memref<576x16xf32, #tpu.memory_space<vmem>>, %arg3: memref<1x16xf32, #tpu.memory_space<vmem>>, %arg4: memref<32x16xbf16, #tpu.memory_space<vmem>>) attributes {dimension_semantics = [#tpu.dimension_semantics<parallel>], iteration_bounds = array<i64: 1>, scalar_prefetch = 0 : i64, scratch_operands = 0 : i64, tpu.core_type = #tpu.core_type<tc>, window_params = [{transform_indices = @transform_0, window_bounds = array<i64: 32, 576>}, {pipeline_mode = #tpu.pipeline_mode<synchronous>, transform_indices = @transform_1, window_bounds = array<i64: 576, 16>}, {pipeline_mode = #tpu.pipeline_mode<synchronous>, transform_indices = @transform_2, window_bounds = array<i64: 1, 16>}, {transform_indices = @transform_3, window_bounds = array<i64: 32, 16>}]} {
    %c0 = arith.constant 0 : index
    %c0_0 = arith.constant 0 : index
    %0 = vector.load %arg1[%c0, %c0_0] : memref<32x576xbf16, #tpu.memory_space<vmem>>, vector<32x576xbf16>
    %c0_1 = arith.constant 0 : index
    %c0_2 = arith.constant 0 : index
    %1 = vector.load %arg2[%c0_1, %c0_2] : memref<576x16xf32, #tpu.memory_space<vmem>>, vector<576x16xf32>
    %2 = arith.truncf %1 : vector<576x16xf32> to vector<576x16xbf16>
    %cst = arith.constant dense<0.000000e+00> : vector<32x16xf32>
    %3 = tpu.matmul %0, %2, %cst {dimension_numbers = #tpu.dot_dimension_numbers<[1], [0], [0], [1], [0, 0, 1, 1], [], []>} : vector<32x576xbf16>, vector<576x16xbf16>, vector<32x16xf32> -> vector<32x16xf32>
    %c0_3 = arith.constant 0 : index
    %c0_4 = arith.constant 0 : index
    %4 = vector.load %arg3[%c0_3, %c0_4] : memref<1x16xf32, #tpu.memory_space<vmem>>, vector<1x16xf32>
    %5 = vector.broadcast %4 : vector<1x16xf32> to vector<32x16xf32>
    %6 = arith.addf %3, %5 : vector<32x16xf32>
    %7 = arith.negf %6 : vector<32x16xf32>
    %8 = math.exp %7 : vector<32x16xf32>
    %cst_5 = arith.constant 1.000000e+00 : f32
    %9 = vector.broadcast %cst_5 : f32 to vector<32x16xf32>
    %10 = arith.addf %9, %8 : vector<32x16xf32>
    %11 = arith.divf %9, %10 : vector<32x16xf32>
    %12 = arith.mulf %6, %11 : vector<32x16xf32>
    %13 = arith.truncf %12 : vector<32x16xf32> to vector<32x16xbf16>
    %c0_6 = arith.constant 0 : index
    %c0_7 = arith.constant 0 : index
    %14 = vector.load %arg4[%c0_6, %c0_7] : memref<32x16xbf16, #tpu.memory_space<vmem>>, vector<32x16xbf16>
    tpu.vector_store %arg4[%c0_6, %c0_7], %13 {strides = array<i32>} : memref<32x16xbf16, #tpu.memory_space<vmem>>, vector<32x16xbf16>,
    return
  }
  func.func @transform_0(%arg0: i32) -> (i32, i32) {
    %c0_i32 = arith.constant 0 : i32
    %c0_i32_0 = arith.constant 0 : i32
    return %arg0, %c0_i32 : i32, i32
  }
  func.func @transform_1(%arg0: i32) -> (i32, i32) {
    %c0_i32 = arith.constant 0 : i32
    %c0_i32_0 = arith.constant 0 : i32
    %c0_i32_1 = arith.constant 0 : i32
    return %c0_i32, %c0_i32_0 : i32, i32
  }
  func.func @transform_2(%arg0: i32) -> (i32, i32) {
    %c0_i32 = arith.constant 0 : i32
    %c0_i32_0 = arith.constant 0 : i32
    %c0_i32_1 = arith.constant 0 : i32
    return %c0_i32, %c0_i32_0 : i32, i32
  }
  func.func @transform_3(%arg0: i32) -> (i32, i32) {
    %c0_i32 = arith.constant 0 : i32
    %c0_i32_0 = arith.constant 0 : i32
    return %arg0, %c0_i32 : i32, i32
  }
}

module attributes {stable_mosaic.version = 11 : i64} {
  func.func @_cell_kernel(%arg0: i32, %arg1: memref<32x16xbf16, #tpu.memory_space<vmem>>, %arg2: memref<32x16xbf16, #tpu.memory_space<vmem>>, %arg3: memref<1x16xf32, #tpu.memory_space<vmem>>, %arg4: memref<1x16xf32, #tpu.memory_space<vmem>>, %arg5: memref<16x48xf32, #tpu.memory_space<vmem>>, %arg6: memref<1x48xf32, #tpu.memory_space<vmem>>, %arg7: memref<16x16xf32, #tpu.memory_space<vmem>>, %arg8: memref<1x16xf32, #tpu.memory_space<vmem>>, %arg9: memref<1x16xf32, #tpu.memory_space<vmem>>, %arg10: memref<1x16xf32, #tpu.memory_space<vmem>>, %arg11: memref<16x64xf32, #tpu.memory_space<vmem>>, %arg12: memref<1x64xf32, #tpu.memory_space<vmem>>, %arg13: memref<64x16xf32, #tpu.memory_space<vmem>>, %arg14: memref<1x16xf32, #tpu.memory_space<vmem>>, %arg15: memref<32x16xbf16, #tpu.memory_space<vmem>>) attributes {dimension_semantics = [#tpu.dimension_semantics<parallel>], iteration_bounds = array<i64: 2>, scalar_prefetch = 0 : i64, scratch_operands = 0 : i64, tpu.core_type = #tpu.core_type<tc>, window_params = [{transform_indices = @transform_0, window_bounds = array<i64: 32, 16>}, {transform_indices = @transform_1, window_bounds = array<i64: 32, 16>}, {pipeline_mode = #tpu.pipeline_mode<synchronous>, transform_indices = @transform_2, window_bounds = array<i64: 1, 16>}, {pipeline_mode = #tpu.pipeline_mode<synchronous>, transform_indices = @transform_3, window_bounds = array<i64: 1, 16>}, {pipeline_mode = #tpu.pipeline_mode<synchronous>, transform_indices = @transform_4, window_bounds = array<i64: 16, 48>}, {pipeline_mode = #tpu.pipeline_mode<synchronous>, transform_indices = @transform_5, window_bounds = array<i64: 1, 48>}, {pipeline_mode = #tpu.pipeline_mode<synchronous>, transform_indices = @transform_6, window_bounds = array<i64: 16, 16>}, {pipeline_mode = #tpu.pipeline_mode<synchronous>, transform_indices = @transform_7, window_bounds = array<i64: 1, 16>}, {pipeline_mode = #tpu.pipeline_mode<synchronous>, transform_indices = @transform_8, window_bounds = array<i64: 1, 16>}, {pipeline_mode = #tpu.pipeline_mode<synchronous>, transform_indices = @transform_9, window_bounds = array<i64: 1, 16>}, {pipeline_mode = #tpu.pipeline_mode<synchronous>, transform_indices = @transform_10, window_bounds = array<i64: 16, 64>}, {pipeline_mode = #tpu.pipeline_mode<synchronous>, transform_indices = @transform_11, window_bounds = array<i64: 1, 64>}, {pipeline_mode = #tpu.pipeline_mode<synchronous>, transform_indices = @transform_12, window_bounds = array<i64: 64, 16>}, {pipeline_mode = #tpu.pipeline_mode<synchronous>, transform_indices = @transform_13, window_bounds = array<i64: 1, 16>}, {transform_indices = @transform_14, window_bounds = array<i64: 32, 16>}]} {
    %c0 = arith.constant 0 : index
    %c0_0 = arith.constant 0 : index
    %0 = vector.load %arg1[%c0, %c0_0] : memref<32x16xbf16, #tpu.memory_space<vmem>>, vector<32x16xbf16>
    %1 = arith.extf %0 : vector<32x16xbf16> to vector<32x16xf32>
    %cst = arith.constant dense<0.000000e+00> : vector<32xf32>
    %2 = vector.multi_reduction <add>, %1, %cst [1] : vector<32x16xf32> to vector<32xf32>
    %3 = vector.shape_cast %2 : vector<32xf32> to vector<32x1xf32>
    %cst_1 = arith.constant 1.600000e+01 : f32
    %4 = vector.broadcast %cst_1 : f32 to vector<32x1xf32>
    %5 = arith.divf %3, %4 : vector<32x1xf32>
    %6 = vector.broadcast %5 : vector<32x1xf32> to vector<32x16xf32>
    %7 = arith.subf %1, %6 : vector<32x16xf32>
    %8 = arith.mulf %7, %7 : vector<32x16xf32>
    %cst_2 = arith.constant dense<0.000000e+00> : vector<32xf32>
    %9 = vector.multi_reduction <add>, %8, %cst_2 [1] : vector<32x16xf32> to vector<32xf32>
    %10 = vector.shape_cast %9 : vector<32xf32> to vector<32x1xf32>
    %cst_3 = arith.constant 1.600000e+01 : f32
    %11 = vector.broadcast %cst_3 : f32 to vector<32x1xf32>
    %12 = arith.divf %10, %11 : vector<32x1xf32>
    %cst_4 = arith.constant 9.99999997E-7 : f32
    %13 = vector.broadcast %cst_4 : f32 to vector<32x1xf32>
    %14 = arith.addf %12, %13 : vector<32x1xf32>
    %15 = math.rsqrt %14 : vector<32x1xf32>
    %16 = vector.broadcast %15 : vector<32x1xf32> to vector<32x16xf32>
    %17 = arith.mulf %7, %16 : vector<32x16xf32>
    %c0_5 = arith.constant 0 : index
    %c0_6 = arith.constant 0 : index
    %18 = vector.load %arg3[%c0_5, %c0_6] : memref<1x16xf32, #tpu.memory_space<vmem>>, vector<1x16xf32>
    %19 = vector.broadcast %18 : vector<1x16xf32> to vector<32x16xf32>
    %20 = arith.mulf %17, %19 : vector<32x16xf32>
    %c0_7 = arith.constant 0 : index
    %c0_8 = arith.constant 0 : index
    %21 = vector.load %arg4[%c0_7, %c0_8] : memref<1x16xf32, #tpu.memory_space<vmem>>, vector<1x16xf32>
    %22 = vector.broadcast %21 : vector<1x16xf32> to vector<32x16xf32>
    %23 = arith.addf %20, %22 : vector<32x16xf32>
    %24 = arith.truncf %23 : vector<32x16xf32> to vector<32x16xbf16>
    %c0_9 = arith.constant 0 : index
    %c0_10 = arith.constant 0 : index
    %25 = vector.load %arg5[%c0_9, %c0_10] : memref<16x48xf32, #tpu.memory_space<vmem>>, vector<16x48xf32>
    %26 = arith.truncf %25 : vector<16x48xf32> to vector<16x48xbf16>
    %cst_11 = arith.constant dense<0.000000e+00> : vector<32x48xf32>
    %27 = tpu.matmul %24, %26, %cst_11 {dimension_numbers = #tpu.dot_dimension_numbers<[1], [0], [0], [1], [0, 0, 1, 1], [], []>} : vector<32x16xbf16>, vector<16x48xbf16>, vector<32x48xf32> -> vector<32x48xf32>
    %c0_12 = arith.constant 0 : index
    %c0_13 = arith.constant 0 : index
    %28 = vector.load %arg6[%c0_12, %c0_13] : memref<1x48xf32, #tpu.memory_space<vmem>>, vector<1x48xf32>
    %29 = vector.broadcast %28 : vector<1x48xf32> to vector<32x48xf32>
    %30 = arith.addf %27, %29 : vector<32x48xf32>
    %31 = tpu.iota {dimensions = array<i32: 2>} : vector<1x1x8xi32>
    %c4_i32 = arith.constant 4 : i32
    %32 = vector.broadcast %c4_i32 : i32 to vector<1x1x8xi32>
    %33 = arith.cmpi slt, %31, %32 : vector<1x1x8xi32>
    %34 = vector.extract_strided_slice %30 {offsets = [0, 0], sizes = [32, 4], strides = [1, 1]} : vector<32x48xf32> to vector<32x4xf32>
    %35 = vector.shape_cast %34 : vector<32x4xf32> to vector<4x8x4xf32>
    %36 = vector.extract_strided_slice %30 {offsets = [0, 16], sizes = [32, 4], strides = [1, 1]} : vector<32x48xf32> to vector<32x4xf32>
    %37 = vector.shape_cast %36 : vector<32x4xf32> to vector<4x8x4xf32>
    %38 = vector.extract_strided_slice %30 {offsets = [0, 32], sizes = [32, 4], strides = [1, 1]} : vector<32x48xf32> to vector<32x4xf32>
    %39 = vector.shape_cast %38 : vector<32x4xf32> to vector<4x8x4xf32>
    %40 = arith.truncf %35 : vector<4x8x4xf32> to vector<4x8x4xbf16>
    %41 = arith.truncf %37 : vector<4x8x4xf32> to vector<4x8x4xbf16>
    "tpu.trace_start"() <{level = 10 : i32, message = "wqd,wkd->wqk"}> : () -> ()
    %cst_14 = arith.constant dense<0.000000e+00> : vector<4x8x8xf32>
    %42 = tpu.matmul %40, %41, %cst_14 {dimension_numbers = #tpu.dot_dimension_numbers<[2], [2], [1], [1], [0, 0, 0, 1, 1, 1], [0], [0]>} : vector<4x8x4xbf16>, vector<4x8x4xbf16>, vector<4x8x8xf32> -> vector<4x8x8xf32>
    "tpu.trace_stop"() : () -> ()
    %cst_15 = arith.constant 5.000000e-01 : f32
    %43 = vector.broadcast %cst_15 : f32 to vector<4x8x8xf32>
    %44 = arith.mulf %42, %43 : vector<4x8x8xf32>
    %cst_16 = arith.constant -1.000000e+09 : f32
    %45 = vector.shape_cast %33 : vector<1x1x8xi1> to vector<1x1x8xi1>
    %46 = vector.broadcast %45 : vector<1x1x8xi1> to vector<4x8x8xi1>
    %47 = vector.broadcast %cst_16 : f32 to vector<4x8x8xf32>
    %48 = arith.select %46, %44, %47 : vector<4x8x8xi1>, vector<4x8x8xf32>
    %cst_17 = arith.constant dense<0xFF800000> : vector<4x8xf32>
    %49 = vector.multi_reduction <maximumf>, %48, %cst_17 [2] : vector<4x8x8xf32> to vector<4x8xf32>
    %50 = vector.shape_cast %49 : vector<4x8xf32> to vector<4x8x1xf32>
    %51 = vector.broadcast %50 : vector<4x8x1xf32> to vector<4x8x8xf32>
    %52 = arith.subf %48, %51 : vector<4x8x8xf32>
    %53 = math.exp %52 : vector<4x8x8xf32>
    %cst_18 = arith.constant dense<0.000000e+00> : vector<4x8xf32>
    %54 = vector.multi_reduction <add>, %53, %cst_18 [2] : vector<4x8x8xf32> to vector<4x8xf32>
    %55 = vector.shape_cast %54 : vector<4x8xf32> to vector<4x8x1xf32>
    %56 = tpu.reciprocal %55 {approx = true} : vector<4x8x1xf32> -> vector<4x8x1xf32>
    %57 = vector.broadcast %56 : vector<4x8x1xf32> to vector<4x8x8xf32>
    %58 = arith.mulf %53, %57 : vector<4x8x8xf32>
    %59 = arith.truncf %58 : vector<4x8x8xf32> to vector<4x8x8xbf16>
    %60 = arith.truncf %39 : vector<4x8x4xf32> to vector<4x8x4xbf16>
    "tpu.trace_start"() <{level = 10 : i32, message = "wqk,wkd->wqd"}> : () -> ()
    %cst_19 = arith.constant dense<0.000000e+00> : vector<4x8x4xf32>
    %61 = tpu.matmul %59, %60, %cst_19 {dimension_numbers = #tpu.dot_dimension_numbers<[2], [1], [1], [2], [0, 0, 0, 1, 1, 2], [0], [0]>} : vector<4x8x8xbf16>, vector<4x8x4xbf16>, vector<4x8x4xf32> -> vector<4x8x4xf32>
    "tpu.trace_stop"() : () -> ()
    %62 = vector.shape_cast %61 : vector<4x8x4xf32> to vector<32x4xf32>
    %63 = vector.extract_strided_slice %30 {offsets = [0, 4], sizes = [32, 4], strides = [1, 1]} : vector<32x48xf32> to vector<32x4xf32>
    %64 = vector.shape_cast %63 : vector<32x4xf32> to vector<4x8x4xf32>
    %65 = vector.extract_strided_slice %30 {offsets = [0, 20], sizes = [32, 4], strides = [1, 1]} : vector<32x48xf32> to vector<32x4xf32>
    %66 = vector.shape_cast %65 : vector<32x4xf32> to vector<4x8x4xf32>
    %67 = vector.extract_strided_slice %30 {offsets = [0, 36], sizes = [32, 4], strides = [1, 1]} : vector<32x48xf32> to vector<32x4xf32>
    %68 = vector.shape_cast %67 : vector<32x4xf32> to vector<4x8x4xf32>
    %69 = arith.truncf %64 : vector<4x8x4xf32> to vector<4x8x4xbf16>
    %70 = arith.truncf %66 : vector<4x8x4xf32> to vector<4x8x4xbf16>
    "tpu.trace_start"() <{level = 10 : i32, message = "wqd,wkd->wqk"}> : () -> ()
    %cst_20 = arith.constant dense<0.000000e+00> : vector<4x8x8xf32>
    %71 = tpu.matmul %69, %70, %cst_20 {dimension_numbers = #tpu.dot_dimension_numbers<[2], [2], [1], [1], [0, 0, 0, 1, 1, 1], [0], [0]>} : vector<4x8x4xbf16>, vector<4x8x4xbf16>, vector<4x8x8xf32> -> vector<4x8x8xf32>
    "tpu.trace_stop"() : () -> ()
    %cst_21 = arith.constant 5.000000e-01 : f32
    %72 = vector.broadcast %cst_21 : f32 to vector<4x8x8xf32>
    %73 = arith.mulf %71, %72 : vector<4x8x8xf32>
    %cst_22 = arith.constant -1.000000e+09 : f32
    %74 = vector.shape_cast %33 : vector<1x1x8xi1> to vector<1x1x8xi1>
    %75 = vector.broadcast %74 : vector<1x1x8xi1> to vector<4x8x8xi1>
    %76 = vector.broadcast %cst_22 : f32 to vector<4x8x8xf32>
    %77 = arith.select %75, %73, %76 : vector<4x8x8xi1>, vector<4x8x8xf32>
    %cst_23 = arith.constant dense<0xFF800000> : vector<4x8xf32>
    %78 = vector.multi_reduction <maximumf>, %77, %cst_23 [2] : vector<4x8x8xf32> to vector<4x8xf32>
    %79 = vector.shape_cast %78 : vector<4x8xf32> to vector<4x8x1xf32>
    %80 = vector.broadcast %79 : vector<4x8x1xf32> to vector<4x8x8xf32>
    %81 = arith.subf %77, %80 : vector<4x8x8xf32>
    %82 = math.exp %81 : vector<4x8x8xf32>
    %cst_24 = arith.constant dense<0.000000e+00> : vector<4x8xf32>
    %83 = vector.multi_reduction <add>, %82, %cst_24 [2] : vector<4x8x8xf32> to vector<4x8xf32>
    %84 = vector.shape_cast %83 : vector<4x8xf32> to vector<4x8x1xf32>
    %85 = tpu.reciprocal %84 {approx = true} : vector<4x8x1xf32> -> vector<4x8x1xf32>
    %86 = vector.broadcast %85 : vector<4x8x1xf32> to vector<4x8x8xf32>
    %87 = arith.mulf %82, %86 : vector<4x8x8xf32>
    %88 = arith.truncf %87 : vector<4x8x8xf32> to vector<4x8x8xbf16>
    %89 = arith.truncf %68 : vector<4x8x4xf32> to vector<4x8x4xbf16>
    "tpu.trace_start"() <{level = 10 : i32, message = "wqk,wkd->wqd"}> : () -> ()
    %cst_25 = arith.constant dense<0.000000e+00> : vector<4x8x4xf32>
    %90 = tpu.matmul %88, %89, %cst_25 {dimension_numbers = #tpu.dot_dimension_numbers<[2], [1], [1], [2], [0, 0, 0, 1, 1, 2], [0], [0]>} : vector<4x8x8xbf16>, vector<4x8x4xbf16>, vector<4x8x4xf32> -> vector<4x8x4xf32>
    "tpu.trace_stop"() : () -> ()
    %91 = vector.shape_cast %90 : vector<4x8x4xf32> to vector<32x4xf32>
    %92 = vector.extract_strided_slice %30 {offsets = [0, 8], sizes = [32, 4], strides = [1, 1]} : vector<32x48xf32> to vector<32x4xf32>
    %93 = vector.shape_cast %92 : vector<32x4xf32> to vector<4x8x4xf32>
    %94 = vector.extract_strided_slice %30 {offsets = [0, 24], sizes = [32, 4], strides = [1, 1]} : vector<32x48xf32> to vector<32x4xf32>
    %95 = vector.shape_cast %94 : vector<32x4xf32> to vector<4x8x4xf32>
    %96 = vector.extract_strided_slice %30 {offsets = [0, 40], sizes = [32, 4], strides = [1, 1]} : vector<32x48xf32> to vector<32x4xf32>
    %97 = vector.shape_cast %96 : vector<32x4xf32> to vector<4x8x4xf32>
    %98 = arith.truncf %93 : vector<4x8x4xf32> to vector<4x8x4xbf16>
    %99 = arith.truncf %95 : vector<4x8x4xf32> to vector<4x8x4xbf16>
    "tpu.trace_start"() <{level = 10 : i32, message = "wqd,wkd->wqk"}> : () -> ()
    %cst_26 = arith.constant dense<0.000000e+00> : vector<4x8x8xf32>
    %100 = tpu.matmul %98, %99, %cst_26 {dimension_numbers = #tpu.dot_dimension_numbers<[2], [2], [1], [1], [0, 0, 0, 1, 1, 1], [0], [0]>} : vector<4x8x4xbf16>, vector<4x8x4xbf16>, vector<4x8x8xf32> -> vector<4x8x8xf32>
    "tpu.trace_stop"() : () -> ()
    %cst_27 = arith.constant 5.000000e-01 : f32
    %101 = vector.broadcast %cst_27 : f32 to vector<4x8x8xf32>
    %102 = arith.mulf %100, %101 : vector<4x8x8xf32>
    %cst_28 = arith.constant -1.000000e+09 : f32
    %103 = vector.shape_cast %33 : vector<1x1x8xi1> to vector<1x1x8xi1>
    %104 = vector.broadcast %103 : vector<1x1x8xi1> to vector<4x8x8xi1>
    %105 = vector.broadcast %cst_28 : f32 to vector<4x8x8xf32>
    %106 = arith.select %104, %102, %105 : vector<4x8x8xi1>, vector<4x8x8xf32>
    %cst_29 = arith.constant dense<0xFF800000> : vector<4x8xf32>
    %107 = vector.multi_reduction <maximumf>, %106, %cst_29 [2] : vector<4x8x8xf32> to vector<4x8xf32>
    %108 = vector.shape_cast %107 : vector<4x8xf32> to vector<4x8x1xf32>
    %109 = vector.broadcast %108 : vector<4x8x1xf32> to vector<4x8x8xf32>
    %110 = arith.subf %106, %109 : vector<4x8x8xf32>
    %111 = math.exp %110 : vector<4x8x8xf32>
    %cst_30 = arith.constant dense<0.000000e+00> : vector<4x8xf32>
    %112 = vector.multi_reduction <add>, %111, %cst_30 [2] : vector<4x8x8xf32> to vector<4x8xf32>
    %113 = vector.shape_cast %112 : vector<4x8xf32> to vector<4x8x1xf32>
    %114 = tpu.reciprocal %113 {approx = true} : vector<4x8x1xf32> -> vector<4x8x1xf32>
    %115 = vector.broadcast %114 : vector<4x8x1xf32> to vector<4x8x8xf32>
    %116 = arith.mulf %111, %115 : vector<4x8x8xf32>
    %117 = arith.truncf %116 : vector<4x8x8xf32> to vector<4x8x8xbf16>
    %118 = arith.truncf %97 : vector<4x8x4xf32> to vector<4x8x4xbf16>
    "tpu.trace_start"() <{level = 10 : i32, message = "wqk,wkd->wqd"}> : () -> ()
    %cst_31 = arith.constant dense<0.000000e+00> : vector<4x8x4xf32>
    %119 = tpu.matmul %117, %118, %cst_31 {dimension_numbers = #tpu.dot_dimension_numbers<[2], [1], [1], [2], [0, 0, 0, 1, 1, 2], [0], [0]>} : vector<4x8x8xbf16>, vector<4x8x4xbf16>, vector<4x8x4xf32> -> vector<4x8x4xf32>
    "tpu.trace_stop"() : () -> ()
    %120 = vector.shape_cast %119 : vector<4x8x4xf32> to vector<32x4xf32>
    %121 = vector.extract_strided_slice %30 {offsets = [0, 12], sizes = [32, 4], strides = [1, 1]} : vector<32x48xf32> to vector<32x4xf32>
    %122 = vector.shape_cast %121 : vector<32x4xf32> to vector<4x8x4xf32>
    %123 = vector.extract_strided_slice %30 {offsets = [0, 28], sizes = [32, 4], strides = [1, 1]} : vector<32x48xf32> to vector<32x4xf32>
    %124 = vector.shape_cast %123 : vector<32x4xf32> to vector<4x8x4xf32>
    %125 = vector.extract_strided_slice %30 {offsets = [0, 44], sizes = [32, 4], strides = [1, 1]} : vector<32x48xf32> to vector<32x4xf32>
    %126 = vector.shape_cast %125 : vector<32x4xf32> to vector<4x8x4xf32>
    %127 = arith.truncf %122 : vector<4x8x4xf32> to vector<4x8x4xbf16>
    %128 = arith.truncf %124 : vector<4x8x4xf32> to vector<4x8x4xbf16>
    "tpu.trace_start"() <{level = 10 : i32, message = "wqd,wkd->wqk"}> : () -> ()
    %cst_32 = arith.constant dense<0.000000e+00> : vector<4x8x8xf32>
    %129 = tpu.matmul %127, %128, %cst_32 {dimension_numbers = #tpu.dot_dimension_numbers<[2], [2], [1], [1], [0, 0, 0, 1, 1, 1], [0], [0]>} : vector<4x8x4xbf16>, vector<4x8x4xbf16>, vector<4x8x8xf32> -> vector<4x8x8xf32>
    "tpu.trace_stop"() : () -> ()
    %cst_33 = arith.constant 5.000000e-01 : f32
    %130 = vector.broadcast %cst_33 : f32 to vector<4x8x8xf32>
    %131 = arith.mulf %129, %130 : vector<4x8x8xf32>
    %cst_34 = arith.constant -1.000000e+09 : f32
    %132 = vector.shape_cast %33 : vector<1x1x8xi1> to vector<1x1x8xi1>
    %133 = vector.broadcast %132 : vector<1x1x8xi1> to vector<4x8x8xi1>
    %134 = vector.broadcast %cst_34 : f32 to vector<4x8x8xf32>
    %135 = arith.select %133, %131, %134 : vector<4x8x8xi1>, vector<4x8x8xf32>
    %cst_35 = arith.constant dense<0xFF800000> : vector<4x8xf32>
    %136 = vector.multi_reduction <maximumf>, %135, %cst_35 [2] : vector<4x8x8xf32> to vector<4x8xf32>
    %137 = vector.shape_cast %136 : vector<4x8xf32> to vector<4x8x1xf32>
    %138 = vector.broadcast %137 : vector<4x8x1xf32> to vector<4x8x8xf32>
    %139 = arith.subf %135, %138 : vector<4x8x8xf32>
    %140 = math.exp %139 : vector<4x8x8xf32>
    %cst_36 = arith.constant dense<0.000000e+00> : vector<4x8xf32>
    %141 = vector.multi_reduction <add>, %140, %cst_36 [2] : vector<4x8x8xf32> to vector<4x8xf32>
    %142 = vector.shape_cast %141 : vector<4x8xf32> to vector<4x8x1xf32>
    %143 = tpu.reciprocal %142 {approx = true} : vector<4x8x1xf32> -> vector<4x8x1xf32>
    %144 = vector.broadcast %143 : vector<4x8x1xf32> to vector<4x8x8xf32>
    %145 = arith.mulf %140, %144 : vector<4x8x8xf32>
    %146 = arith.truncf %145 : vector<4x8x8xf32> to vector<4x8x8xbf16>
    %147 = arith.truncf %126 : vector<4x8x4xf32> to vector<4x8x4xbf16>
    "tpu.trace_start"() <{level = 10 : i32, message = "wqk,wkd->wqd"}> : () -> ()
    %cst_37 = arith.constant dense<0.000000e+00> : vector<4x8x4xf32>
    %148 = tpu.matmul %146, %147, %cst_37 {dimension_numbers = #tpu.dot_dimension_numbers<[2], [1], [1], [2], [0, 0, 0, 1, 1, 2], [0], [0]>} : vector<4x8x8xbf16>, vector<4x8x4xbf16>, vector<4x8x4xf32> -> vector<4x8x4xf32>
    "tpu.trace_stop"() : () -> ()
    %149 = vector.shape_cast %148 : vector<4x8x4xf32> to vector<32x4xf32>
    %150 = tpu.concatenate %62, %91, %120, %149 in 1 : vector<32x4xf32>, vector<32x4xf32>, vector<32x4xf32>, vector<32x4xf32> -> vector<32x16xf32>
    %151 = arith.truncf %150 : vector<32x16xf32> to vector<32x16xbf16>
    %c0_38 = arith.constant 0 : index
    %c0_39 = arith.constant 0 : index
    %152 = vector.load %arg7[%c0_38, %c0_39] : memref<16x16xf32, #tpu.memory_space<vmem>>, vector<16x16xf32>
    %153 = arith.truncf %152 : vector<16x16xf32> to vector<16x16xbf16>
    %cst_40 = arith.constant dense<0.000000e+00> : vector<32x16xf32>
    %154 = tpu.matmul %151, %153, %cst_40 {dimension_numbers = #tpu.dot_dimension_numbers<[1], [0], [0], [1], [0, 0, 1, 1], [], []>} : vector<32x16xbf16>, vector<16x16xbf16>, vector<32x16xf32> -> vector<32x16xf32>
    %c0_41 = arith.constant 0 : index
    %c0_42 = arith.constant 0 : index
    %155 = vector.load %arg8[%c0_41, %c0_42] : memref<1x16xf32, #tpu.memory_space<vmem>>, vector<1x16xf32>
    %156 = vector.broadcast %155 : vector<1x16xf32> to vector<32x16xf32>
    %157 = arith.addf %154, %156 : vector<32x16xf32>
    %c0_43 = arith.constant 0 : index
    %c0_44 = arith.constant 0 : index
    %158 = vector.load %arg2[%c0_43, %c0_44] : memref<32x16xbf16, #tpu.memory_space<vmem>>, vector<32x16xbf16>
    %159 = arith.extf %158 : vector<32x16xbf16> to vector<32x16xf32>
    %160 = arith.addf %157, %159 : vector<32x16xf32>
    %161 = arith.addf %160, %1 : vector<32x16xf32>
    %cst_45 = arith.constant dense<0.000000e+00> : vector<32xf32>
    %162 = vector.multi_reduction <add>, %161, %cst_45 [1] : vector<32x16xf32> to vector<32xf32>
    %163 = vector.shape_cast %162 : vector<32xf32> to vector<32x1xf32>
    %cst_46 = arith.constant 1.600000e+01 : f32
    %164 = vector.broadcast %cst_46 : f32 to vector<32x1xf32>
    %165 = arith.divf %163, %164 : vector<32x1xf32>
    %166 = vector.broadcast %165 : vector<32x1xf32> to vector<32x16xf32>
    %167 = arith.subf %161, %166 : vector<32x16xf32>
    %168 = arith.mulf %167, %167 : vector<32x16xf32>
    %cst_47 = arith.constant dense<0.000000e+00> : vector<32xf32>
    %169 = vector.multi_reduction <add>, %168, %cst_47 [1] : vector<32x16xf32> to vector<32xf32>
    %170 = vector.shape_cast %169 : vector<32xf32> to vector<32x1xf32>
    %cst_48 = arith.constant 1.600000e+01 : f32
    %171 = vector.broadcast %cst_48 : f32 to vector<32x1xf32>
    %172 = arith.divf %170, %171 : vector<32x1xf32>
    %cst_49 = arith.constant 9.99999997E-7 : f32
    %173 = vector.broadcast %cst_49 : f32 to vector<32x1xf32>
    %174 = arith.addf %172, %173 : vector<32x1xf32>
    %175 = math.rsqrt %174 : vector<32x1xf32>
    %176 = vector.broadcast %175 : vector<32x1xf32> to vector<32x16xf32>
    %177 = arith.mulf %167, %176 : vector<32x16xf32>
    %c0_50 = arith.constant 0 : index
    %c0_51 = arith.constant 0 : index
    %178 = vector.load %arg9[%c0_50, %c0_51] : memref<1x16xf32, #tpu.memory_space<vmem>>, vector<1x16xf32>
    %179 = vector.broadcast %178 : vector<1x16xf32> to vector<32x16xf32>
    %180 = arith.mulf %177, %179 : vector<32x16xf32>
    %c0_52 = arith.constant 0 : index
    %c0_53 = arith.constant 0 : index
    %181 = vector.load %arg10[%c0_52, %c0_53] : memref<1x16xf32, #tpu.memory_space<vmem>>, vector<1x16xf32>
    %182 = vector.broadcast %181 : vector<1x16xf32> to vector<32x16xf32>
    %183 = arith.addf %180, %182 : vector<32x16xf32>
    %184 = arith.truncf %183 : vector<32x16xf32> to vector<32x16xbf16>
    %c0_54 = arith.constant 0 : index
    %c0_55 = arith.constant 0 : index
    %185 = vector.load %arg11[%c0_54, %c0_55] : memref<16x64xf32, #tpu.memory_space<vmem>>, vector<16x64xf32>
    %186 = arith.truncf %185 : vector<16x64xf32> to vector<16x64xbf16>
    %cst_56 = arith.constant dense<0.000000e+00> : vector<32x64xf32>
    %187 = tpu.matmul %184, %186, %cst_56 {dimension_numbers = #tpu.dot_dimension_numbers<[1], [0], [0], [1], [0, 0, 1, 1], [], []>} : vector<32x16xbf16>, vector<16x64xbf16>, vector<32x64xf32> -> vector<32x64xf32>
    %c0_57 = arith.constant 0 : index
    %c0_58 = arith.constant 0 : index
    %188 = vector.load %arg12[%c0_57, %c0_58] : memref<1x64xf32, #tpu.memory_space<vmem>>, vector<1x64xf32>
    %189 = vector.broadcast %188 : vector<1x64xf32> to vector<32x64xf32>
    %190 = arith.addf %187, %189 : vector<32x64xf32>
    %191 = arith.mulf %190, %190 : vector<32x64xf32>
    %192 = arith.mulf %190, %191 : vector<32x64xf32>
    %cst_59 = arith.constant 4.471500e-02 : f32
    %193 = vector.broadcast %cst_59 : f32 to vector<32x64xf32>
    %194 = arith.mulf %193, %192 : vector<32x64xf32>
    %195 = arith.addf %190, %194 : vector<32x64xf32>
    %cst_60 = arith.constant 0.797884583 : f32
    %196 = vector.broadcast %cst_60 : f32 to vector<32x64xf32>
    %197 = arith.mulf %196, %195 : vector<32x64xf32>
    %198 = math.tanh %197 : vector<32x64xf32>
    %cst_61 = arith.constant 1.000000e+00 : f32
    %199 = vector.broadcast %cst_61 : f32 to vector<32x64xf32>
    %200 = arith.addf %199, %198 : vector<32x64xf32>
    %cst_62 = arith.constant 5.000000e-01 : f32
    %201 = vector.broadcast %cst_62 : f32 to vector<32x64xf32>
    %202 = arith.mulf %201, %200 : vector<32x64xf32>
    %203 = arith.mulf %190, %202 : vector<32x64xf32>
    %204 = arith.truncf %203 : vector<32x64xf32> to vector<32x64xbf16>
    %c0_63 = arith.constant 0 : index
    %c0_64 = arith.constant 0 : index
    %205 = vector.load %arg13[%c0_63, %c0_64] : memref<64x16xf32, #tpu.memory_space<vmem>>, vector<64x16xf32>
    %206 = arith.truncf %205 : vector<64x16xf32> to vector<64x16xbf16>
    %cst_65 = arith.constant dense<0.000000e+00> : vector<32x16xf32>
    %207 = tpu.matmul %204, %206, %cst_65 {dimension_numbers = #tpu.dot_dimension_numbers<[1], [0], [0], [1], [0, 0, 1, 1], [], []>} : vector<32x64xbf16>, vector<64x16xbf16>, vector<32x16xf32> -> vector<32x16xf32>
    %c0_66 = arith.constant 0 : index
    %c0_67 = arith.constant 0 : index
    %208 = vector.load %arg14[%c0_66, %c0_67] : memref<1x16xf32, #tpu.memory_space<vmem>>, vector<1x16xf32>
    %209 = vector.broadcast %208 : vector<1x16xf32> to vector<32x16xf32>
    %210 = arith.addf %207, %209 : vector<32x16xf32>
    %211 = arith.addf %161, %210 : vector<32x16xf32>
    %212 = arith.truncf %211 : vector<32x16xf32> to vector<32x16xbf16>
    %c0_68 = arith.constant 0 : index
    %c0_69 = arith.constant 0 : index
    %213 = vector.load %arg15[%c0_68, %c0_69] : memref<32x16xbf16, #tpu.memory_space<vmem>>, vector<32x16xbf16>
    tpu.vector_store %arg15[%c0_68, %c0_69], %212 {strides = array<i32>} : memref<32x16xbf16, #tpu.memory_space<vmem>>, vector<32x16xbf16>,
    return
  }
  func.func @transform_0(%arg0: i32) -> (i32, i32) {
    %c0_i32 = arith.constant 0 : i32
    %c0_i32_0 = arith.constant 0 : i32
    return %arg0, %c0_i32 : i32, i32
  }
  func.func @transform_1(%arg0: i32) -> (i32, i32) {
    %c0_i32 = arith.constant 0 : i32
    %c0_i32_0 = arith.constant 0 : i32
    return %arg0, %c0_i32 : i32, i32
  }
  func.func @transform_2(%arg0: i32) -> (i32, i32) {
    %c0_i32 = arith.constant 0 : i32
    %c0_i32_0 = arith.constant 0 : i32
    %c0_i32_1 = arith.constant 0 : i32
    return %c0_i32, %c0_i32_0 : i32, i32
  }
  func.func @transform_3(%arg0: i32) -> (i32, i32) {
    %c0_i32 = arith.constant 0 : i32
    %c0_i32_0 = arith.constant 0 : i32
    %c0_i32_1 = arith.constant 0 : i32
    return %c0_i32, %c0_i32_0 : i32, i32
  }
  func.func @transform_4(%arg0: i32) -> (i32, i32) {
    %c0_i32 = arith.constant 0 : i32
    %c0_i32_0 = arith.constant 0 : i32
    %c0_i32_1 = arith.constant 0 : i32
    return %c0_i32, %c0_i32_0 : i32, i32
  }
  func.func @transform_5(%arg0: i32) -> (i32, i32) {
    %c0_i32 = arith.constant 0 : i32
    %c0_i32_0 = arith.constant 0 : i32
    %c0_i32_1 = arith.constant 0 : i32
    return %c0_i32, %c0_i32_0 : i32, i32
  }
  func.func @transform_6(%arg0: i32) -> (i32, i32) {
    %c0_i32 = arith.constant 0 : i32
    %c0_i32_0 = arith.constant 0 : i32
    %c0_i32_1 = arith.constant 0 : i32
    return %c0_i32, %c0_i32_0 : i32, i32
  }
  func.func @transform_7(%arg0: i32) -> (i32, i32) {
    %c0_i32 = arith.constant 0 : i32
    %c0_i32_0 = arith.constant 0 : i32
    %c0_i32_1 = arith.constant 0 : i32
    return %c0_i32, %c0_i32_0 : i32, i32
  }
  func.func @transform_8(%arg0: i32) -> (i32, i32) {
    %c0_i32 = arith.constant 0 : i32
    %c0_i32_0 = arith.constant 0 : i32
    %c0_i32_1 = arith.constant 0 : i32
    return %c0_i32, %c0_i32_0 : i32, i32
  }
  func.func @transform_9(%arg0: i32) -> (i32, i32) {
    %c0_i32 = arith.constant 0 : i32
    %c0_i32_0 = arith.constant 0 : i32
    %c0_i32_1 = arith.constant 0 : i32
    return %c0_i32, %c0_i32_0 : i32, i32
  }
  func.func @transform_10(%arg0: i32) -> (i32, i32) {
    %c0_i32 = arith.constant 0 : i32
    %c0_i32_0 = arith.constant 0 : i32
    %c0_i32_1 = arith.constant 0 : i32
    return %c0_i32, %c0_i32_0 : i32, i32
  }
  func.func @transform_11(%arg0: i32) -> (i32, i32) {
    %c0_i32 = arith.constant 0 : i32
    %c0_i32_0 = arith.constant 0 : i32
    %c0_i32_1 = arith.constant 0 : i32
    return %c0_i32, %c0_i32_0 : i32, i32
  }
  func.func @transform_12(%arg0: i32) -> (i32, i32) {
    %c0_i32 = arith.constant 0 : i32
    %c0_i32_0 = arith.constant 0 : i32
    %c0_i32_1 = arith.constant 0 : i32
    return %c0_i32, %c0_i32_0 : i32, i32
  }
  func.func @transform_13(%arg0: i32) -> (i32, i32) {
    %c0_i32 = arith.constant 0 : i32
    %c0_i32_0 = arith.constant 0 : i32
    %c0_i32_1 = arith.constant 0 : i32
    return %c0_i32, %c0_i32_0 : i32, i32
  }
  func.func @transform_14(%arg0: i32) -> (i32, i32) {
    %c0_i32 = arith.constant 0 : i32
    %c0_i32_0 = arith.constant 0 : i32
    return %arg0, %c0_i32 : i32, i32
  }
}

module attributes {stable_mosaic.version = 11 : i64} {
  func.func @_mm_kernel(%arg0: i32, %arg1: memref<8x144xbf16, #tpu.memory_space<vmem>>, %arg2: memref<144x16xf32, #tpu.memory_space<vmem>>, %arg3: memref<1x16xf32, #tpu.memory_space<vmem>>, %arg4: memref<8x16xbf16, #tpu.memory_space<vmem>>) attributes {dimension_semantics = [#tpu.dimension_semantics<parallel>], iteration_bounds = array<i64: 1>, scalar_prefetch = 0 : i64, scratch_operands = 0 : i64, tpu.core_type = #tpu.core_type<tc>, window_params = [{transform_indices = @transform_0, window_bounds = array<i64: 8, 144>}, {pipeline_mode = #tpu.pipeline_mode<synchronous>, transform_indices = @transform_1, window_bounds = array<i64: 144, 16>}, {pipeline_mode = #tpu.pipeline_mode<synchronous>, transform_indices = @transform_2, window_bounds = array<i64: 1, 16>}, {transform_indices = @transform_3, window_bounds = array<i64: 8, 16>}]} {
    %c0 = arith.constant 0 : index
    %c0_0 = arith.constant 0 : index
    %0 = vector.load %arg1[%c0, %c0_0] : memref<8x144xbf16, #tpu.memory_space<vmem>>, vector<8x144xbf16>
    %c0_1 = arith.constant 0 : index
    %c0_2 = arith.constant 0 : index
    %1 = vector.load %arg2[%c0_1, %c0_2] : memref<144x16xf32, #tpu.memory_space<vmem>>, vector<144x16xf32>
    %2 = arith.truncf %1 : vector<144x16xf32> to vector<144x16xbf16>
    %cst = arith.constant dense<0.000000e+00> : vector<8x16xf32>
    %3 = tpu.matmul %0, %2, %cst {dimension_numbers = #tpu.dot_dimension_numbers<[1], [0], [0], [1], [0, 0, 1, 1], [], []>} : vector<8x144xbf16>, vector<144x16xbf16>, vector<8x16xf32> -> vector<8x16xf32>
    %c0_3 = arith.constant 0 : index
    %c0_4 = arith.constant 0 : index
    %4 = vector.load %arg3[%c0_3, %c0_4] : memref<1x16xf32, #tpu.memory_space<vmem>>, vector<1x16xf32>
    %5 = vector.broadcast %4 : vector<1x16xf32> to vector<8x16xf32>
    %6 = arith.addf %3, %5 : vector<8x16xf32>
    %7 = arith.negf %6 : vector<8x16xf32>
    %8 = math.exp %7 : vector<8x16xf32>
    %cst_5 = arith.constant 1.000000e+00 : f32
    %9 = vector.broadcast %cst_5 : f32 to vector<8x16xf32>
    %10 = arith.addf %9, %8 : vector<8x16xf32>
    %11 = arith.divf %9, %10 : vector<8x16xf32>
    %12 = arith.mulf %6, %11 : vector<8x16xf32>
    %13 = arith.truncf %12 : vector<8x16xf32> to vector<8x16xbf16>
    %c0_6 = arith.constant 0 : index
    %c0_7 = arith.constant 0 : index
    %14 = vector.load %arg4[%c0_6, %c0_7] : memref<8x16xbf16, #tpu.memory_space<vmem>>, vector<8x16xbf16>
    tpu.vector_store %arg4[%c0_6, %c0_7], %13 {strides = array<i32>} : memref<8x16xbf16, #tpu.memory_space<vmem>>, vector<8x16xbf16>,
    return
  }
  func.func @transform_0(%arg0: i32) -> (i32, i32) {
    %c0_i32 = arith.constant 0 : i32
    %c0_i32_0 = arith.constant 0 : i32
    return %arg0, %c0_i32 : i32, i32
  }
  func.func @transform_1(%arg0: i32) -> (i32, i32) {
    %c0_i32 = arith.constant 0 : i32
    %c0_i32_0 = arith.constant 0 : i32
    %c0_i32_1 = arith.constant 0 : i32
    return %c0_i32, %c0_i32_0 : i32, i32
  }
  func.func @transform_2(%arg0: i32) -> (i32, i32) {
    %c0_i32 = arith.constant 0 : i32
    %c0_i32_0 = arith.constant 0 : i32
    %c0_i32_1 = arith.constant 0 : i32
    return %c0_i32, %c0_i32_0 : i32, i32
  }
  func.func @transform_3(%arg0: i32) -> (i32, i32) {
    %c0_i32 = arith.constant 0 : i32
    %c0_i32_0 = arith.constant 0 : i32
    return %arg0, %c0_i32 : i32, i32
  }
}

module attributes {stable_mosaic.version = 11 : i64} {
  func.func @_mm_kernel(%arg0: i32, %arg1: memref<8x144xbf16, #tpu.memory_space<vmem>>, %arg2: memref<144x32xf32, #tpu.memory_space<vmem>>, %arg3: memref<1x32xf32, #tpu.memory_space<vmem>>, %arg4: memref<8x32xbf16, #tpu.memory_space<vmem>>) attributes {dimension_semantics = [#tpu.dimension_semantics<parallel>], iteration_bounds = array<i64: 1>, scalar_prefetch = 0 : i64, scratch_operands = 0 : i64, tpu.core_type = #tpu.core_type<tc>, window_params = [{transform_indices = @transform_0, window_bounds = array<i64: 8, 144>}, {pipeline_mode = #tpu.pipeline_mode<synchronous>, transform_indices = @transform_1, window_bounds = array<i64: 144, 32>}, {pipeline_mode = #tpu.pipeline_mode<synchronous>, transform_indices = @transform_2, window_bounds = array<i64: 1, 32>}, {transform_indices = @transform_3, window_bounds = array<i64: 8, 32>}]} {
    %c0 = arith.constant 0 : index
    %c0_0 = arith.constant 0 : index
    %0 = vector.load %arg1[%c0, %c0_0] : memref<8x144xbf16, #tpu.memory_space<vmem>>, vector<8x144xbf16>
    %c0_1 = arith.constant 0 : index
    %c0_2 = arith.constant 0 : index
    %1 = vector.load %arg2[%c0_1, %c0_2] : memref<144x32xf32, #tpu.memory_space<vmem>>, vector<144x32xf32>
    %2 = arith.truncf %1 : vector<144x32xf32> to vector<144x32xbf16>
    %cst = arith.constant dense<0.000000e+00> : vector<8x32xf32>
    %3 = tpu.matmul %0, %2, %cst {dimension_numbers = #tpu.dot_dimension_numbers<[1], [0], [0], [1], [0, 0, 1, 1], [], []>} : vector<8x144xbf16>, vector<144x32xbf16>, vector<8x32xf32> -> vector<8x32xf32>
    %c0_3 = arith.constant 0 : index
    %c0_4 = arith.constant 0 : index
    %4 = vector.load %arg3[%c0_3, %c0_4] : memref<1x32xf32, #tpu.memory_space<vmem>>, vector<1x32xf32>
    %5 = vector.broadcast %4 : vector<1x32xf32> to vector<8x32xf32>
    %6 = arith.addf %3, %5 : vector<8x32xf32>
    %7 = arith.negf %6 : vector<8x32xf32>
    %8 = math.exp %7 : vector<8x32xf32>
    %cst_5 = arith.constant 1.000000e+00 : f32
    %9 = vector.broadcast %cst_5 : f32 to vector<8x32xf32>
    %10 = arith.addf %9, %8 : vector<8x32xf32>
    %11 = arith.divf %9, %10 : vector<8x32xf32>
    %12 = arith.mulf %6, %11 : vector<8x32xf32>
    %13 = arith.truncf %12 : vector<8x32xf32> to vector<8x32xbf16>
    %c0_6 = arith.constant 0 : index
    %c0_7 = arith.constant 0 : index
    %14 = vector.load %arg4[%c0_6, %c0_7] : memref<8x32xbf16, #tpu.memory_space<vmem>>, vector<8x32xbf16>
    tpu.vector_store %arg4[%c0_6, %c0_7], %13 {strides = array<i32>} : memref<8x32xbf16, #tpu.memory_space<vmem>>, vector<8x32xbf16>,
    return
  }
  func.func @transform_0(%arg0: i32) -> (i32, i32) {
    %c0_i32 = arith.constant 0 : i32
    %c0_i32_0 = arith.constant 0 : i32
    return %arg0, %c0_i32 : i32, i32
  }
  func.func @transform_1(%arg0: i32) -> (i32, i32) {
    %c0_i32 = arith.constant 0 : i32
    %c0_i32_0 = arith.constant 0 : i32
    %c0_i32_1 = arith.constant 0 : i32
    return %c0_i32, %c0_i32_0 : i32, i32
  }
  func.func @transform_2(%arg0: i32) -> (i32, i32) {
    %c0_i32 = arith.constant 0 : i32
    %c0_i32_0 = arith.constant 0 : i32
    %c0_i32_1 = arith.constant 0 : i32
    return %c0_i32, %c0_i32_0 : i32, i32
  }
  func.func @transform_3(%arg0: i32) -> (i32, i32) {
    %c0_i32 = arith.constant 0 : i32
    %c0_i32_0 = arith.constant 0 : i32
    return %arg0, %c0_i32 : i32, i32
  }
}

module attributes {stable_mosaic.version = 11 : i64} {
  func.func @_mm_kernel(%arg0: i32, %arg1: memref<8x432xbf16, #tpu.memory_space<vmem>>, %arg2: memref<432x48xf32, #tpu.memory_space<vmem>>, %arg3: memref<1x48xf32, #tpu.memory_space<vmem>>, %arg4: memref<8x48xbf16, #tpu.memory_space<vmem>>) attributes {dimension_semantics = [#tpu.dimension_semantics<parallel>], iteration_bounds = array<i64: 1>, scalar_prefetch = 0 : i64, scratch_operands = 0 : i64, tpu.core_type = #tpu.core_type<tc>, window_params = [{transform_indices = @transform_0, window_bounds = array<i64: 8, 432>}, {pipeline_mode = #tpu.pipeline_mode<synchronous>, transform_indices = @transform_1, window_bounds = array<i64: 432, 48>}, {pipeline_mode = #tpu.pipeline_mode<synchronous>, transform_indices = @transform_2, window_bounds = array<i64: 1, 48>}, {transform_indices = @transform_3, window_bounds = array<i64: 8, 48>}]} {
    %c0 = arith.constant 0 : index
    %c0_0 = arith.constant 0 : index
    %0 = vector.load %arg1[%c0, %c0_0] : memref<8x432xbf16, #tpu.memory_space<vmem>>, vector<8x432xbf16>
    %c0_1 = arith.constant 0 : index
    %c0_2 = arith.constant 0 : index
    %1 = vector.load %arg2[%c0_1, %c0_2] : memref<432x48xf32, #tpu.memory_space<vmem>>, vector<432x48xf32>
    %2 = arith.truncf %1 : vector<432x48xf32> to vector<432x48xbf16>
    %cst = arith.constant dense<0.000000e+00> : vector<8x48xf32>
    %3 = tpu.matmul %0, %2, %cst {dimension_numbers = #tpu.dot_dimension_numbers<[1], [0], [0], [1], [0, 0, 1, 1], [], []>} : vector<8x432xbf16>, vector<432x48xbf16>, vector<8x48xf32> -> vector<8x48xf32>
    %c0_3 = arith.constant 0 : index
    %c0_4 = arith.constant 0 : index
    %4 = vector.load %arg3[%c0_3, %c0_4] : memref<1x48xf32, #tpu.memory_space<vmem>>, vector<1x48xf32>
    %5 = vector.broadcast %4 : vector<1x48xf32> to vector<8x48xf32>
    %6 = arith.addf %3, %5 : vector<8x48xf32>
    %7 = arith.mulf %6, %6 : vector<8x48xf32>
    %8 = arith.mulf %6, %7 : vector<8x48xf32>
    %cst_5 = arith.constant 4.471500e-02 : f32
    %9 = vector.broadcast %cst_5 : f32 to vector<8x48xf32>
    %10 = arith.mulf %9, %8 : vector<8x48xf32>
    %11 = arith.addf %6, %10 : vector<8x48xf32>
    %cst_6 = arith.constant 0.797884583 : f32
    %12 = vector.broadcast %cst_6 : f32 to vector<8x48xf32>
    %13 = arith.mulf %12, %11 : vector<8x48xf32>
    %14 = math.tanh %13 : vector<8x48xf32>
    %cst_7 = arith.constant 1.000000e+00 : f32
    %15 = vector.broadcast %cst_7 : f32 to vector<8x48xf32>
    %16 = arith.addf %15, %14 : vector<8x48xf32>
    %cst_8 = arith.constant 5.000000e-01 : f32
    %17 = vector.broadcast %cst_8 : f32 to vector<8x48xf32>
    %18 = arith.mulf %17, %16 : vector<8x48xf32>
    %19 = arith.mulf %6, %18 : vector<8x48xf32>
    %20 = arith.truncf %19 : vector<8x48xf32> to vector<8x48xbf16>
    %c0_9 = arith.constant 0 : index
    %c0_10 = arith.constant 0 : index
    %21 = vector.load %arg4[%c0_9, %c0_10] : memref<8x48xbf16, #tpu.memory_space<vmem>>, vector<8x48xbf16>
    tpu.vector_store %arg4[%c0_9, %c0_10], %20 {strides = array<i32>} : memref<8x48xbf16, #tpu.memory_space<vmem>>, vector<8x48xbf16>,
    return
  }
  func.func @transform_0(%arg0: i32) -> (i32, i32) {
    %c0_i32 = arith.constant 0 : i32
    %c0_i32_0 = arith.constant 0 : i32
    return %arg0, %c0_i32 : i32, i32
  }
  func.func @transform_1(%arg0: i32) -> (i32, i32) {
    %c0_i32 = arith.constant 0 : i32
    %c0_i32_0 = arith.constant 0 : i32
    %c0_i32_1 = arith.constant 0 : i32
    return %c0_i32, %c0_i32_0 : i32, i32
  }
  func.func @transform_2(%arg0: i32) -> (i32, i32) {
    %c0_i32 = arith.constant 0 : i32
    %c0_i32_0 = arith.constant 0 : i32
    %c0_i32_1 = arith.constant 0 : i32
    return %c0_i32, %c0_i32_0 : i32, i32
  }
  func.func @transform_3(%arg0: i32) -> (i32, i32) {
    %c0_i32 = arith.constant 0 : i32
    %c0_i32_0 = arith.constant 0 : i32
    return %arg0, %c0_i32 : i32, i32
  }
}

module attributes {stable_mosaic.version = 11 : i64} {
  func.func @_cell_kernel(%arg0: i32, %arg1: memref<8x48xbf16, #tpu.memory_space<vmem>>, %arg2: memref<8x32xbf16, #tpu.memory_space<vmem>>, %arg3: memref<1x48xf32, #tpu.memory_space<vmem>>, %arg4: memref<1x48xf32, #tpu.memory_space<vmem>>, %arg5: memref<48x96xf32, #tpu.memory_space<vmem>>, %arg6: memref<1x96xf32, #tpu.memory_space<vmem>>, %arg7: memref<32x32xf32, #tpu.memory_space<vmem>>, %arg8: memref<1x32xf32, #tpu.memory_space<vmem>>, %arg9: memref<1x32xf32, #tpu.memory_space<vmem>>, %arg10: memref<1x32xf32, #tpu.memory_space<vmem>>, %arg11: memref<32x32xf32, #tpu.memory_space<vmem>>, %arg12: memref<1x32xf32, #tpu.memory_space<vmem>>, %arg13: memref<32x32xf32, #tpu.memory_space<vmem>>, %arg14: memref<1x32xf32, #tpu.memory_space<vmem>>, %arg15: memref<8x32xbf16, #tpu.memory_space<vmem>>) attributes {dimension_semantics = [#tpu.dimension_semantics<parallel>], iteration_bounds = array<i64: 2>, scalar_prefetch = 0 : i64, scratch_operands = 0 : i64, tpu.core_type = #tpu.core_type<tc>, window_params = [{transform_indices = @transform_0, window_bounds = array<i64: 8, 48>}, {transform_indices = @transform_1, window_bounds = array<i64: 8, 32>}, {pipeline_mode = #tpu.pipeline_mode<synchronous>, transform_indices = @transform_2, window_bounds = array<i64: 1, 48>}, {pipeline_mode = #tpu.pipeline_mode<synchronous>, transform_indices = @transform_3, window_bounds = array<i64: 1, 48>}, {pipeline_mode = #tpu.pipeline_mode<synchronous>, transform_indices = @transform_4, window_bounds = array<i64: 48, 96>}, {pipeline_mode = #tpu.pipeline_mode<synchronous>, transform_indices = @transform_5, window_bounds = array<i64: 1, 96>}, {pipeline_mode = #tpu.pipeline_mode<synchronous>, transform_indices = @transform_6, window_bounds = array<i64: 32, 32>}, {pipeline_mode = #tpu.pipeline_mode<synchronous>, transform_indices = @transform_7, window_bounds = array<i64: 1, 32>}, {pipeline_mode = #tpu.pipeline_mode<synchronous>, transform_indices = @transform_8, window_bounds = array<i64: 1, 32>}, {pipeline_mode = #tpu.pipeline_mode<synchronous>, transform_indices = @transform_9, window_bounds = array<i64: 1, 32>}, {pipeline_mode = #tpu.pipeline_mode<synchronous>, transform_indices = @transform_10, window_bounds = array<i64: 32, 32>}, {pipeline_mode = #tpu.pipeline_mode<synchronous>, transform_indices = @transform_11, window_bounds = array<i64: 1, 32>}, {pipeline_mode = #tpu.pipeline_mode<synchronous>, transform_indices = @transform_12, window_bounds = array<i64: 32, 32>}, {pipeline_mode = #tpu.pipeline_mode<synchronous>, transform_indices = @transform_13, window_bounds = array<i64: 1, 32>}, {transform_indices = @transform_14, window_bounds = array<i64: 8, 32>}]} {
    %c0 = arith.constant 0 : index
    %c0_0 = arith.constant 0 : index
    %0 = vector.load %arg1[%c0, %c0_0] : memref<8x48xbf16, #tpu.memory_space<vmem>>, vector<8x48xbf16>
    %1 = arith.extf %0 : vector<8x48xbf16> to vector<8x48xf32>
    %cst = arith.constant dense<0.000000e+00> : vector<8xf32>
    %2 = vector.multi_reduction <add>, %1, %cst [1] : vector<8x48xf32> to vector<8xf32>
    %3 = vector.shape_cast %2 : vector<8xf32> to vector<8x1xf32>
    %cst_1 = arith.constant 4.800000e+01 : f32
    %4 = vector.broadcast %cst_1 : f32 to vector<8x1xf32>
    %5 = arith.divf %3, %4 : vector<8x1xf32>
    %6 = vector.broadcast %5 : vector<8x1xf32> to vector<8x48xf32>
    %7 = arith.subf %1, %6 : vector<8x48xf32>
    %8 = arith.mulf %7, %7 : vector<8x48xf32>
    %cst_2 = arith.constant dense<0.000000e+00> : vector<8xf32>
    %9 = vector.multi_reduction <add>, %8, %cst_2 [1] : vector<8x48xf32> to vector<8xf32>
    %10 = vector.shape_cast %9 : vector<8xf32> to vector<8x1xf32>
    %cst_3 = arith.constant 4.800000e+01 : f32
    %11 = vector.broadcast %cst_3 : f32 to vector<8x1xf32>
    %12 = arith.divf %10, %11 : vector<8x1xf32>
    %cst_4 = arith.constant 9.99999997E-7 : f32
    %13 = vector.broadcast %cst_4 : f32 to vector<8x1xf32>
    %14 = arith.addf %12, %13 : vector<8x1xf32>
    %15 = math.rsqrt %14 : vector<8x1xf32>
    %16 = vector.broadcast %15 : vector<8x1xf32> to vector<8x48xf32>
    %17 = arith.mulf %7, %16 : vector<8x48xf32>
    %c0_5 = arith.constant 0 : index
    %c0_6 = arith.constant 0 : index
    %18 = vector.load %arg3[%c0_5, %c0_6] : memref<1x48xf32, #tpu.memory_space<vmem>>, vector<1x48xf32>
    %19 = vector.broadcast %18 : vector<1x48xf32> to vector<8x48xf32>
    %20 = arith.mulf %17, %19 : vector<8x48xf32>
    %c0_7 = arith.constant 0 : index
    %c0_8 = arith.constant 0 : index
    %21 = vector.load %arg4[%c0_7, %c0_8] : memref<1x48xf32, #tpu.memory_space<vmem>>, vector<1x48xf32>
    %22 = vector.broadcast %21 : vector<1x48xf32> to vector<8x48xf32>
    %23 = arith.addf %20, %22 : vector<8x48xf32>
    %24 = arith.truncf %23 : vector<8x48xf32> to vector<8x48xbf16>
    %c0_9 = arith.constant 0 : index
    %c0_10 = arith.constant 0 : index
    %25 = vector.load %arg5[%c0_9, %c0_10] : memref<48x96xf32, #tpu.memory_space<vmem>>, vector<48x96xf32>
    %26 = arith.truncf %25 : vector<48x96xf32> to vector<48x96xbf16>
    %cst_11 = arith.constant dense<0.000000e+00> : vector<8x96xf32>
    %27 = tpu.matmul %24, %26, %cst_11 {dimension_numbers = #tpu.dot_dimension_numbers<[1], [0], [0], [1], [0, 0, 1, 1], [], []>} : vector<8x48xbf16>, vector<48x96xbf16>, vector<8x96xf32> -> vector<8x96xf32>
    %c0_12 = arith.constant 0 : index
    %c0_13 = arith.constant 0 : index
    %28 = vector.load %arg6[%c0_12, %c0_13] : memref<1x96xf32, #tpu.memory_space<vmem>>, vector<1x96xf32>
    %29 = vector.broadcast %28 : vector<1x96xf32> to vector<8x96xf32>
    %30 = arith.addf %27, %29 : vector<8x96xf32>
    %31 = tpu.iota {dimensions = array<i32: 2>} : vector<1x1x8xi32>
    %c4_i32 = arith.constant 4 : i32
    %32 = vector.broadcast %c4_i32 : i32 to vector<1x1x8xi32>
    %33 = arith.cmpi slt, %31, %32 : vector<1x1x8xi32>
    %34 = vector.extract_strided_slice %30 {offsets = [0, 0], sizes = [8, 32], strides = [1, 1]} : vector<8x96xf32> to vector<8x32xf32>
    %35 = vector.shape_cast %34 : vector<8x32xf32> to vector<1x8x32xf32>
    %36 = vector.extract_strided_slice %30 {offsets = [0, 32], sizes = [8, 32], strides = [1, 1]} : vector<8x96xf32> to vector<8x32xf32>
    %37 = vector.shape_cast %36 : vector<8x32xf32> to vector<1x8x32xf32>
    %38 = vector.extract_strided_slice %30 {offsets = [0, 64], sizes = [8, 32], strides = [1, 1]} : vector<8x96xf32> to vector<8x32xf32>
    %39 = vector.shape_cast %38 : vector<8x32xf32> to vector<1x8x32xf32>
    %40 = arith.truncf %35 : vector<1x8x32xf32> to vector<1x8x32xbf16>
    %41 = arith.truncf %37 : vector<1x8x32xf32> to vector<1x8x32xbf16>
    "tpu.trace_start"() <{level = 10 : i32, message = "wqd,wkd->wqk"}> : () -> ()
    %cst_14 = arith.constant dense<0.000000e+00> : vector<1x8x8xf32>
    %42 = tpu.matmul %40, %41, %cst_14 {dimension_numbers = #tpu.dot_dimension_numbers<[2], [2], [1], [1], [0, 0, 0, 1, 1, 1], [0], [0]>} : vector<1x8x32xbf16>, vector<1x8x32xbf16>, vector<1x8x8xf32> -> vector<1x8x8xf32>
    "tpu.trace_stop"() : () -> ()
    %cst_15 = arith.constant 0.176776692 : f32
    %43 = vector.broadcast %cst_15 : f32 to vector<1x8x8xf32>
    %44 = arith.mulf %42, %43 : vector<1x8x8xf32>
    %cst_16 = arith.constant -1.000000e+09 : f32
    %45 = vector.shape_cast %33 : vector<1x1x8xi1> to vector<1x1x8xi1>
    %46 = vector.broadcast %45 : vector<1x1x8xi1> to vector<1x8x8xi1>
    %47 = vector.broadcast %cst_16 : f32 to vector<1x8x8xf32>
    %48 = arith.select %46, %44, %47 : vector<1x8x8xi1>, vector<1x8x8xf32>
    %cst_17 = arith.constant dense<0xFF800000> : vector<1x8xf32>
    %49 = vector.multi_reduction <maximumf>, %48, %cst_17 [2] : vector<1x8x8xf32> to vector<1x8xf32>
    %50 = vector.shape_cast %49 : vector<1x8xf32> to vector<1x8x1xf32>
    %51 = vector.broadcast %50 : vector<1x8x1xf32> to vector<1x8x8xf32>
    %52 = arith.subf %48, %51 : vector<1x8x8xf32>
    %53 = math.exp %52 : vector<1x8x8xf32>
    %cst_18 = arith.constant dense<0.000000e+00> : vector<1x8xf32>
    %54 = vector.multi_reduction <add>, %53, %cst_18 [2] : vector<1x8x8xf32> to vector<1x8xf32>
    %55 = vector.shape_cast %54 : vector<1x8xf32> to vector<1x8x1xf32>
    %56 = tpu.reciprocal %55 {approx = true} : vector<1x8x1xf32> -> vector<1x8x1xf32>
    %57 = vector.broadcast %56 : vector<1x8x1xf32> to vector<1x8x8xf32>
    %58 = arith.mulf %53, %57 : vector<1x8x8xf32>
    %59 = arith.truncf %58 : vector<1x8x8xf32> to vector<1x8x8xbf16>
    %60 = arith.truncf %39 : vector<1x8x32xf32> to vector<1x8x32xbf16>
    "tpu.trace_start"() <{level = 10 : i32, message = "wqk,wkd->wqd"}> : () -> ()
    %cst_19 = arith.constant dense<0.000000e+00> : vector<1x8x32xf32>
    %61 = tpu.matmul %59, %60, %cst_19 {dimension_numbers = #tpu.dot_dimension_numbers<[2], [1], [1], [2], [0, 0, 0, 1, 1, 2], [0], [0]>} : vector<1x8x8xbf16>, vector<1x8x32xbf16>, vector<1x8x32xf32> -> vector<1x8x32xf32>
    "tpu.trace_stop"() : () -> ()
    %62 = vector.shape_cast %61 : vector<1x8x32xf32> to vector<8x32xf32>
    %63 = arith.truncf %62 : vector<8x32xf32> to vector<8x32xbf16>
    %c0_20 = arith.constant 0 : index
    %c0_21 = arith.constant 0 : index
    %64 = vector.load %arg7[%c0_20, %c0_21] : memref<32x32xf32, #tpu.memory_space<vmem>>, vector<32x32xf32>
    %65 = arith.truncf %64 : vector<32x32xf32> to vector<32x32xbf16>
    %cst_22 = arith.constant dense<0.000000e+00> : vector<8x32xf32>
    %66 = tpu.matmul %63, %65, %cst_22 {dimension_numbers = #tpu.dot_dimension_numbers<[1], [0], [0], [1], [0, 0, 1, 1], [], []>} : vector<8x32xbf16>, vector<32x32xbf16>, vector<8x32xf32> -> vector<8x32xf32>
    %c0_23 = arith.constant 0 : index
    %c0_24 = arith.constant 0 : index
    %67 = vector.load %arg8[%c0_23, %c0_24] : memref<1x32xf32, #tpu.memory_space<vmem>>, vector<1x32xf32>
    %68 = vector.broadcast %67 : vector<1x32xf32> to vector<8x32xf32>
    %69 = arith.addf %66, %68 : vector<8x32xf32>
    %c0_25 = arith.constant 0 : index
    %c0_26 = arith.constant 0 : index
    %70 = vector.load %arg2[%c0_25, %c0_26] : memref<8x32xbf16, #tpu.memory_space<vmem>>, vector<8x32xbf16>
    %71 = arith.extf %70 : vector<8x32xbf16> to vector<8x32xf32>
    %72 = arith.addf %69, %71 : vector<8x32xf32>
    %cst_27 = arith.constant dense<0.000000e+00> : vector<8xf32>
    %73 = vector.multi_reduction <add>, %72, %cst_27 [1] : vector<8x32xf32> to vector<8xf32>
    %74 = vector.shape_cast %73 : vector<8xf32> to vector<8x1xf32>
    %cst_28 = arith.constant 3.200000e+01 : f32
    %75 = vector.broadcast %cst_28 : f32 to vector<8x1xf32>
    %76 = arith.divf %74, %75 : vector<8x1xf32>
    %77 = vector.broadcast %76 : vector<8x1xf32> to vector<8x32xf32>
    %78 = arith.subf %72, %77 : vector<8x32xf32>
    %79 = arith.mulf %78, %78 : vector<8x32xf32>
    %cst_29 = arith.constant dense<0.000000e+00> : vector<8xf32>
    %80 = vector.multi_reduction <add>, %79, %cst_29 [1] : vector<8x32xf32> to vector<8xf32>
    %81 = vector.shape_cast %80 : vector<8xf32> to vector<8x1xf32>
    %cst_30 = arith.constant 3.200000e+01 : f32
    %82 = vector.broadcast %cst_30 : f32 to vector<8x1xf32>
    %83 = arith.divf %81, %82 : vector<8x1xf32>
    %cst_31 = arith.constant 9.99999997E-7 : f32
    %84 = vector.broadcast %cst_31 : f32 to vector<8x1xf32>
    %85 = arith.addf %83, %84 : vector<8x1xf32>
    %86 = math.rsqrt %85 : vector<8x1xf32>
    %87 = vector.broadcast %86 : vector<8x1xf32> to vector<8x32xf32>
    %88 = arith.mulf %78, %87 : vector<8x32xf32>
    %c0_32 = arith.constant 0 : index
    %c0_33 = arith.constant 0 : index
    %89 = vector.load %arg9[%c0_32, %c0_33] : memref<1x32xf32, #tpu.memory_space<vmem>>, vector<1x32xf32>
    %90 = vector.broadcast %89 : vector<1x32xf32> to vector<8x32xf32>
    %91 = arith.mulf %88, %90 : vector<8x32xf32>
    %c0_34 = arith.constant 0 : index
    %c0_35 = arith.constant 0 : index
    %92 = vector.load %arg10[%c0_34, %c0_35] : memref<1x32xf32, #tpu.memory_space<vmem>>, vector<1x32xf32>
    %93 = vector.broadcast %92 : vector<1x32xf32> to vector<8x32xf32>
    %94 = arith.addf %91, %93 : vector<8x32xf32>
    %95 = arith.truncf %94 : vector<8x32xf32> to vector<8x32xbf16>
    %c0_36 = arith.constant 0 : index
    %c0_37 = arith.constant 0 : index
    %96 = vector.load %arg11[%c0_36, %c0_37] : memref<32x32xf32, #tpu.memory_space<vmem>>, vector<32x32xf32>
    %97 = arith.truncf %96 : vector<32x32xf32> to vector<32x32xbf16>
    %cst_38 = arith.constant dense<0.000000e+00> : vector<8x32xf32>
    %98 = tpu.matmul %95, %97, %cst_38 {dimension_numbers = #tpu.dot_dimension_numbers<[1], [0], [0], [1], [0, 0, 1, 1], [], []>} : vector<8x32xbf16>, vector<32x32xbf16>, vector<8x32xf32> -> vector<8x32xf32>
    %c0_39 = arith.constant 0 : index
    %c0_40 = arith.constant 0 : index
    %99 = vector.load %arg12[%c0_39, %c0_40] : memref<1x32xf32, #tpu.memory_space<vmem>>, vector<1x32xf32>
    %100 = vector.broadcast %99 : vector<1x32xf32> to vector<8x32xf32>
    %101 = arith.addf %98, %100 : vector<8x32xf32>
    %102 = arith.mulf %101, %101 : vector<8x32xf32>
    %103 = arith.mulf %101, %102 : vector<8x32xf32>
    %cst_41 = arith.constant 4.471500e-02 : f32
    %104 = vector.broadcast %cst_41 : f32 to vector<8x32xf32>
    %105 = arith.mulf %104, %103 : vector<8x32xf32>
    %106 = arith.addf %101, %105 : vector<8x32xf32>
    %cst_42 = arith.constant 0.797884583 : f32
    %107 = vector.broadcast %cst_42 : f32 to vector<8x32xf32>
    %108 = arith.mulf %107, %106 : vector<8x32xf32>
    %109 = math.tanh %108 : vector<8x32xf32>
    %cst_43 = arith.constant 1.000000e+00 : f32
    %110 = vector.broadcast %cst_43 : f32 to vector<8x32xf32>
    %111 = arith.addf %110, %109 : vector<8x32xf32>
    %cst_44 = arith.constant 5.000000e-01 : f32
    %112 = vector.broadcast %cst_44 : f32 to vector<8x32xf32>
    %113 = arith.mulf %112, %111 : vector<8x32xf32>
    %114 = arith.mulf %101, %113 : vector<8x32xf32>
    %115 = arith.truncf %114 : vector<8x32xf32> to vector<8x32xbf16>
    %c0_45 = arith.constant 0 : index
    %c0_46 = arith.constant 0 : index
    %116 = vector.load %arg13[%c0_45, %c0_46] : memref<32x32xf32, #tpu.memory_space<vmem>>, vector<32x32xf32>
    %117 = arith.truncf %116 : vector<32x32xf32> to vector<32x32xbf16>
    %cst_47 = arith.constant dense<0.000000e+00> : vector<8x32xf32>
    %118 = tpu.matmul %115, %117, %cst_47 {dimension_numbers = #tpu.dot_dimension_numbers<[1], [0], [0], [1], [0, 0, 1, 1], [], []>} : vector<8x32xbf16>, vector<32x32xbf16>, vector<8x32xf32> -> vector<8x32xf32>
    %c0_48 = arith.constant 0 : index
    %c0_49 = arith.constant 0 : index
    %119 = vector.load %arg14[%c0_48, %c0_49] : memref<1x32xf32, #tpu.memory_space<vmem>>, vector<1x32xf32>
    %120 = vector.broadcast %119 : vector<1x32xf32> to vector<8x32xf32>
    %121 = arith.addf %118, %120 : vector<8x32xf32>
    %122 = arith.addf %72, %121 : vector<8x32xf32>
    %123 = arith.truncf %122 : vector<8x32xf32> to vector<8x32xbf16>
    %c0_50 = arith.constant 0 : index
    %c0_51 = arith.constant 0 : index
    %124 = vector.load %arg15[%c0_50, %c0_51] : memref<8x32xbf16, #tpu.memory_space<vmem>>, vector<8x32xbf16>
    tpu.vector_store %arg15[%c0_50, %c0_51], %123 {strides = array<i32>} : memref<8x32xbf16, #tpu.memory_space<vmem>>, vector<8x32xbf16>,
    return
  }
  func.func @transform_0(%arg0: i32) -> (i32, i32) {
    %c0_i32 = arith.constant 0 : i32
    %c0_i32_0 = arith.constant 0 : i32
    return %arg0, %c0_i32 : i32, i32
  }
  func.func @transform_1(%arg0: i32) -> (i32, i32) {
    %c0_i32 = arith.constant 0 : i32
    %c0_i32_0 = arith.constant 0 : i32
    return %arg0, %c0_i32 : i32, i32
  }
  func.func @transform_2(%arg0: i32) -> (i32, i32) {
    %c0_i32 = arith.constant 0 : i32
    %c0_i32_0 = arith.constant 0 : i32
    %c0_i32_1 = arith.constant 0 : i32
    return %c0_i32, %c0_i32_0 : i32, i32
  }
  func.func @transform_3(%arg0: i32) -> (i32, i32) {
    %c0_i32 = arith.constant 0 : i32
    %c0_i32_0 = arith.constant 0 : i32
    %c0_i32_1 = arith.constant 0 : i32
    return %c0_i32, %c0_i32_0 : i32, i32
  }
  func.func @transform_4(%arg0: i32) -> (i32, i32) {
    %c0_i32 = arith.constant 0 : i32
    %c0_i32_0 = arith.constant 0 : i32
    %c0_i32_1 = arith.constant 0 : i32
    return %c0_i32, %c0_i32_0 : i32, i32
  }
  func.func @transform_5(%arg0: i32) -> (i32, i32) {
    %c0_i32 = arith.constant 0 : i32
    %c0_i32_0 = arith.constant 0 : i32
    %c0_i32_1 = arith.constant 0 : i32
    return %c0_i32, %c0_i32_0 : i32, i32
  }
  func.func @transform_6(%arg0: i32) -> (i32, i32) {
    %c0_i32 = arith.constant 0 : i32
    %c0_i32_0 = arith.constant 0 : i32
    %c0_i32_1 = arith.constant 0 : i32
    return %c0_i32, %c0_i32_0 : i32, i32
  }
  func.func @transform_7(%arg0: i32) -> (i32, i32) {
    %c0_i32 = arith.constant 0 : i32
    %c0_i32_0 = arith.constant 0 : i32
    %c0_i32_1 = arith.constant 0 : i32
    return %c0_i32, %c0_i32_0 : i32, i32
  }
  func.func @transform_8(%arg0: i32) -> (i32, i32) {
    %c0_i32 = arith.constant 0 : i32
    %c0_i32_0 = arith.constant 0 : i32
    %c0_i32_1 = arith.constant 0 : i32
    return %c0_i32, %c0_i32_0 : i32, i32
  }
  func.func @transform_9(%arg0: i32) -> (i32, i32) {
    %c0_i32 = arith.constant 0 : i32
    %c0_i32_0 = arith.constant 0 : i32
    %c0_i32_1 = arith.constant 0 : i32
    return %c0_i32, %c0_i32_0 : i32, i32
  }
  func.func @transform_10(%arg0: i32) -> (i32, i32) {
    %c0_i32 = arith.constant 0 : i32
    %c0_i32_0 = arith.constant 0 : i32
    %c0_i32_1 = arith.constant 0 : i32
    return %c0_i32, %c0_i32_0 : i32, i32
  }
  func.func @transform_11(%arg0: i32) -> (i32, i32) {
    %c0_i32 = arith.constant 0 : i32
    %c0_i32_0 = arith.constant 0 : i32
    %c0_i32_1 = arith.constant 0 : i32
    return %c0_i32, %c0_i32_0 : i32, i32
  }
  func.func @transform_12(%arg0: i32) -> (i32, i32) {
    %c0_i32 = arith.constant 0 : i32
    %c0_i32_0 = arith.constant 0 : i32
    %c0_i32_1 = arith.constant 0 : i32
    return %c0_i32, %c0_i32_0 : i32, i32
  }
  func.func @transform_13(%arg0: i32) -> (i32, i32) {
    %c0_i32 = arith.constant 0 : i32
    %c0_i32_0 = arith.constant 0 : i32
    %c0_i32_1 = arith.constant 0 : i32
    return %c0_i32, %c0_i32_0 : i32, i32
  }
  func.func @transform_14(%arg0: i32) -> (i32, i32) {
    %c0_i32 = arith.constant 0 : i32
    %c0_i32_0 = arith.constant 0 : i32
    return %arg0, %c0_i32 : i32, i32
  }
}

module attributes {stable_mosaic.version = 11 : i64} {
  func.func @_mm_kernel(%arg0: i32, %arg1: memref<8x288xbf16, #tpu.memory_space<vmem>>, %arg2: memref<288x128xf32, #tpu.memory_space<vmem>>, %arg3: memref<1x128xf32, #tpu.memory_space<vmem>>, %arg4: memref<8x128xbf16, #tpu.memory_space<vmem>>) attributes {dimension_semantics = [#tpu.dimension_semantics<parallel>], iteration_bounds = array<i64: 1>, scalar_prefetch = 0 : i64, scratch_operands = 0 : i64, tpu.core_type = #tpu.core_type<tc>, window_params = [{transform_indices = @transform_0, window_bounds = array<i64: 8, 288>}, {pipeline_mode = #tpu.pipeline_mode<synchronous>, transform_indices = @transform_1, window_bounds = array<i64: 288, 128>}, {pipeline_mode = #tpu.pipeline_mode<synchronous>, transform_indices = @transform_2, window_bounds = array<i64: 1, 128>}, {transform_indices = @transform_3, window_bounds = array<i64: 8, 128>}]} {
    %c0 = arith.constant 0 : index
    %c0_0 = arith.constant 0 : index
    %0 = vector.load %arg1[%c0, %c0_0] : memref<8x288xbf16, #tpu.memory_space<vmem>>, vector<8x288xbf16>
    %c0_1 = arith.constant 0 : index
    %c0_2 = arith.constant 0 : index
    %1 = vector.load %arg2[%c0_1, %c0_2] : memref<288x128xf32, #tpu.memory_space<vmem>>, vector<288x128xf32>
    %2 = arith.truncf %1 : vector<288x128xf32> to vector<288x128xbf16>
    %cst = arith.constant dense<0.000000e+00> : vector<8x128xf32>
    %3 = tpu.matmul %0, %2, %cst {dimension_numbers = #tpu.dot_dimension_numbers<[1], [0], [0], [1], [0, 0, 1, 1], [], []>} : vector<8x288xbf16>, vector<288x128xbf16>, vector<8x128xf32> -> vector<8x128xf32>
    %c0_3 = arith.constant 0 : index
    %c0_4 = arith.constant 0 : index
    %4 = vector.load %arg3[%c0_3, %c0_4] : memref<1x128xf32, #tpu.memory_space<vmem>>, vector<1x128xf32>
    %5 = vector.broadcast %4 : vector<1x128xf32> to vector<8x128xf32>
    %6 = arith.addf %3, %5 : vector<8x128xf32>
    %7 = arith.negf %6 : vector<8x128xf32>
    %8 = math.exp %7 : vector<8x128xf32>
    %cst_5 = arith.constant 1.000000e+00 : f32
    %9 = vector.broadcast %cst_5 : f32 to vector<8x128xf32>
    %10 = arith.addf %9, %8 : vector<8x128xf32>
    %11 = arith.divf %9, %10 : vector<8x128xf32>
    %12 = arith.mulf %6, %11 : vector<8x128xf32>
    %13 = arith.truncf %12 : vector<8x128xf32> to vector<8x128xbf16>
    %c0_6 = arith.constant 0 : index
    %c0_7 = arith.constant 0 : index
    %14 = vector.load %arg4[%c0_6, %c0_7] : memref<8x128xbf16, #tpu.memory_space<vmem>>, vector<8x128xbf16>
    tpu.vector_store %arg4[%c0_6, %c0_7], %13 {strides = array<i32>} : memref<8x128xbf16, #tpu.memory_space<vmem>>, vector<8x128xbf16>,
    return
  }
  func.func @transform_0(%arg0: i32) -> (i32, i32) {
    %c0_i32 = arith.constant 0 : i32
    %c0_i32_0 = arith.constant 0 : i32
    return %arg0, %c0_i32 : i32, i32
  }
  func.func @transform_1(%arg0: i32) -> (i32, i32) {
    %c0_i32 = arith.constant 0 : i32
    %c0_i32_0 = arith.constant 0 : i32
    %c0_i32_1 = arith.constant 0 : i32
    return %c0_i32, %c0_i32_0 : i32, i32
  }
  func.func @transform_2(%arg0: i32) -> (i32, i32) {
    %c0_i32 = arith.constant 0 : i32
    %c0_i32_0 = arith.constant 0 : i32
    %c0_i32_1 = arith.constant 0 : i32
    return %c0_i32, %c0_i32_0 : i32, i32
  }
  func.func @transform_3(%arg0: i32) -> (i32, i32) {
    %c0_i32 = arith.constant 0 : i32
    %c0_i32_0 = arith.constant 0 : i32
    return %arg0, %c0_i32 : i32, i32
  }
}

module attributes {stable_mosaic.version = 11 : i64} {
  func.func @_mm_kernel(%arg0: i32, %arg1: memref<8x1152xbf16, #tpu.memory_space<vmem>>, %arg2: memref<1152x32xf32, #tpu.memory_space<vmem>>, %arg3: memref<1x32xf32, #tpu.memory_space<vmem>>, %arg4: memref<8x32xbf16, #tpu.memory_space<vmem>>) attributes {dimension_semantics = [#tpu.dimension_semantics<parallel>], iteration_bounds = array<i64: 1>, scalar_prefetch = 0 : i64, scratch_operands = 0 : i64, tpu.core_type = #tpu.core_type<tc>, window_params = [{transform_indices = @transform_0, window_bounds = array<i64: 8, 1152>}, {pipeline_mode = #tpu.pipeline_mode<synchronous>, transform_indices = @transform_1, window_bounds = array<i64: 1152, 32>}, {pipeline_mode = #tpu.pipeline_mode<synchronous>, transform_indices = @transform_2, window_bounds = array<i64: 1, 32>}, {transform_indices = @transform_3, window_bounds = array<i64: 8, 32>}]} {
    %c0 = arith.constant 0 : index
    %c0_0 = arith.constant 0 : index
    %0 = vector.load %arg1[%c0, %c0_0] : memref<8x1152xbf16, #tpu.memory_space<vmem>>, vector<8x1152xbf16>
    %c0_1 = arith.constant 0 : index
    %c0_2 = arith.constant 0 : index
    %1 = vector.load %arg2[%c0_1, %c0_2] : memref<1152x32xf32, #tpu.memory_space<vmem>>, vector<1152x32xf32>
    %2 = arith.truncf %1 : vector<1152x32xf32> to vector<1152x32xbf16>
    %cst = arith.constant dense<0.000000e+00> : vector<8x32xf32>
    %3 = tpu.matmul %0, %2, %cst {dimension_numbers = #tpu.dot_dimension_numbers<[1], [0], [0], [1], [0, 0, 1, 1], [], []>} : vector<8x1152xbf16>, vector<1152x32xbf16>, vector<8x32xf32> -> vector<8x32xf32>
    %c0_3 = arith.constant 0 : index
    %c0_4 = arith.constant 0 : index
    %4 = vector.load %arg3[%c0_3, %c0_4] : memref<1x32xf32, #tpu.memory_space<vmem>>, vector<1x32xf32>
    %5 = vector.broadcast %4 : vector<1x32xf32> to vector<8x32xf32>
    %6 = arith.addf %3, %5 : vector<8x32xf32>
    %7 = arith.negf %6 : vector<8x32xf32>
    %8 = math.exp %7 : vector<8x32xf32>
    %cst_5 = arith.constant 1.000000e+00 : f32
    %9 = vector.broadcast %cst_5 : f32 to vector<8x32xf32>
    %10 = arith.addf %9, %8 : vector<8x32xf32>
    %11 = arith.divf %9, %10 : vector<8x32xf32>
    %12 = arith.mulf %6, %11 : vector<8x32xf32>
    %13 = arith.truncf %12 : vector<8x32xf32> to vector<8x32xbf16>
    %c0_6 = arith.constant 0 : index
    %c0_7 = arith.constant 0 : index
    %14 = vector.load %arg4[%c0_6, %c0_7] : memref<8x32xbf16, #tpu.memory_space<vmem>>, vector<8x32xbf16>
    tpu.vector_store %arg4[%c0_6, %c0_7], %13 {strides = array<i32>} : memref<8x32xbf16, #tpu.memory_space<vmem>>, vector<8x32xbf16>,
    return
  }
  func.func @transform_0(%arg0: i32) -> (i32, i32) {
    %c0_i32 = arith.constant 0 : i32
    %c0_i32_0 = arith.constant 0 : i32
    return %arg0, %c0_i32 : i32, i32
  }
  func.func @transform_1(%arg0: i32) -> (i32, i32) {
    %c0_i32 = arith.constant 0 : i32
    %c0_i32_0 = arith.constant 0 : i32
    %c0_i32_1 = arith.constant 0 : i32
    return %c0_i32, %c0_i32_0 : i32, i32
  }
  func.func @transform_2(%arg0: i32) -> (i32, i32) {
    %c0_i32 = arith.constant 0 : i32
    %c0_i32_0 = arith.constant 0 : i32
    %c0_i32_1 = arith.constant 0 : i32
    return %c0_i32, %c0_i32_0 : i32, i32
  }
  func.func @transform_3(%arg0: i32) -> (i32, i32) {
    %c0_i32 = arith.constant 0 : i32
    %c0_i32_0 = arith.constant 0 : i32
    return %arg0, %c0_i32 : i32, i32
  }
}

module attributes {stable_mosaic.version = 11 : i64} {
  func.func @_mm_kernel(%arg0: i32, %arg1: memref<8x288xbf16, #tpu.memory_space<vmem>>, %arg2: memref<288x32xf32, #tpu.memory_space<vmem>>, %arg3: memref<1x32xf32, #tpu.memory_space<vmem>>, %arg4: memref<8x32xbf16, #tpu.memory_space<vmem>>) attributes {dimension_semantics = [#tpu.dimension_semantics<parallel>], iteration_bounds = array<i64: 1>, scalar_prefetch = 0 : i64, scratch_operands = 0 : i64, tpu.core_type = #tpu.core_type<tc>, window_params = [{transform_indices = @transform_0, window_bounds = array<i64: 8, 288>}, {pipeline_mode = #tpu.pipeline_mode<synchronous>, transform_indices = @transform_1, window_bounds = array<i64: 288, 32>}, {pipeline_mode = #tpu.pipeline_mode<synchronous>, transform_indices = @transform_2, window_bounds = array<i64: 1, 32>}, {transform_indices = @transform_3, window_bounds = array<i64: 8, 32>}]} {
    %c0 = arith.constant 0 : index
    %c0_0 = arith.constant 0 : index
    %0 = vector.load %arg1[%c0, %c0_0] : memref<8x288xbf16, #tpu.memory_space<vmem>>, vector<8x288xbf16>
    %c0_1 = arith.constant 0 : index
    %c0_2 = arith.constant 0 : index
    %1 = vector.load %arg2[%c0_1, %c0_2] : memref<288x32xf32, #tpu.memory_space<vmem>>, vector<288x32xf32>
    %2 = arith.truncf %1 : vector<288x32xf32> to vector<288x32xbf16>
    %cst = arith.constant dense<0.000000e+00> : vector<8x32xf32>
    %3 = tpu.matmul %0, %2, %cst {dimension_numbers = #tpu.dot_dimension_numbers<[1], [0], [0], [1], [0, 0, 1, 1], [], []>} : vector<8x288xbf16>, vector<288x32xbf16>, vector<8x32xf32> -> vector<8x32xf32>
    %c0_3 = arith.constant 0 : index
    %c0_4 = arith.constant 0 : index
    %4 = vector.load %arg3[%c0_3, %c0_4] : memref<1x32xf32, #tpu.memory_space<vmem>>, vector<1x32xf32>
    %5 = vector.broadcast %4 : vector<1x32xf32> to vector<8x32xf32>
    %6 = arith.addf %3, %5 : vector<8x32xf32>
    %7 = arith.negf %6 : vector<8x32xf32>
    %8 = math.exp %7 : vector<8x32xf32>
    %cst_5 = arith.constant 1.000000e+00 : f32
    %9 = vector.broadcast %cst_5 : f32 to vector<8x32xf32>
    %10 = arith.addf %9, %8 : vector<8x32xf32>
    %11 = arith.divf %9, %10 : vector<8x32xf32>
    %12 = arith.mulf %6, %11 : vector<8x32xf32>
    %13 = arith.truncf %12 : vector<8x32xf32> to vector<8x32xbf16>
    %c0_6 = arith.constant 0 : index
    %c0_7 = arith.constant 0 : index
    %14 = vector.load %arg4[%c0_6, %c0_7] : memref<8x32xbf16, #tpu.memory_space<vmem>>, vector<8x32xbf16>
    tpu.vector_store %arg4[%c0_6, %c0_7], %13 {strides = array<i32>} : memref<8x32xbf16, #tpu.memory_space<vmem>>, vector<8x32xbf16>,
    return
  }
  func.func @transform_0(%arg0: i32) -> (i32, i32) {
    %c0_i32 = arith.constant 0 : i32
    %c0_i32_0 = arith.constant 0 : i32
    return %arg0, %c0_i32 : i32, i32
  }
  func.func @transform_1(%arg0: i32) -> (i32, i32) {
    %c0_i32 = arith.constant 0 : i32
    %c0_i32_0 = arith.constant 0 : i32
    %c0_i32_1 = arith.constant 0 : i32
    return %c0_i32, %c0_i32_0 : i32, i32
  }
  func.func @transform_2(%arg0: i32) -> (i32, i32) {
    %c0_i32 = arith.constant 0 : i32
    %c0_i32_0 = arith.constant 0 : i32
    %c0_i32_1 = arith.constant 0 : i32
    return %c0_i32, %c0_i32_0 : i32, i32
  }
  func.func @transform_3(%arg0: i32) -> (i32, i32) {
    %c0_i32 = arith.constant 0 : i32
    %c0_i32_0 = arith.constant 0 : i32
    return %arg0, %c0_i32 : i32, i32
  }
}

module attributes {stable_mosaic.version = 11 : i64} {
  func.func @_cell_kernel(%arg0: i32, %arg1: memref<8x32xbf16, #tpu.memory_space<vmem>>, %arg2: memref<8x32xbf16, #tpu.memory_space<vmem>>, %arg3: memref<1x32xf32, #tpu.memory_space<vmem>>, %arg4: memref<1x32xf32, #tpu.memory_space<vmem>>, %arg5: memref<32x96xf32, #tpu.memory_space<vmem>>, %arg6: memref<1x96xf32, #tpu.memory_space<vmem>>, %arg7: memref<32x32xf32, #tpu.memory_space<vmem>>, %arg8: memref<1x32xf32, #tpu.memory_space<vmem>>, %arg9: memref<1x32xf32, #tpu.memory_space<vmem>>, %arg10: memref<1x32xf32, #tpu.memory_space<vmem>>, %arg11: memref<32x128xf32, #tpu.memory_space<vmem>>, %arg12: memref<1x128xf32, #tpu.memory_space<vmem>>, %arg13: memref<128x32xf32, #tpu.memory_space<vmem>>, %arg14: memref<1x32xf32, #tpu.memory_space<vmem>>, %arg15: memref<8x32xbf16, #tpu.memory_space<vmem>>) attributes {dimension_semantics = [#tpu.dimension_semantics<parallel>], iteration_bounds = array<i64: 2>, scalar_prefetch = 0 : i64, scratch_operands = 0 : i64, tpu.core_type = #tpu.core_type<tc>, window_params = [{transform_indices = @transform_0, window_bounds = array<i64: 8, 32>}, {transform_indices = @transform_1, window_bounds = array<i64: 8, 32>}, {pipeline_mode = #tpu.pipeline_mode<synchronous>, transform_indices = @transform_2, window_bounds = array<i64: 1, 32>}, {pipeline_mode = #tpu.pipeline_mode<synchronous>, transform_indices = @transform_3, window_bounds = array<i64: 1, 32>}, {pipeline_mode = #tpu.pipeline_mode<synchronous>, transform_indices = @transform_4, window_bounds = array<i64: 32, 96>}, {pipeline_mode = #tpu.pipeline_mode<synchronous>, transform_indices = @transform_5, window_bounds = array<i64: 1, 96>}, {pipeline_mode = #tpu.pipeline_mode<synchronous>, transform_indices = @transform_6, window_bounds = array<i64: 32, 32>}, {pipeline_mode = #tpu.pipeline_mode<synchronous>, transform_indices = @transform_7, window_bounds = array<i64: 1, 32>}, {pipeline_mode = #tpu.pipeline_mode<synchronous>, transform_indices = @transform_8, window_bounds = array<i64: 1, 32>}, {pipeline_mode = #tpu.pipeline_mode<synchronous>, transform_indices = @transform_9, window_bounds = array<i64: 1, 32>}, {pipeline_mode = #tpu.pipeline_mode<synchronous>, transform_indices = @transform_10, window_bounds = array<i64: 32, 128>}, {pipeline_mode = #tpu.pipeline_mode<synchronous>, transform_indices = @transform_11, window_bounds = array<i64: 1, 128>}, {pipeline_mode = #tpu.pipeline_mode<synchronous>, transform_indices = @transform_12, window_bounds = array<i64: 128, 32>}, {pipeline_mode = #tpu.pipeline_mode<synchronous>, transform_indices = @transform_13, window_bounds = array<i64: 1, 32>}, {transform_indices = @transform_14, window_bounds = array<i64: 8, 32>}]} {
    %c0 = arith.constant 0 : index
    %c0_0 = arith.constant 0 : index
    %0 = vector.load %arg1[%c0, %c0_0] : memref<8x32xbf16, #tpu.memory_space<vmem>>, vector<8x32xbf16>
    %1 = arith.extf %0 : vector<8x32xbf16> to vector<8x32xf32>
    %cst = arith.constant dense<0.000000e+00> : vector<8xf32>
    %2 = vector.multi_reduction <add>, %1, %cst [1] : vector<8x32xf32> to vector<8xf32>
    %3 = vector.shape_cast %2 : vector<8xf32> to vector<8x1xf32>
    %cst_1 = arith.constant 3.200000e+01 : f32
    %4 = vector.broadcast %cst_1 : f32 to vector<8x1xf32>
    %5 = arith.divf %3, %4 : vector<8x1xf32>
    %6 = vector.broadcast %5 : vector<8x1xf32> to vector<8x32xf32>
    %7 = arith.subf %1, %6 : vector<8x32xf32>
    %8 = arith.mulf %7, %7 : vector<8x32xf32>
    %cst_2 = arith.constant dense<0.000000e+00> : vector<8xf32>
    %9 = vector.multi_reduction <add>, %8, %cst_2 [1] : vector<8x32xf32> to vector<8xf32>
    %10 = vector.shape_cast %9 : vector<8xf32> to vector<8x1xf32>
    %cst_3 = arith.constant 3.200000e+01 : f32
    %11 = vector.broadcast %cst_3 : f32 to vector<8x1xf32>
    %12 = arith.divf %10, %11 : vector<8x1xf32>
    %cst_4 = arith.constant 9.99999997E-7 : f32
    %13 = vector.broadcast %cst_4 : f32 to vector<8x1xf32>
    %14 = arith.addf %12, %13 : vector<8x1xf32>
    %15 = math.rsqrt %14 : vector<8x1xf32>
    %16 = vector.broadcast %15 : vector<8x1xf32> to vector<8x32xf32>
    %17 = arith.mulf %7, %16 : vector<8x32xf32>
    %c0_5 = arith.constant 0 : index
    %c0_6 = arith.constant 0 : index
    %18 = vector.load %arg3[%c0_5, %c0_6] : memref<1x32xf32, #tpu.memory_space<vmem>>, vector<1x32xf32>
    %19 = vector.broadcast %18 : vector<1x32xf32> to vector<8x32xf32>
    %20 = arith.mulf %17, %19 : vector<8x32xf32>
    %c0_7 = arith.constant 0 : index
    %c0_8 = arith.constant 0 : index
    %21 = vector.load %arg4[%c0_7, %c0_8] : memref<1x32xf32, #tpu.memory_space<vmem>>, vector<1x32xf32>
    %22 = vector.broadcast %21 : vector<1x32xf32> to vector<8x32xf32>
    %23 = arith.addf %20, %22 : vector<8x32xf32>
    %24 = arith.truncf %23 : vector<8x32xf32> to vector<8x32xbf16>
    %c0_9 = arith.constant 0 : index
    %c0_10 = arith.constant 0 : index
    %25 = vector.load %arg5[%c0_9, %c0_10] : memref<32x96xf32, #tpu.memory_space<vmem>>, vector<32x96xf32>
    %26 = arith.truncf %25 : vector<32x96xf32> to vector<32x96xbf16>
    %cst_11 = arith.constant dense<0.000000e+00> : vector<8x96xf32>
    %27 = tpu.matmul %24, %26, %cst_11 {dimension_numbers = #tpu.dot_dimension_numbers<[1], [0], [0], [1], [0, 0, 1, 1], [], []>} : vector<8x32xbf16>, vector<32x96xbf16>, vector<8x96xf32> -> vector<8x96xf32>
    %c0_12 = arith.constant 0 : index
    %c0_13 = arith.constant 0 : index
    %28 = vector.load %arg6[%c0_12, %c0_13] : memref<1x96xf32, #tpu.memory_space<vmem>>, vector<1x96xf32>
    %29 = vector.broadcast %28 : vector<1x96xf32> to vector<8x96xf32>
    %30 = arith.addf %27, %29 : vector<8x96xf32>
    %31 = tpu.iota {dimensions = array<i32: 2>} : vector<1x1x8xi32>
    %c4_i32 = arith.constant 4 : i32
    %32 = vector.broadcast %c4_i32 : i32 to vector<1x1x8xi32>
    %33 = arith.cmpi slt, %31, %32 : vector<1x1x8xi32>
    %34 = vector.extract_strided_slice %30 {offsets = [0, 0], sizes = [8, 8], strides = [1, 1]} : vector<8x96xf32> to vector<8x8xf32>
    %35 = vector.shape_cast %34 : vector<8x8xf32> to vector<1x8x8xf32>
    %36 = vector.extract_strided_slice %30 {offsets = [0, 32], sizes = [8, 8], strides = [1, 1]} : vector<8x96xf32> to vector<8x8xf32>
    %37 = vector.shape_cast %36 : vector<8x8xf32> to vector<1x8x8xf32>
    %38 = vector.extract_strided_slice %30 {offsets = [0, 64], sizes = [8, 8], strides = [1, 1]} : vector<8x96xf32> to vector<8x8xf32>
    %39 = vector.shape_cast %38 : vector<8x8xf32> to vector<1x8x8xf32>
    %40 = arith.truncf %35 : vector<1x8x8xf32> to vector<1x8x8xbf16>
    %41 = arith.truncf %37 : vector<1x8x8xf32> to vector<1x8x8xbf16>
    "tpu.trace_start"() <{level = 10 : i32, message = "wqd,wkd->wqk"}> : () -> ()
    %cst_14 = arith.constant dense<0.000000e+00> : vector<1x8x8xf32>
    %42 = tpu.matmul %40, %41, %cst_14 {dimension_numbers = #tpu.dot_dimension_numbers<[2], [2], [1], [1], [0, 0, 0, 1, 1, 1], [0], [0]>} : vector<1x8x8xbf16>, vector<1x8x8xbf16>, vector<1x8x8xf32> -> vector<1x8x8xf32>
    "tpu.trace_stop"() : () -> ()
    %cst_15 = arith.constant 0.353553385 : f32
    %43 = vector.broadcast %cst_15 : f32 to vector<1x8x8xf32>
    %44 = arith.mulf %42, %43 : vector<1x8x8xf32>
    %cst_16 = arith.constant -1.000000e+09 : f32
    %45 = vector.shape_cast %33 : vector<1x1x8xi1> to vector<1x1x8xi1>
    %46 = vector.broadcast %45 : vector<1x1x8xi1> to vector<1x8x8xi1>
    %47 = vector.broadcast %cst_16 : f32 to vector<1x8x8xf32>
    %48 = arith.select %46, %44, %47 : vector<1x8x8xi1>, vector<1x8x8xf32>
    %cst_17 = arith.constant dense<0xFF800000> : vector<1x8xf32>
    %49 = vector.multi_reduction <maximumf>, %48, %cst_17 [2] : vector<1x8x8xf32> to vector<1x8xf32>
    %50 = vector.shape_cast %49 : vector<1x8xf32> to vector<1x8x1xf32>
    %51 = vector.broadcast %50 : vector<1x8x1xf32> to vector<1x8x8xf32>
    %52 = arith.subf %48, %51 : vector<1x8x8xf32>
    %53 = math.exp %52 : vector<1x8x8xf32>
    %cst_18 = arith.constant dense<0.000000e+00> : vector<1x8xf32>
    %54 = vector.multi_reduction <add>, %53, %cst_18 [2] : vector<1x8x8xf32> to vector<1x8xf32>
    %55 = vector.shape_cast %54 : vector<1x8xf32> to vector<1x8x1xf32>
    %56 = tpu.reciprocal %55 {approx = true} : vector<1x8x1xf32> -> vector<1x8x1xf32>
    %57 = vector.broadcast %56 : vector<1x8x1xf32> to vector<1x8x8xf32>
    %58 = arith.mulf %53, %57 : vector<1x8x8xf32>
    %59 = arith.truncf %58 : vector<1x8x8xf32> to vector<1x8x8xbf16>
    %60 = arith.truncf %39 : vector<1x8x8xf32> to vector<1x8x8xbf16>
    "tpu.trace_start"() <{level = 10 : i32, message = "wqk,wkd->wqd"}> : () -> ()
    %cst_19 = arith.constant dense<0.000000e+00> : vector<1x8x8xf32>
    %61 = tpu.matmul %59, %60, %cst_19 {dimension_numbers = #tpu.dot_dimension_numbers<[2], [1], [1], [2], [0, 0, 0, 1, 1, 2], [0], [0]>} : vector<1x8x8xbf16>, vector<1x8x8xbf16>, vector<1x8x8xf32> -> vector<1x8x8xf32>
    "tpu.trace_stop"() : () -> ()
    %62 = vector.shape_cast %61 : vector<1x8x8xf32> to vector<8x8xf32>
    %63 = vector.extract_strided_slice %30 {offsets = [0, 8], sizes = [8, 8], strides = [1, 1]} : vector<8x96xf32> to vector<8x8xf32>
    %64 = vector.shape_cast %63 : vector<8x8xf32> to vector<1x8x8xf32>
    %65 = vector.extract_strided_slice %30 {offsets = [0, 40], sizes = [8, 8], strides = [1, 1]} : vector<8x96xf32> to vector<8x8xf32>
    %66 = vector.shape_cast %65 : vector<8x8xf32> to vector<1x8x8xf32>
    %67 = vector.extract_strided_slice %30 {offsets = [0, 72], sizes = [8, 8], strides = [1, 1]} : vector<8x96xf32> to vector<8x8xf32>
    %68 = vector.shape_cast %67 : vector<8x8xf32> to vector<1x8x8xf32>
    %69 = arith.truncf %64 : vector<1x8x8xf32> to vector<1x8x8xbf16>
    %70 = arith.truncf %66 : vector<1x8x8xf32> to vector<1x8x8xbf16>
    "tpu.trace_start"() <{level = 10 : i32, message = "wqd,wkd->wqk"}> : () -> ()
    %cst_20 = arith.constant dense<0.000000e+00> : vector<1x8x8xf32>
    %71 = tpu.matmul %69, %70, %cst_20 {dimension_numbers = #tpu.dot_dimension_numbers<[2], [2], [1], [1], [0, 0, 0, 1, 1, 1], [0], [0]>} : vector<1x8x8xbf16>, vector<1x8x8xbf16>, vector<1x8x8xf32> -> vector<1x8x8xf32>
    "tpu.trace_stop"() : () -> ()
    %cst_21 = arith.constant 0.353553385 : f32
    %72 = vector.broadcast %cst_21 : f32 to vector<1x8x8xf32>
    %73 = arith.mulf %71, %72 : vector<1x8x8xf32>
    %cst_22 = arith.constant -1.000000e+09 : f32
    %74 = vector.shape_cast %33 : vector<1x1x8xi1> to vector<1x1x8xi1>
    %75 = vector.broadcast %74 : vector<1x1x8xi1> to vector<1x8x8xi1>
    %76 = vector.broadcast %cst_22 : f32 to vector<1x8x8xf32>
    %77 = arith.select %75, %73, %76 : vector<1x8x8xi1>, vector<1x8x8xf32>
    %cst_23 = arith.constant dense<0xFF800000> : vector<1x8xf32>
    %78 = vector.multi_reduction <maximumf>, %77, %cst_23 [2] : vector<1x8x8xf32> to vector<1x8xf32>
    %79 = vector.shape_cast %78 : vector<1x8xf32> to vector<1x8x1xf32>
    %80 = vector.broadcast %79 : vector<1x8x1xf32> to vector<1x8x8xf32>
    %81 = arith.subf %77, %80 : vector<1x8x8xf32>
    %82 = math.exp %81 : vector<1x8x8xf32>
    %cst_24 = arith.constant dense<0.000000e+00> : vector<1x8xf32>
    %83 = vector.multi_reduction <add>, %82, %cst_24 [2] : vector<1x8x8xf32> to vector<1x8xf32>
    %84 = vector.shape_cast %83 : vector<1x8xf32> to vector<1x8x1xf32>
    %85 = tpu.reciprocal %84 {approx = true} : vector<1x8x1xf32> -> vector<1x8x1xf32>
    %86 = vector.broadcast %85 : vector<1x8x1xf32> to vector<1x8x8xf32>
    %87 = arith.mulf %82, %86 : vector<1x8x8xf32>
    %88 = arith.truncf %87 : vector<1x8x8xf32> to vector<1x8x8xbf16>
    %89 = arith.truncf %68 : vector<1x8x8xf32> to vector<1x8x8xbf16>
    "tpu.trace_start"() <{level = 10 : i32, message = "wqk,wkd->wqd"}> : () -> ()
    %cst_25 = arith.constant dense<0.000000e+00> : vector<1x8x8xf32>
    %90 = tpu.matmul %88, %89, %cst_25 {dimension_numbers = #tpu.dot_dimension_numbers<[2], [1], [1], [2], [0, 0, 0, 1, 1, 2], [0], [0]>} : vector<1x8x8xbf16>, vector<1x8x8xbf16>, vector<1x8x8xf32> -> vector<1x8x8xf32>
    "tpu.trace_stop"() : () -> ()
    %91 = vector.shape_cast %90 : vector<1x8x8xf32> to vector<8x8xf32>
    %92 = vector.extract_strided_slice %30 {offsets = [0, 16], sizes = [8, 8], strides = [1, 1]} : vector<8x96xf32> to vector<8x8xf32>
    %93 = vector.shape_cast %92 : vector<8x8xf32> to vector<1x8x8xf32>
    %94 = vector.extract_strided_slice %30 {offsets = [0, 48], sizes = [8, 8], strides = [1, 1]} : vector<8x96xf32> to vector<8x8xf32>
    %95 = vector.shape_cast %94 : vector<8x8xf32> to vector<1x8x8xf32>
    %96 = vector.extract_strided_slice %30 {offsets = [0, 80], sizes = [8, 8], strides = [1, 1]} : vector<8x96xf32> to vector<8x8xf32>
    %97 = vector.shape_cast %96 : vector<8x8xf32> to vector<1x8x8xf32>
    %98 = arith.truncf %93 : vector<1x8x8xf32> to vector<1x8x8xbf16>
    %99 = arith.truncf %95 : vector<1x8x8xf32> to vector<1x8x8xbf16>
    "tpu.trace_start"() <{level = 10 : i32, message = "wqd,wkd->wqk"}> : () -> ()
    %cst_26 = arith.constant dense<0.000000e+00> : vector<1x8x8xf32>
    %100 = tpu.matmul %98, %99, %cst_26 {dimension_numbers = #tpu.dot_dimension_numbers<[2], [2], [1], [1], [0, 0, 0, 1, 1, 1], [0], [0]>} : vector<1x8x8xbf16>, vector<1x8x8xbf16>, vector<1x8x8xf32> -> vector<1x8x8xf32>
    "tpu.trace_stop"() : () -> ()
    %cst_27 = arith.constant 0.353553385 : f32
    %101 = vector.broadcast %cst_27 : f32 to vector<1x8x8xf32>
    %102 = arith.mulf %100, %101 : vector<1x8x8xf32>
    %cst_28 = arith.constant -1.000000e+09 : f32
    %103 = vector.shape_cast %33 : vector<1x1x8xi1> to vector<1x1x8xi1>
    %104 = vector.broadcast %103 : vector<1x1x8xi1> to vector<1x8x8xi1>
    %105 = vector.broadcast %cst_28 : f32 to vector<1x8x8xf32>
    %106 = arith.select %104, %102, %105 : vector<1x8x8xi1>, vector<1x8x8xf32>
    %cst_29 = arith.constant dense<0xFF800000> : vector<1x8xf32>
    %107 = vector.multi_reduction <maximumf>, %106, %cst_29 [2] : vector<1x8x8xf32> to vector<1x8xf32>
    %108 = vector.shape_cast %107 : vector<1x8xf32> to vector<1x8x1xf32>
    %109 = vector.broadcast %108 : vector<1x8x1xf32> to vector<1x8x8xf32>
    %110 = arith.subf %106, %109 : vector<1x8x8xf32>
    %111 = math.exp %110 : vector<1x8x8xf32>
    %cst_30 = arith.constant dense<0.000000e+00> : vector<1x8xf32>
    %112 = vector.multi_reduction <add>, %111, %cst_30 [2] : vector<1x8x8xf32> to vector<1x8xf32>
    %113 = vector.shape_cast %112 : vector<1x8xf32> to vector<1x8x1xf32>
    %114 = tpu.reciprocal %113 {approx = true} : vector<1x8x1xf32> -> vector<1x8x1xf32>
    %115 = vector.broadcast %114 : vector<1x8x1xf32> to vector<1x8x8xf32>
    %116 = arith.mulf %111, %115 : vector<1x8x8xf32>
    %117 = arith.truncf %116 : vector<1x8x8xf32> to vector<1x8x8xbf16>
    %118 = arith.truncf %97 : vector<1x8x8xf32> to vector<1x8x8xbf16>
    "tpu.trace_start"() <{level = 10 : i32, message = "wqk,wkd->wqd"}> : () -> ()
    %cst_31 = arith.constant dense<0.000000e+00> : vector<1x8x8xf32>
    %119 = tpu.matmul %117, %118, %cst_31 {dimension_numbers = #tpu.dot_dimension_numbers<[2], [1], [1], [2], [0, 0, 0, 1, 1, 2], [0], [0]>} : vector<1x8x8xbf16>, vector<1x8x8xbf16>, vector<1x8x8xf32> -> vector<1x8x8xf32>
    "tpu.trace_stop"() : () -> ()
    %120 = vector.shape_cast %119 : vector<1x8x8xf32> to vector<8x8xf32>
    %121 = vector.extract_strided_slice %30 {offsets = [0, 24], sizes = [8, 8], strides = [1, 1]} : vector<8x96xf32> to vector<8x8xf32>
    %122 = vector.shape_cast %121 : vector<8x8xf32> to vector<1x8x8xf32>
    %123 = vector.extract_strided_slice %30 {offsets = [0, 56], sizes = [8, 8], strides = [1, 1]} : vector<8x96xf32> to vector<8x8xf32>
    %124 = vector.shape_cast %123 : vector<8x8xf32> to vector<1x8x8xf32>
    %125 = vector.extract_strided_slice %30 {offsets = [0, 88], sizes = [8, 8], strides = [1, 1]} : vector<8x96xf32> to vector<8x8xf32>
    %126 = vector.shape_cast %125 : vector<8x8xf32> to vector<1x8x8xf32>
    %127 = arith.truncf %122 : vector<1x8x8xf32> to vector<1x8x8xbf16>
    %128 = arith.truncf %124 : vector<1x8x8xf32> to vector<1x8x8xbf16>
    "tpu.trace_start"() <{level = 10 : i32, message = "wqd,wkd->wqk"}> : () -> ()
    %cst_32 = arith.constant dense<0.000000e+00> : vector<1x8x8xf32>
    %129 = tpu.matmul %127, %128, %cst_32 {dimension_numbers = #tpu.dot_dimension_numbers<[2], [2], [1], [1], [0, 0, 0, 1, 1, 1], [0], [0]>} : vector<1x8x8xbf16>, vector<1x8x8xbf16>, vector<1x8x8xf32> -> vector<1x8x8xf32>
    "tpu.trace_stop"() : () -> ()
    %cst_33 = arith.constant 0.353553385 : f32
    %130 = vector.broadcast %cst_33 : f32 to vector<1x8x8xf32>
    %131 = arith.mulf %129, %130 : vector<1x8x8xf32>
    %cst_34 = arith.constant -1.000000e+09 : f32
    %132 = vector.shape_cast %33 : vector<1x1x8xi1> to vector<1x1x8xi1>
    %133 = vector.broadcast %132 : vector<1x1x8xi1> to vector<1x8x8xi1>
    %134 = vector.broadcast %cst_34 : f32 to vector<1x8x8xf32>
    %135 = arith.select %133, %131, %134 : vector<1x8x8xi1>, vector<1x8x8xf32>
    %cst_35 = arith.constant dense<0xFF800000> : vector<1x8xf32>
    %136 = vector.multi_reduction <maximumf>, %135, %cst_35 [2] : vector<1x8x8xf32> to vector<1x8xf32>
    %137 = vector.shape_cast %136 : vector<1x8xf32> to vector<1x8x1xf32>
    %138 = vector.broadcast %137 : vector<1x8x1xf32> to vector<1x8x8xf32>
    %139 = arith.subf %135, %138 : vector<1x8x8xf32>
    %140 = math.exp %139 : vector<1x8x8xf32>
    %cst_36 = arith.constant dense<0.000000e+00> : vector<1x8xf32>
    %141 = vector.multi_reduction <add>, %140, %cst_36 [2] : vector<1x8x8xf32> to vector<1x8xf32>
    %142 = vector.shape_cast %141 : vector<1x8xf32> to vector<1x8x1xf32>
    %143 = tpu.reciprocal %142 {approx = true} : vector<1x8x1xf32> -> vector<1x8x1xf32>
    %144 = vector.broadcast %143 : vector<1x8x1xf32> to vector<1x8x8xf32>
    %145 = arith.mulf %140, %144 : vector<1x8x8xf32>
    %146 = arith.truncf %145 : vector<1x8x8xf32> to vector<1x8x8xbf16>
    %147 = arith.truncf %126 : vector<1x8x8xf32> to vector<1x8x8xbf16>
    "tpu.trace_start"() <{level = 10 : i32, message = "wqk,wkd->wqd"}> : () -> ()
    %cst_37 = arith.constant dense<0.000000e+00> : vector<1x8x8xf32>
    %148 = tpu.matmul %146, %147, %cst_37 {dimension_numbers = #tpu.dot_dimension_numbers<[2], [1], [1], [2], [0, 0, 0, 1, 1, 2], [0], [0]>} : vector<1x8x8xbf16>, vector<1x8x8xbf16>, vector<1x8x8xf32> -> vector<1x8x8xf32>
    "tpu.trace_stop"() : () -> ()
    %149 = vector.shape_cast %148 : vector<1x8x8xf32> to vector<8x8xf32>
    %150 = tpu.concatenate %62, %91, %120, %149 in 1 : vector<8x8xf32>, vector<8x8xf32>, vector<8x8xf32>, vector<8x8xf32> -> vector<8x32xf32>
    %151 = arith.truncf %150 : vector<8x32xf32> to vector<8x32xbf16>
    %c0_38 = arith.constant 0 : index
    %c0_39 = arith.constant 0 : index
    %152 = vector.load %arg7[%c0_38, %c0_39] : memref<32x32xf32, #tpu.memory_space<vmem>>, vector<32x32xf32>
    %153 = arith.truncf %152 : vector<32x32xf32> to vector<32x32xbf16>
    %cst_40 = arith.constant dense<0.000000e+00> : vector<8x32xf32>
    %154 = tpu.matmul %151, %153, %cst_40 {dimension_numbers = #tpu.dot_dimension_numbers<[1], [0], [0], [1], [0, 0, 1, 1], [], []>} : vector<8x32xbf16>, vector<32x32xbf16>, vector<8x32xf32> -> vector<8x32xf32>
    %c0_41 = arith.constant 0 : index
    %c0_42 = arith.constant 0 : index
    %155 = vector.load %arg8[%c0_41, %c0_42] : memref<1x32xf32, #tpu.memory_space<vmem>>, vector<1x32xf32>
    %156 = vector.broadcast %155 : vector<1x32xf32> to vector<8x32xf32>
    %157 = arith.addf %154, %156 : vector<8x32xf32>
    %c0_43 = arith.constant 0 : index
    %c0_44 = arith.constant 0 : index
    %158 = vector.load %arg2[%c0_43, %c0_44] : memref<8x32xbf16, #tpu.memory_space<vmem>>, vector<8x32xbf16>
    %159 = arith.extf %158 : vector<8x32xbf16> to vector<8x32xf32>
    %160 = arith.addf %157, %159 : vector<8x32xf32>
    %161 = arith.addf %160, %1 : vector<8x32xf32>
    %cst_45 = arith.constant dense<0.000000e+00> : vector<8xf32>
    %162 = vector.multi_reduction <add>, %161, %cst_45 [1] : vector<8x32xf32> to vector<8xf32>
    %163 = vector.shape_cast %162 : vector<8xf32> to vector<8x1xf32>
    %cst_46 = arith.constant 3.200000e+01 : f32
    %164 = vector.broadcast %cst_46 : f32 to vector<8x1xf32>
    %165 = arith.divf %163, %164 : vector<8x1xf32>
    %166 = vector.broadcast %165 : vector<8x1xf32> to vector<8x32xf32>
    %167 = arith.subf %161, %166 : vector<8x32xf32>
    %168 = arith.mulf %167, %167 : vector<8x32xf32>
    %cst_47 = arith.constant dense<0.000000e+00> : vector<8xf32>
    %169 = vector.multi_reduction <add>, %168, %cst_47 [1] : vector<8x32xf32> to vector<8xf32>
    %170 = vector.shape_cast %169 : vector<8xf32> to vector<8x1xf32>
    %cst_48 = arith.constant 3.200000e+01 : f32
    %171 = vector.broadcast %cst_48 : f32 to vector<8x1xf32>
    %172 = arith.divf %170, %171 : vector<8x1xf32>
    %cst_49 = arith.constant 9.99999997E-7 : f32
    %173 = vector.broadcast %cst_49 : f32 to vector<8x1xf32>
    %174 = arith.addf %172, %173 : vector<8x1xf32>
    %175 = math.rsqrt %174 : vector<8x1xf32>
    %176 = vector.broadcast %175 : vector<8x1xf32> to vector<8x32xf32>
    %177 = arith.mulf %167, %176 : vector<8x32xf32>
    %c0_50 = arith.constant 0 : index
    %c0_51 = arith.constant 0 : index
    %178 = vector.load %arg9[%c0_50, %c0_51] : memref<1x32xf32, #tpu.memory_space<vmem>>, vector<1x32xf32>
    %179 = vector.broadcast %178 : vector<1x32xf32> to vector<8x32xf32>
    %180 = arith.mulf %177, %179 : vector<8x32xf32>
    %c0_52 = arith.constant 0 : index
    %c0_53 = arith.constant 0 : index
    %181 = vector.load %arg10[%c0_52, %c0_53] : memref<1x32xf32, #tpu.memory_space<vmem>>, vector<1x32xf32>
    %182 = vector.broadcast %181 : vector<1x32xf32> to vector<8x32xf32>
    %183 = arith.addf %180, %182 : vector<8x32xf32>
    %184 = arith.truncf %183 : vector<8x32xf32> to vector<8x32xbf16>
    %c0_54 = arith.constant 0 : index
    %c0_55 = arith.constant 0 : index
    %185 = vector.load %arg11[%c0_54, %c0_55] : memref<32x128xf32, #tpu.memory_space<vmem>>, vector<32x128xf32>
    %186 = arith.truncf %185 : vector<32x128xf32> to vector<32x128xbf16>
    %cst_56 = arith.constant dense<0.000000e+00> : vector<8x128xf32>
    %187 = tpu.matmul %184, %186, %cst_56 {dimension_numbers = #tpu.dot_dimension_numbers<[1], [0], [0], [1], [0, 0, 1, 1], [], []>} : vector<8x32xbf16>, vector<32x128xbf16>, vector<8x128xf32> -> vector<8x128xf32>
    %c0_57 = arith.constant 0 : index
    %c0_58 = arith.constant 0 : index
    %188 = vector.load %arg12[%c0_57, %c0_58] : memref<1x128xf32, #tpu.memory_space<vmem>>, vector<1x128xf32>
    %189 = vector.broadcast %188 : vector<1x128xf32> to vector<8x128xf32>
    %190 = arith.addf %187, %189 : vector<8x128xf32>
    %191 = arith.mulf %190, %190 : vector<8x128xf32>
    %192 = arith.mulf %190, %191 : vector<8x128xf32>
    %cst_59 = arith.constant 4.471500e-02 : f32
    %193 = vector.broadcast %cst_59 : f32 to vector<8x128xf32>
    %194 = arith.mulf %193, %192 : vector<8x128xf32>
    %195 = arith.addf %190, %194 : vector<8x128xf32>
    %cst_60 = arith.constant 0.797884583 : f32
    %196 = vector.broadcast %cst_60 : f32 to vector<8x128xf32>
    %197 = arith.mulf %196, %195 : vector<8x128xf32>
    %198 = math.tanh %197 : vector<8x128xf32>
    %cst_61 = arith.constant 1.000000e+00 : f32
    %199 = vector.broadcast %cst_61 : f32 to vector<8x128xf32>
    %200 = arith.addf %199, %198 : vector<8x128xf32>
    %cst_62 = arith.constant 5.000000e-01 : f32
    %201 = vector.broadcast %cst_62 : f32 to vector<8x128xf32>
    %202 = arith.mulf %201, %200 : vector<8x128xf32>
    %203 = arith.mulf %190, %202 : vector<8x128xf32>
    %204 = arith.truncf %203 : vector<8x128xf32> to vector<8x128xbf16>
    %c0_63 = arith.constant 0 : index
    %c0_64 = arith.constant 0 : index
    %205 = vector.load %arg13[%c0_63, %c0_64] : memref<128x32xf32, #tpu.memory_space<vmem>>, vector<128x32xf32>
    %206 = arith.truncf %205 : vector<128x32xf32> to vector<128x32xbf16>
    %cst_65 = arith.constant dense<0.000000e+00> : vector<8x32xf32>
    %207 = tpu.matmul %204, %206, %cst_65 {dimension_numbers = #tpu.dot_dimension_numbers<[1], [0], [0], [1], [0, 0, 1, 1], [], []>} : vector<8x128xbf16>, vector<128x32xbf16>, vector<8x32xf32> -> vector<8x32xf32>
    %c0_66 = arith.constant 0 : index
    %c0_67 = arith.constant 0 : index
    %208 = vector.load %arg14[%c0_66, %c0_67] : memref<1x32xf32, #tpu.memory_space<vmem>>, vector<1x32xf32>
    %209 = vector.broadcast %208 : vector<1x32xf32> to vector<8x32xf32>
    %210 = arith.addf %207, %209 : vector<8x32xf32>
    %211 = arith.addf %161, %210 : vector<8x32xf32>
    %212 = arith.truncf %211 : vector<8x32xf32> to vector<8x32xbf16>
    %c0_68 = arith.constant 0 : index
    %c0_69 = arith.constant 0 : index
    %213 = vector.load %arg15[%c0_68, %c0_69] : memref<8x32xbf16, #tpu.memory_space<vmem>>, vector<8x32xbf16>
    tpu.vector_store %arg15[%c0_68, %c0_69], %212 {strides = array<i32>} : memref<8x32xbf16, #tpu.memory_space<vmem>>, vector<8x32xbf16>,
    return
  }
  func.func @transform_0(%arg0: i32) -> (i32, i32) {
    %c0_i32 = arith.constant 0 : i32
    %c0_i32_0 = arith.constant 0 : i32
    return %arg0, %c0_i32 : i32, i32
  }
  func.func @transform_1(%arg0: i32) -> (i32, i32) {
    %c0_i32 = arith.constant 0 : i32
    %c0_i32_0 = arith.constant 0 : i32
    return %arg0, %c0_i32 : i32, i32
  }
  func.func @transform_2(%arg0: i32) -> (i32, i32) {
    %c0_i32 = arith.constant 0 : i32
    %c0_i32_0 = arith.constant 0 : i32
    %c0_i32_1 = arith.constant 0 : i32
    return %c0_i32, %c0_i32_0 : i32, i32
  }
  func.func @transform_3(%arg0: i32) -> (i32, i32) {
    %c0_i32 = arith.constant 0 : i32
    %c0_i32_0 = arith.constant 0 : i32
    %c0_i32_1 = arith.constant 0 : i32
    return %c0_i32, %c0_i32_0 : i32, i32
  }
  func.func @transform_4(%arg0: i32) -> (i32, i32) {
    %c0_i32 = arith.constant 0 : i32
    %c0_i32_0 = arith.constant 0 : i32
    %c0_i32_1 = arith.constant 0 : i32
    return %c0_i32, %c0_i32_0 : i32, i32
  }
  func.func @transform_5(%arg0: i32) -> (i32, i32) {
    %c0_i32 = arith.constant 0 : i32
    %c0_i32_0 = arith.constant 0 : i32
    %c0_i32_1 = arith.constant 0 : i32
    return %c0_i32, %c0_i32_0 : i32, i32
  }
  func.func @transform_6(%arg0: i32) -> (i32, i32) {
    %c0_i32 = arith.constant 0 : i32
    %c0_i32_0 = arith.constant 0 : i32
    %c0_i32_1 = arith.constant 0 : i32
    return %c0_i32, %c0_i32_0 : i32, i32
  }
  func.func @transform_7(%arg0: i32) -> (i32, i32) {
    %c0_i32 = arith.constant 0 : i32
    %c0_i32_0 = arith.constant 0 : i32
    %c0_i32_1 = arith.constant 0 : i32
    return %c0_i32, %c0_i32_0 : i32, i32
  }
  func.func @transform_8(%arg0: i32) -> (i32, i32) {
    %c0_i32 = arith.constant 0 : i32
    %c0_i32_0 = arith.constant 0 : i32
    %c0_i32_1 = arith.constant 0 : i32
    return %c0_i32, %c0_i32_0 : i32, i32
  }
  func.func @transform_9(%arg0: i32) -> (i32, i32) {
    %c0_i32 = arith.constant 0 : i32
    %c0_i32_0 = arith.constant 0 : i32
    %c0_i32_1 = arith.constant 0 : i32
    return %c0_i32, %c0_i32_0 : i32, i32
  }
  func.func @transform_10(%arg0: i32) -> (i32, i32) {
    %c0_i32 = arith.constant 0 : i32
    %c0_i32_0 = arith.constant 0 : i32
    %c0_i32_1 = arith.constant 0 : i32
    return %c0_i32, %c0_i32_0 : i32, i32
  }
  func.func @transform_11(%arg0: i32) -> (i32, i32) {
    %c0_i32 = arith.constant 0 : i32
    %c0_i32_0 = arith.constant 0 : i32
    %c0_i32_1 = arith.constant 0 : i32
    return %c0_i32, %c0_i32_0 : i32, i32
  }
  func.func @transform_12(%arg0: i32) -> (i32, i32) {
    %c0_i32 = arith.constant 0 : i32
    %c0_i32_0 = arith.constant 0 : i32
    %c0_i32_1 = arith.constant 0 : i32
    return %c0_i32, %c0_i32_0 : i32, i32
  }
  func.func @transform_13(%arg0: i32) -> (i32, i32) {
    %c0_i32 = arith.constant 0 : i32
    %c0_i32_0 = arith.constant 0 : i32
    %c0_i32_1 = arith.constant 0 : i32
    return %c0_i32, %c0_i32_0 : i32, i32
  }
  func.func @transform_14(%arg0: i32) -> (i32, i32) {
    %c0_i32 = arith.constant 0 : i32
    %c0_i32_0 = arith.constant 0 : i32
    return %arg0, %c0_i32 : i32, i32
  }
}

</mosaic_0001>

<bundles_post_ra>
// kernel: vitaev2_vsa_forward.27
= control target key start
LH: loop header
LB: loop body
LE: loop exit
PB: predicated region body
PF: predicated region fallthrough
CT: control target
= control target key end

     0   :  { %vm109_vm0 = vcmask 1044480   ;;  %vm110_vm1 = vcmask 1045504   ;;  %v582_v3 = vmov 65535   ;;  %vm84_vm2 = vcmask 220160   ;;  %s796_s1 = inlined_call_operand.vmem [shape: f32[27,16], index: 1, kind: input, shape index: {}]   ;;  %s797_s0 = inlined_call_operand.vmem [shape: bf16[128,27], index: 0, kind: input, shape index: {}]   ;;  %s798_s2 = inlined_call_operand.vmem [shape: f32[1,16], index: 2, kind: input, shape index: {}]   ;;  %s799_s3 = inlined_call_operand.vmem [shape: bf16[128,16], index: 3, kind: output, shape index: {}]  }
   0x1   :  { %v31_v0 = vld [vmem:[%s796_s1] sm:$0xff]  ;;  %v32_v1 = vld [vmem:[%s796_s1 + $0x8] sm:$0xff]  ;;  %v33_v2 = vld [vmem:[%s796_s1 + $0x10] sm:$0xff]  ;;  %v111_v4 = vsel %vm109_vm0, 4294967295, %v582_v3  ;;  %vm389_vm3 = vcmask 125952  }
   0x2   :  { %v35_v5 = vpack.c.bf16 %v32_v1, %v31_v0  ;;  %v34_v6 = vld [vmem:[%s796_s1 + $0x18] sm:$0x7]  ;;  %v112_v7 = vsel %vm110_vm1, %v111_v4, 0  ;;  %v510_v8 = vld [vmem:[%s797_s0] sm:$0xff]   ;;  %v512_v12 = vld [vmem:[%s797_s0 + $0x8] sm:$0xff]  }
   0x3   :  { %v36_v9 = vpack.c.bf16 %v34_v6, %v33_v2  ;;  %v511_v10 = vld [vmem:[%s797_s0 + $0x20] sm:$0xff]   ;;  %489 = vmatprep.mubr.msk.bf16.mxu0 %vm84_vm2, %v510_v8  ;;  %v513_v13 = vld [vmem:[%s797_s0 + $0x28] sm:$0xff]   ;;  %v514_v14 = vld [vmem:[%s797_s0 + $0x10] sm:$0xff]  }
   0x4   :  { %485 = vmatprep.subr.bf16.mxu0 %v35_v5  ;;  %505 = vmatprep.subr.bf16.mxu1 %v35_v5  ;;  %v515_v15 = vld [vmem:[%s797_s0 + $0x30] sm:$0xff]   ;;  %v516_v16 = vld [vmem:[%s797_s0 + $0x18] sm:$0xff]   ;;  %v650_v18 = vld [vmem:[%s798_s2] ss:$0 sm:$0xff] }
   0x5   :  { %486 = vmatpush3.bf16.msra.mxu0 %v35_v5  ;;  %507 = vmatpush3.bf16.msra.mxu1 %v35_v5  ;;  %v114_v11 = vand.u32 %v112_v7, %v36_v9  ;;  %v517_v17 = vld [vmem:[%s797_s0 + $0x38] sm:$0xff]  }
   0x6   :  { %497 = vmatprep.mubr.msk.bf16.mxu1 %vm84_vm2, %v511_v10 }
   0x7   :  { %487 = vmatprep.subr.bf16.mxu0 %v114_v11  ;;  %506 = vmatprep.subr.bf16.mxu1 %v114_v11 }
   0x9   :  { %488 = vmatpush3.bf16.msra.mxu0 %v114_v11  ;;  %508 = vmatpush3.bf16.msra.mxu1 %v114_v11 }
   0xc   :  { %490 = vmatmul.mubr.msk.bf16.vlgmr.msra.gmra.mrb[0].mxu0 %vm84_vm2, %v512_v12  ;;  %498 = vmatmul.mubr.msk.bf16.vlgmr.msra.gmra.mrb[0].mxu1 %vm84_vm2, %v513_v13 }
   0xd   :  { %493 = vmatprep.mubr.msk.bf16.mxu0 %vm84_vm2, %v514_v14  ;;  %501 = vmatprep.mubr.msk.bf16.mxu1 %vm84_vm2, %v515_v15 }
  0x14   :  { %494 = vmatmul.mubr.msk.bf16.gmra.mrb[4].mxu0 %vm84_vm2, %v516_v16  ;;  %502 = vmatmul.mubr.msk.bf16.gmra.mrb[4].mxu1 %vm84_vm2, %v517_v17 }
  0xdf   :  { %v491_v19 = vpop.f32.mrb[0].mxu0  ;;  %v499_v20 = vpop.f32.mrb[0].mxu1 }
  0xe0   :  { %v653_v21 = vadd.f32 %v491_v19, %v650_v18  ;;  %v656_v22 = vadd.f32 %v499_v20, %v650_v18  ;;  %v150_v23 = vpop.f32.mrb[1].mxu0  ;;  %v182_v24 = vpop.f32.mrb[1].mxu1 }
  0xe1   :  { %v659_v25 = vadd.f32 %v650_v18, %v150_v23  ;;  %v662_v26 = vadd.f32 %v650_v18, %v182_v24  ;;  %v492_v27 = vpop.f32.mrb[2].mxu0  ;;  %v500_v28 = vpop.f32.mrb[2].mxu1 }
  0xe2   :  { %v429_v29 = vmul.f32 -1.442695, %v653_v21  ;;  %v437_v30 = vmul.f32 -1.442695, %v656_v22  ;;  %v667_v31 = vadd.f32 %v492_v27, %v650_v18  ;;  %v670_v32 = vadd.f32 %v500_v28, %v650_v18  ;;  %v153_v33 = vpop.f32.mrb[3].mxu0  ;;  %v185_v34 = vpop.f32.mrb[3].mxu1 }
  0xe3   :  { %v427_v35 = vmul.f32 -1.442695, %v659_v25  ;;  %v435_v36 = vmul.f32 -1.442695, %v662_v26  ;;  %v675_v37 = vadd.f32 %v650_v18, %v153_v33  ;;  %v678_v38 = vadd.f32 %v650_v18, %v185_v34 }
  0xe4   :  { %518 = vpow2.f32 %v429_v29  ;;  %v430_v39 = vmul.f32 -1.442695, %v667_v31  ;;  %v438_v40 = vmul.f32 -1.442695, %v670_v32 }
  0xe5   :  { %520 = vpow2.f32 %v437_v30  ;;  %v428_v41 = vmul.f32 -1.442695, %v675_v37  ;;  %v436_v42 = vmul.f32 -1.442695, %v678_v38 }
  0xe6   :  { %522 = vpow2.f32 %v427_v35 }
  0xe7   :  { %524 = vpow2.f32 %v435_v36  ;;  %v495_v43 = vpop.f32.mrb[4].mxu0  ;;  %v503_v44 = vpop.f32.mrb[4].mxu1 }
  0xe8   :  { %526 = vpow2.f32 %v430_v39  ;;  %v685_v45 = vadd.f32 %v495_v43, %v650_v18  ;;  %v688_v46 = vadd.f32 %v503_v44, %v650_v18  ;;  %v166_v47 = vpop.f32.mrb[5].mxu0  ;;  %v198_v48 = vpop.f32.mrb[5].mxu1 }
  0xe9   :  { %528 = vpow2.f32 %v438_v40  ;;  %v691_v49 = vadd.f32 %v650_v18, %v166_v47  ;;  %v694_v50 = vadd.f32 %v650_v18, %v198_v48  ;;  %v496_v51 = vpop.f32.mrb[6].mxu0  ;;  %v504_v52 = vpop.f32.mrb[6].mxu1 }
  0xea   :  { %530 = vpow2.f32 %v428_v41  ;;  %v433_v53 = vmul.f32 -1.442695, %v685_v45  ;;  %v441_v54 = vmul.f32 -1.442695, %v688_v46  ;;  %v699_v55 = vadd.f32 %v496_v51, %v650_v18  ;;  %v169_v56 = vpop.f32.mrb[7].mxu0  ;;  %v201_v57 = vpop.f32.mrb[7].mxu1 }
  0xeb   :  { %532 = vpow2.f32 %v436_v42  ;;  %v431_v58 = vmul.f32 -1.442695, %v691_v49  ;;  %v439_v59 = vmul.f32 -1.442695, %v694_v50  ;;  %v705_v14 = vadd.f32 %v504_v52, %v650_v18 }
  0xec   :  { %534 = vpow2.f32 %v433_v53  ;;  %v434_v60 = vmul.f32 -1.442695, %v699_v55  ;;  %v708_v17 = vadd.f32 %v650_v18, %v169_v56  ;;  %v711_v23 = vadd.f32 %v650_v18, %v201_v57 }
  0xed   :  { %536 = vpow2.f32 %v441_v54  ;;  %v442_v30 = vmul.f32 -1.442695, %v705_v14 }
  0xee   :  { %v519_v61 = vpop.eup %518  ;;  %538 = vpow2.f32 %v431_v58  ;;  %v432_v35 = vmul.f32 -1.442695, %v708_v17  ;;  %v440_v18 = vmul.f32 -1.442695, %v711_v23 }
  0xef   :  { %v521_v62 = vpop.eup %520  ;;  %v263_v63 = vadd.f32 1.0, %v519_v61  ;;  %540 = vpow2.f32 %v439_v59 }
  0xf0   :  { %v523_v0 = vpop.eup %522  ;;  %v271_v1 = vadd.f32 1.0, %v521_v62  ;;  %542 = vpow2.f32 %v434_v60 }
  0xf1   :  { %v525_v2 = vpop.eup %524  ;;  %544 = vrcp.f32 %v263_v63  ;;  %v261_v3 = vadd.f32 1.0, %v523_v0 }
  0xf2   :  { %v527_v4 = vpop.eup %526  ;;  %546 = vrcp.f32 %v271_v1  ;;  %v269_v5 = vadd.f32 1.0, %v525_v2 }
  0xf3   :  { %v529_v6 = vpop.eup %528  ;;  %548 = vrcp.f32 %v261_v3  ;;  %v264_v7 = vadd.f32 1.0, %v527_v4 }
  0xf4   :  { %v531_v8 = vpop.eup %530  ;;  %550 = vrcp.f32 %v269_v5  ;;  %v272_v9 = vadd.f32 1.0, %v529_v6 }
  0xf5   :  { %v533_v10 = vpop.eup %532  ;;  %552 = vrcp.f32 %v264_v7  ;;  %v262_v11 = vadd.f32 1.0, %v531_v8 }
  0xf6   :  { %v535_v12 = vpop.eup %534  ;;  %554 = vrcp.f32 %v272_v9  ;;  %v270_v13 = vadd.f32 1.0, %v533_v10 }
  0xf7   :  { %v537_v15 = vpop.eup %536  ;;  %556 = vrcp.f32 %v262_v11  ;;  %v267_v16 = vadd.f32 1.0, %v535_v12 }
  0xf8   :  { %v539_v19 = vpop.eup %538  ;;  %558 = vrcp.f32 %v270_v13  ;;  %v275_v20 = vadd.f32 1.0, %v537_v15 }
  0xf9   :  { %v541_v24 = vpop.eup %540  ;;  %560 = vrcp.f32 %v267_v16  ;;  %v265_v27 = vadd.f32 1.0, %v539_v19 }
  0xfa   :  { %v543_v28 = vpop.eup %542  ;;  %562 = vrcp.f32 %v275_v20  ;;  %v273_v29 = vadd.f32 1.0, %v541_v24 }
  0xfb   :  { %v545_v33 = vpop.eup %544  ;;  %564 = vrcp.f32 %v265_v27  ;;  %v268_v34 = vadd.f32 1.0, %v543_v28 }
  0xfc   :  { %v547_v36 = vpop.eup %546  ;;  %v311_v39 = vmul.f32 %v545_v33, %v653_v21  ;;  %566 = vrcp.f32 %v273_v29 }
  0xfd   :  { %v549_v40 = vpop.eup %548  ;;  %v319_v41 = vmul.f32 %v547_v36, %v656_v22  ;;  %568 = vrcp.f32 %v268_v34 }
  0xfe   :  { %v551_v42 = vpop.eup %550  ;;  %v461_v43 = vpack.c.bf16 %v311_v39, %v311_v39  ;;  %v309_v44 = vmul.f32 %v549_v40, %v659_v25  ;;  %570 = vpow2.f32 %v442_v30 }
  0xff   :  { %v553_v47 = vpop.eup %552  ;;  %v469_v48 = vpack.c.bf16 %v319_v41, %v319_v41  ;;  %v317_v51 = vmul.f32 %v551_v42, %v662_v26  ;;  %572 = vpow2.f32 %v432_v35 }
 0x100   :  { %v555_v52 = vpop.eup %554  ;;  %392 = vst.msk [vmem:[%s799_s3 + $0x8] sm:$0xf] %vm389_vm3, %v461_v43  ;;  %v459_v21 = vpack.c.bf16 %v309_v44, %v309_v44  ;;  %v312_v22 = vmul.f32 %v553_v47, %v667_v31  ;;  %574 = vpow2.f32 %v440_v18 }
 0x101   :  { %v557_v53 = vpop.eup %556  ;;  %400 = vst.msk [vmem:[%s799_s3 + $0x28] sm:$0xf] %vm389_vm3, %v469_v48  ;;  %v467_v25 = vpack.c.bf16 %v317_v51, %v317_v51  ;;  %v320_v26 = vmul.f32 %v555_v52, %v670_v32 }
 0x102   :  { %v559_v54 = vpop.eup %558  ;;  %390 = vst.msk [vmem:[%s799_s3] sm:$0xf] %vm389_vm3, %v459_v21  ;;  %v462_v56 = vpack.c.bf16 %v312_v22, %v312_v22  ;;  %v310_v57 = vmul.f32 %v557_v53, %v675_v37 }
 0x103   :  { %v561_v31 = vpop.eup %560  ;;  %398 = vst.msk [vmem:[%s799_s3 + $0x20] sm:$0xf] %vm389_vm3, %v467_v25  ;;  %v470_v58 = vpack.c.bf16 %v320_v26, %v320_v26  ;;  %v318_v59 = vmul.f32 %v559_v54, %v678_v38 }
 0x104   :  { %v563_v60 = vpop.eup %562  ;;  %393 = vst.msk [vmem:[%s799_s3 + $0xc] sm:$0xf] %vm389_vm3, %v462_v56  ;;  %v460_v32 = vpack.c.bf16 %v310_v57, %v310_v57  ;;  %v315_v61 = vmul.f32 %v561_v31, %v685_v45 }
 0x105   :  { %v565_v62 = vpop.eup %564  ;;  %401 = vst.msk [vmem:[%s799_s3 + $0x2c] sm:$0xf] %vm389_vm3, %v470_v58  ;;  %v468_v37 = vpack.c.bf16 %v318_v59, %v318_v59  ;;  %v323_v63 = vmul.f32 %v563_v60, %v688_v46 }
 0x106   :  { %v567_v0 = vpop.eup %566  ;;  %391 = vst.msk [vmem:[%s799_s3 + $0x4] sm:$0xf] %vm389_vm3, %v460_v32  ;;  %v465_v38 = vpack.c.bf16 %v315_v61, %v315_v61  ;;  %v313_v1 = vmul.f32 %v565_v62, %v691_v49 }
 0x107   :  { %v569_v2 = vpop.eup %568  ;;  %399 = vst.msk [vmem:[%s799_s3 + $0x24] sm:$0xf] %vm389_vm3, %v468_v37  ;;  %v473_v45 = vpack.c.bf16 %v323_v63, %v323_v63  ;;  %v321_v3 = vmul.f32 %v567_v0, %v694_v50 }
 0x108   :  { %v571_v4 = vpop.eup %570  ;;  %396 = vst.msk [vmem:[%s799_s3 + $0x18] sm:$0xf] %vm389_vm3, %v465_v38  ;;  %v463_v46 = vpack.c.bf16 %v313_v1, %v313_v1  ;;  %v316_v5 = vmul.f32 %v569_v2, %v699_v55 }
 0x109   :  { %v573_v6 = vpop.eup %572  ;;  %404 = vst.msk [vmem:[%s799_s3 + $0x38] sm:$0xf] %vm389_vm3, %v473_v45  ;;  %v471_v49 = vpack.c.bf16 %v321_v3, %v321_v3  ;;  %v276_v7 = vadd.f32 1.0, %v571_v4 }
 0x10a   :  { %v575_v8 = vpop.eup %574  ;;  %394 = vst.msk [vmem:[%s799_s3 + $0x10] sm:$0xf] %vm389_vm3, %v463_v46  ;;  %v466_v50 = vpack.c.bf16 %v316_v5, %v316_v5  ;;  %v266_v9 = vadd.f32 1.0, %v573_v6 }
 0x10b   :  { %402 = vst.msk [vmem:[%s799_s3 + $0x30] sm:$0xf] %vm389_vm3, %v471_v49  ;;  %576 = vrcp.f32 %v276_v7  ;;  %v274_v55 = vadd.f32 1.0, %v575_v8 }
 0x10c   :  { %397 = vst.msk [vmem:[%s799_s3 + $0x1c] sm:$0xf] %vm389_vm3, %v466_v50  ;;  %578 = vrcp.f32 %v266_v9 }
 0x10d   :  { %580 = vrcp.f32 %v274_v55 }
 0x115   :  { %v577_v10 = vpop.eup %576 }
 0x116   :  { %v579_v11 = vpop.eup %578  ;;  %v324_v12 = vmul.f32 %v577_v10, %v705_v14 }
 0x117   :  { %v581_v13 = vpop.eup %580  ;;  %v314_v15 = vmul.f32 %v579_v11, %v708_v17 }
 0x118   :  { %v474_v16 = vpack.c.bf16 %v324_v12, %v324_v12  ;;  %v322_v19 = vmul.f32 %v581_v13, %v711_v23 }
 0x119   :  { %v464_v20 = vpack.c.bf16 %v314_v15, %v314_v15 }
 0x11a   :  { %405 = vst.msk [vmem:[%s799_s3 + $0x3c] sm:$0xf] %vm389_vm3, %v474_v16  ;;  %v472_v24 = vpack.c.bf16 %v322_v19, %v322_v19 }
 0x11b   :  { %395 = vst.msk [vmem:[%s799_s3 + $0x14] sm:$0xf] %vm389_vm3, %v464_v20 }
 0x11c   :  { %403 = vst.msk [vmem:[%s799_s3 + $0x34] sm:$0xf] %vm389_vm3, %v472_v24 }

// kernel: vitaev2_vsa_forward.28
= control target key start
LH: loop header
LB: loop body
LE: loop exit
PB: predicated region body
PF: predicated region fallthrough
CT: control target
= control target key end

     0   :  { %v240_v0 = vmov 0   ;;  %vm71_vm0 = vcmask 130048   ;;  %vm171_vm1 = vcmask 125952   ;;  %s360_s1 = inlined_call_operand.vmem [shape: f32[144,16], index: 1, kind: input, shape index: {}]   ;;  %s361_s0 = inlined_call_operand.vmem [shape: bf16[32,144], index: 0, kind: input, shape index: {}]   ;;  %s362_s2 = inlined_call_operand.vmem [shape: f32[1,16], index: 2, kind: input, shape index: {}]   ;;  %s363_s3 = inlined_call_operand.vmem [shape: bf16[32,16], index: 3, kind: output, shape index: {}]  }
   0x1   :  { %78 = vmatprep.subr.bf16.mxu0 %v240_v0  ;;  %199 = vmatprep.subr.bf16.mxu1 %v240_v0  ;;  %v19_v1 = vld [vmem:[%s360_s1] sm:$0xff]  ;;  %v20_v2 = vld [vmem:[%s360_s1 + $0x8] sm:$0xff]  ;;  %v21_v3 = vld [vmem:[%s360_s1 + $0x10] sm:$0xff] }
   0x2   :  { %v37_v4 = vpack.c.bf16 %v20_v2, %v19_v1  ;;  %v22_v5 = vld [vmem:[%s360_s1 + $0x18] sm:$0xff]  ;;  %v23_v7 = vld [vmem:[%s360_s1 + $0x20] sm:$0xff]  ;;  %v24_v8 = vld [vmem:[%s360_s1 + $0x28] sm:$0xff] }
   0x3   :  { %v38_v6 = vpack.c.bf16 %v22_v5, %v21_v3  ;;  %v39_v9 = vpack.c.bf16 %v24_v8, %v23_v7  ;;  %v220_v10 = vld [vmem:[%s361_s0 + $0x4] ss:$8 sps:$4 sm:$0xff]   ;;  %v25_v11 = vld [vmem:[%s360_s1 + $0x30] sm:$0xff]  ;;  %v26_v12 = vld [vmem:[%s360_s1 + $0x38] sm:$0xff] }
   0x4   :  { %79 = vmatpush1.bf16.msra.mxu0 %v37_v4  ;;  %208 = vmatpush1.bf16.msra.mxu1 %v37_v4  ;;  %v223_v13 = vld [vmem:[%s361_s0 + $0x14] ss:$8 sps:$4 sm:$0xff]   ;;  %v40_v14 = vpack.c.bf16 %v26_v12, %v25_v11  ;;  %v27_v15 = vld [vmem:[%s360_s1 + $0x40] sm:$0xff]  ;;  %v28_v16 = vld [vmem:[%s360_s1 + $0x48] sm:$0xff] }
   0x5   :  { %80 = vmatprep.subr.bf16.mxu0 %v240_v0  ;;  %200 = vmatprep.subr.bf16.mxu1 %v240_v0  ;;  %v41_v17 = vpack.c.bf16 %v28_v16, %v27_v15  ;;  %v29_v18 = vld [vmem:[%s360_s1 + $0x50] sm:$0xff]  ;;  %v30_v19 = vld [vmem:[%s360_s1 + $0x58] sm:$0xff]  ;;  %v31_v21 = vld [vmem:[%s360_s1 + $0x60] sm:$0xff] }
   0x6   :  { %185 = vmatprep.mubr.msk.bf16.mxu0 %vm71_vm0, %v220_v10  ;;  %186 = vmatprep.mubr.msk.bf16.mxu1 %vm71_vm0, %v223_v13  ;;  %v42_v20 = vpack.c.bf16 %v30_v19, %v29_v18  ;;  %v32_v22 = vld [vmem:[%s360_s1 + $0x68] sm:$0xff]  ;;  %v33_v24 = vld [vmem:[%s360_s1 + $0x70] sm:$0xff]  ;;  %v34_v25 = vld [vmem:[%s360_s1 + $0x78] sm:$0xff] }
   0x7   :  { %v43_v23 = vpack.c.bf16 %v32_v22, %v31_v21  ;;  %v44_v26 = vpack.c.bf16 %v34_v25, %v33_v24  ;;  %v35_v27 = vld [vmem:[%s360_s1 + $0x80] sm:$0xff]  ;;  %v36_v28 = vld [vmem:[%s360_s1 + $0x88] sm:$0xff]  ;;  %v221_v31 = vld [vmem:[%s361_s0 + $0x10] ss:$8 sps:$4 sm:$0xff]  }
   0x8   :  { %81 = vmatpush1.bf16.msra.mxu0 %v38_v6  ;;  %209 = vmatpush1.bf16.msra.mxu1 %v38_v6  ;;  %v45_v29 = vpack.c.bf16 %v36_v28, %v35_v27  ;;  %v218_v30 = vld [vmem:[%s361_s0] ss:$8 sps:$4 sm:$0xff]  }
   0x9   :  { %82 = vmatprep.subr.bf16.mxu0 %v240_v0  ;;  %201 = vmatprep.subr.bf16.mxu1 %v240_v0  ;;  %v180_v32 = vld [vmem:[%s362_s2] ss:$0 sm:$0xff] }
   0xc   :  { %83 = vmatpush1.bf16.msra.mxu0 %v39_v9  ;;  %210 = vmatpush1.bf16.msra.mxu1 %v39_v9 }
   0xd   :  { %84 = vmatprep.subr.bf16.mxu0 %v240_v0  ;;  %202 = vmatprep.subr.bf16.mxu1 %v240_v0 }
  0x10   :  { %85 = vmatpush1.bf16.msra.mxu0 %v40_v14  ;;  %211 = vmatpush1.bf16.msra.mxu1 %v40_v14 }
  0x11   :  { %86 = vmatprep.subr.bf16.mxu0 %v240_v0  ;;  %203 = vmatprep.subr.bf16.mxu1 %v240_v0 }
  0x14   :  { %87 = vmatpush1.bf16.msra.mxu0 %v41_v17  ;;  %212 = vmatpush1.bf16.msra.mxu1 %v41_v17 }
  0x15   :  { %88 = vmatprep.subr.bf16.mxu0 %v240_v0  ;;  %204 = vmatprep.subr.bf16.mxu1 %v240_v0 }
  0x18   :  { %89 = vmatpush1.bf16.msra.mxu0 %v42_v20  ;;  %213 = vmatpush1.bf16.msra.mxu1 %v42_v20 }
  0x19   :  { %90 = vmatprep.subr.bf16.mxu0 %v240_v0  ;;  %205 = vmatprep.subr.bf16.mxu1 %v240_v0 }
  0x1c   :  { %91 = vmatpush1.bf16.msra.mxu0 %v43_v23  ;;  %214 = vmatpush1.bf16.msra.mxu1 %v43_v23 }
  0x1d   :  { %92 = vmatprep.subr.bf16.mxu0 %v240_v0  ;;  %206 = vmatprep.subr.bf16.mxu1 %v240_v0 }
  0x20   :  { %93 = vmatpush1.bf16.msra.mxu0 %v44_v26  ;;  %215 = vmatpush1.bf16.msra.mxu1 %v44_v26 }
  0x21   :  { %94 = vmatprep.subr.bf16.mxu0 %v240_v0  ;;  %207 = vmatprep.subr.bf16.mxu1 %v240_v0 }
  0x24   :  { %95 = vmatpush1.bf16.msra.mxu0 %v45_v29  ;;  %216 = vmatpush1.bf16.msra.mxu1 %v45_v29 }
  0x27   :  { %111 = vmatmul.mubr.bf16.vlgmr.msra.gmra.mrb[0].mxu0 %v218_v30  ;;  %119 = vmatmul.mubr.bf16.vlgmr.msra.gmra.mrb[0].mxu1 %v221_v31 }
  0xfa   :  { %v112_v33 = vpop.f32.mrb[0].mxu0  ;;  %v120_v34 = vpop.f32.mrb[0].mxu1 }
  0xfb   :  { %v113_v35 = vadd.f32 %v180_v32, %v112_v33  ;;  %v121_v36 = vadd.f32 %v180_v32, %v120_v34  ;;  %v114_v37 = vpop.f32.mrb[1].mxu0  ;;  %v122_v38 = vpop.f32.mrb[1].mxu1 }
  0xfc   :  { %v115_v39 = vpop.f32.mrb[2].mxu0  ;;  %v123_v40 = vpop.f32.mrb[2].mxu1 }
  0xfd   :  { %v187_v41 = vmul.f32 -1.442695, %v113_v35  ;;  %v189_v42 = vmul.f32 -1.442695, %v121_v36  ;;  %v116_v43 = vadd.f32 %v180_v32, %v115_v39  ;;  %v124_v44 = vadd.f32 %v180_v32, %v123_v40  ;;  %v117_v45 = vpop.f32.mrb[3].mxu0  ;;  %v125_v46 = vpop.f32.mrb[3].mxu1 }
  0xff   :  { %224 = vpow2.f32 %v187_v41  ;;  %v188_v47 = vmul.f32 -1.442695, %v116_v43  ;;  %v190_v48 = vmul.f32 -1.442695, %v124_v44 }
 0x100   :  { %226 = vpow2.f32 %v189_v42 }
 0x101   :  { %228 = vpow2.f32 %v188_v47 }
 0x102   :  { %230 = vpow2.f32 %v190_v48 }
 0x109   :  { %v225_v49 = vpop.eup %224 }
 0x10a   :  { %v227_v50 = vpop.eup %226  ;;  %v139_v51 = vadd.f32 1.0, %v225_v49 }
 0x10b   :  { %v229_v52 = vpop.eup %228  ;;  %v141_v53 = vadd.f32 1.0, %v227_v50 }
 0x10c   :  { %v231_v54 = vpop.eup %230  ;;  %232 = vrcp.f32 %v139_v51  ;;  %v140_v55 = vadd.f32 1.0, %v229_v52 }
 0x10d   :  { %234 = vrcp.f32 %v141_v53  ;;  %v142_v56 = vadd.f32 1.0, %v231_v54 }
 0x10e   :  { %236 = vrcp.f32 %v140_v55 }
 0x10f   :  { %238 = vrcp.f32 %v142_v56 }
 0x116   :  { %v233_v57 = vpop.eup %232 }
 0x117   :  { %v235_v58 = vpop.eup %234  ;;  %v151_v59 = vmul.f32 %v233_v57, %v113_v35 }
 0x118   :  { %v237_v60 = vpop.eup %236  ;;  %v153_v61 = vmul.f32 %v235_v58, %v121_v36 }
 0x119   :  { %v239_v62 = vpop.eup %238  ;;  %v195_v63 = vpack.c.bf16 %v151_v59, %v151_v59  ;;  %v152_v0 = vmul.f32 %v237_v60, %v116_v43 }
 0x11a   :  { %v197_v1 = vpack.c.bf16 %v153_v61, %v153_v61  ;;  %v154_v2 = vmul.f32 %v239_v62, %v124_v44 }
 0x11b   :  { %172 = vst.msk [vmem:[%s363_s3] sm:$0xf] %vm171_vm1, %v195_v63  ;;  %v196_v3 = vpack.c.bf16 %v152_v0, %v152_v0 }
 0x11c   :  { %174 = vst.msk [vmem:[%s363_s3 + $0x8] sm:$0xf] %vm171_vm1, %v197_v1  ;;  %v198_v4 = vpack.c.bf16 %v154_v2, %v154_v2 }
 0x11d   :  { %173 = vst.msk [vmem:[%s363_s3 + $0x4] sm:$0xf] %vm171_vm1, %v196_v3 }
 0x11e   :  { %175 = vst.msk [vmem:[%s363_s3 + $0xc] sm:$0xf] %vm171_vm1, %v198_v4 }

// kernel: vitaev2_vsa_forward.26
= control target key start
LH: loop header
LB: loop body
LE: loop exit
PB: predicated region body
PF: predicated region fallthrough
CT: control target
= control target key end

     0   :  { %vm195_vm0 = vcmask 621568   ;;  %vm202_vm1 = vcmask 1045504   ;;  %vm405_vm2 = vcmask 519168   ;;  %s822_s1 = inlined_call_operand.vmem [shape: f32[588,64], index: 1, kind: input, shape index: {}]   ;;  %s823_s0 = inlined_call_operand.vmem [shape: bf16[32,588], index: 0, kind: input, shape index: {}]   ;;  %s824_s2 = inlined_call_operand.vmem [shape: f32[1,64], index: 2, kind: input, shape index: {}]   ;;  %s825_s3 = inlined_call_operand.vmem [shape: bf16[32,64], index: 3, kind: output, shape index: {}]  }
   0x1   :  { %v43_v0 = vld [vmem:[%s822_s1 + $0x80] sm:$0xff]  ;;  %v44_v1 = vld [vmem:[%s822_s1 + $0x88] sm:$0xff]  ;;  %v45_v11 = vld [vmem:[%s822_s1 + $0x90] sm:$0xff] }
   0x2   :  { %v27_v2 = vld [vmem:[%s822_s1] sm:$0xff]  ;;  %v109_v3 = vpack.c.bf16 %v44_v1, %v43_v0  ;;  %v28_v4 = vld [vmem:[%s822_s1 + $0x8] sm:$0xff]  ;;  %v46_v13 = vld [vmem:[%s822_s1 + $0x98] sm:$0xff] }
   0x3   :  { %v75_v5 = vld [vmem:[%s822_s1 + $0x180] sm:$0xff]  ;;  %v76_v6 = vld [vmem:[%s822_s1 + $0x188] sm:$0xff]  ;;  %v101_v7 = vpack.c.bf16 %v28_v4, %v27_v2  ;;  %v29_v14 = vld [vmem:[%s822_s1 + $0x10] sm:$0xff]  ;;  %v110_v16 = vpack.c.bf16 %v46_v13, %v45_v11 }
   0x4   :  { %v125_v8 = vpack.c.bf16 %v76_v6, %v75_v5  ;;  %v59_v9 = vld [vmem:[%s822_s1 + $0x100] sm:$0xff]  ;;  %v60_v10 = vld [vmem:[%s822_s1 + $0x108] sm:$0xff]  ;;  %435 = vmatprep.subr.bf16.mxu0 %v109_v3  ;;  %v30_v15 = vld [vmem:[%s822_s1 + $0x18] sm:$0xff] }
   0x5   :  { %v117_v12 = vpack.c.bf16 %v60_v10, %v59_v9  ;;  %436 = vmatpush3.bf16.msra.mxu0 %v101_v7  ;;  %v102_v17 = vpack.c.bf16 %v30_v15, %v29_v14  ;;  %v77_v18 = vld [vmem:[%s822_s1 + $0x190] sm:$0xff]  ;;  %v78_v19 = vld [vmem:[%s822_s1 + $0x198] sm:$0xff]  ;;  %v47_v23 = vld [vmem:[%s822_s1 + $0xa0] sm:$0xff] }
   0x6   :  { %463 = vmatprep.subr.bf16.mxu1 %v125_v8  ;;  %v61_v20 = vld [vmem:[%s822_s1 + $0x110] sm:$0xff]  ;;  %v126_v21 = vpack.c.bf16 %v78_v19, %v77_v18  ;;  %v62_v22 = vld [vmem:[%s822_s1 + $0x118] sm:$0xff]  ;;  %v48_v24 = vld [vmem:[%s822_s1 + $0xa8] sm:$0xff]  ;;  %437 = vmatprep.subr.bf16.mxu0 %v110_v16 }
   0x7   :  { %464 = vmatpush3.bf16.msra.mxu1 %v117_v12  ;;  %v118_v25 = vpack.c.bf16 %v62_v22, %v61_v20  ;;  %v111_v26 = vpack.c.bf16 %v48_v24, %v47_v23  ;;  %v31_v27 = vld [vmem:[%s822_s1 + $0x20] sm:$0xff]  ;;  %v32_v28 = vld [vmem:[%s822_s1 + $0x28] sm:$0xff]  ;;  %v49_v35 = vld [vmem:[%s822_s1 + $0xb0] sm:$0xff] }
   0x8   :  { %v79_v29 = vld [vmem:[%s822_s1 + $0x1a0] sm:$0xff]  ;;  %465 = vmatprep.subr.bf16.mxu1 %v126_v21  ;;  %v80_v30 = vld [vmem:[%s822_s1 + $0x1a8] sm:$0xff]  ;;  %v103_v33 = vpack.c.bf16 %v32_v28, %v31_v27  ;;  %v50_v36 = vld [vmem:[%s822_s1 + $0xb8] sm:$0xff] }
   0x9   :  { %v63_v31 = vld [vmem:[%s822_s1 + $0x120] sm:$0xff]  ;;  %v64_v32 = vld [vmem:[%s822_s1 + $0x128] sm:$0xff]  ;;  %438 = vmatpush3.bf16.msra.mxu0 %v102_v17  ;;  %v127_v34 = vpack.c.bf16 %v80_v30, %v79_v29  ;;  %v33_v37 = vld [vmem:[%s822_s1 + $0x30] sm:$0xff]  ;;  %v112_v39 = vpack.c.bf16 %v50_v36, %v49_v35 }
   0xa   :  { %439 = vmatprep.subr.bf16.mxu0 %v111_v26  ;;  %v119_v38 = vpack.c.bf16 %v64_v32, %v63_v31  ;;  %v34_v40 = vld [vmem:[%s822_s1 + $0x38] sm:$0xff]  ;;  %v81_v41 = vld [vmem:[%s822_s1 + $0x1b0] sm:$0xff]  ;;  %v51_v46 = vld [vmem:[%s822_s1 + $0xc0] sm:$0xff] }
   0xb   :  { %466 = vmatpush3.bf16.msra.mxu1 %v118_v25  ;;  %v82_v42 = vld [vmem:[%s822_s1 + $0x1b8] sm:$0xff]  ;;  %v65_v44 = vld [vmem:[%s822_s1 + $0x130] sm:$0xff]  ;;  %v52_v47 = vld [vmem:[%s822_s1 + $0xc8] sm:$0xff]  ;;  %v104_v48 = vpack.c.bf16 %v34_v40, %v33_v37 }
   0xc   :  { %467 = vmatprep.subr.bf16.mxu1 %v127_v34  ;;  %v128_v43 = vpack.c.bf16 %v82_v42, %v81_v41  ;;  %v66_v45 = vld [vmem:[%s822_s1 + $0x138] sm:$0xff]  ;;  %v83_v49 = vld [vmem:[%s822_s1 + $0x1c0] sm:$0xff]  ;;  %v84_v50 = vld [vmem:[%s822_s1 + $0x1c8] sm:$0xff]  ;;  %v113_v52 = vpack.c.bf16 %v52_v47, %v51_v46 }
   0xd   :  { %440 = vmatpush3.bf16.msra.mxu0 %v103_v33  ;;  %v120_v51 = vpack.c.bf16 %v66_v45, %v65_v44  ;;  %v35_v53 = vld [vmem:[%s822_s1 + $0x40] sm:$0xff]  ;;  %v36_v54 = vld [vmem:[%s822_s1 + $0x48] sm:$0xff]  ;;  %v129_v56 = vpack.c.bf16 %v84_v50, %v83_v49  ;;  %v53_v58 = vld [vmem:[%s822_s1 + $0xd0] sm:$0xff] }
   0xe   :  { %441 = vmatprep.subr.bf16.mxu0 %v112_v39  ;;  %v67_v55 = vld [vmem:[%s822_s1 + $0x140] sm:$0xff]  ;;  %v68_v57 = vld [vmem:[%s822_s1 + $0x148] sm:$0xff]  ;;  %v54_v59 = vld [vmem:[%s822_s1 + $0xd8] sm:$0xff]  ;;  %v105_v62 = vpack.c.bf16 %v36_v54, %v35_v53 }
   0xf   :  { %468 = vmatpush3.bf16.msra.mxu1 %v119_v38  ;;  %v85_v60 = vld [vmem:[%s822_s1 + $0x1d0] sm:$0xff]  ;;  %v86_v61 = vld [vmem:[%s822_s1 + $0x1d8] sm:$0xff]  ;;  %v121_v63 = vpack.c.bf16 %v68_v57, %v67_v55  ;;  %v114_v0 = vpack.c.bf16 %v54_v59, %v53_v58  ;;  %v55_v6 = vld [vmem:[%s822_s1 + $0xe0] sm:$0xff] }
  0x10   :  { %469 = vmatprep.subr.bf16.mxu1 %v128_v43  ;;  %v37_v1 = vld [vmem:[%s822_s1 + $0x50] sm:$0xff]  ;;  %v38_v2 = vld [vmem:[%s822_s1 + $0x58] sm:$0xff]  ;;  %v130_v4 = vpack.c.bf16 %v86_v61, %v85_v60  ;;  %v56_v7 = vld [vmem:[%s822_s1 + $0xe8] sm:$0xff] }
  0x11   :  { %442 = vmatpush3.bf16.msra.mxu0 %v104_v48  ;;  %v69_v3 = vld [vmem:[%s822_s1 + $0x150] sm:$0xff]  ;;  %v70_v5 = vld [vmem:[%s822_s1 + $0x158] sm:$0xff]  ;;  %v39_v8 = vld [vmem:[%s822_s1 + $0x60] sm:$0xff]  ;;  %v106_v11 = vpack.c.bf16 %v38_v2, %v37_v1  ;;  %v115_v15 = vpack.c.bf16 %v56_v7, %v55_v6 }
  0x12   :  { %443 = vmatprep.subr.bf16.mxu0 %v113_v52  ;;  %v87_v9 = vld [vmem:[%s822_s1 + $0x1e0] sm:$0xff]  ;;  %v88_v10 = vld [vmem:[%s822_s1 + $0x1e8] sm:$0xff]  ;;  %v122_v14 = vpack.c.bf16 %v70_v5, %v69_v3  ;;  %v57_v19 = vld [vmem:[%s822_s1 + $0xf0] sm:$0xff] }
  0x13   :  { %470 = vmatpush3.bf16.msra.mxu1 %v120_v51  ;;  %v40_v12 = vld [vmem:[%s822_s1 + $0x68] sm:$0xff]  ;;  %v71_v13 = vld [vmem:[%s822_s1 + $0x160] sm:$0xff]  ;;  %v131_v18 = vpack.c.bf16 %v88_v10, %v87_v9  ;;  %v58_v20 = vld [vmem:[%s822_s1 + $0xf8] sm:$0xff] }
  0x14   :  { %471 = vmatprep.subr.bf16.mxu1 %v129_v56  ;;  %v72_v16 = vld [vmem:[%s822_s1 + $0x168] sm:$0xff]  ;;  %v515_v17 = vld [vmem:[%s823_s0 + $0x4] ss:$20 sps:$4 sm:$0xff]   ;;  %v89_v21 = vld [vmem:[%s822_s1 + $0x1f0] sm:$0xff]  ;;  %v107_v23 = vpack.c.bf16 %v40_v12, %v39_v8  ;;  %v116_v28 = vpack.c.bf16 %v58_v20, %v57_v19 }
  0x15   :  { %444 = vmatpush3.bf16.msra.mxu0 %v105_v62  ;;  %v90_v22 = vld [vmem:[%s822_s1 + $0x1f8] sm:$0xff]  ;;  %238 = vmatprep.mubr.bf16.mxu0 %v515_v17  ;;  %v41_v24 = vld [vmem:[%s822_s1 + $0x70] sm:$0xff]  ;;  %v518_v26 = vld [vmem:[%s823_s0 + $0xc] ss:$20 sps:$4 sm:$0xff]   ;;  %v123_v27 = vpack.c.bf16 %v72_v16, %v71_v13 }
  0x16   :  { %445 = vmatprep.subr.bf16.mxu0 %v114_v0  ;;  %v42_v25 = vld [vmem:[%s822_s1 + $0x78] sm:$0xff]  ;;  %v73_v29 = vld [vmem:[%s822_s1 + $0x170] sm:$0xff]  ;;  %v132_v30 = vpack.c.bf16 %v90_v22, %v89_v21  ;;  %v91_v32 = vld [vmem:[%s822_s1 + $0x200] sm:$0xff]  ;;  %287 = vmatprep.mubr.bf16.mxu1 %v518_v26 }
  0x17   :  { %472 = vmatpush3.bf16.msra.mxu1 %v121_v63  ;;  %v74_v31 = vld [vmem:[%s822_s1 + $0x178] sm:$0xff]  ;;  %v92_v33 = vld [vmem:[%s822_s1 + $0x208] sm:$0xff]  ;;  %v108_v34 = vpack.c.bf16 %v42_v25, %v41_v24  ;;  %v93_v37 = vld [vmem:[%s822_s1 + $0x210] sm:$0xff] }
  0x18   :  { %473 = vmatprep.subr.bf16.mxu1 %v130_v4  ;;  %v124_v35 = vpack.c.bf16 %v74_v31, %v73_v29  ;;  %v133_v36 = vpack.c.bf16 %v92_v33, %v91_v32  ;;  %v94_v38 = vld [vmem:[%s822_s1 + $0x218] sm:$0xff]  ;;  %v513_v39 = vld [vmem:[%s823_s0] ss:$20 sps:$4 sm:$0xff]   ;;  %v96_v44 = vld [vmem:[%s822_s1 + $0x228] sm:$0xff] }
  0x19   :  { %446 = vmatpush3.bf16.msra.mxu0 %v106_v11  ;;  %v516_v40 = vld [vmem:[%s823_s0 + $0x8] ss:$20 sps:$4 sm:$0xff]   ;;  %v134_v41 = vpack.c.bf16 %v94_v38, %v93_v37  ;;  %v519_v42 = vld [vmem:[%s823_s0 + $0x2c] ss:$20 sps:$4 sm:$0xff]   ;;  %v97_v47 = vld [vmem:[%s822_s1 + $0x230] sm:$0xff] }
  0x1a   :  { %447 = vmatprep.subr.bf16.mxu0 %v115_v15  ;;  %v95_v43 = vld [vmem:[%s822_s1 + $0x220] sm:$0xff]  ;;  %v522_v45 = vld [vmem:[%s823_s0 + $0x34] ss:$20 sps:$4 sm:$0xff]   ;;  %v98_v48 = vld [vmem:[%s822_s1 + $0x238] sm:$0xff] }
  0x1b   :  { %474 = vmatpush3.bf16.msra.mxu1 %v122_v14  ;;  %v135_v46 = vpack.c.bf16 %v96_v44, %v95_v43  ;;  %v521_v49 = vld [vmem:[%s823_s0 + $0x28] ss:$20 sps:$4 sm:$0xff]   ;;  %v524_v50 = vld [vmem:[%s823_s0 + $0x30] ss:$20 sps:$4 sm:$0xff]   ;;  %v136_v51 = vpack.c.bf16 %v98_v48, %v97_v47  ;;  %v526_v57 = vld [vmem:[%s823_s0 + $0x38] ss:$20 sps:$4 sm:$0xff]  }
  0x1c   :  { %475 = vmatprep.subr.bf16.mxu1 %v131_v18  ;;  %v525_v52 = vld [vmem:[%s823_s0 + $0x10] ss:$20 sps:$4 sm:$0xff]   ;;  %v100_v54 = vld [vmem:[%s822_s1 + $0x248] sm:$0xf]  ;;  %v414_v59 = vld [vmem:[%s824_s2] ss:$0 sm:$0xff] }
  0x1d   :  { %448 = vmatpush3.bf16.msra.mxu0 %v107_v23  ;;  %v99_v53 = vld [vmem:[%s822_s1 + $0x240] sm:$0xff] }
  0x1e   :  { %449 = vmatprep.subr.bf16.mxu0 %v116_v28  ;;  %v137_v55 = vpack.c.bf16 %v100_v54, %v99_v53 }
  0x1f   :  { %476 = vmatpush3.bf16.msra.mxu1 %v123_v27 }
  0x20   :  { %477 = vmatprep.subr.bf16.mxu1 %v132_v30  ;;  %v204_v56 = vsel %vm202_vm1, %v137_v55, 0 }
  0x21   :  { %450 = vmatpush3.bf16.msra.mxu0 %v108_v34 }
  0x22   :  { %498 = vmatprep.subr.bf16.mxu0 %v133_v36 }
  0x23   :  { %478 = vmatpush3.bf16.msra.mxu1 %v124_v35 }
  0x24   :  { %239 = vmatmul.mubr.bf16.vlgmr.msra.gmra.mrb[0].mxu0 %v513_v39 }
  0x25   :  { %499 = vmatpush3.bf16.msra.mxu0 %v133_v36  ;;  %246 = vmatprep.mubr.bf16.mxu0 %v519_v42 }
  0x26   :  { %288 = vmatmul.mubr.bf16.vlgmr.msra.gmra.mrb[0].mxu1 %v516_v40  ;;  %500 = vmatprep.subr.bf16.mxu0 %v134_v41 }
  0x27   :  { %295 = vmatprep.mubr.bf16.mxu1 %v522_v45 }
  0x29   :  { %501 = vmatpush3.bf16.msra.mxu0 %v134_v41 }
  0x2a   :  { %502 = vmatprep.subr.bf16.mxu0 %v135_v46 }
  0x2c   :  { %247 = vmatmul.mubr.bf16.gmra.mrb[4].mxu0 %v521_v49 }
  0x2d   :  { %503 = vmatpush3.bf16.msra.mxu0 %v135_v46  ;;  %508 = vmatprep.mubr.msk.bf16.mxu0 %vm195_vm0, %v525_v52 }
  0x2e   :  { %296 = vmatmul.mubr.bf16.gmra.mrb[4].mxu1 %v524_v50  ;;  %504 = vmatprep.subr.bf16.mxu0 %v136_v51 }
  0x31   :  { %505 = vmatpush3.bf16.msra.mxu0 %v136_v51 }
  0x32   :  { %512 = vmatprep.subr.msk.bf16.mxu0 %vm202_vm1, %v137_v55 }
  0x35   :  { %507 = vmatpush3.bf16.msra.mxu0 %v204_v56 }
  0x38   :  { %509 = vmatmul.mubr.msk.bf16.vlgmr.msra.gmra.mrb[8].mxu0 %vm195_vm0, %v526_v57 }
  0xf7   :  { %v451_v58 = vpop.f32.mrb[0].mxu0 }
  0xf8   :  { %v452_v60 = vpop.f32.mrb[1].mxu0 }
  0xf9   :  { %v479_v61 = vpop.f32.mrb[0].mxu1  ;;  %v453_v62 = vadd.f32 %v452_v60, %v451_v58  ;;  %v454_v63 = vpop.f32.mrb[2].mxu0 }
  0xfa   :  { %v480_v0 = vpop.f32.mrb[1].mxu1  ;;  %v455_v1 = vpop.f32.mrb[3].mxu0 }
  0xfb   :  { %v481_v2 = vadd.f32 %v480_v0, %v479_v61  ;;  %v482_v3 = vpop.f32.mrb[2].mxu1  ;;  %v241_v4 = vadd.f32 %v453_v62, %v414_v59  ;;  %v456_v5 = vadd.f32 %v455_v1, %v454_v63 }
  0xfc   :  { %v483_v6 = vpop.f32.mrb[3].mxu1 }
  0xfd   :  { %v484_v7 = vadd.f32 %v483_v6, %v482_v3  ;;  %v244_v8 = vadd.f32 %v456_v5, %v414_v59  ;;  %v290_v9 = vadd.f32 %v481_v2, %v241_v4 }
  0xff   :  { %v457_v10 = vpop.f32.mrb[4].mxu0  ;;  %v293_v11 = vadd.f32 %v484_v7, %v244_v8 }
 0x100   :  { %v458_v12 = vpop.f32.mrb[5].mxu0 }
 0x101   :  { %v485_v13 = vpop.f32.mrb[4].mxu1  ;;  %v459_v14 = vadd.f32 %v458_v12, %v457_v10  ;;  %v460_v15 = vpop.f32.mrb[6].mxu0 }
 0x102   :  { %v486_v16 = vpop.f32.mrb[5].mxu1  ;;  %v461_v17 = vpop.f32.mrb[7].mxu0 }
 0x103   :  { %v487_v18 = vadd.f32 %v486_v16, %v485_v13  ;;  %v488_v19 = vpop.f32.mrb[6].mxu1  ;;  %v249_v20 = vadd.f32 %v459_v14, %v414_v59  ;;  %v462_v21 = vadd.f32 %v461_v17, %v460_v15 }
 0x104   :  { %v489_v22 = vpop.f32.mrb[7].mxu1 }
 0x105   :  { %v490_v23 = vadd.f32 %v489_v22, %v488_v19  ;;  %v252_v24 = vadd.f32 %v462_v21, %v414_v59  ;;  %v298_v25 = vadd.f32 %v487_v18, %v249_v20 }
 0x107   :  { %v301_v26 = vadd.f32 %v490_v23, %v252_v24 }
 0x10b   :  { %v510_v27 = vpop.f32.mrb[8].mxu0 }
 0x10c   :  { %v347_v28 = vadd.f32 %v510_v27, %v298_v25  ;;  %v338_v29 = vpop.f32.mrb[9].mxu0 }
 0x10d   :  { %v339_v30 = vadd.f32 %v338_v29, %v290_v9  ;;  %v511_v31 = vpop.f32.mrb[10].mxu0 }
 0x10e   :  { %v355_v32 = vmul.f32 %v347_v28, %v347_v28  ;;  %v350_v33 = vadd.f32 %v511_v31, %v301_v26  ;;  %v341_v34 = vpop.f32.mrb[11].mxu0 }
 0x10f   :  { %v353_v35 = vmul.f32 %v339_v30, %v339_v30  ;;  %v342_v36 = vadd.f32 %v341_v34, %v293_v11 }
 0x110   :  { %v359_v37 = vmul.f32 %v355_v32, %v347_v28  ;;  %v356_v38 = vmul.f32 %v350_v33, %v350_v33 }
 0x111   :  { %v357_v39 = vmul.f32 %v353_v35, %v339_v30  ;;  %v354_v40 = vmul.f32 %v342_v36, %v342_v36 }
 0x112   :  { %v363_v41 = vmul.f32 0.044715, %v359_v37  ;;  %v360_v42 = vmul.f32 %v356_v38, %v350_v33 }
 0x113   :  { %v361_v43 = vmul.f32 0.044715, %v357_v39  ;;  %v358_v44 = vmul.f32 %v354_v40, %v342_v36 }
 0x114   :  { %v367_v45 = vadd.f32 %v363_v41, %v347_v28  ;;  %v364_v46 = vmul.f32 0.044715, %v360_v42 }
 0x115   :  { %v365_v47 = vadd.f32 %v361_v43, %v339_v30  ;;  %v362_v48 = vmul.f32 0.044715, %v358_v44 }
 0x116   :  { %v371_v49 = vmul.f32 0.7978846, %v367_v45  ;;  %v368_v50 = vadd.f32 %v364_v46, %v350_v33 }
 0x117   :  { %v369_v51 = vmul.f32 0.7978846, %v365_v47  ;;  %v366_v52 = vadd.f32 %v362_v48, %v342_v36 }
 0x118   :  { %527 = vtanh.f32 %v371_v49  ;;  %v372_v53 = vmul.f32 0.7978846, %v368_v50 }
 0x119   :  { %529 = vtanh.f32 %v369_v51  ;;  %v370_v54 = vmul.f32 0.7978846, %v366_v52 }
 0x11a   :  { %531 = vtanh.f32 %v372_v53 }
 0x11b   :  { %533 = vtanh.f32 %v370_v54 }
 0x122   :  { %v528_v55 = vpop.eup %527 }
 0x123   :  { %v530_v56 = vpop.eup %529  ;;  %v379_v57 = vadd.f32 1.0, %v528_v55 }
 0x124   :  { %v532_v58 = vpop.eup %531  ;;  %v377_v59 = vadd.f32 1.0, %v530_v56 }
 0x125   :  { %v534_v60 = vpop.eup %533  ;;  %v383_v61 = vmul.f32 0.5, %v379_v57  ;;  %v380_v62 = vadd.f32 1.0, %v532_v58 }
 0x126   :  { %v381_v63 = vmul.f32 0.5, %v377_v59  ;;  %v378_v0 = vadd.f32 1.0, %v534_v60 }
 0x127   :  { %v387_v1 = vmul.f32 %v383_v61, %v347_v28  ;;  %v384_v2 = vmul.f32 0.5, %v380_v62 }
 0x128   :  { %v385_v3 = vmul.f32 %v381_v63, %v339_v30  ;;  %v382_v4 = vmul.f32 0.5, %v378_v0 }
 0x129   :  { %v433_v5 = vpack.c.bf16 %v387_v1, %v387_v1  ;;  %v388_v6 = vmul.f32 %v384_v2, %v350_v33 }
 0x12a   :  { %v431_v7 = vpack.c.bf16 %v385_v3, %v385_v3  ;;  %v386_v8 = vmul.f32 %v382_v4, %v342_v36 }
 0x12b   :  { %408 = vst.msk [vmem:[%s825_s3 + $0x8] sm:$0xf] %vm405_vm2, %v433_v5  ;;  %v434_v9 = vpack.c.bf16 %v388_v6, %v388_v6 }
 0x12c   :  { %406 = vst.msk [vmem:[%s825_s3] sm:$0xf] %vm405_vm2, %v431_v7  ;;  %v432_v10 = vpack.c.bf16 %v386_v8, %v386_v8 }
 0x12d   :  { %409 = vst.msk [vmem:[%s825_s3 + $0xc] sm:$0xf] %vm405_vm2, %v434_v9 }
 0x12e   :  { %407 = vst.msk [vmem:[%s825_s3 + $0x4] sm:$0xf] %vm405_vm2, %v432_v10 }

// kernel: vitaev2_vsa_forward.31
= control target key start
LH: loop header
LB: loop body
LE: loop exit
PB: predicated region body
PF: predicated region fallthrough
CT: control target
= control target key end

     0   :  { %v240_v0 = vmov 0   ;;  %vm71_vm0 = vcmask 130048   ;;  %vm171_vm1 = vcmask 519168   ;;  %s360_s1 = inlined_call_operand.vmem [shape: f32[144,64], index: 1, kind: input, shape index: {}]   ;;  %s361_s0 = inlined_call_operand.vmem [shape: bf16[32,144], index: 0, kind: input, shape index: {}]   ;;  %s362_s2 = inlined_call_operand.vmem [shape: f32[1,64], index: 2, kind: input, shape index: {}]   ;;  %s363_s3 = inlined_call_operand.vmem [shape: bf16[32,64], index: 3, kind: output, shape index: {}]  }
   0x1   :  { %78 = vmatprep.subr.bf16.mxu0 %v240_v0  ;;  %199 = vmatprep.subr.bf16.mxu1 %v240_v0  ;;  %v19_v1 = vld [vmem:[%s360_s1] sm:$0xff]  ;;  %v20_v2 = vld [vmem:[%s360_s1 + $0x8] sm:$0xff]  ;;  %v21_v3 = vld [vmem:[%s360_s1 + $0x10] sm:$0xff] }
   0x2   :  { %v37_v4 = vpack.c.bf16 %v20_v2, %v19_v1  ;;  %v22_v5 = vld [vmem:[%s360_s1 + $0x18] sm:$0xff]  ;;  %v23_v7 = vld [vmem:[%s360_s1 + $0x20] sm:$0xff]  ;;  %v24_v8 = vld [vmem:[%s360_s1 + $0x28] sm:$0xff] }
   0x3   :  { %v38_v6 = vpack.c.bf16 %v22_v5, %v21_v3  ;;  %v39_v9 = vpack.c.bf16 %v24_v8, %v23_v7  ;;  %v220_v10 = vld [vmem:[%s361_s0 + $0x4] ss:$8 sps:$4 sm:$0xff]   ;;  %v25_v11 = vld [vmem:[%s360_s1 + $0x30] sm:$0xff]  ;;  %v26_v12 = vld [vmem:[%s360_s1 + $0x38] sm:$0xff] }
   0x4   :  { %79 = vmatpush1.bf16.msra.mxu0 %v37_v4  ;;  %208 = vmatpush1.bf16.msra.mxu1 %v37_v4  ;;  %v223_v13 = vld [vmem:[%s361_s0 + $0x14] ss:$8 sps:$4 sm:$0xff]   ;;  %v40_v14 = vpack.c.bf16 %v26_v12, %v25_v11  ;;  %v27_v15 = vld [vmem:[%s360_s1 + $0x40] sm:$0xff]  ;;  %v28_v16 = vld [vmem:[%s360_s1 + $0x48] sm:$0xff] }
   0x5   :  { %80 = vmatprep.subr.bf16.mxu0 %v240_v0  ;;  %200 = vmatprep.subr.bf16.mxu1 %v240_v0  ;;  %v41_v17 = vpack.c.bf16 %v28_v16, %v27_v15  ;;  %v29_v18 = vld [vmem:[%s360_s1 + $0x50] sm:$0xff]  ;;  %v30_v19 = vld [vmem:[%s360_s1 + $0x58] sm:$0xff]  ;;  %v31_v21 = vld [vmem:[%s360_s1 + $0x60] sm:$0xff] }
   0x6   :  { %185 = vmatprep.mubr.msk.bf16.mxu0 %vm71_vm0, %v220_v10  ;;  %186 = vmatprep.mubr.msk.bf16.mxu1 %vm71_vm0, %v223_v13  ;;  %v42_v20 = vpack.c.bf16 %v30_v19, %v29_v18  ;;  %v32_v22 = vld [vmem:[%s360_s1 + $0x68] sm:$0xff]  ;;  %v33_v24 = vld [vmem:[%s360_s1 + $0x70] sm:$0xff]  ;;  %v34_v25 = vld [vmem:[%s360_s1 + $0x78] sm:$0xff] }
   0x7   :  { %v43_v23 = vpack.c.bf16 %v32_v22, %v31_v21  ;;  %v44_v26 = vpack.c.bf16 %v34_v25, %v33_v24  ;;  %v35_v27 = vld [vmem:[%s360_s1 + $0x80] sm:$0xff]  ;;  %v36_v28 = vld [vmem:[%s360_s1 + $0x88] sm:$0xff]  ;;  %v221_v31 = vld [vmem:[%s361_s0 + $0x10] ss:$8 sps:$4 sm:$0xff]  }
   0x8   :  { %81 = vmatpush1.bf16.msra.mxu0 %v38_v6  ;;  %209 = vmatpush1.bf16.msra.mxu1 %v38_v6  ;;  %v45_v29 = vpack.c.bf16 %v36_v28, %v35_v27  ;;  %v218_v30 = vld [vmem:[%s361_s0] ss:$8 sps:$4 sm:$0xff]  }
   0x9   :  { %82 = vmatprep.subr.bf16.mxu0 %v240_v0  ;;  %201 = vmatprep.subr.bf16.mxu1 %v240_v0  ;;  %v180_v32 = vld [vmem:[%s362_s2] ss:$0 sm:$0xff] }
   0xc   :  { %83 = vmatpush1.bf16.msra.mxu0 %v39_v9  ;;  %210 = vmatpush1.bf16.msra.mxu1 %v39_v9 }
   0xd   :  { %84 = vmatprep.subr.bf16.mxu0 %v240_v0  ;;  %202 = vmatprep.subr.bf16.mxu1 %v240_v0 }
  0x10   :  { %85 = vmatpush1.bf16.msra.mxu0 %v40_v14  ;;  %211 = vmatpush1.bf16.msra.mxu1 %v40_v14 }
  0x11   :  { %86 = vmatprep.subr.bf16.mxu0 %v240_v0  ;;  %203 = vmatprep.subr.bf16.mxu1 %v240_v0 }
  0x14   :  { %87 = vmatpush1.bf16.msra.mxu0 %v41_v17  ;;  %212 = vmatpush1.bf16.msra.mxu1 %v41_v17 }
  0x15   :  { %88 = vmatprep.subr.bf16.mxu0 %v240_v0  ;;  %204 = vmatprep.subr.bf16.mxu1 %v240_v0 }
  0x18   :  { %89 = vmatpush1.bf16.msra.mxu0 %v42_v20  ;;  %213 = vmatpush1.bf16.msra.mxu1 %v42_v20 }
  0x19   :  { %90 = vmatprep.subr.bf16.mxu0 %v240_v0  ;;  %205 = vmatprep.subr.bf16.mxu1 %v240_v0 }
  0x1c   :  { %91 = vmatpush1.bf16.msra.mxu0 %v43_v23  ;;  %214 = vmatpush1.bf16.msra.mxu1 %v43_v23 }
  0x1d   :  { %92 = vmatprep.subr.bf16.mxu0 %v240_v0  ;;  %206 = vmatprep.subr.bf16.mxu1 %v240_v0 }
  0x20   :  { %93 = vmatpush1.bf16.msra.mxu0 %v44_v26  ;;  %215 = vmatpush1.bf16.msra.mxu1 %v44_v26 }
  0x21   :  { %94 = vmatprep.subr.bf16.mxu0 %v240_v0  ;;  %207 = vmatprep.subr.bf16.mxu1 %v240_v0 }
  0x24   :  { %95 = vmatpush1.bf16.msra.mxu0 %v45_v29  ;;  %216 = vmatpush1.bf16.msra.mxu1 %v45_v29 }
  0x27   :  { %111 = vmatmul.mubr.bf16.vlgmr.msra.gmra.mrb[0].mxu0 %v218_v30  ;;  %119 = vmatmul.mubr.bf16.vlgmr.msra.gmra.mrb[0].mxu1 %v221_v31 }
  0xfa   :  { %v112_v33 = vpop.f32.mrb[0].mxu0  ;;  %v120_v34 = vpop.f32.mrb[0].mxu1 }
  0xfb   :  { %v113_v35 = vadd.f32 %v180_v32, %v112_v33  ;;  %v121_v36 = vadd.f32 %v180_v32, %v120_v34  ;;  %v114_v37 = vpop.f32.mrb[1].mxu0  ;;  %v122_v38 = vpop.f32.mrb[1].mxu1 }
  0xfc   :  { %v115_v39 = vpop.f32.mrb[2].mxu0  ;;  %v123_v40 = vpop.f32.mrb[2].mxu1 }
  0xfd   :  { %v187_v41 = vmul.f32 -1.442695, %v113_v35  ;;  %v189_v42 = vmul.f32 -1.442695, %v121_v36  ;;  %v116_v43 = vadd.f32 %v180_v32, %v115_v39  ;;  %v124_v44 = vadd.f32 %v180_v32, %v123_v40  ;;  %v117_v45 = vpop.f32.mrb[3].mxu0  ;;  %v125_v46 = vpop.f32.mrb[3].mxu1 }
  0xff   :  { %224 = vpow2.f32 %v187_v41  ;;  %v188_v47 = vmul.f32 -1.442695, %v116_v43  ;;  %v190_v48 = vmul.f32 -1.442695, %v124_v44 }
 0x100   :  { %226 = vpow2.f32 %v189_v42 }
 0x101   :  { %228 = vpow2.f32 %v188_v47 }
 0x102   :  { %230 = vpow2.f32 %v190_v48 }
 0x109   :  { %v225_v49 = vpop.eup %224 }
 0x10a   :  { %v227_v50 = vpop.eup %226  ;;  %v139_v51 = vadd.f32 1.0, %v225_v49 }
 0x10b   :  { %v229_v52 = vpop.eup %228  ;;  %v141_v53 = vadd.f32 1.0, %v227_v50 }
 0x10c   :  { %v231_v54 = vpop.eup %230  ;;  %232 = vrcp.f32 %v139_v51  ;;  %v140_v55 = vadd.f32 1.0, %v229_v52 }
 0x10d   :  { %234 = vrcp.f32 %v141_v53  ;;  %v142_v56 = vadd.f32 1.0, %v231_v54 }
 0x10e   :  { %236 = vrcp.f32 %v140_v55 }
 0x10f   :  { %238 = vrcp.f32 %v142_v56 }
 0x116   :  { %v233_v57 = vpop.eup %232 }
 0x117   :  { %v235_v58 = vpop.eup %234  ;;  %v151_v59 = vmul.f32 %v233_v57, %v113_v35 }
 0x118   :  { %v237_v60 = vpop.eup %236  ;;  %v153_v61 = vmul.f32 %v235_v58, %v121_v36 }
 0x119   :  { %v239_v62 = vpop.eup %238  ;;  %v195_v63 = vpack.c.bf16 %v151_v59, %v151_v59  ;;  %v152_v0 = vmul.f32 %v237_v60, %v116_v43 }
 0x11a   :  { %v197_v1 = vpack.c.bf16 %v153_v61, %v153_v61  ;;  %v154_v2 = vmul.f32 %v239_v62, %v124_v44 }
 0x11b   :  { %172 = vst.msk [vmem:[%s363_s3] sm:$0xf] %vm171_vm1, %v195_v63  ;;  %v196_v3 = vpack.c.bf16 %v152_v0, %v152_v0 }
 0x11c   :  { %174 = vst.msk [vmem:[%s363_s3 + $0x8] sm:$0xf] %vm171_vm1, %v197_v1  ;;  %v198_v4 = vpack.c.bf16 %v154_v2, %v154_v2 }
 0x11d   :  { %173 = vst.msk [vmem:[%s363_s3 + $0x4] sm:$0xf] %vm171_vm1, %v196_v3 }
 0x11e   :  { %175 = vst.msk [vmem:[%s363_s3 + $0xc] sm:$0xf] %vm171_vm1, %v198_v4 }

// kernel: vitaev2_vsa_forward.30
= control target key start
LH: loop header
LB: loop body
LE: loop exit
PB: predicated region body
PF: predicated region fallthrough
CT: control target
= control target key end

     0   :  { %s1838_s29 = smov 0   ;;  %s2049_s0 = inlined_call_operand.vmem [shape: bf16[64,64], index: 0, kind: input, shape index: {}]   ;;  %s2050_s1 = inlined_call_operand.vmem [shape: bf16[64,16], index: 1, kind: input, shape index: {}]   ;;  %s2051_s2 = inlined_call_operand.vmem [shape: f32[1,64], index: 2, kind: input, shape index: {}]   ;;  %s2052_s3 = inlined_call_operand.vmem [shape: f32[1,64], index: 3, kind: input, shape index: {}]   ;;  %s2053_s4 = inlined_call_operand.vmem [shape: f32[64,48], index: 4, kind: input, shape index: {}]   ;;  %s2054_s5 = inlined_call_operand.vmem [shape: f32[1,48], index: 5, kind: input, shape index: {}]   ;;  %s2055_s6 = inlined_call_operand.vmem [shape: f32[16,16], index: 6, kind: input, shape index: {}]   ;;  %s2056_s7 = inlined_call_operand.vmem [shape: f32[1,16], index: 7, kind: input, shape index: {}]   ;;  %s2057_s8 = inlined_call_operand.vmem [shape: f32[1,16], index: 8, kind: input, shape index: {}]   ;;  %s2058_s9 = inlined_call_operand.vmem [shape: f32[1,16], index: 9, kind: input, shape index: {}]   ;;  %s2059_s10 = inlined_call_operand.vmem [shape: f32[16,16], index: 10, kind: input, shape index: {}]   ;;  %s2060_s11 = inlined_call_operand.vmem [shape: f32[1,16], index: 11, kind: input, shape index: {}]   ;;  %s2061_s12 = inlined_call_operand.vmem [shape: f32[16,16], index: 12, kind: input, shape index: {}]   ;;  %s2062_s13 = inlined_call_operand.vmem [shape: f32[1,16], index: 13, kind: input, shape index: {}]   ;;  %s2063_s14 = inlined_call_operand.vmem [shape: bf16[64,16], index: 14, kind: output, shape index: {}]  }
   0x1 LB: > { %s1527_s30 = sadd.s32 4294967295, %s1757_s29   ;;  %p1531_p0 = scmp.ge.s32.totalorder %s1757_s29, 1  ;;  %s1757_s29 = sphi %s1838_s29, %s24_s29  }
   0x2   : > { %p424_p1 = scmp.lt.s32.totalorder %s1757_s29, 3 }
   0x4   : > { %p425_p2 = pnand %p1531_p0, %p424_p1 }
   0x5   : > { %s1532_s15 = sshll.u32 (!%p425_p2), %s1527_s30, 2  ;;  %vm502_vm0 = vcmask (!%p425_p2), 523264   ;;  %v580_v30 = vld [vmem:[%s2053_s4] sm:$0xff] (!%p425_p2)  ;;  %v581_v31 = vld [vmem:[%s2053_s4 + $0x8] sm:$0xff] (!%p425_p2)  ;;  %v582_v33 = vld [vmem:[%s2053_s4 + $0x10] sm:$0xff] (!%p425_p2)  ;;  %vm1760_vm1 = vmmov (!%p425_p2), 0  }
   0x6   : > { %428 = sbr.rel (%p425_p2) target bundleno = 2454 (0x996), region = 76  ;;  %p476_p3 = scmp.lt.s32.totalorder (!%p425_p2), %s1532_s15, 7  ;;  %v588_v32 = vpack.c.bf16 (!%p425_p2), %v581_v31, %v580_v30  ;;  %v583_v34 = vld [vmem:[%s2053_s4 + $0x18] sm:$0xff] (!%p425_p2)  ;;  %v584_v36 = vld [vmem:[%s2053_s4 + $0x20] sm:$0xff] (!%p425_p2)  ;;  %v585_v37 = vld [vmem:[%s2053_s4 + $0x28] sm:$0xff] (!%p425_p2)  ;;  %vm664_vm2 = vcmask (!%p425_p2), 130048  }
   0x7   : > { %v589_v35 = vpack.c.bf16 (!%p425_p2), %v583_v34, %v582_v33  ;;  %v590_v38 = vpack.c.bf16 (!%p425_p2), %v585_v37, %v584_v36  ;;  %v586_v39 = vld [vmem:[%s2053_s4 + $0x30] sm:$0xff] (!%p425_p2)  ;;  %v587_v40 = vld [vmem:[%s2053_s4 + $0x38] sm:$0xff] (!%p425_p2)  ;;  %v1538_v56 = vld [vmem:[%s2051_s2] ss:$0 sm:$0xff] (!%p425_p2)  ;;  %s1761_s28 = smov (!%p425_p2), 112   ;;  %vm868_vm4 = vcmask (!%p425_p2), 64512  }
   0x8   : > { %1621 = vmatprep.subr.bf16.mxu0 (!%p425_p2), %v588_v32  ;;  %v591_v41 = vpack.c.bf16 (!%p425_p2), %v587_v40, %v586_v39  ;;  %v1539_v62 = vld [vmem:[%s2052_s3] ss:$0 sm:$0xff] (!%p425_p2)  ;;  %s1762_s30 = smov (!%p425_p2), 96   ;;  %vm922_vm5 = vcmask (!%p425_p2), 1043456   ;;  %vm1454_vm6 = vcmask (!%p425_p2), 125952  }
   0x9   : > { %1622 = vmatpush3.bf16.msra.mxu0 (!%p425_p2), %v588_v32  ;;  %v654_v32 = vlaneseq (!%p425_p2) }
   0xa   : > { %1623 = vmatprep.subr.bf16.mxu0 (!%p425_p2), %v589_v35 }
   0xb   : > { %v655_v33 = vand.u32 (!%p425_p2), 127, %v654_v32 }
   0xd   : > { %s2065_s15 = smov (!%p476_p3, %s1532_s15), 7  ;;  %1624 = vmatpush3.bf16.msra.mxu0 %v589_v35  ;;  %vm656_vm3 = vcmp.lt.s32.totalorder %v655_v33, 4 }
   0xe   : > { %s1846_s16 = sshll.u32 %s2065_s15, 2  ;;  %1625 = vmatprep.subr.bf16.mxu0 %v590_v38 }
   0xf   : > { %s479_s19 = scalar_lea.vmem %s2049_s0, %s1846_s16  ;;  %s485_s22 = scalar_lea.vmem %s2050_s1, %s1846_s16 }
  0x10   : > { %v1573_v0 = vld [vmem:[%s479_s19] sm:$0xff]   ;;  %v1588_v1 = vld [vmem:[%s479_s19 + $0x8] sm:$0xff]  }
  0x11   : > { %v1574_v2 = vunpack.c.l.bf16 %v1573_v0  ;;  %v1578_v3 = vunpack.c.l.bf16 %v1588_v1  ;;  %v1575_v4 = vunpack.c.h.bf16 %v1573_v0  ;;  %v1579_v5 = vunpack.c.h.bf16 %v1588_v1  ;;  %1626 = vmatpush3.bf16.msra.mxu0 %v590_v38 }
  0x12   : > { %1627 = vmatprep.subr.bf16.mxu0 %v591_v41 }
  0x13   : > { %v503_v6 = vsel %vm502_vm0, %v1574_v2, 0.0  ;;  %v509_v7 = vsel %vm502_vm0, %v1578_v3, 0.0  ;;  %v506_v8 = vsel %vm502_vm0, %v1575_v4, 0.0  ;;  %v512_v9 = vsel %vm502_vm0, %v1579_v5, 0.0 }
  0x14   : > { %504 = vadd.xlane.f32.xlu0 %v503_v6  ;;  %510 = vadd.xlane.f32.xlu1 %v509_v7 }
  0x15   : > { %1628 = vmatpush3.bf16.msra.mxu0 %v591_v41 }
  0x18   : > { %507 = vadd.xlane.f32.xlu0 %v506_v8  ;;  %513 = vadd.xlane.f32.xlu1 %v512_v9 }
  0xa1   : > { %v505_v10 = vpop.xlane.xlu0 %504  ;;  %v511_v11 = vpop.xlane.xlu1 %510 }
  0xa2   : > { %v516_v12 = vmul.f32 0.015625, %v505_v10  ;;  %v518_v13 = vmul.f32 0.015625, %v511_v11  ;;  %v1759_v10 = vmov 0.0   ;;  %v1540_v11 = vld [vmem:[%s2054_s5] ss:$0 sm:$0xff] }
  0xa3   : > { %1633 = vmatprep.subr.bf16.mxu1 %v1759_v10  ;;  %1645 = vmatprep.subr.bf16.mxu0 %v1759_v10 }
  0xa4   : > { %v520_v14 = vsub.f32 %v1574_v2, %v516_v12  ;;  %v522_v15 = vsub.f32 %v1578_v3, %v518_v13  ;;  %1635 = vmatprep.mubr.msk.bf16.mxu1 %vm1760_vm1, %v1759_v10 }
  0xa5   : > { %v508_v16 = vpop.xlane.xlu0 %507  ;;  %v514_v17 = vpop.xlane.xlu1 %513 }
  0xa6   : > { %v517_v18 = vmul.f32 0.015625, %v508_v16  ;;  %v519_v19 = vmul.f32 0.015625, %v514_v17  ;;  %v524_v20 = vmul.f32 %v520_v14, %v520_v14  ;;  %v526_v21 = vmul.f32 %v522_v15, %v522_v15 }
  0xa8   : > { %v521_v22 = vsub.f32 %v1575_v4, %v517_v18  ;;  %v523_v23 = vsub.f32 %v1579_v5, %v519_v19  ;;  %v528_v24 = vsel %vm502_vm0, %v524_v20, 0.0  ;;  %v534_v25 = vsel %vm502_vm0, %v526_v21, 0.0 }
  0xa9   : > { %529 = vadd.xlane.f32.xlu0 %v528_v24 }
  0xaa   : > { %v525_v26 = vmul.f32 %v521_v22, %v521_v22  ;;  %v527_v27 = vmul.f32 %v523_v23, %v523_v23 }
  0xac   : > { %v531_v28 = vsel %vm502_vm0, %v525_v26, 0.0  ;;  %v537_v29 = vsel %vm502_vm0, %v527_v27, 0.0 }
  0xad   : > { %535 = vadd.xlane.f32.xlu0 %v534_v25  ;;  %532 = vadd.xlane.f32.xlu1 %v531_v28 }
  0xb1   : > { %538 = vadd.xlane.f32.xlu1 %v537_v29 }
 0x136   : > { %v530_v42 = vpop.xlane.xlu0 %529 }
 0x137   : > { %v540_v43 = vmul.f32 0.015625, %v530_v42 }
 0x139   : > { %v544_v44 = vadd.f32 1e-06, %v540_v43 }
 0x13a   : > { %v533_v45 = vpop.xlane.xlu1 %532  ;;  %v536_v46 = vpop.xlane.xlu0 %535 }
 0x13b   : > { %1711 = vrsqrt.f32 %v544_v44  ;;  %v541_v47 = vmul.f32 0.015625, %v533_v45  ;;  %v542_v48 = vmul.f32 0.015625, %v536_v46 }
 0x13d   : > { %v545_v49 = vadd.f32 1e-06, %v541_v47  ;;  %v546_v50 = vadd.f32 1e-06, %v542_v48 }
 0x13e   : > { %v539_v51 = vpop.xlane.xlu1 %538 }
 0x13f   : > { %1713 = vrsqrt.f32 %v545_v49  ;;  %v543_v52 = vmul.f32 0.015625, %v539_v51 }
 0x140   : > { %1715 = vrsqrt.f32 %v546_v50 }
 0x141   : > { %v547_v53 = vadd.f32 1e-06, %v543_v52 }
 0x143   : > { %1717 = vrsqrt.f32 %v547_v53 }
 0x145   : > { %v1712_v54 = vpop.eup %1711 }
 0x146   : > { %v552_v55 = vmul.f32 %v1712_v54, %v520_v14 }
 0x148   : > { %v563_v60 = vmul.f32 %v1538_v56, %v552_v55 }
 0x149   : > { %v1714_v57 = vpop.eup %1713 }
 0x14a   : > { %v1716_v58 = vpop.eup %1715  ;;  %v553_v59 = vmul.f32 %v1714_v57, %v521_v22  ;;  %v574_v2 = vadd.f32 %v1539_v62, %v563_v60 }
 0x14b   : > { %v554_v61 = vmul.f32 %v1716_v58, %v522_v15 }
 0x14c   : > { %v564_v63 = vmul.f32 %v1538_v56, %v553_v59 }
 0x14d   : > { %v1718_v0 = vpop.eup %1717  ;;  %v565_v4 = vmul.f32 %v1538_v56, %v554_v61 }
 0x14e   : > { %v555_v1 = vmul.f32 %v1718_v0, %v523_v23  ;;  %v575_v3 = vadd.f32 %v1539_v62, %v564_v63 }
 0x14f   : > { %v576_v7 = vadd.f32 %v1539_v62, %v565_v4 }
 0x150   : > { %v578_v5 = vpack.c.bf16 %v575_v3, %v574_v2  ;;  %v566_v6 = vmul.f32 %v1538_v56, %v555_v1 }
 0x152   : > { %1629 = vmatprep.mubr.msk.bf16.mxu0 %vm502_vm0, %v578_v5  ;;  %v577_v8 = vadd.f32 %v1539_v62, %v566_v6 }
 0x154   : > { %v579_v9 = vpack.c.bf16 %v577_v8, %v576_v7 }
 0x156   : > { %1630 = vmatmul.mubr.msk.bf16.vlgmr.msra.gmra.mrb[0].mxu0 %vm502_vm0, %v579_v9 }
 0x157   : > { %1647 = vmatprep.mubr.msk.bf16.mxu0 %vm1760_vm1, %v1759_v10 }
 0x229   : > { %v1631_v12 = vpop.f32.mrb[0].mxu0 }
 0x22a   : > { %v639_v13 = vpop.f32.mrb[1].mxu0  ;;  %v648_v19 = vadd.f32 %v1631_v12, %v1540_v11 }
 0x22b   : > { %v640_v14 = vadd.f32 %v1540_v11, %v639_v13  ;;  %v1632_v15 = vpop.f32.mrb[2].mxu0 }
 0x22c   : > { %v642_v16 = vpop.f32.mrb[3].mxu0  ;;  %v1907_v21 = vpack.c.bf16 %v648_v19, %v648_v19  ;;  %v651_v22 = vadd.f32 %v1632_v15, %v1540_v11 }
 0x22d   : > { %v1901_v17 = vpack.c.bf16 %v640_v14, %v640_v14  ;;  %v643_v18 = vadd.f32 %v1540_v11, %v642_v16 }
 0x22e   : > { %v1910_v23 = vpack.c.bf16 %v651_v22, %v651_v22 }
 0x22f   : > { %v1903_v20 = vpack.c.bf16 %v643_v18, %v643_v18  ;;  %662 = vrot.lane.b32.xlu0 %v1901_v17, %s1761_s28 }
 0x231   : > { %712 = vrot.lane.b32.xlu1 %v1903_v20, %s1761_s28 }
 0x235   : > { %761 = vrot.lane.b32.xlu1 %v1907_v21, %s1761_s28 }
 0x239   : > { %810 = vrot.lane.b32.xlu1 %v1910_v23, %s1761_s28 }
 0x2a1   : > { %v663_v24 = vpop.permute.xlu0 %662 }
 0x2a2   : > { %v669_v25 = vsel %vm664_vm2, %v663_v24, 0 }
 0x2a3   : > { %v713_v26 = vpop.permute.xlu1 %712  ;;  %1634 = vmatpush3.bf16.xpose.msra.mxu1 %v669_v25 }
 0x2a4   : > { %1639 = vmatprep.subr.bf16.mxu1 %v1759_v10  ;;  %v718_v29 = vsel %vm664_vm2, %v713_v26, 0 }
 0x2a7   : > { %v762_v27 = vpop.permute.xlu1 %761 }
 0x2a8   : > { %v767_v28 = vsel %vm664_vm2, %v762_v27, 0 }
 0x2a9   : > { %1646 = vmatpush3.bf16.xpose.msra.mxu0 %v767_v28 }
 0x2aa   : > { %1636 = vmatmul.mubr.msk.bf16.vlgmr.msra.gmra.mrb[0].mxu1 %vm664_vm2, %v1901_v17  ;;  %1657 = vmatprep.subr.bf16.mxu0 %v1759_v10 }
 0x2ab   : > { %1640 = vmatpush3.bf16.xpose.msra.mxu1 %v718_v29  ;;  %1641 = vmatprep.mubr.msk.bf16.mxu1 %vm1760_vm1, %v1759_v10  ;;  %v811_v30 = vpop.permute.xlu1 %810 }
 0x2ac   : > { %1651 = vmatprep.subr.bf16.mxu1 %v1759_v10  ;;  %v816_v31 = vsel %vm664_vm2, %v811_v30, 0 }
 0x2b0   : > { %1648 = vmatmul.mubr.msk.bf16.vlgmr.msra.gmra.mrb[4].mxu0 %vm664_vm2, %v1907_v21 }
 0x2b1   : > { %1659 = vmatprep.mubr.msk.bf16.mxu0 %vm1760_vm1, %v1759_v10 }
 0x2b2   : > { %1642 = vmatmul.mubr.msk.bf16.vlgmr.msra.gmra.mrb[4].mxu1 %vm664_vm2, %v1903_v20 }
 0x2b3   : > { %1652 = vmatpush3.bf16.xpose.msra.mxu1 %v816_v31  ;;  %1653 = vmatprep.mubr.msk.bf16.mxu1 %vm1760_vm1, %v1759_v10 }
 0x2b4   : > { %1663 = vmatprep.subr.bf16.mxu1 %v1759_v10 }
 0x2ba   : > { %1654 = vmatmul.mubr.msk.bf16.vlgmr.msra.gmra.mrb[8].mxu1 %vm664_vm2, %v1910_v23 }
 0x2bb   : > { %1665 = vmatprep.mubr.msk.bf16.mxu1 %vm1760_vm1, %v1759_v10 }
 0x37d   : > { %v705_v34 = vpop.f32.mrb[0].mxu1 }
 0x37e   : > { %v858_v35 = vmul.f32 0.25, %v705_v34  ;;  %v1637_v36 = vpop.f32.mrb[1].mxu1 }
 0x37f   : > { %v708_v37 = vpop.f32.mrb[2].mxu1 }
 0x380   : > { %v1638_v38 = vpop.f32.mrb[3].mxu1  ;;  %v864_v39 = vsel %vm656_vm3, %v858_v35, -1e+09 }
 0x381   : > { %v869_v40 = vsel %vm868_vm4, %v864_v39, -inf }
 0x382   : > { %870 = vmax.xlane.f32.xlu0 %v869_v40 }
 0x383   : > { %v803_v41 = vpop.f32.mrb[4].mxu0 }
 0x384   : > { %v860_v42 = vmul.f32 0.25, %v803_v41  ;;  %v1649_v43 = vpop.f32.mrb[5].mxu0 }
 0x385   : > { %v754_v44 = vpop.f32.mrb[4].mxu1  ;;  %v806_v45 = vpop.f32.mrb[6].mxu0  ;;  %v1112_v43 = vld [vmem:[%s2055_s6] sm:$0xff] }
 0x386   : > { %v859_v46 = vmul.f32 0.25, %v754_v44  ;;  %v1643_v47 = vpop.f32.mrb[5].mxu1  ;;  %v1650_v48 = vpop.f32.mrb[7].mxu0  ;;  %v866_v49 = vsel %vm656_vm3, %v860_v42, -1e+09  ;;  %v1113_v44 = vld [vmem:[%s2055_s6 + $0x8] sm:$0xff] }
 0x387   : > { %v757_v50 = vpop.f32.mrb[6].mxu1  ;;  %v875_v51 = vsel %vm868_vm4, %v866_v49, -inf  ;;  %v1114_v45 = vpack.c.bf16 %v1113_v44, %v1112_v43  ;;  %v1266_v43 = vld [vmem:[%s2059_s10] sm:$0xff]  ;;  %v1267_v44 = vld [vmem:[%s2059_s10 + $0x8] sm:$0xff] }
 0x388   : > { %876 = vmax.xlane.f32.xlu0 %v875_v51  ;;  %v1644_v52 = vpop.f32.mrb[7].mxu1  ;;  %v865_v53 = vsel %vm656_vm3, %v859_v46, -1e+09 }
 0x389   : > { %v872_v54 = vsel %vm868_vm4, %v865_v53, -inf }
 0x38a   : > { %873 = vmax.xlane.f32.xlu1 %v872_v54 }
 0x38d   : > { %v852_v55 = vpop.f32.mrb[8].mxu1 }
 0x38e   : > { %v861_v56 = vmul.f32 0.25, %v852_v55  ;;  %v1655_v57 = vpop.f32.mrb[9].mxu1 }
 0x38f   : > { %v855_v58 = vpop.f32.mrb[10].mxu1 }
 0x390   : > { %v1656_v59 = vpop.f32.mrb[11].mxu1  ;;  %v867_v60 = vsel %vm656_vm3, %v861_v56, -1e+09 }
 0x391   : > { %v878_v61 = vsel %vm868_vm4, %v867_v60, -inf }
 0x392   : > { %879 = vmax.xlane.f32.xlu0 %v878_v61 }
 0x39b   : > { %966 = vrot.lane.b32.xlu1 %v1903_v20, %s1762_s30 }
 0x39f   : > { %1014 = vrot.lane.b32.xlu1 %v1907_v21, %s1762_s30 }
 0x40f   : > { %v871_v62 = vpop.xlane.xlu0 %870 }
 0x410   : > { %v881_v63 = vsub.f32 %v864_v39, %v871_v62 }
 0x412   : > { %v885_v2 = vmul.f32 1.442695, %v881_v63  ;;  %v1581_v63 = vld [vmem:[%s485_s22] sm:$0xff]  }
 0x415   : > { %v877_v0 = vpop.xlane.xlu0 %876 }
 0x416   : > { %v883_v1 = vsub.f32 %v866_v49, %v877_v0  ;;  %v1551_v0 = vld [vmem:[%s2056_s7] ss:$0 sm:$0xff] }
 0x417   : > { %v874_v3 = vpop.xlane.xlu1 %873 }
 0x418   : > { %v889_v4 = vmul.f32 1.442695, %v883_v1  ;;  %v882_v5 = vsub.f32 %v865_v53, %v874_v3  ;;  %v1589_v1 = vld [vmem:[%s485_s22 + $0x8] sm:$0xff]   ;;  %v1582_v3 = vunpack.c.l.bf16 %v1581_v63 }
 0x41a   : > { %1719 = vpow2.f32 %v889_v4  ;;  %v887_v6 = vmul.f32 1.442695, %v882_v5 }
 0x41b   : > { %1721 = vpow2.f32 %v885_v2  ;;  %v967_v7 = vpop.permute.xlu1 %966 }
 0x41c   : > { %1723 = vpow2.f32 %v887_v6  ;;  %v972_v8 = vsel %vm922_vm5, %v967_v7, 0  ;;  %v1586_v6 = vunpack.c.l.bf16 %v1589_v1 }
 0x41d   : > { %1664 = vmatpush3.bf16.msra.mxu1 %v972_v8 }
 0x41e   : > { %1675 = vmatprep.subr.bf16.mxu1 %v1759_v10 }
 0x41f   : > { %v880_v9 = vpop.xlane.xlu0 %879  ;;  %v1015_v22 = vpop.permute.xlu1 %1014 }
 0x420   : > { %v884_v11 = vsub.f32 %v867_v60, %v880_v9  ;;  %v1020_v37 = vsel %vm922_vm5, %v1015_v22, 0  ;;  %v1583_v9 = vunpack.c.h.bf16 %v1581_v63 }
 0x422   : > { %v891_v12 = vmul.f32 1.442695, %v884_v11 }
 0x424   : > { %v1720_v13 = vpop.eup %1719  ;;  %1725 = vpow2.f32 %v891_v12 }
 0x425   : > { %v1722_v14 = vpop.eup %1721  ;;  %v899_v15 = vsel %vm868_vm4, %v1720_v13, 0.0 }
 0x426   : > { %v1724_v16 = vpop.eup %1723  ;;  %900 = vadd.xlane.f32.xlu0 %v899_v15  ;;  %v893_v19 = vsel %vm868_vm4, %v1722_v14, 0.0 }
 0x427   : > { %v896_v18 = vsel %vm868_vm4, %v1724_v16, 0.0 }
 0x428   : > { %897 = vadd.xlane.f32.xlu1 %v896_v18 }
 0x42a   : > { %894 = vadd.xlane.f32.xlu0 %v893_v19 }
 0x42e   : > { %v1726_v20 = vpop.eup %1725 }
 0x42f   : > { %v902_v21 = vsel %vm868_vm4, %v1726_v20, 0.0 }
 0x430   : > { %903 = vadd.xlane.f32.xlu1 %v902_v21 }
 0x440   : > { %917 = vrot.lane.b32.xlu0 %v1901_v17, %s1762_s30 }
 0x441   : > { %1062 = vrot.lane.b32.xlu1 %v1910_v23, %s1762_s30  ;;  %s491_s30 = scalar_lea.vmem %s2063_s14, %s1846_s16 }
 0x4b3   : > { %v901_v24 = vpop.xlane.xlu0 %900 }
 0x4b5   : > { %v898_v25 = vpop.xlane.xlu1 %897 }
 0x4b6   : > { %1727 = vrcp.f32 %v898_v25 }
 0x4b7   : > { %v895_v26 = vpop.xlane.xlu0 %894 }
 0x4b8   : > { %1729 = vrcp.f32 %v895_v26 }
 0x4b9   : > { %1731 = vrcp.f32 %v901_v24 }
 0x4bb   : > { %v918_v27 = vpop.permute.xlu0 %917 }
 0x4bc   : > { %v924_v28 = vsel %vm922_vm5, %v918_v27, 0 }
 0x4bd   : > { %v904_v29 = vpop.xlane.xlu1 %903  ;;  %1658 = vmatpush3.bf16.msra.mxu0 %v924_v28 }
 0x4be   : > { %1733 = vrcp.f32 %v904_v29  ;;  %1669 = vmatprep.subr.bf16.mxu0 %v1759_v10 }
 0x4c0   : > { %v1728_v30 = vpop.eup %1727 }
 0x4c1   : > { %v910_v17 = vmul.f32 %v1728_v30, %v1724_v16  ;;  %v1063_v32 = vpop.permute.xlu1 %1062 }
 0x4c2   : > { %v1730_v31 = vpop.eup %1729  ;;  %v1068_v34 = vsel %vm922_vm5, %v1063_v32, 0 }
 0x4c3   : > { %v909_v23 = vmul.f32 %v1730_v31, %v1722_v14  ;;  %v914_v33 = vpack.c.bf16 %v910_v17, %v910_v17  ;;  %v1732_v36 = vpop.eup %1731  ;;  %v1587_v14 = vunpack.c.h.bf16 %v1589_v1 }
 0x4c4   : > { %v911_v39 = vmul.f32 %v1732_v36, %v1720_v13 }
 0x4c5   : > { %1666 = vmatmul.mubr.msk.bf16.vlgmr.msra.gmra.mrb[12].mxu1 %vm868_vm4, %v914_v33  ;;  %v913_v35 = vpack.c.bf16 %v909_v23, %v909_v23 }
 0x4c6   : > { %1676 = vmatpush3.bf16.msra.mxu1 %v1068_v34  ;;  %1677 = vmatprep.mubr.msk.bf16.mxu1 %vm1760_vm1, %v1759_v10  ;;  %v915_v42 = vpack.c.bf16 %v911_v39, %v911_v39 }
 0x4c7   : > { %1660 = vmatmul.mubr.msk.bf16.vlgmr.msra.gmra.mrb[8].mxu0 %vm868_vm4, %v913_v35 }
 0x4c8   : > { %v1734_v38 = vpop.eup %1733  ;;  %1670 = vmatpush3.bf16.msra.mxu0 %v1020_v37  ;;  %1671 = vmatprep.mubr.msk.bf16.mxu0 %vm1760_vm1, %v1759_v10 }
 0x4c9   : > { %v912_v40 = vmul.f32 %v1734_v38, %v1726_v20  ;;  %1681 = vmatprep.subr.bf16.mxu0 %v1114_v45 }
 0x4cb   : > { %v916_v41 = vpack.c.bf16 %v912_v40, %v912_v40 }
 0x4cd   : > { %1678 = vmatmul.mubr.msk.bf16.vlgmr.msra.gmra.mrb[16].mxu1 %vm868_vm4, %v916_v41 }
 0x4cf   : > { %1672 = vmatmul.mubr.msk.bf16.vlgmr.msra.gmra.mrb[12].mxu0 %vm868_vm4, %v915_v42 }
 0x4d0   : > { %1682 = vmatpush3.bf16.msra.mxu0 %v1114_v45  ;;  %v1268_v45 = vpack.c.bf16 %v1267_v44, %v1266_v43 }
 0x4d2   : > { %1687 = vmatprep.subr.bf16.mxu1 %v1268_v45 }
 0x4d3   : > { %1688 = vmatpush3.bf16.msra.mxu1 %v1268_v45 }
 0x598   : > { %v1008_v10 = vpop.f32.mrb[12].mxu1 }
 0x599   : > { %v1667_v46 = vpop.f32.mrb[13].mxu1 }
 0x59a   : > { %v960_v47 = vpop.f32.mrb[8].mxu0  ;;  %v1011_v48 = vpop.f32.mrb[14].mxu1 }
 0x59b   : > { %v1110_v49 = vpack.c.bf16 %v1008_v10, %v960_v47  ;;  %v1661_v50 = vpop.f32.mrb[9].mxu0  ;;  %v1668_v51 = vpop.f32.mrb[15].mxu1 }
 0x59c   : > { %v963_v52 = vpop.f32.mrb[10].mxu0 }
 0x59d   : > { %v1662_v53 = vpop.f32.mrb[11].mxu0  ;;  %1683 = vmatprep.mubr.msk.bf16.mxu0 %vm664_vm2, %v1110_v49 }
 0x5a0   : > { %v1104_v54 = vpop.f32.mrb[16].mxu1 }
 0x5a1   : > { %v1679_v55 = vpop.f32.mrb[17].mxu1 }
 0x5a2   : > { %v1056_v56 = vpop.f32.mrb[12].mxu0  ;;  %v1107_v57 = vpop.f32.mrb[18].mxu1 }
 0x5a3   : > { %v1111_v58 = vpack.c.bf16 %v1104_v54, %v1056_v56  ;;  %v1673_v59 = vpop.f32.mrb[13].mxu0  ;;  %v1680_v60 = vpop.f32.mrb[19].mxu1 }
 0x5a4   : > { %v1059_v61 = vpop.f32.mrb[14].mxu0 }
 0x5a5   : > { %v1674_v62 = vpop.f32.mrb[15].mxu0  ;;  %1684 = vmatmul.mubr.msk.bf16.vlgmr.msra.gmra.mrb[16].mxu0 %vm664_vm2, %v1111_v58  ;;  %v1554_v58 = vld [vmem:[%s2057_s8] ss:$0 sm:$0xff] }
 0x678   : > { %v1685_v2 = vpop.f32.mrb[16].mxu0 }
 0x679   : > { %v1162_v4 = vpop.f32.mrb[17].mxu0  ;;  %v1171_v5 = vadd.f32 %v1685_v2, %v1551_v0 }
 0x67a   : > { %v1163_v7 = vadd.f32 %v1551_v0, %v1162_v4  ;;  %v1686_v8 = vpop.f32.mrb[18].mxu0 }
 0x67b   : > { %v1165_v11 = vpop.f32.mrb[19].mxu0  ;;  %v1988_v15 = vadd.f32 %v1586_v6, %v1171_v5  ;;  %v1174_v16 = vadd.f32 %v1686_v8, %v1551_v0 }
 0x67c   : > { %v1986_v12 = vadd.f32 %v1582_v3, %v1163_v7  ;;  %v1166_v13 = vadd.f32 %v1551_v0, %v1165_v11  ;;  %v1555_v0 = vld [vmem:[%s2058_s9] ss:$0 sm:$0xff] }
 0x67d   : > { %v1996_v21 = vadd.f32 %v1587_v14, %v1174_v16  ;;  %v1195_v22 = vsel %vm664_vm2, %v1988_v15, 0.0  ;;  %v1369_v16 = vld [vmem:[%s2061_s12] sm:$0xff] }
 0x67e   : > { %v1990_v18 = vadd.f32 %v1583_v9, %v1166_v13  ;;  %v1189_v19 = vsel %vm664_vm2, %v1986_v12, 0.0 }
 0x67f   : > { %1190 = vadd.xlane.f32.xlu0 %v1189_v19  ;;  %v1198_v24 = vsel %vm664_vm2, %v1996_v21, 0.0  ;;  %v1370_v19 = vld [vmem:[%s2061_s12 + $0x8] sm:$0xff] }
 0x680   : > { %v1192_v20 = vsel %vm664_vm2, %v1990_v18, 0.0 }
 0x681   : > { %1193 = vadd.xlane.f32.xlu1 %v1192_v20  ;;  %v1371_v20 = vpack.c.bf16 %v1370_v19, %v1369_v16 }
 0x683   : > { %1196 = vadd.xlane.f32.xlu0 %v1195_v22  ;;  %1693 = vmatprep.subr.bf16.mxu0 %v1371_v20  ;;  %v1556_v22 = vld [vmem:[%s2060_s11] ss:$0 sm:$0xff] }
 0x684   : > { %1694 = vmatpush3.bf16.msra.mxu0 %v1371_v20 }
 0x687   : > { %1199 = vadd.xlane.f32.xlu0 %v1198_v24 }
 0x70c   : > { %v1191_v25 = vpop.xlane.xlu0 %1190 }
 0x70d   : > { %v1202_v26 = vmul.f32 0.0625, %v1191_v25 }
 0x70e   : > { %v1194_v27 = vpop.xlane.xlu1 %1193 }
 0x70f   : > { %v1206_v28 = vsub.f32 %v1986_v12, %v1202_v26  ;;  %v1203_v29 = vmul.f32 0.0625, %v1194_v27 }
 0x710   : > { %v1197_v30 = vpop.xlane.xlu0 %1196 }
 0x711   : > { %v1207_v17 = vsub.f32 %v1990_v18, %v1203_v29  ;;  %v1204_v31 = vmul.f32 0.0625, %v1197_v30  ;;  %v1210_v32 = vmul.f32 %v1206_v28, %v1206_v28 }
 0x713   : > { %v1208_v23 = vsub.f32 %v1988_v15, %v1204_v31  ;;  %v1214_v33 = vsel %vm664_vm2, %v1210_v32, 0.0  ;;  %v1211_v34 = vmul.f32 %v1207_v17, %v1207_v17 }
 0x714   : > { %1215 = vadd.xlane.f32.xlu0 %v1214_v33  ;;  %v1200_v35 = vpop.xlane.xlu0 %1199 }
 0x715   : > { %v1205_v36 = vmul.f32 0.0625, %v1200_v35  ;;  %v1217_v37 = vsel %vm664_vm2, %v1211_v34, 0.0  ;;  %v1212_v38 = vmul.f32 %v1208_v23, %v1208_v23 }
 0x716   : > { %1218 = vadd.xlane.f32.xlu1 %v1217_v37 }
 0x717   : > { %v1209_v39 = vsub.f32 %v1996_v21, %v1205_v36  ;;  %v1220_v40 = vsel %vm664_vm2, %v1212_v38, 0.0 }
 0x718   : > { %1221 = vadd.xlane.f32.xlu0 %v1220_v40 }
 0x719   : > { %v1213_v41 = vmul.f32 %v1209_v39, %v1209_v39 }
 0x71b   : > { %v1223_v42 = vsel %vm664_vm2, %v1213_v41, 0.0 }
 0x71c   : > { %1224 = vadd.xlane.f32.xlu1 %v1223_v42 }
 0x7a1   : > { %v1216_v10 = vpop.xlane.xlu0 %1215 }
 0x7a2   : > { %v1226_v46 = vmul.f32 0.0625, %v1216_v10 }
 0x7a3   : > { %v1219_v47 = vpop.xlane.xlu1 %1218 }
 0x7a4   : > { %v1230_v48 = vadd.f32 1e-06, %v1226_v46  ;;  %v1227_v49 = vmul.f32 0.0625, %v1219_v47 }
 0x7a5   : > { %v1222_v50 = vpop.xlane.xlu0 %1221 }
 0x7a6   : > { %1735 = vrsqrt.f32 %v1230_v48  ;;  %v1231_v51 = vadd.f32 1e-06, %v1227_v49  ;;  %v1228_v52 = vmul.f32 0.0625, %v1222_v50 }
 0x7a8   : > { %1737 = vrsqrt.f32 %v1231_v51  ;;  %v1232_v53 = vadd.f32 1e-06, %v1228_v52 }
 0x7a9   : > { %v1225_v54 = vpop.xlane.xlu1 %1224 }
 0x7aa   : > { %1739 = vrsqrt.f32 %v1232_v53  ;;  %v1229_v55 = vmul.f32 0.0625, %v1225_v54 }
 0x7ac   : > { %v1233_v56 = vadd.f32 1e-06, %v1229_v55 }
 0x7ae   : > { %1741 = vrsqrt.f32 %v1233_v56 }
 0x7b0   : > { %v1736_v57 = vpop.eup %1735 }
 0x7b1   : > { %v1238_v59 = vmul.f32 %v1736_v57, %v1206_v28 }
 0x7b2   : > { %v1738_v60 = vpop.eup %1737 }
 0x7b3   : > { %v1239_v61 = vmul.f32 %v1738_v60, %v1207_v17  ;;  %v1249_v62 = vmul.f32 %v1554_v58, %v1238_v59 }
 0x7b4   : > { %v1740_v63 = vpop.eup %1739 }
 0x7b5   : > { %v1240_v1 = vmul.f32 %v1740_v63, %v1208_v23  ;;  %v1250_v2 = vmul.f32 %v1554_v58, %v1239_v61  ;;  %v1260_v3 = vadd.f32 %v1555_v0, %v1249_v62 }
 0x7b7   : > { %v1261_v4 = vadd.f32 %v1555_v0, %v1250_v2  ;;  %v1251_v6 = vmul.f32 %v1554_v58, %v1240_v1 }
 0x7b8   : > { %v1742_v5 = vpop.eup %1741 }
 0x7b9   : > { %v1241_v7 = vmul.f32 %v1742_v5, %v1209_v39  ;;  %v1264_v8 = vpack.c.bf16 %v1261_v4, %v1260_v3  ;;  %v1262_v11 = vadd.f32 %v1555_v0, %v1251_v6  ;;  %v1559_v3 = vld [vmem:[%s2062_s13] ss:$0 sm:$0xff] }
 0x7bb   : > { %v1252_v9 = vmul.f32 %v1554_v58, %v1241_v7  ;;  %1689 = vmatprep.mubr.msk.bf16.mxu1 %vm664_vm2, %v1264_v8 }
 0x7bd   : > { %v1263_v13 = vadd.f32 %v1555_v0, %v1252_v9 }
 0x7bf   : > { %v1265_v14 = vpack.c.bf16 %v1263_v13, %v1262_v11 }
 0x7c1   : > { %1690 = vmatmul.mubr.msk.bf16.vlgmr.msra.gmra.mrb[20].mxu1 %vm664_vm2, %v1265_v14 }
 0x894   : > { %v1691_v24 = vpop.f32.mrb[20].mxu1 }
 0x895   : > { %v1325_v25 = vadd.f32 %v1691_v24, %v1556_v22  ;;  %v1316_v26 = vpop.f32.mrb[21].mxu1 }
 0x896   : > { %v1317_v27 = vadd.f32 %v1556_v22, %v1316_v26  ;;  %v1692_v28 = vpop.f32.mrb[22].mxu1 }
 0x897   : > { %v1333_v29 = vmul.f32 %v1325_v25, %v1325_v25  ;;  %v1328_v30 = vadd.f32 %v1692_v28, %v1556_v22  ;;  %v1319_v17 = vpop.f32.mrb[23].mxu1 }
 0x898   : > { %v1331_v31 = vmul.f32 %v1317_v27, %v1317_v27  ;;  %v1320_v32 = vadd.f32 %v1556_v22, %v1319_v17 }
 0x899   : > { %v1337_v23 = vmul.f32 %v1333_v29, %v1325_v25  ;;  %v1334_v33 = vmul.f32 %v1328_v30, %v1328_v30 }
 0x89a   : > { %v1335_v34 = vmul.f32 %v1331_v31, %v1317_v27  ;;  %v1332_v35 = vmul.f32 %v1320_v32, %v1320_v32 }
 0x89b   : > { %v1341_v36 = vmul.f32 0.044715, %v1337_v23  ;;  %v1338_v37 = vmul.f32 %v1334_v33, %v1328_v30 }
 0x89c   : > { %v1339_v38 = vmul.f32 0.044715, %v1335_v34  ;;  %v1336_v39 = vmul.f32 %v1332_v35, %v1320_v32 }
 0x89d   : > { %v1345_v40 = vadd.f32 %v1341_v36, %v1325_v25  ;;  %v1342_v41 = vmul.f32 0.044715, %v1338_v37 }
 0x89e   : > { %v1343_v42 = vadd.f32 %v1339_v38, %v1317_v27  ;;  %v1340_v43 = vmul.f32 0.044715, %v1336_v39 }
 0x89f   : > { %v1349_v44 = vmul.f32 0.7978846, %v1345_v40  ;;  %v1346_v45 = vadd.f32 %v1342_v41, %v1328_v30 }
 0x8a0   : > { %v1347_v10 = vmul.f32 0.7978846, %v1343_v42  ;;  %v1344_v46 = vadd.f32 %v1340_v43, %v1320_v32 }
 0x8a1   : > { %1743 = vtanh.f32 %v1349_v44  ;;  %v1350_v47 = vmul.f32 0.7978846, %v1346_v45 }
 0x8a2   : > { %1745 = vtanh.f32 %v1347_v10  ;;  %v1348_v48 = vmul.f32 0.7978846, %v1344_v46 }
 0x8a3   : > { %1747 = vtanh.f32 %v1350_v47 }
 0x8a4   : > { %1749 = vtanh.f32 %v1348_v48 }
 0x8ab   : > { %v1744_v49 = vpop.eup %1743 }
 0x8ac   : > { %v1746_v50 = vpop.eup %1745  ;;  %v1357_v51 = vadd.f32 1.0, %v1744_v49 }
 0x8ad   : > { %v1748_v52 = vpop.eup %1747  ;;  %v1355_v53 = vadd.f32 1.0, %v1746_v50 }
 0x8ae   : > { %v1750_v54 = vpop.eup %1749  ;;  %v1361_v55 = vmul.f32 0.5, %v1357_v51  ;;  %v1358_v56 = vadd.f32 1.0, %v1748_v52 }
 0x8af   : > { %v1359_v57 = vmul.f32 0.5, %v1355_v53  ;;  %v1356_v58 = vadd.f32 1.0, %v1750_v54 }
 0x8b0   : > { %v1362_v59 = vmul.f32 0.5, %v1358_v56  ;;  %v1365_v61 = vmul.f32 %v1361_v55, %v1325_v25 }
 0x8b1   : > { %v1360_v60 = vmul.f32 0.5, %v1356_v58  ;;  %v1363_v63 = vmul.f32 %v1359_v57, %v1317_v27 }
 0x8b2   : > { %v1366_v62 = vmul.f32 %v1362_v59, %v1328_v30 }
 0x8b3   : > { %v1364_v0 = vmul.f32 %v1360_v60, %v1320_v32 }
 0x8b4   : > { %v1368_v1 = vpack.c.bf16 %v1366_v62, %v1365_v61 }
 0x8b5   : > { %v1367_v2 = vpack.c.bf16 %v1364_v0, %v1363_v63 }
 0x8b7   : > { %1695 = vmatprep.mubr.msk.bf16.mxu0 %vm664_vm2, %v1367_v2 }
 0x8b8   : > { %1696 = vmatmul.mubr.msk.bf16.vlgmr.msra.gmra.mrb[20].mxu0 %vm664_vm2, %v1368_v1 }
 0x98b   : > { %v1697_v4 = vpop.f32.mrb[20].mxu0 }
 0x98c   : > { %v1428_v5 = vadd.f32 %v1697_v4, %v1559_v3  ;;  %v1419_v6 = vpop.f32.mrb[21].mxu0 }
 0x98d   : > { %v1420_v7 = vadd.f32 %v1559_v3, %v1419_v6  ;;  %v1698_v8 = vpop.f32.mrb[22].mxu0 }
 0x98e   : > { %v1431_v9 = vadd.f32 %v1698_v8, %v1559_v3  ;;  %v1422_v11 = vpop.f32.mrb[23].mxu0  ;;  %v1436_v16 = vadd.f32 %v1428_v5, %v1988_v15 }
 0x98f   : > { %v1434_v13 = vadd.f32 %v1420_v7, %v1986_v12  ;;  %v1423_v14 = vadd.f32 %v1559_v3, %v1422_v11 }
 0x990   : > { %v1437_v20 = vadd.f32 %v1431_v9, %v1996_v21  ;;  %v1570_v25 = vpack.c.bf16 %v1436_v16, %v1436_v16 }
 0x991   : > { %v1568_v19 = vpack.c.bf16 %v1434_v13, %v1434_v13  ;;  %v1435_v22 = vadd.f32 %v1423_v14, %v1990_v18 }
 0x992   : > { %v1571_v26 = vpack.c.bf16 %v1437_v20, %v1437_v20  ;;  %1457 = vst.msk [vmem:[%s491_s30 + $0x8] sm:$0xf] %vm1454_vm6, %v1570_v25 }
 0x993   : > { %1455 = vst.msk [vmem:[%s491_s30] sm:$0xf] %vm1454_vm6, %v1568_v19  ;;  %v1569_v24 = vpack.c.bf16 %v1435_v22, %v1435_v22 }
 0x994   : > { %1458 = vst.msk [vmem:[%s491_s30 + $0xc] sm:$0xf] %vm1454_vm6, %v1571_v26 }
 0x995   : > { %1456 = vst.msk [vmem:[%s491_s30 + $0x4] sm:$0xf] %vm1454_vm6, %v1569_v24 }
 0x996 PF: > { %s24_s29 = sadd.s32 1, %s1757_s29  }
 0x997   : > { %p21_p4 = scmp.ge.s32.totalorder %s24_s29, 4  }
 0x999   :  { %23 = sbr.rel (!%p21_p4) target bundleno = 1 (0x1), region = 109 }

// kernel: vitaev2_vsa_forward.32
= control target key start
LH: loop header
LB: loop body
LE: loop exit
PB: predicated region body
PF: predicated region fallthrough
CT: control target
= control target key end

     0   :  { %vm192_vm0 = vcmask 523264   ;;  %vm390_vm1 = vcmask 125952   ;;  %s809_s1 = inlined_call_operand.vmem [shape: f32[576,16], index: 1, kind: input, shape index: {}]   ;;  %s810_s0 = inlined_call_operand.vmem [shape: bf16[32,576], index: 0, kind: input, shape index: {}]   ;;  %s811_s2 = inlined_call_operand.vmem [shape: f32[1,16], index: 2, kind: input, shape index: {}]   ;;  %s812_s3 = inlined_call_operand.vmem [shape: bf16[32,16], index: 3, kind: output, shape index: {}]  }
   0x1   :  { %v43_v0 = vld [vmem:[%s809_s1 + $0x80] sm:$0xff]  ;;  %v44_v1 = vld [vmem:[%s809_s1 + $0x88] sm:$0xff]  ;;  %v45_v11 = vld [vmem:[%s809_s1 + $0x90] sm:$0xff] }
   0x2   :  { %v27_v2 = vld [vmem:[%s809_s1] sm:$0xff]  ;;  %v107_v3 = vpack.c.bf16 %v44_v1, %v43_v0  ;;  %v28_v4 = vld [vmem:[%s809_s1 + $0x8] sm:$0xff]  ;;  %v46_v13 = vld [vmem:[%s809_s1 + $0x98] sm:$0xff] }
   0x3   :  { %v75_v5 = vld [vmem:[%s809_s1 + $0x180] sm:$0xff]  ;;  %v76_v6 = vld [vmem:[%s809_s1 + $0x188] sm:$0xff]  ;;  %v99_v7 = vpack.c.bf16 %v28_v4, %v27_v2  ;;  %v29_v14 = vld [vmem:[%s809_s1 + $0x10] sm:$0xff]  ;;  %v108_v16 = vpack.c.bf16 %v46_v13, %v45_v11 }
   0x4   :  { %v123_v8 = vpack.c.bf16 %v76_v6, %v75_v5  ;;  %v59_v9 = vld [vmem:[%s809_s1 + $0x100] sm:$0xff]  ;;  %v60_v10 = vld [vmem:[%s809_s1 + $0x108] sm:$0xff]  ;;  %424 = vmatprep.subr.bf16.mxu0 %v107_v3  ;;  %v30_v15 = vld [vmem:[%s809_s1 + $0x18] sm:$0xff] }
   0x5   :  { %v115_v12 = vpack.c.bf16 %v60_v10, %v59_v9  ;;  %425 = vmatpush3.bf16.msra.mxu0 %v99_v7  ;;  %v100_v17 = vpack.c.bf16 %v30_v15, %v29_v14  ;;  %v77_v18 = vld [vmem:[%s809_s1 + $0x190] sm:$0xff]  ;;  %v78_v19 = vld [vmem:[%s809_s1 + $0x198] sm:$0xff]  ;;  %v47_v23 = vld [vmem:[%s809_s1 + $0xa0] sm:$0xff] }
   0x6   :  { %452 = vmatprep.subr.bf16.mxu1 %v123_v8  ;;  %v61_v20 = vld [vmem:[%s809_s1 + $0x110] sm:$0xff]  ;;  %v124_v21 = vpack.c.bf16 %v78_v19, %v77_v18  ;;  %v62_v22 = vld [vmem:[%s809_s1 + $0x118] sm:$0xff]  ;;  %v48_v24 = vld [vmem:[%s809_s1 + $0xa8] sm:$0xff]  ;;  %426 = vmatprep.subr.bf16.mxu0 %v108_v16 }
   0x7   :  { %453 = vmatpush3.bf16.msra.mxu1 %v115_v12  ;;  %v116_v25 = vpack.c.bf16 %v62_v22, %v61_v20  ;;  %v109_v26 = vpack.c.bf16 %v48_v24, %v47_v23  ;;  %v31_v27 = vld [vmem:[%s809_s1 + $0x20] sm:$0xff]  ;;  %v32_v28 = vld [vmem:[%s809_s1 + $0x28] sm:$0xff]  ;;  %v49_v35 = vld [vmem:[%s809_s1 + $0xb0] sm:$0xff] }
   0x8   :  { %v79_v29 = vld [vmem:[%s809_s1 + $0x1a0] sm:$0xff]  ;;  %454 = vmatprep.subr.bf16.mxu1 %v124_v21  ;;  %v80_v30 = vld [vmem:[%s809_s1 + $0x1a8] sm:$0xff]  ;;  %v101_v33 = vpack.c.bf16 %v32_v28, %v31_v27  ;;  %v50_v36 = vld [vmem:[%s809_s1 + $0xb8] sm:$0xff] }
   0x9   :  { %v63_v31 = vld [vmem:[%s809_s1 + $0x120] sm:$0xff]  ;;  %v64_v32 = vld [vmem:[%s809_s1 + $0x128] sm:$0xff]  ;;  %427 = vmatpush3.bf16.msra.mxu0 %v100_v17  ;;  %v125_v34 = vpack.c.bf16 %v80_v30, %v79_v29  ;;  %v33_v37 = vld [vmem:[%s809_s1 + $0x30] sm:$0xff]  ;;  %v110_v39 = vpack.c.bf16 %v50_v36, %v49_v35 }
   0xa   :  { %428 = vmatprep.subr.bf16.mxu0 %v109_v26  ;;  %v117_v38 = vpack.c.bf16 %v64_v32, %v63_v31  ;;  %v34_v40 = vld [vmem:[%s809_s1 + $0x38] sm:$0xff]  ;;  %v81_v41 = vld [vmem:[%s809_s1 + $0x1b0] sm:$0xff]  ;;  %v51_v46 = vld [vmem:[%s809_s1 + $0xc0] sm:$0xff] }
   0xb   :  { %455 = vmatpush3.bf16.msra.mxu1 %v116_v25  ;;  %v82_v42 = vld [vmem:[%s809_s1 + $0x1b8] sm:$0xff]  ;;  %v65_v44 = vld [vmem:[%s809_s1 + $0x130] sm:$0xff]  ;;  %v52_v47 = vld [vmem:[%s809_s1 + $0xc8] sm:$0xff]  ;;  %v102_v48 = vpack.c.bf16 %v34_v40, %v33_v37 }
   0xc   :  { %456 = vmatprep.subr.bf16.mxu1 %v125_v34  ;;  %v126_v43 = vpack.c.bf16 %v82_v42, %v81_v41  ;;  %v66_v45 = vld [vmem:[%s809_s1 + $0x138] sm:$0xff]  ;;  %v83_v49 = vld [vmem:[%s809_s1 + $0x1c0] sm:$0xff]  ;;  %v84_v50 = vld [vmem:[%s809_s1 + $0x1c8] sm:$0xff]  ;;  %v111_v52 = vpack.c.bf16 %v52_v47, %v51_v46 }
   0xd   :  { %429 = vmatpush3.bf16.msra.mxu0 %v101_v33  ;;  %v118_v51 = vpack.c.bf16 %v66_v45, %v65_v44  ;;  %v35_v53 = vld [vmem:[%s809_s1 + $0x40] sm:$0xff]  ;;  %v36_v54 = vld [vmem:[%s809_s1 + $0x48] sm:$0xff]  ;;  %v127_v56 = vpack.c.bf16 %v84_v50, %v83_v49  ;;  %v53_v58 = vld [vmem:[%s809_s1 + $0xd0] sm:$0xff] }
   0xe   :  { %430 = vmatprep.subr.bf16.mxu0 %v110_v39  ;;  %v67_v55 = vld [vmem:[%s809_s1 + $0x140] sm:$0xff]  ;;  %v68_v57 = vld [vmem:[%s809_s1 + $0x148] sm:$0xff]  ;;  %v54_v59 = vld [vmem:[%s809_s1 + $0xd8] sm:$0xff]  ;;  %v103_v62 = vpack.c.bf16 %v36_v54, %v35_v53 }
   0xf   :  { %457 = vmatpush3.bf16.msra.mxu1 %v117_v38  ;;  %v85_v60 = vld [vmem:[%s809_s1 + $0x1d0] sm:$0xff]  ;;  %v86_v61 = vld [vmem:[%s809_s1 + $0x1d8] sm:$0xff]  ;;  %v119_v63 = vpack.c.bf16 %v68_v57, %v67_v55  ;;  %v112_v0 = vpack.c.bf16 %v54_v59, %v53_v58  ;;  %v55_v6 = vld [vmem:[%s809_s1 + $0xe0] sm:$0xff] }
  0x10   :  { %458 = vmatprep.subr.bf16.mxu1 %v126_v43  ;;  %v37_v1 = vld [vmem:[%s809_s1 + $0x50] sm:$0xff]  ;;  %v38_v2 = vld [vmem:[%s809_s1 + $0x58] sm:$0xff]  ;;  %v128_v4 = vpack.c.bf16 %v86_v61, %v85_v60  ;;  %v56_v7 = vld [vmem:[%s809_s1 + $0xe8] sm:$0xff] }
  0x11   :  { %431 = vmatpush3.bf16.msra.mxu0 %v102_v48  ;;  %v69_v3 = vld [vmem:[%s809_s1 + $0x150] sm:$0xff]  ;;  %v70_v5 = vld [vmem:[%s809_s1 + $0x158] sm:$0xff]  ;;  %v39_v8 = vld [vmem:[%s809_s1 + $0x60] sm:$0xff]  ;;  %v104_v11 = vpack.c.bf16 %v38_v2, %v37_v1  ;;  %v113_v15 = vpack.c.bf16 %v56_v7, %v55_v6 }
  0x12   :  { %432 = vmatprep.subr.bf16.mxu0 %v111_v52  ;;  %v87_v9 = vld [vmem:[%s809_s1 + $0x1e0] sm:$0xff]  ;;  %v88_v10 = vld [vmem:[%s809_s1 + $0x1e8] sm:$0xff]  ;;  %v120_v14 = vpack.c.bf16 %v70_v5, %v69_v3  ;;  %v57_v19 = vld [vmem:[%s809_s1 + $0xf0] sm:$0xff] }
  0x13   :  { %459 = vmatpush3.bf16.msra.mxu1 %v118_v51  ;;  %v40_v12 = vld [vmem:[%s809_s1 + $0x68] sm:$0xff]  ;;  %v71_v13 = vld [vmem:[%s809_s1 + $0x160] sm:$0xff]  ;;  %v129_v18 = vpack.c.bf16 %v88_v10, %v87_v9  ;;  %v58_v20 = vld [vmem:[%s809_s1 + $0xf8] sm:$0xff] }
  0x14   :  { %460 = vmatprep.subr.bf16.mxu1 %v127_v56  ;;  %v72_v16 = vld [vmem:[%s809_s1 + $0x168] sm:$0xff]  ;;  %v500_v17 = vld [vmem:[%s810_s0 + $0x4] ss:$20 sps:$4 sm:$0xff]   ;;  %v89_v21 = vld [vmem:[%s809_s1 + $0x1f0] sm:$0xff]  ;;  %v105_v23 = vpack.c.bf16 %v40_v12, %v39_v8  ;;  %v114_v28 = vpack.c.bf16 %v58_v20, %v57_v19 }
  0x15   :  { %433 = vmatpush3.bf16.msra.mxu0 %v103_v62  ;;  %v90_v22 = vld [vmem:[%s809_s1 + $0x1f8] sm:$0xff]  ;;  %231 = vmatprep.mubr.bf16.mxu0 %v500_v17  ;;  %v41_v24 = vld [vmem:[%s809_s1 + $0x70] sm:$0xff]  ;;  %v503_v26 = vld [vmem:[%s810_s0 + $0xc] ss:$20 sps:$4 sm:$0xff]   ;;  %v121_v27 = vpack.c.bf16 %v72_v16, %v71_v13 }
  0x16   :  { %434 = vmatprep.subr.bf16.mxu0 %v112_v0  ;;  %v42_v25 = vld [vmem:[%s809_s1 + $0x78] sm:$0xff]  ;;  %v73_v29 = vld [vmem:[%s809_s1 + $0x170] sm:$0xff]  ;;  %v130_v30 = vpack.c.bf16 %v90_v22, %v89_v21  ;;  %v91_v32 = vld [vmem:[%s809_s1 + $0x200] sm:$0xff]  ;;  %280 = vmatprep.mubr.bf16.mxu1 %v503_v26 }
  0x17   :  { %461 = vmatpush3.bf16.msra.mxu1 %v119_v63  ;;  %v74_v31 = vld [vmem:[%s809_s1 + $0x178] sm:$0xff]  ;;  %v92_v33 = vld [vmem:[%s809_s1 + $0x208] sm:$0xff]  ;;  %v106_v34 = vpack.c.bf16 %v42_v25, %v41_v24  ;;  %v93_v37 = vld [vmem:[%s809_s1 + $0x210] sm:$0xff] }
  0x18   :  { %462 = vmatprep.subr.bf16.mxu1 %v128_v4  ;;  %v122_v35 = vpack.c.bf16 %v74_v31, %v73_v29  ;;  %v131_v36 = vpack.c.bf16 %v92_v33, %v91_v32  ;;  %v94_v38 = vld [vmem:[%s809_s1 + $0x218] sm:$0xff]  ;;  %v498_v39 = vld [vmem:[%s810_s0] ss:$20 sps:$4 sm:$0xff]   ;;  %v96_v44 = vld [vmem:[%s809_s1 + $0x228] sm:$0xff] }
  0x19   :  { %435 = vmatpush3.bf16.msra.mxu0 %v104_v11  ;;  %v501_v40 = vld [vmem:[%s810_s0 + $0x8] ss:$20 sps:$4 sm:$0xff]   ;;  %v132_v41 = vpack.c.bf16 %v94_v38, %v93_v37  ;;  %v504_v42 = vld [vmem:[%s810_s0 + $0x2c] ss:$20 sps:$4 sm:$0xff]   ;;  %v97_v47 = vld [vmem:[%s809_s1 + $0x230] sm:$0xff] }
  0x1a   :  { %436 = vmatprep.subr.bf16.mxu0 %v113_v15  ;;  %v95_v43 = vld [vmem:[%s809_s1 + $0x220] sm:$0xff]  ;;  %v507_v45 = vld [vmem:[%s810_s0 + $0x34] ss:$20 sps:$4 sm:$0xff]   ;;  %v98_v48 = vld [vmem:[%s809_s1 + $0x238] sm:$0xff] }
  0x1b   :  { %463 = vmatpush3.bf16.msra.mxu1 %v120_v14  ;;  %v133_v46 = vpack.c.bf16 %v96_v44, %v95_v43  ;;  %v506_v49 = vld [vmem:[%s810_s0 + $0x28] ss:$20 sps:$4 sm:$0xff]   ;;  %v509_v50 = vld [vmem:[%s810_s0 + $0x30] ss:$20 sps:$4 sm:$0xff]   ;;  %v134_v51 = vpack.c.bf16 %v98_v48, %v97_v47  ;;  %v511_v53 = vld [vmem:[%s810_s0 + $0x38] ss:$20 sps:$4 sm:$0xff]  }
  0x1c   :  { %464 = vmatprep.subr.bf16.mxu1 %v129_v18  ;;  %v510_v52 = vld [vmem:[%s810_s0 + $0x10] ss:$20 sps:$4 sm:$0xff]   ;;  %v399_v55 = vld [vmem:[%s811_s2] ss:$0 sm:$0xff] }
  0x1d   :  { %437 = vmatpush3.bf16.msra.mxu0 %v105_v23 }
  0x1e   :  { %438 = vmatprep.subr.bf16.mxu0 %v114_v28 }
  0x1f   :  { %465 = vmatpush3.bf16.msra.mxu1 %v121_v27 }
  0x20   :  { %466 = vmatprep.subr.bf16.mxu1 %v130_v30 }
  0x21   :  { %439 = vmatpush3.bf16.msra.mxu0 %v106_v34 }
  0x22   :  { %486 = vmatprep.subr.bf16.mxu0 %v131_v36 }
  0x23   :  { %467 = vmatpush3.bf16.msra.mxu1 %v122_v35 }
  0x24   :  { %232 = vmatmul.mubr.bf16.vlgmr.msra.gmra.mrb[0].mxu0 %v498_v39 }
  0x25   :  { %487 = vmatpush3.bf16.msra.mxu0 %v131_v36  ;;  %239 = vmatprep.mubr.bf16.mxu0 %v504_v42 }
  0x26   :  { %281 = vmatmul.mubr.bf16.vlgmr.msra.gmra.mrb[0].mxu1 %v501_v40  ;;  %488 = vmatprep.subr.bf16.mxu0 %v132_v41 }
  0x27   :  { %288 = vmatprep.mubr.bf16.mxu1 %v507_v45 }
  0x29   :  { %489 = vmatpush3.bf16.msra.mxu0 %v132_v41 }
  0x2a   :  { %490 = vmatprep.subr.bf16.mxu0 %v133_v46 }
  0x2c   :  { %240 = vmatmul.mubr.bf16.gmra.mrb[4].mxu0 %v506_v49 }
  0x2d   :  { %491 = vmatpush3.bf16.msra.mxu0 %v133_v46  ;;  %494 = vmatprep.mubr.msk.bf16.mxu0 %vm192_vm0, %v510_v52 }
  0x2e   :  { %289 = vmatmul.mubr.bf16.gmra.mrb[4].mxu1 %v509_v50  ;;  %492 = vmatprep.subr.bf16.mxu0 %v134_v51 }
  0x31   :  { %493 = vmatpush3.bf16.msra.mxu0 %v134_v51 }
  0x34   :  { %495 = vmatmul.mubr.msk.bf16.vlgmr.msra.gmra.mrb[8].mxu0 %vm192_vm0, %v511_v53 }
  0xf7   :  { %v440_v54 = vpop.f32.mrb[0].mxu0 }
  0xf8   :  { %v441_v56 = vpop.f32.mrb[1].mxu0 }
  0xf9   :  { %v468_v57 = vpop.f32.mrb[0].mxu1  ;;  %v442_v58 = vadd.f32 %v441_v56, %v440_v54  ;;  %v443_v59 = vpop.f32.mrb[2].mxu0 }
  0xfa   :  { %v469_v60 = vpop.f32.mrb[1].mxu1  ;;  %v444_v61 = vpop.f32.mrb[3].mxu0 }
  0xfb   :  { %v470_v62 = vadd.f32 %v469_v60, %v468_v57  ;;  %v471_v63 = vpop.f32.mrb[2].mxu1  ;;  %v234_v0 = vadd.f32 %v442_v58, %v399_v55  ;;  %v445_v1 = vadd.f32 %v444_v61, %v443_v59 }
  0xfc   :  { %v472_v2 = vpop.f32.mrb[3].mxu1 }
  0xfd   :  { %v473_v3 = vadd.f32 %v472_v2, %v471_v63  ;;  %v237_v4 = vadd.f32 %v445_v1, %v399_v55  ;;  %v283_v5 = vadd.f32 %v470_v62, %v234_v0 }
  0xff   :  { %v446_v6 = vpop.f32.mrb[4].mxu0  ;;  %v286_v7 = vadd.f32 %v473_v3, %v237_v4 }
 0x100   :  { %v447_v8 = vpop.f32.mrb[5].mxu0 }
 0x101   :  { %v474_v9 = vpop.f32.mrb[4].mxu1  ;;  %v448_v10 = vadd.f32 %v447_v8, %v446_v6  ;;  %v449_v11 = vpop.f32.mrb[6].mxu0 }
 0x102   :  { %v475_v12 = vpop.f32.mrb[5].mxu1  ;;  %v450_v13 = vpop.f32.mrb[7].mxu0 }
 0x103   :  { %v476_v14 = vadd.f32 %v475_v12, %v474_v9  ;;  %v477_v15 = vpop.f32.mrb[6].mxu1  ;;  %v242_v16 = vadd.f32 %v448_v10, %v399_v55  ;;  %v451_v17 = vadd.f32 %v450_v13, %v449_v11 }
 0x104   :  { %v478_v18 = vpop.f32.mrb[7].mxu1 }
 0x105   :  { %v479_v19 = vadd.f32 %v478_v18, %v477_v15  ;;  %v245_v20 = vadd.f32 %v451_v17, %v399_v55  ;;  %v291_v21 = vadd.f32 %v476_v14, %v242_v16 }
 0x107   :  { %v496_v22 = vpop.f32.mrb[8].mxu0  ;;  %v294_v23 = vadd.f32 %v479_v19, %v245_v20 }
 0x108   :  { %v340_v24 = vadd.f32 %v496_v22, %v291_v21  ;;  %v331_v25 = vpop.f32.mrb[9].mxu0 }
 0x109   :  { %v332_v26 = vadd.f32 %v331_v25, %v283_v5  ;;  %v497_v27 = vpop.f32.mrb[10].mxu0 }
 0x10a   :  { %v414_v28 = vmul.f32 -1.442695, %v340_v24  ;;  %v343_v29 = vadd.f32 %v497_v27, %v294_v23  ;;  %v334_v30 = vpop.f32.mrb[11].mxu0 }
 0x10b   :  { %v412_v31 = vmul.f32 -1.442695, %v332_v26  ;;  %v335_v32 = vadd.f32 %v334_v30, %v286_v7 }
 0x10c   :  { %512 = vpow2.f32 %v414_v28  ;;  %v415_v33 = vmul.f32 -1.442695, %v343_v29 }
 0x10d   :  { %514 = vpow2.f32 %v412_v31  ;;  %v413_v34 = vmul.f32 -1.442695, %v335_v32 }
 0x10e   :  { %516 = vpow2.f32 %v415_v33 }
 0x10f   :  { %518 = vpow2.f32 %v413_v34 }
 0x116   :  { %v513_v35 = vpop.eup %512 }
 0x117   :  { %v515_v36 = vpop.eup %514  ;;  %v360_v37 = vadd.f32 1.0, %v513_v35 }
 0x118   :  { %v517_v38 = vpop.eup %516  ;;  %v358_v39 = vadd.f32 1.0, %v515_v36 }
 0x119   :  { %v519_v40 = vpop.eup %518  ;;  %520 = vrcp.f32 %v360_v37  ;;  %v361_v41 = vadd.f32 1.0, %v517_v38 }
 0x11a   :  { %522 = vrcp.f32 %v358_v39  ;;  %v359_v42 = vadd.f32 1.0, %v519_v40 }
 0x11b   :  { %524 = vrcp.f32 %v361_v41 }
 0x11c   :  { %526 = vrcp.f32 %v359_v42 }
 0x123   :  { %v521_v43 = vpop.eup %520 }
 0x124   :  { %v523_v44 = vpop.eup %522  ;;  %v372_v45 = vmul.f32 %v521_v43, %v340_v24 }
 0x125   :  { %v525_v46 = vpop.eup %524  ;;  %v370_v47 = vmul.f32 %v523_v44, %v332_v26 }
 0x126   :  { %v527_v48 = vpop.eup %526  ;;  %v422_v49 = vpack.c.bf16 %v372_v45, %v372_v45  ;;  %v373_v50 = vmul.f32 %v525_v46, %v343_v29 }
 0x127   :  { %v420_v51 = vpack.c.bf16 %v370_v47, %v370_v47  ;;  %v371_v52 = vmul.f32 %v527_v48, %v335_v32 }
 0x128   :  { %393 = vst.msk [vmem:[%s812_s3 + $0x8] sm:$0xf] %vm390_vm1, %v422_v49  ;;  %v423_v53 = vpack.c.bf16 %v373_v50, %v373_v50 }
 0x129   :  { %391 = vst.msk [vmem:[%s812_s3] sm:$0xf] %vm390_vm1, %v420_v51  ;;  %v421_v54 = vpack.c.bf16 %v371_v52, %v371_v52 }
 0x12a   :  { %394 = vst.msk [vmem:[%s812_s3 + $0xc] sm:$0xf] %vm390_vm1, %v423_v53 }
 0x12b   :  { %392 = vst.msk [vmem:[%s812_s3 + $0x4] sm:$0xf] %vm390_vm1, %v421_v54 }

// kernel: vitaev2_vsa_forward.40
= control target key start
LH: loop header
LB: loop body
LE: loop exit
PB: predicated region body
PF: predicated region fallthrough
CT: control target
= control target key end

     0   :  { %v126_v0 = vmov 0   ;;  %vm56_vm0 = vcmask 130048   ;;  %vm108_vm1 = vcmask 125952   ;;  %s210_s1 = inlined_call_operand.vmem [shape: f32[144,16], index: 1, kind: input, shape index: {}]   ;;  %s211_s0 = inlined_call_operand.vmem [shape: bf16[8,144], index: 0, kind: input, shape index: {}]   ;;  %s212_s2 = inlined_call_operand.vmem [shape: f32[1,16], index: 2, kind: input, shape index: {}]   ;;  %s213_s3 = inlined_call_operand.vmem [shape: bf16[8,16], index: 3, kind: output, shape index: {}]  }
   0x1   :  { %60 = vmatprep.subr.bf16.mxu0 %v126_v0  ;;  %v16_v1 = vld [vmem:[%s210_s1] sm:$0xff]  ;;  %v17_v2 = vld [vmem:[%s210_s1 + $0x8] sm:$0xff]  ;;  %v18_v3 = vld [vmem:[%s210_s1 + $0x10] sm:$0xff] }
   0x2   :  { %v34_v4 = vpack.c.bf16 %v17_v2, %v16_v1  ;;  %v19_v5 = vld [vmem:[%s210_s1 + $0x18] sm:$0xff]  ;;  %v20_v7 = vld [vmem:[%s210_s1 + $0x20] sm:$0xff]  ;;  %v21_v8 = vld [vmem:[%s210_s1 + $0x28] sm:$0xff] }
   0x3   :  { %v35_v6 = vpack.c.bf16 %v19_v5, %v18_v3  ;;  %v15_v9 = vld [vmem:[%s211_s0] sm:$0xff]  ;;  %v36_v10 = vpack.c.bf16 %v21_v8, %v20_v7  ;;  %v22_v12 = vld [vmem:[%s210_s1 + $0x30] sm:$0xff]  ;;  %v23_v13 = vld [vmem:[%s210_s1 + $0x38] sm:$0xff] }
   0x4   :  { %61 = vmatpush1.bf16.msra.mxu0 %v34_v4  ;;  %v116_v11 = vcombine.high %v15_v9, %v15_v9  ;;  %v37_v14 = vpack.c.bf16 %v23_v13, %v22_v12  ;;  %v24_v15 = vld [vmem:[%s210_s1 + $0x40] sm:$0xff]  ;;  %v25_v16 = vld [vmem:[%s210_s1 + $0x48] sm:$0xff]  ;;  %v26_v18 = vld [vmem:[%s210_s1 + $0x50] sm:$0xff]  ;;  %v115_v30 = vcombine.low %v15_v9, %v15_v9 }
   0x5   :  { %62 = vmatprep.subr.bf16.mxu0 %v126_v0  ;;  %v38_v17 = vpack.c.bf16 %v25_v16, %v24_v15  ;;  %v27_v19 = vld [vmem:[%s210_s1 + $0x58] sm:$0xff]  ;;  %v28_v21 = vld [vmem:[%s210_s1 + $0x60] sm:$0xff]  ;;  %v29_v22 = vld [vmem:[%s210_s1 + $0x68] sm:$0xff] }
   0x6   :  { %117 = vmatprep.mubr.msk.bf16.mxu0 %vm56_vm0, %v116_v11  ;;  %v39_v20 = vpack.c.bf16 %v27_v19, %v26_v18  ;;  %v40_v23 = vpack.c.bf16 %v29_v22, %v28_v21  ;;  %v30_v24 = vld [vmem:[%s210_s1 + $0x70] sm:$0xff]  ;;  %v31_v25 = vld [vmem:[%s210_s1 + $0x78] sm:$0xff]  ;;  %v32_v27 = vld [vmem:[%s210_s1 + $0x80] sm:$0xff] }
   0x7   :  { %v41_v26 = vpack.c.bf16 %v31_v25, %v30_v24  ;;  %v33_v28 = vld [vmem:[%s210_s1 + $0x88] sm:$0xff]  ;;  %v114_v31 = vld [vmem:[%s212_s2] ss:$0 sm:$0xff] }
   0x8   :  { %63 = vmatpush1.bf16.msra.mxu0 %v35_v6  ;;  %v42_v29 = vpack.c.bf16 %v33_v28, %v32_v27 }
   0x9   :  { %64 = vmatprep.subr.bf16.mxu0 %v126_v0 }
   0xc   :  { %65 = vmatpush1.bf16.msra.mxu0 %v36_v10 }
   0xd   :  { %66 = vmatprep.subr.bf16.mxu0 %v126_v0 }
  0x10   :  { %67 = vmatpush1.bf16.msra.mxu0 %v37_v14 }
  0x11   :  { %68 = vmatprep.subr.bf16.mxu0 %v126_v0 }
  0x14   :  { %69 = vmatpush1.bf16.msra.mxu0 %v38_v17 }
  0x15   :  { %70 = vmatprep.subr.bf16.mxu0 %v126_v0 }
  0x18   :  { %71 = vmatpush1.bf16.msra.mxu0 %v39_v20 }
  0x19   :  { %72 = vmatprep.subr.bf16.mxu0 %v126_v0 }
  0x1c   :  { %73 = vmatpush1.bf16.msra.mxu0 %v40_v23 }
  0x1d   :  { %74 = vmatprep.subr.bf16.mxu0 %v126_v0 }
  0x20   :  { %75 = vmatpush1.bf16.msra.mxu0 %v41_v26 }
  0x21   :  { %76 = vmatprep.subr.bf16.mxu0 %v126_v0 }
  0x24   :  { %77 = vmatpush1.bf16.msra.mxu0 %v42_v29 }
  0x27   :  { %93 = vmatmul.mubr.bf16.vlgmr.msra.gmra.mrb[0].mxu0 %v115_v30 }
  0xfa   :  { %v94_v32 = vpop.f32.mrb[0].mxu0 }
  0xfb   :  { %v95_v33 = vadd.f32 %v114_v31, %v94_v32  ;;  %v96_v34 = vpop.f32.mrb[1].mxu0 }
  0xfc   :  { %v97_v35 = vpop.f32.mrb[2].mxu0 }
  0xfd   :  { %v118_v36 = vmul.f32 -1.442695, %v95_v33  ;;  %v98_v37 = vpop.f32.mrb[3].mxu0 }
  0xff   :  { %122 = vpow2.f32 %v118_v36 }
 0x109   :  { %v123_v38 = vpop.eup %122 }
 0x10a   :  { %v103_v39 = vadd.f32 1.0, %v123_v38 }
 0x10c   :  { %124 = vrcp.f32 %v103_v39 }
 0x116   :  { %v125_v40 = vpop.eup %124 }
 0x117   :  { %v106_v41 = vmul.f32 %v125_v40, %v95_v33 }
 0x119   :  { %v107_v42 = vpack.c.bf16 %v106_v41, %v106_v41 }
 0x11b   :  { %109 = vst.msk [vmem:[%s213_s3] sm:$0xf] %vm108_vm1, %v107_v42 }

// kernel: vitaev2_vsa_forward.42
= control target key start
LH: loop header
LB: loop body
LE: loop exit
PB: predicated region body
PF: predicated region fallthrough
CT: control target
= control target key end

     0   :  { %v126_v0 = vmov 0   ;;  %vm56_vm0 = vcmask 130048   ;;  %vm108_vm1 = vcmask 257024   ;;  %s210_s1 = inlined_call_operand.vmem [shape: f32[144,32], index: 1, kind: input, shape index: {}]   ;;  %s211_s0 = inlined_call_operand.vmem [shape: bf16[8,144], index: 0, kind: input, shape index: {}]   ;;  %s212_s2 = inlined_call_operand.vmem [shape: f32[1,32], index: 2, kind: input, shape index: {}]   ;;  %s213_s3 = inlined_call_operand.vmem [shape: bf16[8,32], index: 3, kind: output, shape index: {}]  }
   0x1   :  { %60 = vmatprep.subr.bf16.mxu0 %v126_v0  ;;  %v16_v1 = vld [vmem:[%s210_s1] sm:$0xff]  ;;  %v17_v2 = vld [vmem:[%s210_s1 + $0x8] sm:$0xff]  ;;  %v18_v3 = vld [vmem:[%s210_s1 + $0x10] sm:$0xff] }
   0x2   :  { %v34_v4 = vpack.c.bf16 %v17_v2, %v16_v1  ;;  %v19_v5 = vld [vmem:[%s210_s1 + $0x18] sm:$0xff]  ;;  %v20_v7 = vld [vmem:[%s210_s1 + $0x20] sm:$0xff]  ;;  %v21_v8 = vld [vmem:[%s210_s1 + $0x28] sm:$0xff] }
   0x3   :  { %v35_v6 = vpack.c.bf16 %v19_v5, %v18_v3  ;;  %v15_v9 = vld [vmem:[%s211_s0] sm:$0xff]  ;;  %v36_v10 = vpack.c.bf16 %v21_v8, %v20_v7  ;;  %v22_v12 = vld [vmem:[%s210_s1 + $0x30] sm:$0xff]  ;;  %v23_v13 = vld [vmem:[%s210_s1 + $0x38] sm:$0xff] }
   0x4   :  { %61 = vmatpush1.bf16.msra.mxu0 %v34_v4  ;;  %v116_v11 = vcombine.high %v15_v9, %v15_v9  ;;  %v37_v14 = vpack.c.bf16 %v23_v13, %v22_v12  ;;  %v24_v15 = vld [vmem:[%s210_s1 + $0x40] sm:$0xff]  ;;  %v25_v16 = vld [vmem:[%s210_s1 + $0x48] sm:$0xff]  ;;  %v26_v18 = vld [vmem:[%s210_s1 + $0x50] sm:$0xff]  ;;  %v115_v30 = vcombine.low %v15_v9, %v15_v9 }
   0x5   :  { %62 = vmatprep.subr.bf16.mxu0 %v126_v0  ;;  %v38_v17 = vpack.c.bf16 %v25_v16, %v24_v15  ;;  %v27_v19 = vld [vmem:[%s210_s1 + $0x58] sm:$0xff]  ;;  %v28_v21 = vld [vmem:[%s210_s1 + $0x60] sm:$0xff]  ;;  %v29_v22 = vld [vmem:[%s210_s1 + $0x68] sm:$0xff] }
   0x6   :  { %117 = vmatprep.mubr.msk.bf16.mxu0 %vm56_vm0, %v116_v11  ;;  %v39_v20 = vpack.c.bf16 %v27_v19, %v26_v18  ;;  %v40_v23 = vpack.c.bf16 %v29_v22, %v28_v21  ;;  %v30_v24 = vld [vmem:[%s210_s1 + $0x70] sm:$0xff]  ;;  %v31_v25 = vld [vmem:[%s210_s1 + $0x78] sm:$0xff]  ;;  %v32_v27 = vld [vmem:[%s210_s1 + $0x80] sm:$0xff] }
   0x7   :  { %v41_v26 = vpack.c.bf16 %v31_v25, %v30_v24  ;;  %v33_v28 = vld [vmem:[%s210_s1 + $0x88] sm:$0xff]  ;;  %v114_v31 = vld [vmem:[%s212_s2] ss:$0 sm:$0xff] }
   0x8   :  { %63 = vmatpush1.bf16.msra.mxu0 %v35_v6  ;;  %v42_v29 = vpack.c.bf16 %v33_v28, %v32_v27 }
   0x9   :  { %64 = vmatprep.subr.bf16.mxu0 %v126_v0 }
   0xc   :  { %65 = vmatpush1.bf16.msra.mxu0 %v36_v10 }
   0xd   :  { %66 = vmatprep.subr.bf16.mxu0 %v126_v0 }
  0x10   :  { %67 = vmatpush1.bf16.msra.mxu0 %v37_v14 }
  0x11   :  { %68 = vmatprep.subr.bf16.mxu0 %v126_v0 }
  0x14   :  { %69 = vmatpush1.bf16.msra.mxu0 %v38_v17 }
  0x15   :  { %70 = vmatprep.subr.bf16.mxu0 %v126_v0 }
  0x18   :  { %71 = vmatpush1.bf16.msra.mxu0 %v39_v20 }
  0x19   :  { %72 = vmatprep.subr.bf16.mxu0 %v126_v0 }
  0x1c   :  { %73 = vmatpush1.bf16.msra.mxu0 %v40_v23 }
  0x1d   :  { %74 = vmatprep.subr.bf16.mxu0 %v126_v0 }
  0x20   :  { %75 = vmatpush1.bf16.msra.mxu0 %v41_v26 }
  0x21   :  { %76 = vmatprep.subr.bf16.mxu0 %v126_v0 }
  0x24   :  { %77 = vmatpush1.bf16.msra.mxu0 %v42_v29 }
  0x27   :  { %93 = vmatmul.mubr.bf16.vlgmr.msra.gmra.mrb[0].mxu0 %v115_v30 }
  0xfa   :  { %v94_v32 = vpop.f32.mrb[0].mxu0 }
  0xfb   :  { %v95_v33 = vadd.f32 %v114_v31, %v94_v32  ;;  %v96_v34 = vpop.f32.mrb[1].mxu0 }
  0xfc   :  { %v97_v35 = vpop.f32.mrb[2].mxu0 }
  0xfd   :  { %v118_v36 = vmul.f32 -1.442695, %v95_v33  ;;  %v98_v37 = vpop.f32.mrb[3].mxu0 }
  0xff   :  { %122 = vpow2.f32 %v118_v36 }
 0x109   :  { %v123_v38 = vpop.eup %122 }
 0x10a   :  { %v103_v39 = vadd.f32 1.0, %v123_v38 }
 0x10c   :  { %124 = vrcp.f32 %v103_v39 }
 0x116   :  { %v125_v40 = vpop.eup %124 }
 0x117   :  { %v106_v41 = vmul.f32 %v125_v40, %v95_v33 }
 0x119   :  { %v107_v42 = vpack.c.bf16 %v106_v41, %v106_v41 }
 0x11b   :  { %109 = vst.msk [vmem:[%s213_s3] sm:$0xf] %vm108_vm1, %v107_v42 }

// kernel: vitaev2_vsa_forward.34
= control target key start
LH: loop header
LB: loop body
LE: loop exit
PB: predicated region body
PF: predicated region fallthrough
CT: control target
= control target key end

     0   :  { %s3565_s29 = smov 0   ;;  %s4059_s0 = inlined_call_operand.vmem [shape: bf16[64,16], index: 0, kind: input, shape index: {}]   ;;  %s4060_s1 = inlined_call_operand.vmem [shape: bf16[64,16], index: 1, kind: input, shape index: {}]   ;;  %s4061_s2 = inlined_call_operand.vmem [shape: f32[1,16], index: 2, kind: input, shape index: {}]   ;;  %s4062_s3 = inlined_call_operand.vmem [shape: f32[1,16], index: 3, kind: input, shape index: {}]   ;;  %s4063_s4 = inlined_call_operand.vmem [shape: f32[16,48], index: 4, kind: input, shape index: {}]   ;;  %s4064_s5 = inlined_call_operand.vmem [shape: f32[1,48], index: 5, kind: input, shape index: {}]   ;;  %s4065_s6 = inlined_call_operand.vmem [shape: f32[16,16], index: 6, kind: input, shape index: {}]   ;;  %s4066_s7 = inlined_call_operand.vmem [shape: f32[1,16], index: 7, kind: input, shape index: {}]   ;;  %s4067_s8 = inlined_call_operand.vmem [shape: f32[1,16], index: 8, kind: input, shape index: {}]   ;;  %s4068_s9 = inlined_call_operand.vmem [shape: f32[1,16], index: 9, kind: input, shape index: {}]   ;;  %s4069_s10 = inlined_call_operand.vmem [shape: f32[16,64], index: 10, kind: input, shape index: {}]   ;;  %s4070_s11 = inlined_call_operand.vmem [shape: f32[1,64], index: 11, kind: input, shape index: {}]   ;;  %s4071_s12 = inlined_call_operand.vmem [shape: f32[64,16], index: 12, kind: input, shape index: {}]   ;;  %s4072_s13 = inlined_call_operand.vmem [shape: f32[1,16], index: 13, kind: input, shape index: {}]   ;;  %s4073_s14 = inlined_call_operand.vmem [shape: bf16[64,16], index: 14, kind: output, shape index: {}]  }
   0x1 LB: > { %s2936_s30 = sadd.s32 4294967295, %s3472_s29   ;;  %p2940_p0 = scmp.ge.s32.totalorder %s3472_s29, 1  ;;  %s3472_s29 = sphi %s3565_s29, %s24_s29  }
   0x2   : > { %p424_p1 = scmp.lt.s32.totalorder %s3472_s29, 3 }
   0x4   : > { %p425_p2 = pnand %p2940_p0, %p424_p1 }
   0x5   : > { %s2941_s15 = sshll.u32 (!%p425_p2), %s2936_s30, 2  ;;  %vm502_vm0 = vcmask (!%p425_p2), 130048   ;;  %v580_v30 = vld [vmem:[%s4063_s4] sm:$0xff] (!%p425_p2)  ;;  %v581_v31 = vld [vmem:[%s4063_s4 + $0x8] sm:$0xff] (!%p425_p2)  ;;  %vm3475_vm1 = vmmov (!%p425_p2), 0   ;;  %vm655_vm2 = vcmask (!%p425_p2), 31744  }
   0x6   : > { %428 = sbr.rel (%p425_p2) target bundleno = 4399 (0x112f), region = 76  ;;  %p476_p3 = scmp.lt.s32.totalorder (!%p425_p2), %s2941_s15, 7  ;;  %v582_v32 = vpack.c.bf16 (!%p425_p2), %v581_v31, %v580_v30  ;;  %v2947_v47 = vld [vmem:[%s4061_s2] ss:$0 sm:$0xff] (!%p425_p2)  ;;  %vm859_vm4 = vcmask (!%p425_p2), 64512   ;;  %vm913_vm5 = vcmask (!%p425_p2), 1043456  }
   0x7   : > { %v2948_v53 = vld [vmem:[%s4062_s3] ss:$0 sm:$0xff] (!%p425_p2)  ;;  %s3477_s17 = smov (!%p425_p2), 96   ;;  %s3478_s18 = smov (!%p425_p2), 108   ;;  %vm2501_vm6 = vcmask (!%p425_p2), 97280   ;;  %vm2787_vm7 = vcmask (!%p425_p2), 523264  }
   0x8   : > { %3102 = vmatprep.subr.bf16.mxu0 (!%p425_p2), %v582_v32  ;;  %s3480_s20 = smov (!%p425_p2), 92   ;;  %s3481_s21 = smov (!%p425_p2), 104   ;;  %vm2863_vm8 = vcmask (!%p425_p2), 125952  }
   0x9   : > { %3103 = vmatpush3.bf16.msra.mxu0 (!%p425_p2), %v582_v32  ;;  %s3482_s22 = smov (!%p425_p2), 120   ;;  %s3483_s23 = smov (!%p425_p2), 88  }
   0xa   : > { %s3484_s24 = smov (!%p425_p2), 100   ;;  %s3485_s25 = smov (!%p425_p2), 116  }
   0xb   : > { %s3486_s26 = smov (!%p425_p2), 84   ;;  %s3487_s27 = smov (!%p425_p2), 4  }
   0xc   : > { %s3488_s28 = smov (!%p425_p2), 8  }
   0xd   : > { %s4075_s15 = smov (!%p476_p3, %s2941_s15), 7 }
   0xe   : > { %s3573_s16 = sshll.u32 %s4075_s15, 2  ;;  %s3476_s15 = smov 112  }
   0xf   : > { %s479_s19 = scalar_lea.vmem %s4059_s0, %s3573_s16 }
  0x10   : > { %v3006_v0 = vld [vmem:[%s479_s19] sm:$0xff]   ;;  %v3021_v1 = vld [vmem:[%s479_s19 + $0x8] sm:$0xff]   ;;  %s3479_s19 = smov 124  }
  0x11   : > { %v3579_v2 = vunpack.c.l.bf16 %v3006_v0  ;;  %v3581_v3 = vunpack.c.l.bf16 %v3021_v1  ;;  %v3583_v4 = vunpack.c.h.bf16 %v3006_v0  ;;  %v3585_v5 = vunpack.c.h.bf16 %v3021_v1 }
  0x12   : > { %v3474_v1 = vmov 0.0  }
  0x13   : > { %v503_v6 = vsel %vm502_vm0, %v3579_v2, 0.0  ;;  %v509_v7 = vsel %vm502_vm0, %v3581_v3, 0.0  ;;  %v506_v8 = vsel %vm502_vm0, %v3583_v4, 0.0  ;;  %v512_v9 = vsel %vm502_vm0, %v3585_v5, 0.0  ;;  %3108 = vmatprep.subr.bf16.mxu0 %v3474_v1  ;;  %3120 = vmatprep.subr.bf16.mxu1 %v3474_v1 }
  0x14   : > { %504 = vadd.xlane.f32.xlu0 %v503_v6  ;;  %510 = vadd.xlane.f32.xlu1 %v509_v7  ;;  %v2949_v6 = vld [vmem:[%s4064_s5] ss:$0 sm:$0xff] }
  0x15   : > { %3122 = vmatprep.mubr.msk.bf16.mxu1 %vm3475_vm1, %v3474_v1 }
  0x18   : > { %507 = vadd.xlane.f32.xlu0 %v506_v8  ;;  %513 = vadd.xlane.f32.xlu1 %v512_v9 }
  0xa1   : > { %v505_v10 = vpop.xlane.xlu0 %504  ;;  %v511_v11 = vpop.xlane.xlu1 %510 }
  0xa2   : > { %v516_v12 = vmul.f32 0.0625, %v505_v10  ;;  %v518_v13 = vmul.f32 0.0625, %v511_v11 }
  0xa4   : > { %v520_v14 = vsub.f32 %v3579_v2, %v516_v12  ;;  %v522_v15 = vsub.f32 %v3581_v3, %v518_v13 }
  0xa5   : > { %v508_v16 = vpop.xlane.xlu0 %507  ;;  %v514_v17 = vpop.xlane.xlu1 %513 }
  0xa6   : > { %v517_v18 = vmul.f32 0.0625, %v508_v16  ;;  %v519_v19 = vmul.f32 0.0625, %v514_v17  ;;  %v524_v20 = vmul.f32 %v520_v14, %v520_v14  ;;  %v526_v21 = vmul.f32 %v522_v15, %v522_v15 }
  0xa8   : > { %v521_v22 = vsub.f32 %v3583_v4, %v517_v18  ;;  %v523_v23 = vsub.f32 %v3585_v5, %v519_v19  ;;  %v528_v24 = vsel %vm502_vm0, %v524_v20, 0.0  ;;  %v534_v25 = vsel %vm502_vm0, %v526_v21, 0.0 }
  0xa9   : > { %529 = vadd.xlane.f32.xlu0 %v528_v24 }
  0xaa   : > { %v525_v26 = vmul.f32 %v521_v22, %v521_v22  ;;  %v527_v27 = vmul.f32 %v523_v23, %v523_v23 }
  0xac   : > { %v531_v28 = vsel %vm502_vm0, %v525_v26, 0.0  ;;  %v537_v29 = vsel %vm502_vm0, %v527_v27, 0.0  ;;  %v645_v27 = vlaneseq }
  0xad   : > { %535 = vadd.xlane.f32.xlu0 %v534_v25  ;;  %532 = vadd.xlane.f32.xlu1 %v531_v28 }
  0xae   : > { %v3662_v28 = vand.u32 127, %v645_v27 }
  0xb0   : > { %vm647_vm3 = vcmp.lt.s32.totalorder %v3662_v28, 4 }
  0xb1   : > { %538 = vadd.xlane.f32.xlu1 %v537_v29 }
 0x136   : > { %v530_v33 = vpop.xlane.xlu0 %529 }
 0x137   : > { %v540_v34 = vmul.f32 0.0625, %v530_v33 }
 0x139   : > { %v544_v35 = vadd.f32 1e-06, %v540_v34 }
 0x13a   : > { %v533_v36 = vpop.xlane.xlu1 %532  ;;  %v536_v37 = vpop.xlane.xlu0 %535 }
 0x13b   : > { %3378 = vrsqrt.f32 %v544_v35  ;;  %v541_v38 = vmul.f32 0.0625, %v533_v36  ;;  %v542_v39 = vmul.f32 0.0625, %v536_v37 }
 0x13d   : > { %v545_v40 = vadd.f32 1e-06, %v541_v38  ;;  %v546_v41 = vadd.f32 1e-06, %v542_v39 }
 0x13e   : > { %v539_v42 = vpop.xlane.xlu1 %538 }
 0x13f   : > { %3380 = vrsqrt.f32 %v545_v40  ;;  %v543_v43 = vmul.f32 0.0625, %v539_v42 }
 0x140   : > { %3382 = vrsqrt.f32 %v546_v41 }
 0x141   : > { %v547_v44 = vadd.f32 1e-06, %v543_v43 }
 0x143   : > { %3384 = vrsqrt.f32 %v547_v44 }
 0x145   : > { %v3379_v45 = vpop.eup %3378 }
 0x146   : > { %v552_v46 = vmul.f32 %v3379_v45, %v520_v14 }
 0x148   : > { %v563_v51 = vmul.f32 %v2947_v47, %v552_v46 }
 0x149   : > { %v3381_v48 = vpop.eup %3380 }
 0x14a   : > { %v3383_v49 = vpop.eup %3382  ;;  %v553_v50 = vmul.f32 %v3381_v48, %v521_v22  ;;  %v574_v57 = vadd.f32 %v2948_v53, %v563_v51 }
 0x14b   : > { %v554_v52 = vmul.f32 %v3383_v49, %v522_v15 }
 0x14c   : > { %v564_v54 = vmul.f32 %v2947_v47, %v553_v50 }
 0x14d   : > { %v3385_v55 = vpop.eup %3384  ;;  %v565_v59 = vmul.f32 %v2947_v47, %v554_v52 }
 0x14e   : > { %v555_v56 = vmul.f32 %v3385_v55, %v523_v23  ;;  %v575_v58 = vadd.f32 %v2948_v53, %v564_v54 }
 0x14f   : > { %v576_v62 = vadd.f32 %v2948_v53, %v565_v59 }
 0x150   : > { %v578_v60 = vpack.c.bf16 %v575_v58, %v574_v57  ;;  %v566_v61 = vmul.f32 %v2947_v47, %v555_v56 }
 0x152   : > { %3104 = vmatprep.mubr.msk.bf16.mxu0 %vm502_vm0, %v578_v60  ;;  %v577_v63 = vadd.f32 %v2948_v53, %v566_v61 }
 0x154   : > { %v579_v0 = vpack.c.bf16 %v577_v63, %v576_v62 }
 0x156   : > { %3105 = vmatmul.mubr.msk.bf16.vlgmr.msra.gmra.mrb[0].mxu0 %vm502_vm0, %v579_v0 }
 0x157   : > { %3110 = vmatprep.mubr.msk.bf16.mxu0 %vm3475_vm1, %v3474_v1 }
 0x229   : > { %v3106_v7 = vpop.f32.mrb[0].mxu0 }
 0x22a   : > { %v630_v8 = vpop.f32.mrb[1].mxu0  ;;  %v639_v14 = vadd.f32 %v3106_v7, %v2949_v6 }
 0x22b   : > { %v631_v9 = vadd.f32 %v2949_v6, %v630_v8  ;;  %v3107_v10 = vpop.f32.mrb[2].mxu0 }
 0x22c   : > { %v633_v11 = vpop.f32.mrb[3].mxu0  ;;  %v3632_v16 = vpack.c.bf16 %v639_v14, %v639_v14  ;;  %v642_v17 = vadd.f32 %v3107_v10, %v2949_v6 }
 0x22d   : > { %v3626_v12 = vpack.c.bf16 %v631_v9, %v631_v9  ;;  %v634_v13 = vadd.f32 %v2949_v6, %v633_v11 }
 0x22e   : > { %v3635_v18 = vpack.c.bf16 %v642_v17, %v642_v17 }
 0x22f   : > { %v3628_v15 = vpack.c.bf16 %v634_v13, %v634_v13  ;;  %653 = vrot.lane.b32.xlu0 %v3626_v12, %s3476_s15 }
 0x231   : > { %703 = vrot.lane.b32.xlu1 %v3628_v15, %s3476_s15 }
 0x235   : > { %752 = vrot.lane.b32.xlu1 %v3632_v16, %s3476_s15 }
 0x239   : > { %801 = vrot.lane.b32.xlu1 %v3635_v18, %s3476_s15 }
 0x2a1   : > { %v654_v19 = vpop.permute.xlu0 %653 }
 0x2a2   : > { %v660_v20 = vsel %vm655_vm2, %v654_v19, 0 }
 0x2a3   : > { %v704_v21 = vpop.permute.xlu1 %703  ;;  %3109 = vmatpush3.bf16.xpose.msra.mxu0 %v660_v20 }
 0x2a4   : > { %3114 = vmatprep.subr.bf16.mxu0 %v3474_v1  ;;  %v709_v24 = vsel %vm655_vm2, %v704_v21, 0 }
 0x2a7   : > { %v753_v22 = vpop.permute.xlu1 %752 }
 0x2a8   : > { %v758_v23 = vsel %vm655_vm2, %v753_v22, 0 }
 0x2a9   : > { %3121 = vmatpush3.bf16.xpose.msra.mxu1 %v758_v23 }
 0x2aa   : > { %3111 = vmatmul.mubr.msk.bf16.vlgmr.msra.gmra.mrb[4].mxu0 %vm655_vm2, %v3626_v12  ;;  %3132 = vmatprep.subr.bf16.mxu1 %v3474_v1 }
 0x2ab   : > { %3115 = vmatpush3.bf16.xpose.msra.mxu0 %v709_v24  ;;  %3116 = vmatprep.mubr.msk.bf16.mxu0 %vm3475_vm1, %v3474_v1  ;;  %v802_v25 = vpop.permute.xlu1 %801 }
 0x2ac   : > { %3126 = vmatprep.subr.bf16.mxu0 %v3474_v1  ;;  %v807_v26 = vsel %vm655_vm2, %v802_v25, 0 }
 0x2b0   : > { %3123 = vmatmul.mubr.msk.bf16.vlgmr.msra.gmra.mrb[0].mxu1 %vm655_vm2, %v3632_v16 }
 0x2b1   : > { %3134 = vmatprep.mubr.msk.bf16.mxu1 %vm3475_vm1, %v3474_v1 }
 0x2b2   : > { %3117 = vmatmul.mubr.msk.bf16.vlgmr.msra.gmra.mrb[8].mxu0 %vm655_vm2, %v3628_v15 }
 0x2b3   : > { %3127 = vmatpush3.bf16.xpose.msra.mxu0 %v807_v26  ;;  %3128 = vmatprep.mubr.msk.bf16.mxu0 %vm3475_vm1, %v3474_v1 }
 0x2b4   : > { %3138 = vmatprep.subr.bf16.mxu0 %v3474_v1 }
 0x2ba   : > { %3129 = vmatmul.mubr.msk.bf16.vlgmr.msra.gmra.mrb[12].mxu0 %vm655_vm2, %v3635_v18 }
 0x2bb   : > { %3140 = vmatprep.mubr.msk.bf16.mxu0 %vm3475_vm1, %v3474_v1 }
 0x37d   : > { %v696_v29 = vpop.f32.mrb[4].mxu0 }
 0x37e   : > { %v849_v30 = vmul.f32 0.5, %v696_v29  ;;  %v3112_v31 = vpop.f32.mrb[5].mxu0 }
 0x37f   : > { %v699_v32 = vpop.f32.mrb[6].mxu0 }
 0x380   : > { %v3113_v33 = vpop.f32.mrb[7].mxu0  ;;  %v855_v34 = vsel %vm647_vm3, %v849_v30, -1e+09 }
 0x381   : > { %v860_v35 = vsel %vm859_vm4, %v855_v34, -inf }
 0x382   : > { %861 = vmax.xlane.f32.xlu0 %v860_v35 }
 0x383   : > { %v794_v36 = vpop.f32.mrb[0].mxu1 }
 0x384   : > { %v851_v37 = vmul.f32 0.5, %v794_v36  ;;  %v3124_v38 = vpop.f32.mrb[1].mxu1 }
 0x385   : > { %v745_v39 = vpop.f32.mrb[8].mxu0  ;;  %v797_v40 = vpop.f32.mrb[2].mxu1 }
 0x386   : > { %v850_v41 = vmul.f32 0.5, %v745_v39  ;;  %v3118_v42 = vpop.f32.mrb[9].mxu0  ;;  %v3125_v43 = vpop.f32.mrb[3].mxu1  ;;  %v857_v44 = vsel %vm647_vm3, %v851_v37, -1e+09 }
 0x387   : > { %v748_v45 = vpop.f32.mrb[10].mxu0  ;;  %v866_v46 = vsel %vm859_vm4, %v857_v44, -inf }
 0x388   : > { %867 = vmax.xlane.f32.xlu0 %v866_v46  ;;  %v3119_v47 = vpop.f32.mrb[11].mxu0  ;;  %v856_v48 = vsel %vm647_vm3, %v850_v41, -1e+09 }
 0x389   : > { %v863_v49 = vsel %vm859_vm4, %v856_v48, -inf }
 0x38a   : > { %864 = vmax.xlane.f32.xlu1 %v863_v49 }
 0x38d   : > { %v843_v50 = vpop.f32.mrb[12].mxu0 }
 0x38e   : > { %v852_v51 = vmul.f32 0.5, %v843_v50  ;;  %v3130_v52 = vpop.f32.mrb[13].mxu0 }
 0x38f   : > { %v846_v53 = vpop.f32.mrb[14].mxu0 }
 0x390   : > { %v3131_v54 = vpop.f32.mrb[15].mxu0  ;;  %v858_v55 = vsel %vm647_vm3, %v852_v51, -1e+09 }
 0x391   : > { %v869_v56 = vsel %vm859_vm4, %v858_v55, -inf }
 0x392   : > { %870 = vmax.xlane.f32.xlu0 %v869_v56 }
 0x39b   : > { %957 = vrot.lane.b32.xlu1 %v3628_v15, %s3477_s17 }
 0x39f   : > { %1005 = vrot.lane.b32.xlu1 %v3632_v16, %s3477_s17 }
 0x3a3   : > { %1053 = vrot.lane.b32.xlu1 %v3635_v18, %s3477_s17 }
 0x40f   : > { %v862_v57 = vpop.xlane.xlu0 %861 }
 0x410   : > { %v872_v58 = vsub.f32 %v855_v34, %v862_v57 }
 0x412   : > { %v876_v61 = vmul.f32 1.442695, %v872_v58 }
 0x415   : > { %v868_v59 = vpop.xlane.xlu0 %867 }
 0x416   : > { %v874_v60 = vsub.f32 %v857_v44, %v868_v59 }
 0x417   : > { %v865_v62 = vpop.xlane.xlu1 %864 }
 0x418   : > { %v880_v63 = vmul.f32 1.442695, %v874_v60  ;;  %v873_v0 = vsub.f32 %v856_v48, %v865_v62 }
 0x41a   : > { %3386 = vpow2.f32 %v880_v63  ;;  %v878_v6 = vmul.f32 1.442695, %v873_v0 }
 0x41b   : > { %3388 = vpow2.f32 %v876_v61  ;;  %v958_v7 = vpop.permute.xlu1 %957 }
 0x41c   : > { %3390 = vpow2.f32 %v878_v6  ;;  %v963_v8 = vsel %vm913_vm5, %v958_v7, 0 }
 0x41d   : > { %3139 = vmatpush3.bf16.msra.mxu0 %v963_v8 }
 0x41e   : > { %3150 = vmatprep.subr.bf16.mxu0 %v3474_v1 }
 0x41f   : > { %v871_v19 = vpop.xlane.xlu0 %870  ;;  %v1006_v24 = vpop.permute.xlu1 %1005 }
 0x420   : > { %v875_v20 = vsub.f32 %v858_v55, %v871_v19  ;;  %v1011_v40 = vsel %vm913_vm5, %v1006_v24, 0 }
 0x422   : > { %v882_v21 = vmul.f32 1.442695, %v875_v20 }
 0x423   : > { %v1054_v25 = vpop.permute.xlu1 %1053 }
 0x424   : > { %v3387_v9 = vpop.eup %3386  ;;  %3392 = vpow2.f32 %v882_v21  ;;  %v1059_v37 = vsel %vm913_vm5, %v1054_v25, 0 }
 0x425   : > { %v3389_v10 = vpop.eup %3388  ;;  %v890_v11 = vsel %vm859_vm4, %v3387_v9, 0.0 }
 0x426   : > { %v3391_v13 = vpop.eup %3390  ;;  %891 = vadd.xlane.f32.xlu0 %v890_v11  ;;  %v884_v17 = vsel %vm859_vm4, %v3389_v10, 0.0 }
 0x427   : > { %v887_v14 = vsel %vm859_vm4, %v3391_v13, 0.0 }
 0x428   : > { %888 = vadd.xlane.f32.xlu1 %v887_v14 }
 0x42a   : > { %885 = vadd.xlane.f32.xlu0 %v884_v17 }
 0x42e   : > { %v3393_v22 = vpop.eup %3392 }
 0x42f   : > { %v893_v23 = vsel %vm859_vm4, %v3393_v22, 0.0 }
 0x439   : > { %1153 = vrot.lane.b32.xlu1 %v3628_v15, %s3478_s18 }
 0x440   : > { %908 = vrot.lane.b32.xlu0 %v3626_v12, %s3477_s17 }
 0x444   : > { %1103 = vrot.lane.b32.xlu0 %v3626_v12, %s3478_s18 }
 0x448   : > { %1101 = vrot.lane.b32.xlu0 %v3626_v12, %s3479_s19 }
 0x44c   : > { %1203 = vrot.lane.b32.xlu0 %v3632_v16, %s3478_s18 }
 0x450   : > { %1201 = vrot.lane.b32.xlu0 %v3632_v16, %s3479_s19 }
 0x45d   : > { %894 = vadd.xlane.f32.xlu1 %v893_v23 }
 0x46e   : > { %1151 = vrot.lane.b32.xlu1 %v3628_v15, %s3479_s19 }
 0x472   : > { %1253 = vrot.lane.b32.xlu1 %v3635_v18, %s3478_s18 }
 0x476   : > { %1251 = vrot.lane.b32.xlu1 %v3635_v18, %s3479_s19  ;;  %s3489_s19 = smov 12  }
 0x4b3   : > { %v892_v26 = vpop.xlane.xlu0 %891 }
 0x4b5   : > { %v889_v27 = vpop.xlane.xlu1 %888 }
 0x4b6   : > { %3394 = vrcp.f32 %v889_v27 }
 0x4b7   : > { %v886_v29 = vpop.xlane.xlu0 %885 }
 0x4b8   : > { %3396 = vrcp.f32 %v886_v29 }
 0x4b9   : > { %3398 = vrcp.f32 %v892_v26  ;;  %v1154_v49 = vpop.permute.xlu1 %1153 }
 0x4ba   : > { %v1159_v55 = vsel %vm655_vm2, %v1154_v49, 0 }
 0x4bb   : > { %v909_v30 = vpop.permute.xlu0 %908 }
 0x4bc   : > { %v915_v31 = vsel %vm913_vm5, %v909_v30, 0 }
 0x4bd   : > { %3133 = vmatpush3.bf16.msra.mxu1 %v915_v31 }
 0x4be   : > { %3144 = vmatprep.subr.bf16.mxu1 %v3474_v1 }
 0x4bf   : > { %v1104_v42 = vpop.permute.xlu0 %1103 }
 0x4c0   : > { %v3395_v32 = vpop.eup %3394  ;;  %v1109_v45 = vsel %vm655_vm2, %v1104_v42, 0 }
 0x4c1   : > { %v901_v33 = vmul.f32 %v3395_v32, %v3391_v13 }
 0x4c2   : > { %v3397_v34 = vpop.eup %3396 }
 0x4c3   : > { %v900_v35 = vmul.f32 %v3397_v34, %v3389_v10  ;;  %v905_v36 = vpack.c.bf16 %v901_v33, %v901_v33  ;;  %v3399_v39 = vpop.eup %3398  ;;  %v1102_v44 = vpop.permute.xlu0 %1101 }
 0x4c4   : > { %v902_v41 = vmul.f32 %v3399_v39, %v3387_v9 }
 0x4c5   : > { %3141 = vmatmul.mubr.msk.bf16.vlgmr.msra.gmra.mrb[16].mxu0 %vm859_vm4, %v905_v36  ;;  %v904_v38 = vpack.c.bf16 %v900_v35, %v900_v35 }
 0x4c6   : > { %3151 = vmatpush3.bf16.msra.mxu0 %v1059_v37  ;;  %3152 = vmatprep.mubr.msk.bf16.mxu0 %vm3475_vm1, %v3474_v1  ;;  %v906_v43 = vpack.c.bf16 %v902_v41, %v902_v41 }
 0x4c7   : > { %3135 = vmatmul.mubr.msk.bf16.vlgmr.msra.gmra.mrb[4].mxu1 %vm859_vm4, %v904_v38  ;;  %3162 = vmatprep.subr.bf16.mxu0 %v3474_v1  ;;  %v1204_v46 = vpop.permute.xlu0 %1203 }
 0x4c8   : > { %3145 = vmatpush3.bf16.msra.mxu1 %v1011_v40  ;;  %3146 = vmatprep.mubr.msk.bf16.mxu1 %vm3475_vm1, %v3474_v1  ;;  %v1209_v47 = vsel %vm655_vm2, %v1204_v46, 0 }
 0x4c9   : > { %3156 = vmatprep.subr.bf16.mxu1 %v3474_v1 }
 0x4cb   : > { %v1202_v48 = vpop.permute.xlu0 %1201 }
 0x4cf   : > { %3147 = vmatmul.mubr.msk.bf16.vlgmr.msra.gmra.mrb[8].mxu1 %vm859_vm4, %v906_v43 }
 0x4d0   : > { %3158 = vmatprep.mubr.msk.bf16.mxu1 %vm3475_vm1, %v3474_v1 }
 0x4d1   : > { %3157 = vmatpush3.bf16.xpose.msra.mxu1 %v1109_v45 }
 0x4d2   : > { %3168 = vmatprep.subr.bf16.mxu1 %v3474_v1 }
 0x4d8   : > { %3159 = vmatmul.mubr.msk.bf16.vlgmr.msra.gmra.mrb[12].mxu1 %vm655_vm2, %v1102_v44 }
 0x4d9   : > { %3169 = vmatpush3.bf16.xpose.msra.mxu1 %v1209_v47  ;;  %3170 = vmatprep.mubr.msk.bf16.mxu1 %vm3475_vm1, %v3474_v1 }
 0x4da   : > { %3180 = vmatprep.subr.bf16.mxu1 %v3474_v1 }
 0x4e0   : > { %3171 = vmatmul.mubr.msk.bf16.vlgmr.msra.gmra.mrb[16].mxu1 %vm655_vm2, %v1202_v48 }
 0x4e1   : > { %3182 = vmatprep.mubr.msk.bf16.mxu1 %vm3475_vm1, %v3474_v1 }
 0x4ea   : > { %v895_v50 = vpop.xlane.xlu1 %894 }
 0x4eb   : > { %3400 = vrcp.f32 %v895_v50 }
 0x4ee   : > { %v1152_v54 = vpop.permute.xlu1 %1151 }
 0x4f2   : > { %v1254_v56 = vpop.permute.xlu1 %1253 }
 0x4f3   : > { %v1259_v57 = vsel %vm655_vm2, %v1254_v56, 0 }
 0x4f5   : > { %v3401_v51 = vpop.eup %3400 }
 0x4f6   : > { %v903_v52 = vmul.f32 %v3401_v51, %v3393_v22  ;;  %v1252_v58 = vpop.permute.xlu1 %1251 }
 0x4f8   : > { %v907_v53 = vpack.c.bf16 %v903_v52, %v903_v52 }
 0x4fa   : > { %3153 = vmatmul.mubr.msk.bf16.vlgmr.msra.gmra.mrb[20].mxu0 %vm859_vm4, %v907_v53 }
 0x4fb   : > { %3163 = vmatpush3.bf16.xpose.msra.mxu0 %v1159_v55  ;;  %3164 = vmatprep.mubr.msk.bf16.mxu0 %vm3475_vm1, %v3474_v1 }
 0x4fc   : > { %3174 = vmatprep.subr.bf16.mxu0 %v3474_v1 }
 0x502   : > { %3165 = vmatmul.mubr.msk.bf16.vlgmr.msra.gmra.mrb[24].mxu0 %vm655_vm2, %v1152_v54 }
 0x503   : > { %3175 = vmatpush3.bf16.xpose.msra.mxu0 %v1259_v57  ;;  %3176 = vmatprep.mubr.msk.bf16.mxu0 %vm3475_vm1, %v3474_v1 }
 0x504   : > { %3186 = vmatprep.subr.bf16.mxu0 %v3474_v1 }
 0x50a   : > { %3177 = vmatmul.mubr.msk.bf16.vlgmr.msra.gmra.mrb[28].mxu0 %vm655_vm2, %v1252_v58 }
 0x50b   : > { %3188 = vmatprep.mubr.msk.bf16.mxu0 %vm3475_vm1, %v3474_v1 }
 0x598   : > { %v3737_v59 = vpop.f32.mrb[16].mxu0 }
 0x599   : > { %v3142_v60 = vpop.f32.mrb[17].mxu0 }
 0x59a   : > { %v3739_v61 = vpop.f32.mrb[4].mxu1  ;;  %v1002_v62 = vpop.f32.mrb[18].mxu0 }
 0x59b   : > { %v3136_v63 = vpop.f32.mrb[5].mxu1  ;;  %v3143_v0 = vpop.f32.mrb[19].mxu0 }
 0x59c   : > { %v954_v6 = vpop.f32.mrb[6].mxu1 }
 0x59d   : > { %v3137_v7 = vpop.f32.mrb[7].mxu1 }
 0x5a2   : > { %v3741_v8 = vpop.f32.mrb[8].mxu1 }
 0x5a3   : > { %v3148_v9 = vpop.f32.mrb[9].mxu1 }
 0x5a4   : > { %v1050_v10 = vpop.f32.mrb[10].mxu1 }
 0x5a5   : > { %v3149_v11 = vpop.f32.mrb[11].mxu1 }
 0x5ab   : > { %v1145_v13 = vpop.f32.mrb[12].mxu1 }
 0x5ac   : > { %v1301_v14 = vmul.f32 0.5, %v1145_v13  ;;  %v3160_v17 = vpop.f32.mrb[13].mxu1 }
 0x5ad   : > { %v1148_v19 = vpop.f32.mrb[14].mxu1 }
 0x5ae   : > { %v3161_v20 = vpop.f32.mrb[15].mxu1  ;;  %v1305_v21 = vsel %vm647_vm3, %v1301_v14, -1e+09 }
 0x5af   : > { %v1309_v22 = vsel %vm859_vm4, %v1305_v21, -inf }
 0x5b0   : > { %1310 = vmax.xlane.f32.xlu0 %v1309_v22 }
 0x5b3   : > { %v1245_v23 = vpop.f32.mrb[16].mxu1 }
 0x5b4   : > { %v1303_v24 = vmul.f32 0.5, %v1245_v23  ;;  %v3172_v25 = vpop.f32.mrb[17].mxu1 }
 0x5b5   : > { %v1248_v26 = vpop.f32.mrb[18].mxu1 }
 0x5b6   : > { %v3173_v27 = vpop.f32.mrb[19].mxu1  ;;  %v1307_v29 = vsel %vm647_vm3, %v1303_v24, -1e+09 }
 0x5b7   : > { %v1315_v30 = vsel %vm859_vm4, %v1307_v29, -inf }
 0x5b8   : > { %1316 = vmax.xlane.f32.xlu0 %v1315_v30 }
 0x5cd   : > { %v3749_v31 = vpop.f32.mrb[20].mxu0 }
 0x5ce   : > { %v3154_v32 = vpop.f32.mrb[21].mxu0 }
 0x5cf   : > { %v1098_v33 = vpop.f32.mrb[22].mxu0 }
 0x5d0   : > { %v3155_v34 = vpop.f32.mrb[23].mxu0 }
 0x5d5   : > { %v1195_v35 = vpop.f32.mrb[24].mxu0 }
 0x5d6   : > { %v1302_v36 = vmul.f32 0.5, %v1195_v35  ;;  %v3166_v37 = vpop.f32.mrb[25].mxu0 }
 0x5d7   : > { %v1198_v38 = vpop.f32.mrb[26].mxu0 }
 0x5d8   : > { %v3167_v39 = vpop.f32.mrb[27].mxu0  ;;  %v1306_v40 = vsel %vm647_vm3, %v1302_v36, -1e+09 }
 0x5d9   : > { %v1312_v41 = vsel %vm859_vm4, %v1306_v40, -inf }
 0x5da   : > { %1313 = vmax.xlane.f32.xlu1 %v1312_v41 }
 0x5dd   : > { %v1295_v42 = vpop.f32.mrb[28].mxu0 }
 0x5de   : > { %v1304_v43 = vmul.f32 0.5, %v1295_v42  ;;  %v3178_v44 = vpop.f32.mrb[29].mxu0 }
 0x5df   : > { %v1298_v45 = vpop.f32.mrb[30].mxu0 }
 0x5e0   : > { %v3179_v46 = vpop.f32.mrb[31].mxu0  ;;  %v1308_v47 = vsel %vm647_vm3, %v1304_v43, -1e+09 }
 0x5e1   : > { %v1318_v48 = vsel %vm859_vm4, %v1308_v47, -inf }
 0x5e2   : > { %1319 = vmax.xlane.f32.xlu0 %v1318_v48 }
 0x5eb   : > { %1405 = vrot.lane.b32.xlu1 %v3628_v15, %s3480_s20 }
 0x5ef   : > { %1453 = vrot.lane.b32.xlu1 %v3632_v16, %s3480_s20 }
 0x5f3   : > { %1501 = vrot.lane.b32.xlu1 %v3635_v18, %s3480_s20 }
 0x63d   : > { %v1311_v49 = vpop.xlane.xlu0 %1310 }
 0x63e   : > { %v1321_v50 = vsub.f32 %v1305_v21, %v1311_v49 }
 0x640   : > { %v1325_v51 = vmul.f32 1.442695, %v1321_v50 }
 0x642   : > { %3402 = vpow2.f32 %v1325_v51 }
 0x645   : > { %v1317_v56 = vpop.xlane.xlu0 %1316 }
 0x646   : > { %v1323_v62 = vsub.f32 %v1307_v29, %v1317_v56 }
 0x648   : > { %v1329_v63 = vmul.f32 1.442695, %v1323_v62 }
 0x64c   : > { %v3403_v52 = vpop.eup %3402 }
 0x64d   : > { %v1333_v53 = vsel %vm859_vm4, %v3403_v52, 0.0 }
 0x64e   : > { %1334 = vadd.xlane.f32.xlu0 %v1333_v53 }
 0x664   : > { %1357 = vrot.lane.b32.xlu0 %v3626_v12, %s3480_s20 }
 0x667   : > { %v1314_v54 = vpop.xlane.xlu1 %1313 }
 0x668   : > { %v1322_v55 = vsub.f32 %v1306_v40, %v1314_v54 }
 0x66a   : > { %v1327_v57 = vmul.f32 1.442695, %v1322_v55 }
 0x66b   : > { %v1406_v58 = vpop.permute.xlu1 %1405 }
 0x66c   : > { %3404 = vpow2.f32 %v1327_v57  ;;  %v1411_v60 = vsel %vm913_vm5, %v1406_v58, 0 }
 0x66d   : > { %3187 = vmatpush3.bf16.msra.mxu0 %v1411_v60  ;;  %3406 = vpow2.f32 %v1329_v63 }
 0x66e   : > { %3198 = vmatprep.subr.bf16.mxu0 %v3474_v1 }
 0x66f   : > { %v1320_v10 = vpop.xlane.xlu0 %1319  ;;  %v1454_v24 = vpop.permute.xlu1 %1453 }
 0x670   : > { %v1324_v11 = vsub.f32 %v1308_v47, %v1320_v10  ;;  %v1459_v26 = vsel %vm913_vm5, %v1454_v24, 0 }
 0x672   : > { %v1331_v13 = vmul.f32 1.442695, %v1324_v11 }
 0x673   : > { %v1502_v27 = vpop.permute.xlu1 %1501 }
 0x674   : > { %3408 = vpow2.f32 %v1331_v13  ;;  %v1507_v35 = vsel %vm913_vm5, %v1502_v27, 0 }
 0x676   : > { %v3405_v0 = vpop.eup %3404 }
 0x677   : > { %v1336_v6 = vsel %vm859_vm4, %v3405_v0, 0.0  ;;  %v3407_v7 = vpop.eup %3406 }
 0x678   : > { %1337 = vadd.xlane.f32.xlu1 %v1336_v6  ;;  %v1339_v9 = vsel %vm859_vm4, %v3407_v7, 0.0 }
 0x67e   : > { %v3409_v14 = vpop.eup %3408 }
 0x67f   : > { %v1342_v17 = vsel %vm859_vm4, %v3409_v14, 0.0 }
 0x683   : > { %1340 = vadd.xlane.f32.xlu0 %v1339_v9 }
 0x689   : > { %1601 = vrot.lane.b32.xlu1 %v3628_v15, %s3481_s21 }
 0x699   : > { %1551 = vrot.lane.b32.xlu0 %v3626_v12, %s3481_s21 }
 0x69d   : > { %1549 = vrot.lane.b32.xlu0 %v3626_v12, %s3482_s22 }
 0x6a1   : > { %1651 = vrot.lane.b32.xlu0 %v3632_v16, %s3481_s21 }
 0x6a5   : > { %1649 = vrot.lane.b32.xlu0 %v3632_v16, %s3482_s22 }
 0x6ad   : > { %1343 = vadd.xlane.f32.xlu1 %v1342_v17 }
 0x6be   : > { %1599 = vrot.lane.b32.xlu1 %v3628_v15, %s3482_s22 }
 0x6c2   : > { %1701 = vrot.lane.b32.xlu1 %v3635_v18, %s3481_s21 }
 0x6c6   : > { %1699 = vrot.lane.b32.xlu1 %v3635_v18, %s3482_s22  ;;  %s485_s22 = scalar_lea.vmem %s4060_s1, %s3573_s16 }
 0x6db   : > { %v1335_v19 = vpop.xlane.xlu0 %1334 }
 0x6dc   : > { %3410 = vrcp.f32 %v1335_v19 }
 0x6df   : > { %v1358_v20 = vpop.permute.xlu0 %1357 }
 0x6e0   : > { %v1363_v21 = vsel %vm913_vm5, %v1358_v20, 0 }
 0x6e1   : > { %3181 = vmatpush3.bf16.msra.mxu1 %v1363_v21 }
 0x6e2   : > { %3192 = vmatprep.subr.bf16.mxu1 %v3474_v1 }
 0x6e6   : > { %v3411_v22 = vpop.eup %3410 }
 0x6e7   : > { %v1349_v23 = vmul.f32 %v3411_v22, %v3403_v52 }
 0x6e9   : > { %v1353_v25 = vpack.c.bf16 %v1349_v23, %v1349_v23 }
 0x6eb   : > { %3183 = vmatmul.mubr.msk.bf16.vlgmr.msra.gmra.mrb[20].mxu1 %vm859_vm4, %v1353_v25 }
 0x6ec   : > { %3193 = vmatpush3.bf16.msra.mxu1 %v1459_v26  ;;  %3194 = vmatprep.mubr.msk.bf16.mxu1 %vm3475_vm1, %v3474_v1 }
 0x6ed   : > { %3204 = vmatprep.subr.bf16.mxu1 %v3474_v1 }
 0x705   : > { %v1338_v29 = vpop.xlane.xlu1 %1337 }
 0x706   : > { %3412 = vrcp.f32 %v1338_v29 }
 0x709   : > { %v1602_v45 = vpop.permute.xlu1 %1601 }
 0x70a   : > { %v1607_v51 = vsel %vm655_vm2, %v1602_v45, 0 }
 0x710   : > { %v3413_v30 = vpop.eup %3412  ;;  %v1341_v32 = vpop.xlane.xlu0 %1340 }
 0x711   : > { %v1350_v33 = vmul.f32 %v3413_v30, %v3405_v0  ;;  %3414 = vrcp.f32 %v1341_v32 }
 0x713   : > { %v1354_v34 = vpack.c.bf16 %v1350_v33, %v1350_v33 }
 0x714   : > { %v1552_v36 = vpop.permute.xlu0 %1551 }
 0x715   : > { %3189 = vmatmul.mubr.msk.bf16.vlgmr.msra.gmra.mrb[32].mxu0 %vm859_vm4, %v1354_v34  ;;  %v1557_v41 = vsel %vm655_vm2, %v1552_v36, 0 }
 0x716   : > { %3199 = vmatpush3.bf16.msra.mxu0 %v1507_v35  ;;  %3200 = vmatprep.mubr.msk.bf16.mxu0 %vm3475_vm1, %v3474_v1 }
 0x717   : > { %3210 = vmatprep.subr.bf16.mxu0 %v3474_v1 }
 0x718   : > { %v1550_v40 = vpop.permute.xlu0 %1549 }
 0x71b   : > { %v3415_v37 = vpop.eup %3414 }
 0x71c   : > { %v1351_v38 = vmul.f32 %v3415_v37, %v3407_v7  ;;  %v1652_v42 = vpop.permute.xlu0 %1651 }
 0x71d   : > { %v1657_v43 = vsel %vm655_vm2, %v1652_v42, 0 }
 0x71e   : > { %v1355_v39 = vpack.c.bf16 %v1351_v38, %v1351_v38 }
 0x720   : > { %3195 = vmatmul.mubr.msk.bf16.vlgmr.msra.gmra.mrb[24].mxu1 %vm859_vm4, %v1355_v39  ;;  %v1650_v44 = vpop.permute.xlu0 %1649 }
 0x721   : > { %3205 = vmatpush3.bf16.xpose.msra.mxu1 %v1557_v41  ;;  %3206 = vmatprep.mubr.msk.bf16.mxu1 %vm3475_vm1, %v3474_v1 }
 0x722   : > { %3216 = vmatprep.subr.bf16.mxu1 %v3474_v1 }
 0x728   : > { %3207 = vmatmul.mubr.msk.bf16.vlgmr.msra.gmra.mrb[28].mxu1 %vm655_vm2, %v1550_v40 }
 0x729   : > { %3217 = vmatpush3.bf16.xpose.msra.mxu1 %v1657_v43  ;;  %3218 = vmatprep.mubr.msk.bf16.mxu1 %vm3475_vm1, %v3474_v1 }
 0x72a   : > { %3228 = vmatprep.subr.bf16.mxu1 %v3474_v1 }
 0x730   : > { %3219 = vmatmul.mubr.msk.bf16.vlgmr.msra.gmra.mrb[32].mxu1 %vm655_vm2, %v1650_v44 }
 0x731   : > { %3230 = vmatprep.mubr.msk.bf16.mxu1 %vm3475_vm1, %v3474_v1 }
 0x73a   : > { %v1344_v46 = vpop.xlane.xlu1 %1343 }
 0x73b   : > { %3416 = vrcp.f32 %v1344_v46 }
 0x73e   : > { %v1600_v50 = vpop.permute.xlu1 %1599 }
 0x742   : > { %v1702_v52 = vpop.permute.xlu1 %1701 }
 0x743   : > { %v1707_v53 = vsel %vm655_vm2, %v1702_v52, 0 }
 0x745   : > { %v3417_v47 = vpop.eup %3416 }
 0x746   : > { %v1352_v48 = vmul.f32 %v3417_v47, %v3409_v14  ;;  %v1700_v54 = vpop.permute.xlu1 %1699 }
 0x748   : > { %v1356_v49 = vpack.c.bf16 %v1352_v48, %v1352_v48 }
 0x74a   : > { %3201 = vmatmul.mubr.msk.bf16.vlgmr.msra.gmra.mrb[36].mxu0 %vm859_vm4, %v1356_v49 }
 0x74b   : > { %3211 = vmatpush3.bf16.xpose.msra.mxu0 %v1607_v51  ;;  %3212 = vmatprep.mubr.msk.bf16.mxu0 %vm3475_vm1, %v3474_v1 }
 0x74c   : > { %3222 = vmatprep.subr.bf16.mxu0 %v3474_v1 }
 0x752   : > { %3213 = vmatmul.mubr.msk.bf16.vlgmr.msra.gmra.mrb[40].mxu0 %vm655_vm2, %v1600_v50 }
 0x753   : > { %3223 = vmatpush3.bf16.xpose.msra.mxu0 %v1707_v53  ;;  %3224 = vmatprep.mubr.msk.bf16.mxu0 %vm3475_vm1, %v3474_v1 }
 0x754   : > { %3234 = vmatprep.subr.bf16.mxu0 %v3474_v1 }
 0x75a   : > { %3225 = vmatmul.mubr.msk.bf16.vlgmr.msra.gmra.mrb[44].mxu0 %vm655_vm2, %v1700_v54 }
 0x75b   : > { %3236 = vmatprep.mubr.msk.bf16.mxu0 %vm3475_vm1, %v3474_v1 }
 0x7be   : > { %v3813_v55 = vpop.f32.mrb[20].mxu1 }
 0x7bf   : > { %v3184_v56 = vpop.f32.mrb[21].mxu1 }
 0x7c0   : > { %v1402_v57 = vpop.f32.mrb[22].mxu1 }
 0x7c1   : > { %v3185_v58 = vpop.f32.mrb[23].mxu1 }
 0x7e8   : > { %v3815_v60 = vpop.f32.mrb[32].mxu0 }
 0x7e9   : > { %v3348_v62 = vpack.i.bf16 %v3815_v60, %v3813_v55  ;;  %v3190_v63 = vpop.f32.mrb[33].mxu0 }
 0x7ea   : > { %v1450_v0 = vpop.f32.mrb[34].mxu0 }
 0x7eb   : > { %v3191_v6 = vpop.f32.mrb[35].mxu0 }
 0x7f3   : > { %v3819_v7 = vpop.f32.mrb[24].mxu1 }
 0x7f4   : > { %v3196_v9 = vpop.f32.mrb[25].mxu1 }
 0x7f5   : > { %v1498_v10 = vpop.f32.mrb[26].mxu1 }
 0x7f6   : > { %v3197_v11 = vpop.f32.mrb[27].mxu1 }
 0x7fb   : > { %v1593_v13 = vpop.f32.mrb[28].mxu1 }
 0x7fc   : > { %v1749_v14 = vmul.f32 0.5, %v1593_v13  ;;  %v3208_v17 = vpop.f32.mrb[29].mxu1 }
 0x7fd   : > { %v1596_v19 = vpop.f32.mrb[30].mxu1 }
 0x7fe   : > { %v3209_v20 = vpop.f32.mrb[31].mxu1  ;;  %v1753_v21 = vsel %vm647_vm3, %v1749_v14, -1e+09 }
 0x7ff   : > { %v1757_v22 = vsel %vm859_vm4, %v1753_v21, -inf }
 0x800   : > { %1758 = vmax.xlane.f32.xlu0 %v1757_v22 }
 0x803   : > { %v1693_v23 = vpop.f32.mrb[32].mxu1 }
 0x804   : > { %v1751_v24 = vmul.f32 0.5, %v1693_v23  ;;  %v3220_v25 = vpop.f32.mrb[33].mxu1 }
 0x805   : > { %v1696_v26 = vpop.f32.mrb[34].mxu1 }
 0x806   : > { %v3221_v27 = vpop.f32.mrb[35].mxu1  ;;  %v1755_v29 = vsel %vm647_vm3, %v1751_v24, -1e+09 }
 0x807   : > { %v1763_v30 = vsel %vm859_vm4, %v1755_v29, -inf }
 0x808   : > { %1764 = vmax.xlane.f32.xlu0 %v1763_v30 }
 0x81d   : > { %v3827_v32 = vpop.f32.mrb[36].mxu0 }
 0x81e   : > { %v3353_v33 = vpack.i.bf16 %v3827_v32, %v3819_v7  ;;  %v3202_v34 = vpop.f32.mrb[37].mxu0 }
 0x81f   : > { %v1546_v35 = vpop.f32.mrb[38].mxu0 }
 0x820   : > { %v3203_v36 = vpop.f32.mrb[39].mxu0 }
 0x825   : > { %v1643_v37 = vpop.f32.mrb[40].mxu0 }
 0x826   : > { %v1750_v38 = vmul.f32 0.5, %v1643_v37  ;;  %v3214_v39 = vpop.f32.mrb[41].mxu0 }
 0x827   : > { %v1646_v40 = vpop.f32.mrb[42].mxu0 }
 0x828   : > { %v3215_v41 = vpop.f32.mrb[43].mxu0  ;;  %v1754_v42 = vsel %vm647_vm3, %v1750_v38, -1e+09 }
 0x829   : > { %v1760_v43 = vsel %vm859_vm4, %v1754_v42, -inf }
 0x82a   : > { %1761 = vmax.xlane.f32.xlu1 %v1760_v43 }
 0x82d   : > { %v1743_v44 = vpop.f32.mrb[44].mxu0 }
 0x82e   : > { %v1752_v45 = vmul.f32 0.5, %v1743_v44  ;;  %v3226_v46 = vpop.f32.mrb[45].mxu0 }
 0x82f   : > { %v1746_v47 = vpop.f32.mrb[46].mxu0 }
 0x830   : > { %v3227_v48 = vpop.f32.mrb[47].mxu0  ;;  %v1756_v49 = vsel %vm647_vm3, %v1752_v45, -1e+09 }
 0x831   : > { %v1766_v50 = vsel %vm859_vm4, %v1756_v49, -inf }
 0x832   : > { %1767 = vmax.xlane.f32.xlu0 %v1766_v50 }
 0x83b   : > { %1853 = vrot.lane.b32.xlu1 %v3628_v15, %s3483_s23 }
 0x83f   : > { %1901 = vrot.lane.b32.xlu1 %v3632_v16, %s3483_s23 }
 0x843   : > { %1949 = vrot.lane.b32.xlu1 %v3635_v18, %s3483_s23 }
 0x88d   : > { %v1759_v51 = vpop.xlane.xlu0 %1758 }
 0x88e   : > { %v1769_v52 = vsub.f32 %v1753_v21, %v1759_v51 }
 0x890   : > { %v1773_v53 = vmul.f32 1.442695, %v1769_v52 }
 0x892   : > { %3418 = vpow2.f32 %v1773_v53 }
 0x895   : > { %v1765_v63 = vpop.xlane.xlu0 %1764 }
 0x896   : > { %v1771_v10 = vsub.f32 %v1755_v29, %v1765_v63 }
 0x898   : > { %v1777_v11 = vmul.f32 1.442695, %v1771_v10 }
 0x89c   : > { %v3419_v54 = vpop.eup %3418 }
 0x89d   : > { %v1781_v56 = vsel %vm859_vm4, %v3419_v54, 0.0 }
 0x89e   : > { %1782 = vadd.xlane.f32.xlu0 %v1781_v56 }
 0x8b4   : > { %1805 = vrot.lane.b32.xlu0 %v3626_v12, %s3483_s23 }
 0x8b7   : > { %v1762_v57 = vpop.xlane.xlu1 %1761 }
 0x8b8   : > { %v1770_v58 = vsub.f32 %v1754_v42, %v1762_v57 }
 0x8ba   : > { %v1775_v0 = vmul.f32 1.442695, %v1770_v58 }
 0x8bb   : > { %v1854_v6 = vpop.permute.xlu1 %1853 }
 0x8bc   : > { %3420 = vpow2.f32 %v1775_v0  ;;  %v1859_v9 = vsel %vm913_vm5, %v1854_v6, 0 }
 0x8bd   : > { %3235 = vmatpush3.bf16.msra.mxu0 %v1859_v9  ;;  %3422 = vpow2.f32 %v1777_v11 }
 0x8be   : > { %3246 = vmatprep.subr.bf16.mxu0 %v3474_v1 }
 0x8bf   : > { %v1768_v20 = vpop.xlane.xlu0 %1767  ;;  %v1902_v34 = vpop.permute.xlu1 %1901 }
 0x8c0   : > { %v1772_v21 = vsub.f32 %v1756_v49, %v1768_v20  ;;  %v1907_v36 = vsel %vm913_vm5, %v1902_v34, 0 }
 0x8c2   : > { %v1779_v22 = vmul.f32 1.442695, %v1772_v21 }
 0x8c3   : > { %v1950_v37 = vpop.permute.xlu1 %1949 }
 0x8c4   : > { %3424 = vpow2.f32 %v1779_v22  ;;  %v1955_v43 = vsel %vm913_vm5, %v1950_v37, 0 }
 0x8c6   : > { %v3421_v13 = vpop.eup %3420 }
 0x8c7   : > { %v1784_v14 = vsel %vm859_vm4, %v3421_v13, 0.0  ;;  %v3423_v17 = vpop.eup %3422 }
 0x8c8   : > { %1785 = vadd.xlane.f32.xlu1 %v1784_v14  ;;  %v1787_v19 = vsel %vm859_vm4, %v3423_v17, 0.0 }
 0x8ce   : > { %v3425_v23 = vpop.eup %3424 }
 0x8cf   : > { %v1790_v24 = vsel %vm859_vm4, %v3425_v23, 0.0 }
 0x8d3   : > { %1788 = vadd.xlane.f32.xlu0 %v1787_v19 }
 0x8d9   : > { %2049 = vrot.lane.b32.xlu1 %v3628_v15, %s3484_s24 }
 0x8e9   : > { %1999 = vrot.lane.b32.xlu0 %v3626_v12, %s3484_s24 }
 0x8ed   : > { %1997 = vrot.lane.b32.xlu0 %v3626_v12, %s3485_s25 }
 0x8f1   : > { %2099 = vrot.lane.b32.xlu0 %v3632_v16, %s3484_s24 }
 0x8f5   : > { %2097 = vrot.lane.b32.xlu0 %v3632_v16, %s3485_s25 }
 0x8fd   : > { %1791 = vadd.xlane.f32.xlu1 %v1790_v24 }
 0x90e   : > { %2047 = vrot.lane.b32.xlu1 %v3628_v15, %s3485_s25 }
 0x912   : > { %2149 = vrot.lane.b32.xlu1 %v3635_v18, %s3484_s24 }
 0x916   : > { %2147 = vrot.lane.b32.xlu1 %v3635_v18, %s3485_s25 }
 0x92b   : > { %v1783_v25 = vpop.xlane.xlu0 %1782 }
 0x92c   : > { %3426 = vrcp.f32 %v1783_v25 }
 0x92f   : > { %v1806_v26 = vpop.permute.xlu0 %1805 }
 0x930   : > { %v1811_v27 = vsel %vm913_vm5, %v1806_v26, 0 }
 0x931   : > { %3229 = vmatpush3.bf16.msra.mxu1 %v1811_v27 }
 0x932   : > { %3240 = vmatprep.subr.bf16.mxu1 %v3474_v1 }
 0x936   : > { %v3427_v29 = vpop.eup %3426 }
 0x937   : > { %v1797_v30 = vmul.f32 %v3427_v29, %v3419_v54 }
 0x939   : > { %v1801_v35 = vpack.c.bf16 %v1797_v30, %v1797_v30 }
 0x93b   : > { %3231 = vmatmul.mubr.msk.bf16.vlgmr.msra.gmra.mrb[36].mxu1 %vm859_vm4, %v1801_v35 }
 0x93c   : > { %3241 = vmatpush3.bf16.msra.mxu1 %v1907_v36  ;;  %3242 = vmatprep.mubr.msk.bf16.mxu1 %vm3475_vm1, %v3474_v1 }
 0x93d   : > { %3252 = vmatprep.subr.bf16.mxu1 %v3474_v1 }
 0x955   : > { %v1786_v38 = vpop.xlane.xlu1 %1785 }
 0x956   : > { %3428 = vrcp.f32 %v1786_v38 }
 0x959   : > { %v2050_v53 = vpop.permute.xlu1 %2049 }
 0x95a   : > { %v2055_v0 = vsel %vm655_vm2, %v2050_v53, 0 }
 0x960   : > { %v3429_v39 = vpop.eup %3428  ;;  %v1789_v40 = vpop.xlane.xlu0 %1788 }
 0x961   : > { %v1798_v41 = vmul.f32 %v3429_v39, %v3421_v13  ;;  %3430 = vrcp.f32 %v1789_v40 }
 0x963   : > { %v1802_v42 = vpack.c.bf16 %v1798_v41, %v1798_v41 }
 0x964   : > { %v2000_v44 = vpop.permute.xlu0 %1999 }
 0x965   : > { %3237 = vmatmul.mubr.msk.bf16.vlgmr.msra.gmra.mrb[48].mxu0 %vm859_vm4, %v1802_v42  ;;  %v2005_v49 = vsel %vm655_vm2, %v2000_v44, 0 }
 0x966   : > { %3247 = vmatpush3.bf16.msra.mxu0 %v1955_v43  ;;  %3248 = vmatprep.mubr.msk.bf16.mxu0 %vm3475_vm1, %v3474_v1 }
 0x967   : > { %3258 = vmatprep.subr.bf16.mxu0 %v3474_v1 }
 0x968   : > { %v1998_v48 = vpop.permute.xlu0 %1997 }
 0x96b   : > { %v3431_v45 = vpop.eup %3430 }
 0x96c   : > { %v1799_v46 = vmul.f32 %v3431_v45, %v3423_v17  ;;  %v2100_v50 = vpop.permute.xlu0 %2099 }
 0x96d   : > { %v2105_v51 = vsel %vm655_vm2, %v2100_v50, 0 }
 0x96e   : > { %v1803_v47 = vpack.c.bf16 %v1799_v46, %v1799_v46 }
 0x970   : > { %3243 = vmatmul.mubr.msk.bf16.vlgmr.msra.gmra.mrb[40].mxu1 %vm859_vm4, %v1803_v47  ;;  %v2098_v52 = vpop.permute.xlu0 %2097 }
 0x971   : > { %3253 = vmatpush3.bf16.xpose.msra.mxu1 %v2005_v49  ;;  %3254 = vmatprep.mubr.msk.bf16.mxu1 %vm3475_vm1, %v3474_v1 }
 0x972   : > { %3264 = vmatprep.subr.bf16.mxu1 %v3474_v1 }
 0x978   : > { %3255 = vmatmul.mubr.msk.bf16.vlgmr.msra.gmra.mrb[44].mxu1 %vm655_vm2, %v1998_v48 }
 0x979   : > { %3265 = vmatpush3.bf16.xpose.msra.mxu1 %v2105_v51  ;;  %3266 = vmatprep.mubr.msk.bf16.mxu1 %vm3475_vm1, %v3474_v1 }
 0x97a   : > { %3276 = vmatprep.subr.bf16.mxu1 %v3474_v1 }
 0x980   : > { %3267 = vmatmul.mubr.msk.bf16.vlgmr.msra.gmra.mrb[48].mxu1 %vm655_vm2, %v2098_v52 }
 0x981   : > { %3278 = vmatprep.mubr.msk.bf16.mxu1 %vm3475_vm1, %v3474_v1 }
 0x98a   : > { %v1792_v54 = vpop.xlane.xlu1 %1791 }
 0x98b   : > { %3432 = vrcp.f32 %v1792_v54 }
 0x98e   : > { %v2048_v63 = vpop.permute.xlu1 %2047 }
 0x992   : > { %v2150_v6 = vpop.permute.xlu1 %2149 }
 0x993   : > { %v2155_v9 = vsel %vm655_vm2, %v2150_v6, 0 }
 0x995   : > { %v3433_v56 = vpop.eup %3432 }
 0x996   : > { %v1800_v57 = vmul.f32 %v3433_v56, %v3425_v23  ;;  %v2148_v10 = vpop.permute.xlu1 %2147 }
 0x998   : > { %v1804_v58 = vpack.c.bf16 %v1800_v57, %v1800_v57 }
 0x99a   : > { %3249 = vmatmul.mubr.msk.bf16.vlgmr.msra.gmra.mrb[52].mxu0 %vm859_vm4, %v1804_v58 }
 0x99b   : > { %3259 = vmatpush3.bf16.xpose.msra.mxu0 %v2055_v0  ;;  %3260 = vmatprep.mubr.msk.bf16.mxu0 %vm3475_vm1, %v3474_v1 }
 0x99c   : > { %3270 = vmatprep.subr.bf16.mxu0 %v3474_v1 }
 0x9a2   : > { %3261 = vmatmul.mubr.msk.bf16.vlgmr.msra.gmra.mrb[56].mxu0 %vm655_vm2, %v2048_v63 }
 0x9a3   : > { %3271 = vmatpush3.bf16.xpose.msra.mxu0 %v2155_v9  ;;  %3272 = vmatprep.mubr.msk.bf16.mxu0 %vm3475_vm1, %v3474_v1 }
 0x9a4   : > { %3282 = vmatprep.subr.bf16.mxu0 %v3474_v1 }
 0x9aa   : > { %3273 = vmatmul.mubr.msk.bf16.vlgmr.msra.gmra.mrb[60].mxu0 %vm655_vm2, %v2148_v10 }
 0x9ab   : > { %3284 = vmatprep.mubr.msk.bf16.mxu0 %vm3475_vm1, %v3474_v1 }
 0xa0e   : > { %v3893_v11 = vpop.f32.mrb[36].mxu1 }
 0xa0f   : > { %v3232_v13 = vpop.f32.mrb[37].mxu1 }
 0xa10   : > { %v1850_v14 = vpop.f32.mrb[38].mxu1 }
 0xa11   : > { %v3233_v17 = vpop.f32.mrb[39].mxu1 }
 0xa38   : > { %v3895_v19 = vpop.f32.mrb[48].mxu0 }
 0xa39   : > { %v3358_v20 = vpack.i.bf16 %v3895_v19, %v3893_v11  ;;  %v3238_v21 = vpop.f32.mrb[49].mxu0 }
 0xa3a   : > { %v1898_v22 = vpop.f32.mrb[50].mxu0 }
 0xa3b   : > { %v3239_v23 = vpop.f32.mrb[51].mxu0 }
 0xa43   : > { %v3899_v24 = vpop.f32.mrb[40].mxu1 }
 0xa44   : > { %v3244_v25 = vpop.f32.mrb[41].mxu1 }
 0xa45   : > { %v1946_v26 = vpop.f32.mrb[42].mxu1 }
 0xa46   : > { %v3245_v27 = vpop.f32.mrb[43].mxu1 }
 0xa4b   : > { %v2041_v29 = vpop.f32.mrb[44].mxu1 }
 0xa4c   : > { %v2197_v30 = vmul.f32 0.5, %v2041_v29  ;;  %v3256_v34 = vpop.f32.mrb[45].mxu1 }
 0xa4d   : > { %v2044_v35 = vpop.f32.mrb[46].mxu1 }
 0xa4e   : > { %v3257_v36 = vpop.f32.mrb[47].mxu1  ;;  %v2201_v37 = vsel %vm647_vm3, %v2197_v30, -1e+09 }
 0xa4f   : > { %v2205_v38 = vsel %vm859_vm4, %v2201_v37, -inf }
 0xa50   : > { %2206 = vmax.xlane.f32.xlu0 %v2205_v38 }
 0xa53   : > { %v2141_v39 = vpop.f32.mrb[48].mxu1 }
 0xa54   : > { %v2199_v40 = vmul.f32 0.5, %v2141_v39  ;;  %v3268_v41 = vpop.f32.mrb[49].mxu1 }
 0xa55   : > { %v2144_v42 = vpop.f32.mrb[50].mxu1 }
 0xa56   : > { %v3269_v43 = vpop.f32.mrb[51].mxu1  ;;  %v2203_v44 = vsel %vm647_vm3, %v2199_v40, -1e+09 }
 0xa57   : > { %v2211_v45 = vsel %vm859_vm4, %v2203_v44, -inf }
 0xa58   : > { %2212 = vmax.xlane.f32.xlu0 %v2211_v45 }
 0xa6d   : > { %v1991_v46 = vpop.f32.mrb[52].mxu0 }
 0xa6e   : > { %v3363_v47 = vpack.i.bf16 %v1991_v46, %v3899_v24  ;;  %v3250_v48 = vpop.f32.mrb[53].mxu0 }
 0xa6f   : > { %v1994_v49 = vpop.f32.mrb[54].mxu0 }
 0xa70   : > { %v3251_v50 = vpop.f32.mrb[55].mxu0 }
 0xa75   : > { %v2091_v51 = vpop.f32.mrb[56].mxu0 }
 0xa76   : > { %v2198_v52 = vmul.f32 0.5, %v2091_v51  ;;  %v3262_v53 = vpop.f32.mrb[57].mxu0 }
 0xa77   : > { %v2094_v54 = vpop.f32.mrb[58].mxu0 }
 0xa78   : > { %v3263_v56 = vpop.f32.mrb[59].mxu0  ;;  %v2202_v57 = vsel %vm647_vm3, %v2198_v52, -1e+09 }
 0xa79   : > { %v2208_v58 = vsel %vm859_vm4, %v2202_v57, -inf }
 0xa7a   : > { %2209 = vmax.xlane.f32.xlu1 %v2208_v58 }
 0xa7d   : > { %v2191_v63 = vpop.f32.mrb[60].mxu0 }
 0xa7e   : > { %v2200_v0 = vmul.f32 0.5, %v2191_v63  ;;  %v3274_v6 = vpop.f32.mrb[61].mxu0  ;;  %v2508_v63 = vld [vmem:[%s4065_s6] sm:$0xff] }
 0xa7f   : > { %v2194_v9 = vpop.f32.mrb[62].mxu0 }
 0xa80   : > { %v3275_v10 = vpop.f32.mrb[63].mxu0  ;;  %v2204_v13 = vsel %vm647_vm3, %v2200_v0, -1e+09 }
 0xa81   : > { %v2214_v14 = vsel %vm859_vm4, %v2204_v13, -inf }
 0xa82   : > { %2215 = vmax.xlane.f32.xlu0 %v2214_v14 }
 0xadd   : > { %v2207_v17 = vpop.xlane.xlu0 %2206 }
 0xade   : > { %v2217_v21 = vsub.f32 %v2201_v37, %v2207_v17 }
 0xae0   : > { %v2221_v22 = vmul.f32 1.442695, %v2217_v21 }
 0xae2   : > { %3434 = vpow2.f32 %v2221_v22 }
 0xae5   : > { %v2213_v23 = vpop.xlane.xlu0 %2212 }
 0xae6   : > { %v2219_v24 = vsub.f32 %v2203_v44, %v2213_v23 }
 0xae8   : > { %v2225_v25 = vmul.f32 1.442695, %v2219_v24 }
 0xaea   : > { %3436 = vpow2.f32 %v2225_v25 }
 0xaec   : > { %v3435_v26 = vpop.eup %3434 }
 0xaed   : > { %v2229_v27 = vsel %vm859_vm4, %v3435_v26, 0.0 }
 0xaee   : > { %2230 = vadd.xlane.f32.xlu0 %v2229_v27 }
 0xaf4   : > { %v3437_v29 = vpop.eup %3436 }
 0xaf5   : > { %v2235_v30 = vsel %vm859_vm4, %v3437_v29, 0.0 }
 0xaf6   : > { %2236 = vadd.xlane.f32.xlu0 %v2235_v30 }
 0xb07   : > { %v2210_v28 = vpop.xlane.xlu1 %2209 }
 0xb08   : > { %v2218_v34 = vsub.f32 %v2202_v57, %v2210_v28 }
 0xb0a   : > { %v2223_v35 = vmul.f32 1.442695, %v2218_v34 }
 0xb0c   : > { %3438 = vpow2.f32 %v2223_v35  ;;  %2253 = vrot.lane.b32.xlu0 %v3626_v12, %s3486_s26 }
 0xb0f   : > { %v2216_v38 = vpop.xlane.xlu0 %2215 }
 0xb10   : > { %3349 = vrot.lane.b32.xlu0 %v3348_v62, %s3487_s27  ;;  %v2220_v12 = vsub.f32 %v2204_v13, %v2216_v38 }
 0xb12   : > { %v2227_v39 = vmul.f32 1.442695, %v2220_v12 }
 0xb14   : > { %3359 = vrot.lane.b32.xlu0 %v3358_v20, %s3488_s28  ;;  %3440 = vpow2.f32 %v2227_v39 }
 0xb16   : > { %v3439_v36 = vpop.eup %3438 }
 0xb17   : > { %v2232_v37 = vsel %vm859_vm4, %v3439_v36, 0.0 }
 0xb18   : > { %2233 = vadd.xlane.f32.xlu1 %v2232_v37 }
 0xb1e   : > { %v3441_v40 = vpop.eup %3440 }
 0xb1f   : > { %v2238_v55 = vsel %vm859_vm4, %v3441_v40, 0.0 }
 0xb29   : > { %2301 = vrot.lane.b32.xlu1 %v3628_v15, %s3486_s26 }
 0xb2d   : > { %2349 = vrot.lane.b32.xlu1 %v3632_v16, %s3486_s26 }
 0xb51   : > { %2239 = vadd.xlane.f32.xlu1 %v2238_v55 }
 0xb62   : > { %2397 = vrot.lane.b32.xlu1 %v3635_v18, %s3486_s26 }
 0xb66   : > { %3354 = vrot.lane.b32.xlu1 %v3353_v33, %s3487_s27  ;;  %s491_s27 = scalar_lea.vmem %s4073_s14, %s3573_s16 }
 0xb6a   : > { %3364 = vrot.lane.b32.xlu1 %v3363_v47, %s3488_s28 }
 0xb7b   : > { %v2231_v60 = vpop.xlane.xlu0 %2230 }
 0xb7c   : > { %3442 = vrcp.f32 %v2231_v60 }
 0xb83   : > { %v2237_v15 = vpop.xlane.xlu0 %2236 }
 0xb84   : > { %3444 = vrcp.f32 %v2237_v15 }
 0xb86   : > { %v3443_v62 = vpop.eup %3442 }
 0xb87   : > { %v2245_v16 = vmul.f32 %v3443_v62, %v3435_v26  ;;  %v2254_v11 = vpop.permute.xlu0 %2253 }
 0xb88   : > { %v2259_v19 = vsel %vm913_vm5, %v2254_v11, 0 }
 0xb89   : > { %3277 = vmatpush3.bf16.msra.mxu1 %v2259_v19  ;;  %v2249_v20 = vpack.c.bf16 %v2245_v16, %v2245_v16 }
 0xb8a   : > { %3288 = vmatprep.subr.bf16.mxu1 %v3474_v1 }
 0xb8b   : > { %v3350_v30 = vpop.permute.xlu0 %3349 }
 0xb8c   : > { %3279 = vmatmul.mubr.msk.bf16.vlgmr.msra.gmra.mrb[52].mxu1 %vm859_vm4, %v2249_v20  ;;  %v3352_v34 = vunpack.i.h.bf16 %v3350_v30  ;;  %v3351_v35 = vunpack.i.l.bf16 %v3350_v30 }
 0xb8d   : > { %3290 = vmatprep.mubr.msk.bf16.mxu1 %vm3475_vm1, %v3474_v1 }
 0xb8e   : > { %v3445_v7 = vpop.eup %3444  ;;  %v2494_v12 = vsel %vm655_vm2, %v3737_v59, %v3352_v34  ;;  %v2493_v39 = vsel %vm655_vm2, %v3739_v61, %v3351_v35 }
 0xb8f   : > { %v2247_v41 = vmul.f32 %v3445_v7, %v3437_v29  ;;  %v3360_v28 = vpop.permute.xlu0 %3359 }
 0xb90   : > { %v3361_v37 = vunpack.i.l.bf16 %v3360_v28 }
 0xb91   : > { %v2251_v45 = vpack.c.bf16 %v2247_v41, %v2247_v41 }
 0xb92   : > { %v2497_v60 = vsel %vm859_vm4, %v2493_v39, %v3361_v37 }
 0xba5   : > { %v2234_v18 = vpop.xlane.xlu1 %2233 }
 0xba6   : > { %3446 = vrcp.f32 %v2234_v18 }
 0xba9   : > { %v2302_v32 = vpop.permute.xlu1 %2301 }
 0xbaa   : > { %v2307_v33 = vsel %vm913_vm5, %v2302_v32, 0 }
 0xbab   : > { %3283 = vmatpush3.bf16.msra.mxu0 %v2307_v33 }
 0xbac   : > { %3294 = vmatprep.subr.bf16.mxu0 %v3474_v1 }
 0xbad   : > { %v2350_v42 = vpop.permute.xlu1 %2349 }
 0xbae   : > { %v2355_v43 = vsel %vm913_vm5, %v2350_v42, 0 }
 0xbaf   : > { %3289 = vmatpush3.bf16.msra.mxu1 %v2355_v43 }
 0xbb0   : > { %v3447_v44 = vpop.eup %3446 }
 0xbb1   : > { %v2246_v46 = vmul.f32 %v3447_v44, %v3439_v36  ;;  %v3362_v36 = vunpack.i.h.bf16 %v3360_v28 }
 0xbb2   : > { %3291 = vmatmul.mubr.msk.bf16.vlgmr.msra.gmra.mrb[56].mxu1 %vm859_vm4, %v2251_v45 }
 0xbb3   : > { %v2250_v47 = vpack.c.bf16 %v2246_v46, %v2246_v46  ;;  %v2498_v15 = vsel %vm859_vm4, %v2494_v12, %v3362_v36 }
 0xbb5   : > { %3285 = vmatmul.mubr.msk.bf16.vlgmr.msra.gmra.mrb[64].mxu0 %vm859_vm4, %v2250_v47 }
 0xbb6   : > { %3296 = vmatprep.mubr.msk.bf16.mxu0 %vm3475_vm1, %v3474_v1  ;;  %v2509_v1 = vld [vmem:[%s4065_s6 + $0x8] sm:$0xff] }
 0xbb7   : > { %v2510_v0 = vpack.c.bf16 %v2509_v1, %v2508_v63 }
 0xbb9   : > { %3300 = vmatprep.subr.bf16.mxu1 %v2510_v0 }
 0xbba   : > { %3301 = vmatpush3.bf16.msra.mxu1 %v2510_v0 }
 0xbde   : > { %v2240_v48 = vpop.xlane.xlu1 %2239 }
 0xbdf   : > { %3448 = vrcp.f32 %v2240_v48 }
 0xbe2   : > { %v2398_v49 = vpop.permute.xlu1 %2397 }
 0xbe3   : > { %v2403_v50 = vsel %vm913_vm5, %v2398_v49, 0  ;;  %v3014_v49 = vld [vmem:[%s485_s22] sm:$0xff]  }
 0xbe4   : > { %3295 = vmatpush3.bf16.msra.mxu0 %v2403_v50 }
 0xbe6   : > { %v3355_v19 = vpop.permute.xlu1 %3354 }
 0xbe7   : > { %v3357_v59 = vunpack.i.h.bf16 %v3355_v19  ;;  %v3356_v18 = vunpack.i.l.bf16 %v3355_v19  ;;  %v2666_v19 = vld [vmem:[%s4069_s10 + $0x8] sm:$0xff] }
 0xbe9   : > { %v3449_v51 = vpop.eup %3448  ;;  %v2496_v33 = vsel %vm655_vm2, %v3749_v31, %v3357_v59  ;;  %v2495_v41 = vsel %vm655_vm2, %v3741_v8, %v3356_v18  ;;  %v3022_v31 = vld [vmem:[%s485_s22 + $0x8] sm:$0xff]   ;;  %v2984_v8 = vld [vmem:[%s4066_s7] ss:$0 sm:$0xff] }
 0xbea   : > { %v2248_v52 = vmul.f32 %v3449_v51, %v3441_v40  ;;  %v3365_v20 = vpop.permute.xlu1 %3364  ;;  %v3019_v51 = vunpack.c.l.bf16 %v3022_v31  ;;  %v3020_v63 = vunpack.c.h.bf16 %v3022_v31 }
 0xbeb   : > { %v3367_v7 = vunpack.i.h.bf16 %v3365_v20  ;;  %v3366_v61 = vunpack.i.l.bf16 %v3365_v20 }
 0xbec   : > { %v2252_v53 = vpack.c.bf16 %v2248_v52, %v2248_v52  ;;  %v3015_v52 = vunpack.c.l.bf16 %v3014_v49 }
 0xbed   : > { %v2499_v44 = vsel %vm859_vm4, %v2495_v41, %v3366_v61  ;;  %v2500_v45 = vsel %vm859_vm4, %v2496_v33, %v3367_v7 }
 0xbee   : > { %3297 = vmatmul.mubr.msk.bf16.vlgmr.msra.gmra.mrb[68].mxu0 %vm859_vm4, %v2252_v53 }
 0xc5f   : > { %v2295_v54 = vpop.f32.mrb[52].mxu1 }
 0xc60   : > { %v3280_v56 = vpop.f32.mrb[53].mxu1 }
 0xc61   : > { %v2298_v57 = vpop.f32.mrb[54].mxu1 }
 0xc62   : > { %v3281_v58 = vpop.f32.mrb[55].mxu1 }
 0xc63   : > { %v3016_v58 = vunpack.c.h.bf16 %v3014_v49 }
 0xc85   : > { %v2391_v6 = vpop.f32.mrb[56].mxu1 }
 0xc86   : > { %v3292_v9 = vpop.f32.mrb[57].mxu1 }
 0xc87   : > { %v2394_v10 = vpop.f32.mrb[58].mxu1 }
 0xc88   : > { %v2343_v13 = vpop.f32.mrb[64].mxu0  ;;  %v3293_v14 = vpop.f32.mrb[59].mxu1 }
 0xc89   : > { %v3368_v17 = vpack.i.bf16 %v2343_v13, %v2295_v54  ;;  %v3286_v21 = vpop.f32.mrb[65].mxu0 }
 0xc8a   : > { %v2346_v22 = vpop.f32.mrb[66].mxu0 }
 0xc8b   : > { %3369 = vrot.lane.b32.xlu0 %v3368_v17, %s3489_s19  ;;  %v3287_v23 = vpop.f32.mrb[67].mxu0 }
 0xcc1   : > { %v2439_v24 = vpop.f32.mrb[68].mxu0 }
 0xcc2   : > { %v3373_v25 = vpack.i.bf16 %v2439_v24, %v2391_v6  ;;  %v3298_v26 = vpop.f32.mrb[69].mxu0 }
 0xcc3   : > { %v2442_v27 = vpop.f32.mrb[70].mxu0 }
 0xcc4   : > { %3374 = vrot.lane.b32.xlu1 %v3373_v25, %s3489_s19  ;;  %v3299_v29 = vpop.f32.mrb[71].mxu0 }
 0xcfd   : > { %v3370_v38 = vpop.permute.xlu0 %3369 }
 0xcfe   : > { %v3372_v40 = vunpack.i.h.bf16 %v3370_v38  ;;  %v3371_v55 = vunpack.i.l.bf16 %v3370_v38 }
 0xd00   : > { %v2503_v62 = vsel %vm2501_vm6, %v2498_v15, %v3372_v40  ;;  %v2502_v16 = vsel %vm2501_vm6, %v2497_v60, %v3371_v55 }
 0xd01   : > { %v2506_v11 = vpack.c.bf16 %v2503_v62, %v2502_v16 }
 0xd03   : > { %3302 = vmatprep.mubr.msk.bf16.mxu1 %vm502_vm0, %v2506_v11  ;;  %v2665_v11 = vld [vmem:[%s4069_s10] sm:$0xff] }
 0xd04   : > { %v2667_v20 = vpack.c.bf16 %v2666_v19, %v2665_v11 }
 0xd06   : > { %3306 = vmatprep.subr.bf16.mxu0 %v2667_v20 }
 0xd07   : > { %3307 = vmatpush3.bf16.msra.mxu0 %v2667_v20 }
 0xd36   : > { %v3375_v32 = vpop.permute.xlu1 %3374 }
 0xd37   : > { %v3377_v42 = vunpack.i.h.bf16 %v3375_v32  ;;  %v3376_v43 = vunpack.i.l.bf16 %v3375_v32 }
 0xd39   : > { %v2505_v46 = vsel %vm2501_vm6, %v2500_v45, %v3377_v42  ;;  %v2504_v47 = vsel %vm2501_vm6, %v2499_v44, %v3376_v43 }
 0xd3a   : > { %v2507_v48 = vpack.c.bf16 %v2505_v46, %v2504_v47 }
 0xd3c   : > { %3303 = vmatmul.mubr.msk.bf16.vlgmr.msra.gmra.mrb[60].mxu1 %vm502_vm0, %v2507_v48  ;;  %v2987_v48 = vld [vmem:[%s4067_s8] ss:$0 sm:$0xff] }
 0xe0f   : > { %v3304_v50 = vpop.f32.mrb[60].mxu1 }
 0xe10   : > { %v2567_v53 = vadd.f32 %v3304_v50, %v2984_v8  ;;  %v2558_v54 = vpop.f32.mrb[61].mxu1 }
 0xe11   : > { %v2559_v56 = vadd.f32 %v2984_v8, %v2558_v54  ;;  %v3305_v57 = vpop.f32.mrb[62].mxu1 }
 0xe12   : > { %v2561_v1 = vpop.f32.mrb[63].mxu1  ;;  %v2583_v0 = vadd.f32 %v3019_v51, %v2567_v53  ;;  %v2570_v9 = vadd.f32 %v3305_v57, %v2984_v8 }
 0xe13   : > { %v2581_v6 = vadd.f32 %v3015_v52, %v2559_v56  ;;  %v2562_v10 = vadd.f32 %v2984_v8, %v2561_v1  ;;  %v2988_v52 = vld [vmem:[%s4068_s9] ss:$0 sm:$0xff] }
 0xe14   : > { %v3980_v17 = vadd.f32 %v3581_v3, %v2583_v0  ;;  %v2584_v21 = vadd.f32 %v3020_v63, %v2570_v9 }
 0xe15   : > { %v3977_v13 = vadd.f32 %v3579_v2, %v2581_v6  ;;  %v2582_v14 = vadd.f32 %v3016_v58, %v2562_v10 }
 0xe16   : > { %v3990_v25 = vadd.f32 %v3585_v5, %v2584_v21  ;;  %v2595_v2 = vsel %vm502_vm0, %v3980_v17, 0.0  ;;  %v2768_v21 = vld [vmem:[%s4071_s12] sm:$0xff] }
 0xe17   : > { %v3983_v22 = vadd.f32 %v3583_v4, %v2582_v14  ;;  %v2589_v23 = vsel %vm502_vm0, %v3977_v13, 0.0 }
 0xe18   : > { %2590 = vadd.xlane.f32.xlu0 %v2589_v23  ;;  %v2598_v3 = vsel %vm502_vm0, %v3990_v25, 0.0  ;;  %v2769_v23 = vld [vmem:[%s4071_s12 + $0x8] sm:$0xff] }
 0xe19   : > { %v2592_v24 = vsel %vm502_vm0, %v3983_v22, 0.0 }
 0xe1a   : > { %2593 = vadd.xlane.f32.xlu1 %v2592_v24  ;;  %v2776_v24 = vpack.c.bf16 %v2769_v23, %v2768_v21 }
 0xe1c   : > { %2596 = vadd.xlane.f32.xlu0 %v2595_v2  ;;  %3312 = vmatprep.subr.bf16.mxu1 %v2776_v24  ;;  %v2770_v2 = vld [vmem:[%s4071_s12 + $0x10] sm:$0xff] }
 0xe1d   : > { %3313 = vmatpush3.bf16.msra.mxu1 %v2776_v24 }
 0xe20   : > { %2599 = vadd.xlane.f32.xlu0 %v2598_v3  ;;  %v2771_v3 = vld [vmem:[%s4071_s12 + $0x18] sm:$0xff] }
 0xea5   : > { %v2591_v4 = vpop.xlane.xlu0 %2590 }
 0xea6   : > { %v2601_v26 = vmul.f32 0.0625, %v2591_v4  ;;  %v2777_v4 = vpack.c.bf16 %v2771_v3, %v2770_v2 }
 0xea7   : > { %v2594_v27 = vpop.xlane.xlu1 %2593 }
 0xea8   : > { %v2605_v29 = vsub.f32 %v3977_v13, %v2601_v26  ;;  %v2602_v30 = vmul.f32 0.0625, %v2594_v27  ;;  %3314 = vmatprep.subr.bf16.mxu1 %v2777_v4  ;;  %v2772_v26 = vld [vmem:[%s4071_s12 + $0x20] sm:$0xff]  ;;  %v2773_v27 = vld [vmem:[%s4071_s12 + $0x28] sm:$0xff] }
 0xea9   : > { %v2597_v28 = vpop.xlane.xlu0 %2596  ;;  %3315 = vmatpush3.bf16.msra.mxu1 %v2777_v4 }
 0xeaa   : > { %v2606_v34 = vsub.f32 %v3983_v22, %v2602_v30  ;;  %v2603_v35 = vmul.f32 0.0625, %v2597_v28  ;;  %v2609_v5 = vmul.f32 %v2605_v29, %v2605_v29  ;;  %v2774_v30 = vld [vmem:[%s4071_s12 + $0x30] sm:$0xff]  ;;  %v2775_v28 = vld [vmem:[%s4071_s12 + $0x38] sm:$0xff] }
 0xeac   : > { %v2607_v36 = vsub.f32 %v3980_v17, %v2603_v35  ;;  %v2613_v37 = vsel %vm502_vm0, %v2609_v5, 0.0  ;;  %v2610_v38 = vmul.f32 %v2606_v34, %v2606_v34  ;;  %v2989_v35 = vld [vmem:[%s4070_s11] ss:$0 sm:$0xff] }
 0xead   : > { %2614 = vadd.xlane.f32.xlu0 %v2613_v37  ;;  %v2600_v12 = vpop.xlane.xlu0 %2599 }
 0xeae   : > { %v2604_v39 = vmul.f32 0.0625, %v2600_v12  ;;  %v2616_v40 = vsel %vm502_vm0, %v2610_v38, 0.0  ;;  %v2611_v55 = vmul.f32 %v2607_v36, %v2607_v36 }
 0xeaf   : > { %2617 = vadd.xlane.f32.xlu1 %v2616_v40 }
 0xeb0   : > { %v2608_v60 = vsub.f32 %v3990_v25, %v2604_v39  ;;  %v2619_v15 = vsel %vm502_vm0, %v2611_v55, 0.0 }
 0xeb1   : > { %2620 = vadd.xlane.f32.xlu0 %v2619_v15 }
 0xeb2   : > { %v2612_v62 = vmul.f32 %v2608_v60, %v2608_v60 }
 0xeb4   : > { %v2622_v16 = vsel %vm502_vm0, %v2612_v62, 0.0 }
 0xeb5   : > { %2623 = vadd.xlane.f32.xlu1 %v2622_v16 }
 0xf3a   : > { %v2615_v59 = vpop.xlane.xlu0 %2614 }
 0xf3b   : > { %v2625_v18 = vmul.f32 0.0625, %v2615_v59 }
 0xf3c   : > { %v2618_v7 = vpop.xlane.xlu1 %2617 }
 0xf3d   : > { %v2629_v61 = vadd.f32 1e-06, %v2625_v18  ;;  %v2626_v32 = vmul.f32 0.0625, %v2618_v7 }
 0xf3e   : > { %v2621_v33 = vpop.xlane.xlu0 %2620 }
 0xf3f   : > { %3450 = vrsqrt.f32 %v2629_v61  ;;  %v2630_v41 = vadd.f32 1e-06, %v2626_v32  ;;  %v2627_v42 = vmul.f32 0.0625, %v2621_v33 }
 0xf41   : > { %3452 = vrsqrt.f32 %v2630_v41  ;;  %v2631_v43 = vadd.f32 1e-06, %v2627_v42 }
 0xf42   : > { %v2624_v44 = vpop.xlane.xlu1 %2623 }
 0xf43   : > { %3454 = vrsqrt.f32 %v2631_v43  ;;  %v2628_v45 = vmul.f32 0.0625, %v2624_v44 }
 0xf45   : > { %v2632_v46 = vadd.f32 1e-06, %v2628_v45 }
 0xf47   : > { %3456 = vrsqrt.f32 %v2632_v46 }
 0xf49   : > { %v3451_v47 = vpop.eup %3450 }
 0xf4a   : > { %v2637_v31 = vmul.f32 %v3451_v47, %v2605_v29  ;;  %v2778_v29 = vpack.c.bf16 %v2773_v27, %v2772_v26 }
 0xf4b   : > { %v3453_v49 = vpop.eup %3452 }
 0xf4c   : > { %v2638_v8 = vmul.f32 %v3453_v49, %v2606_v34  ;;  %v2648_v50 = vmul.f32 %v2987_v48, %v2637_v31  ;;  %3316 = vmatprep.subr.bf16.mxu1 %v2778_v29  ;;  %v2779_v34 = vpack.c.bf16 %v2775_v28, %v2774_v30 }
 0xf4d   : > { %v3455_v51 = vpop.eup %3454  ;;  %3317 = vmatpush3.bf16.msra.mxu1 %v2778_v29 }
 0xf4e   : > { %v2639_v53 = vmul.f32 %v3455_v51, %v2607_v36  ;;  %v2649_v54 = vmul.f32 %v2987_v48, %v2638_v8  ;;  %v2659_v56 = vadd.f32 %v2988_v52, %v2648_v50  ;;  %3318 = vmatprep.subr.bf16.mxu1 %v2779_v34 }
 0xf50   : > { %v2660_v57 = vadd.f32 %v2988_v52, %v2649_v54  ;;  %v2650_v63 = vmul.f32 %v2987_v48, %v2639_v53 }
 0xf51   : > { %v3457_v58 = vpop.eup %3456  ;;  %3319 = vmatpush3.bf16.msra.mxu1 %v2779_v34 }
 0xf52   : > { %v2640_v1 = vmul.f32 %v3457_v58, %v2608_v60  ;;  %v2663_v0 = vpack.c.bf16 %v2660_v57, %v2659_v56  ;;  %v2661_v9 = vadd.f32 %v2988_v52, %v2650_v63 }
 0xf54   : > { %v2651_v6 = vmul.f32 %v2987_v48, %v2640_v1  ;;  %3308 = vmatprep.mubr.msk.bf16.mxu0 %vm502_vm0, %v2663_v0 }
 0xf56   : > { %v2662_v10 = vadd.f32 %v2988_v52, %v2651_v6 }
 0xf58   : > { %v2664_v14 = vpack.c.bf16 %v2662_v10, %v2661_v9 }
 0xf5a   : > { %3309 = vmatmul.mubr.msk.bf16.vlgmr.msra.gmra.mrb[72].mxu0 %vm502_vm0, %v2664_v14  ;;  %v2992_v14 = vld [vmem:[%s4072_s13] ss:$0 sm:$0xff] }
0x102d   : > { %v3310_v5 = vpop.f32.mrb[72].mxu0 }
0x102e   : > { %v2724_v36 = vadd.f32 %v3310_v5, %v2989_v35  ;;  %v2715_v37 = vpop.f32.mrb[73].mxu0 }
0x102f   : > { %v2716_v38 = vadd.f32 %v2989_v35, %v2715_v37  ;;  %v3311_v12 = vpop.f32.mrb[74].mxu0 }
0x1030   : > { %v2732_v39 = vmul.f32 %v2724_v36, %v2724_v36  ;;  %v2727_v40 = vadd.f32 %v3311_v12, %v2989_v35  ;;  %v2718_v55 = vpop.f32.mrb[75].mxu0 }
0x1031   : > { %v2730_v60 = vmul.f32 %v2716_v38, %v2716_v38  ;;  %v2719_v15 = vadd.f32 %v2989_v35, %v2718_v55 }
0x1032   : > { %v2736_v62 = vmul.f32 %v2732_v39, %v2724_v36  ;;  %v2733_v16 = vmul.f32 %v2727_v40, %v2727_v40 }
0x1033   : > { %v2734_v11 = vmul.f32 %v2730_v60, %v2716_v38  ;;  %v2731_v19 = vmul.f32 %v2719_v15, %v2719_v15 }
0x1034   : > { %v2740_v20 = vmul.f32 0.044715, %v2736_v62  ;;  %v2737_v59 = vmul.f32 %v2733_v16, %v2727_v40 }
0x1035   : > { %v2738_v18 = vmul.f32 0.044715, %v2734_v11  ;;  %v2735_v7 = vmul.f32 %v2731_v19, %v2719_v15 }
0x1036   : > { %v2744_v61 = vadd.f32 %v2740_v20, %v2724_v36  ;;  %v2741_v32 = vmul.f32 0.044715, %v2737_v59 }
0x1037   : > { %v2742_v33 = vadd.f32 %v2738_v18, %v2716_v38  ;;  %v2739_v41 = vmul.f32 0.044715, %v2735_v7 }
0x1038   : > { %v2748_v42 = vmul.f32 0.7978846, %v2744_v61  ;;  %v2745_v43 = vadd.f32 %v2741_v32, %v2727_v40 }
0x1039   : > { %v2746_v44 = vmul.f32 0.7978846, %v2742_v33  ;;  %v2743_v45 = vadd.f32 %v2739_v41, %v2719_v15 }
0x103a   : > { %3458 = vtanh.f32 %v2748_v42  ;;  %v2749_v46 = vmul.f32 0.7978846, %v2745_v43 }
0x103b   : > { %3460 = vtanh.f32 %v2746_v44  ;;  %v2747_v47 = vmul.f32 0.7978846, %v2743_v45 }
0x103c   : > { %3462 = vtanh.f32 %v2749_v46 }
0x103d   : > { %3464 = vtanh.f32 %v2747_v47 }
0x1044   : > { %v3459_v48 = vpop.eup %3458 }
0x1045   : > { %v3461_v31 = vpop.eup %3460  ;;  %v2756_v49 = vadd.f32 1.0, %v3459_v48 }
0x1046   : > { %v3463_v8 = vpop.eup %3462  ;;  %v2754_v50 = vadd.f32 1.0, %v3461_v31 }
0x1047   : > { %v3465_v51 = vpop.eup %3464  ;;  %v2760_v52 = vmul.f32 0.5, %v2756_v49  ;;  %v2757_v53 = vadd.f32 1.0, %v3463_v8 }
0x1048   : > { %v2758_v54 = vmul.f32 0.5, %v2754_v50  ;;  %v2755_v56 = vadd.f32 1.0, %v3465_v51 }
0x1049   : > { %v2761_v57 = vmul.f32 0.5, %v2757_v53  ;;  %v2764_v63 = vmul.f32 %v2760_v52, %v2724_v36 }
0x104a   : > { %v2759_v58 = vmul.f32 0.5, %v2755_v56  ;;  %v2762_v0 = vmul.f32 %v2758_v54, %v2716_v38 }
0x104b   : > { %v2765_v1 = vmul.f32 %v2761_v57, %v2727_v40 }
0x104c   : > { %v2763_v6 = vmul.f32 %v2759_v58, %v2719_v15 }
0x104d   : > { %v2767_v9 = vpack.c.bf16 %v2765_v1, %v2764_v63 }
0x104e   : > { %v2766_v10 = vpack.c.bf16 %v2763_v6, %v2762_v0 }
0x1050   : > { %3320 = vmatprep.mubr.msk.bf16.mxu1 %vm2787_vm7, %v2766_v10 }
0x1051   : > { %3321 = vmatmul.mubr.msk.bf16.vlgmr.msra.gmra.mrb[64].mxu1 %vm2787_vm7, %v2767_v9 }
0x1124   : > { %v3322_v21 = vpop.f32.mrb[64].mxu1 }
0x1125   : > { %v2837_v23 = vadd.f32 %v3322_v21, %v2992_v14  ;;  %v2828_v24 = vpop.f32.mrb[65].mxu1 }
0x1126   : > { %v2829_v2 = vadd.f32 %v2992_v14, %v2828_v24  ;;  %v3323_v3 = vpop.f32.mrb[66].mxu1 }
0x1127   : > { %v2840_v4 = vadd.f32 %v3323_v3, %v2992_v14  ;;  %v2831_v26 = vpop.f32.mrb[67].mxu1  ;;  %v2845_v30 = vadd.f32 %v2837_v23, %v3980_v17 }
0x1128   : > { %v2843_v27 = vadd.f32 %v2829_v2, %v3977_v13  ;;  %v2832_v29 = vadd.f32 %v2992_v14, %v2831_v26 }
0x1129   : > { %v2846_v34 = vadd.f32 %v2840_v4, %v3990_v25  ;;  %v3003_v36 = vpack.c.bf16 %v2845_v30, %v2845_v30 }
0x112a   : > { %v3001_v28 = vpack.c.bf16 %v2843_v27, %v2843_v27  ;;  %v2844_v35 = vadd.f32 %v2832_v29, %v3983_v22 }
0x112b   : > { %v3004_v37 = vpack.c.bf16 %v2846_v34, %v2846_v34  ;;  %2866 = vst.msk [vmem:[%s491_s27 + $0x8] sm:$0xf] %vm2863_vm8, %v3003_v36 }
0x112c   : > { %2864 = vst.msk [vmem:[%s491_s27] sm:$0xf] %vm2863_vm8, %v3001_v28  ;;  %v3002_v5 = vpack.c.bf16 %v2844_v35, %v2844_v35 }
0x112d   : > { %2867 = vst.msk [vmem:[%s491_s27 + $0xc] sm:$0xf] %vm2863_vm8, %v3004_v37 }
0x112e   : > { %2865 = vst.msk [vmem:[%s491_s27 + $0x4] sm:$0xf] %vm2863_vm8, %v3002_v5 }
0x112f PF: > { %s24_s29 = sadd.s32 1, %s3472_s29  }
0x1130   : > { %p21_p4 = scmp.ge.s32.totalorder %s24_s29, 4  }
0x1132   :  { %23 = sbr.rel (!%p21_p4) target bundleno = 1 (0x1), region = 109 }

// kernel: vitaev2_vsa_forward.39
= control target key start
LH: loop header
LB: loop body
LE: loop exit
PB: predicated region body
PF: predicated region fallthrough
CT: control target
= control target key end

     0   :  { %v253_v0 = vmov 0   ;;  %vm118_vm0 = vcmask 392192   ;;  %vm212_vm1 = vcmask 388096   ;;  %s459_s1 = inlined_call_operand.vmem [shape: f32[432,48], index: 1, kind: input, shape index: {}]   ;;  %s460_s0 = inlined_call_operand.vmem [shape: bf16[8,432], index: 0, kind: input, shape index: {}]   ;;  %s461_s2 = inlined_call_operand.vmem [shape: f32[1,48], index: 2, kind: input, shape index: {}]   ;;  %s462_s3 = inlined_call_operand.vmem [shape: bf16[8,48], index: 3, kind: output, shape index: {}]  }
   0x1   :  { %162 = vmatprep.subr.bf16.mxu1 %v253_v0  ;;  %v49_v1 = vld [vmem:[%s459_s1 + $0x100] sm:$0xff]  ;;  %v50_v2 = vld [vmem:[%s459_s1 + $0x108] sm:$0xff]  ;;  %v51_v10 = vld [vmem:[%s459_s1 + $0x110] sm:$0xff] }
   0x2   :  { %v33_v3 = vld [vmem:[%s459_s1 + $0x80] sm:$0xff]  ;;  %v87_v4 = vpack.c.bf16 %v50_v2, %v49_v1  ;;  %v34_v5 = vld [vmem:[%s459_s1 + $0x88] sm:$0xff]  ;;  %v52_v11 = vld [vmem:[%s459_s1 + $0x118] sm:$0xff] }
   0x3   :  { %v17_v6 = vld [vmem:[%s459_s1] sm:$0xff]  ;;  %v18_v7 = vld [vmem:[%s459_s1 + $0x8] sm:$0xff]  ;;  %v79_v8 = vpack.c.bf16 %v34_v5, %v33_v3  ;;  %v35_v12 = vld [vmem:[%s459_s1 + $0x90] sm:$0xff]  ;;  %v88_v13 = vpack.c.bf16 %v52_v11, %v51_v10 }
   0x4   :  { %v71_v9 = vpack.c.bf16 %v18_v7, %v17_v6  ;;  %163 = vmatpush1.bf16.msra.mxu1 %v87_v4  ;;  %v36_v14 = vld [vmem:[%s459_s1 + $0x98] sm:$0xff]  ;;  %v19_v15 = vld [vmem:[%s459_s1 + $0x10] sm:$0xff]  ;;  %v53_v18 = vld [vmem:[%s459_s1 + $0x120] sm:$0xff] }
   0x5   :  { %v20_v16 = vld [vmem:[%s459_s1 + $0x18] sm:$0xff]  ;;  %224 = vmatprep.subr.bf16.mxu0 %v79_v8  ;;  %164 = vmatprep.subr.bf16.mxu1 %v253_v0  ;;  %v80_v17 = vpack.c.bf16 %v36_v14, %v35_v12  ;;  %v54_v19 = vld [vmem:[%s459_s1 + $0x128] sm:$0xff]  ;;  %v37_v20 = vld [vmem:[%s459_s1 + $0xa0] sm:$0xff] }
   0x6   :  { %225 = vmatpush3.bf16.msra.mxu0 %v71_v9  ;;  %v72_v21 = vpack.c.bf16 %v20_v16, %v19_v15  ;;  %v38_v22 = vld [vmem:[%s459_s1 + $0xa8] sm:$0xff]  ;;  %v21_v24 = vld [vmem:[%s459_s1 + $0x20] sm:$0xff]  ;;  %v89_v26 = vpack.c.bf16 %v54_v19, %v53_v18  ;;  %v39_v27 = vld [vmem:[%s459_s1 + $0xb0] sm:$0xff] }
   0x7   :  { %226 = vmatprep.subr.bf16.mxu0 %v80_v17  ;;  %v81_v23 = vpack.c.bf16 %v38_v22, %v37_v20  ;;  %v22_v25 = vld [vmem:[%s459_s1 + $0x28] sm:$0xff]  ;;  %v40_v28 = vld [vmem:[%s459_s1 + $0xb8] sm:$0xff]  ;;  %v55_v29 = vld [vmem:[%s459_s1 + $0x130] sm:$0xff] }
   0x8   :  { %165 = vmatpush1.bf16.msra.mxu1 %v88_v13  ;;  %v56_v30 = vld [vmem:[%s459_s1 + $0x138] sm:$0xff]  ;;  %v73_v31 = vpack.c.bf16 %v22_v25, %v21_v24  ;;  %v82_v32 = vpack.c.bf16 %v40_v28, %v39_v27  ;;  %v23_v33 = vld [vmem:[%s459_s1 + $0x30] sm:$0xff]  ;;  %v41_v36 = vld [vmem:[%s459_s1 + $0xc0] sm:$0xff] }
   0x9   :  { %166 = vmatprep.subr.bf16.mxu1 %v253_v0  ;;  %v24_v34 = vld [vmem:[%s459_s1 + $0x38] sm:$0xff]  ;;  %v90_v35 = vpack.c.bf16 %v56_v30, %v55_v29  ;;  %v42_v37 = vld [vmem:[%s459_s1 + $0xc8] sm:$0xff]  ;;  %v57_v38 = vld [vmem:[%s459_s1 + $0x140] sm:$0xff] }
   0xa   :  { %227 = vmatpush3.bf16.msra.mxu0 %v72_v21  ;;  %v58_v39 = vld [vmem:[%s459_s1 + $0x148] sm:$0xff]  ;;  %v74_v40 = vpack.c.bf16 %v24_v34, %v23_v33  ;;  %v83_v41 = vpack.c.bf16 %v42_v37, %v41_v36  ;;  %v25_v42 = vld [vmem:[%s459_s1 + $0x40] sm:$0xff]  ;;  %v43_v45 = vld [vmem:[%s459_s1 + $0xd0] sm:$0xff] }
   0xb   :  { %228 = vmatprep.subr.bf16.mxu0 %v81_v23  ;;  %v26_v43 = vld [vmem:[%s459_s1 + $0x48] sm:$0xff]  ;;  %v91_v44 = vpack.c.bf16 %v58_v39, %v57_v38  ;;  %v44_v46 = vld [vmem:[%s459_s1 + $0xd8] sm:$0xff]  ;;  %v59_v47 = vld [vmem:[%s459_s1 + $0x150] sm:$0xff] }
   0xc   :  { %167 = vmatpush1.bf16.msra.mxu1 %v89_v26  ;;  %v60_v48 = vld [vmem:[%s459_s1 + $0x158] sm:$0xff]  ;;  %v15_v49 = vld [vmem:[%s460_s0] sm:$0xff]  ;;  %v75_v50 = vpack.c.bf16 %v26_v43, %v25_v42  ;;  %v84_v52 = vpack.c.bf16 %v44_v46, %v43_v45  ;;  %v27_v53 = vld [vmem:[%s459_s1 + $0x50] sm:$0xff] }
   0xd   :  { %168 = vmatprep.subr.bf16.mxu1 %v253_v0  ;;  %v220_v51 = vcombine.high %v15_v49, %v15_v49  ;;  %v28_v54 = vld [vmem:[%s459_s1 + $0x58] sm:$0xff]  ;;  %v16_v55 = vld [vmem:[%s460_s0 + $0x8] sm:$0xff]  ;;  %v92_v56 = vpack.c.bf16 %v60_v48, %v59_v47  ;;  %v45_v57 = vld [vmem:[%s459_s1 + $0xe0] sm:$0xff]  ;;  %v219_v17 = vcombine.low %v15_v49, %v15_v49 }
   0xe   :  { %229 = vmatpush3.bf16.msra.mxu0 %v73_v31  ;;  %v46_v58 = vld [vmem:[%s459_s1 + $0xe8] sm:$0xff]  ;;  %v222_v59 = vcombine.high %v16_v55, %v16_v55  ;;  %v61_v60 = vld [vmem:[%s459_s1 + $0x160] sm:$0xff]  ;;  %v76_v62 = vpack.c.bf16 %v28_v54, %v27_v53  ;;  %v47_v4 = vld [vmem:[%s459_s1 + $0xf0] sm:$0xff]  ;;  %v221_v24 = vcombine.low %v16_v55, %v16_v55 }
   0xf   :  { %230 = vmatprep.subr.bf16.mxu0 %v82_v32  ;;  %154 = vmatprep.mubr.bf16.mxu0 %v220_v51  ;;  %v62_v61 = vld [vmem:[%s459_s1 + $0x168] sm:$0xff]  ;;  %v85_v63 = vpack.c.bf16 %v46_v58, %v45_v57  ;;  %v29_v1 = vld [vmem:[%s459_s1 + $0x60] sm:$0xff]  ;;  %v48_v5 = vld [vmem:[%s459_s1 + $0xf8] sm:$0xff] }
  0x10   :  { %169 = vmatpush1.bf16.msra.mxu1 %v90_v35  ;;  %223 = vmatprep.mubr.msk.bf16.mxu1 %vm118_vm0, %v222_v59  ;;  %v30_v2 = vld [vmem:[%s459_s1 + $0x68] sm:$0xff]  ;;  %v93_v3 = vpack.c.bf16 %v62_v61, %v61_v60  ;;  %v63_v6 = vld [vmem:[%s459_s1 + $0x170] sm:$0xff]  ;;  %v64_v7 = vld [vmem:[%s459_s1 + $0x178] sm:$0xff]  ;;  %v86_v9 = vpack.c.bf16 %v48_v5, %v47_v4 }
  0x11   :  { %170 = vmatprep.subr.bf16.mxu1 %v253_v0  ;;  %v77_v8 = vpack.c.bf16 %v30_v2, %v29_v1  ;;  %v31_v10 = vld [vmem:[%s459_s1 + $0x70] sm:$0xff]  ;;  %v32_v11 = vld [vmem:[%s459_s1 + $0x78] sm:$0xff]  ;;  %v94_v12 = vpack.c.bf16 %v64_v7, %v63_v6  ;;  %v65_v13 = vld [vmem:[%s459_s1 + $0x180] sm:$0xff] }
  0x12   :  { %231 = vmatpush3.bf16.msra.mxu0 %v74_v40  ;;  %v66_v14 = vld [vmem:[%s459_s1 + $0x188] sm:$0xff]  ;;  %v78_v15 = vpack.c.bf16 %v32_v11, %v31_v10  ;;  %v67_v18 = vld [vmem:[%s459_s1 + $0x190] sm:$0xff]  ;;  %v68_v19 = vld [vmem:[%s459_s1 + $0x198] sm:$0xff] }
  0x13   :  { %232 = vmatprep.subr.bf16.mxu0 %v83_v41  ;;  %v95_v16 = vpack.c.bf16 %v66_v14, %v65_v13  ;;  %v96_v20 = vpack.c.bf16 %v68_v19, %v67_v18  ;;  %v69_v21 = vld [vmem:[%s459_s1 + $0x1a0] sm:$0xff]  ;;  %v70_v22 = vld [vmem:[%s459_s1 + $0x1a8] sm:$0xff] }
  0x14   :  { %171 = vmatpush1.bf16.msra.mxu1 %v91_v44  ;;  %v97_v23 = vpack.c.bf16 %v70_v22, %v69_v21  ;;  %v218_v30 = vld [vmem:[%s461_s2] ss:$0 sm:$0xff] }
  0x15   :  { %172 = vmatprep.subr.bf16.mxu1 %v253_v0 }
  0x16   :  { %233 = vmatpush3.bf16.msra.mxu0 %v75_v50 }
  0x17   :  { %234 = vmatprep.subr.bf16.mxu0 %v84_v52 }
  0x18   :  { %173 = vmatpush1.bf16.msra.mxu1 %v92_v56 }
  0x19   :  { %174 = vmatprep.subr.bf16.mxu1 %v253_v0 }
  0x1a   :  { %235 = vmatpush3.bf16.msra.mxu0 %v76_v62 }
  0x1b   :  { %236 = vmatprep.subr.bf16.mxu0 %v85_v63 }
  0x1c   :  { %175 = vmatpush1.bf16.msra.mxu1 %v93_v3 }
  0x1d   :  { %176 = vmatprep.subr.bf16.mxu1 %v253_v0 }
  0x1e   :  { %237 = vmatpush3.bf16.msra.mxu0 %v77_v8 }
  0x1f   :  { %238 = vmatprep.subr.bf16.mxu0 %v86_v9 }
  0x20   :  { %177 = vmatpush1.bf16.msra.mxu1 %v94_v12 }
  0x21   :  { %178 = vmatprep.subr.bf16.mxu1 %v253_v0 }
  0x22   :  { %239 = vmatpush3.bf16.msra.mxu0 %v78_v15 }
  0x24   :  { %179 = vmatpush1.bf16.msra.mxu1 %v95_v16 }
  0x25   :  { %155 = vmatmul.mubr.bf16.vlgmr.msra.gmra.mrb[0].mxu0 %v219_v17  ;;  %180 = vmatprep.subr.bf16.mxu1 %v253_v0 }
  0x28   :  { %181 = vmatpush1.bf16.msra.mxu1 %v96_v20 }
  0x29   :  { %182 = vmatprep.subr.bf16.mxu1 %v253_v0 }
  0x2c   :  { %183 = vmatpush1.bf16.msra.mxu1 %v97_v23 }
  0x2f   :  { %195 = vmatmul.mubr.bf16.vlgmr.msra.gmra.mrb[0].mxu1 %v221_v24 }
  0xf8   :  { %v240_v25 = vpop.f32.mrb[0].mxu0 }
  0xf9   :  { %v241_v26 = vpop.f32.mrb[1].mxu0 }
  0xfa   :  { %v242_v27 = vadd.f32 %v241_v26, %v240_v25  ;;  %v243_v28 = vpop.f32.mrb[2].mxu0 }
  0xfb   :  { %v244_v29 = vpop.f32.mrb[3].mxu0 }
  0xfc   :  { %v157_v31 = vadd.f32 %v242_v27, %v218_v30 }
 0x102   :  { %v196_v32 = vpop.f32.mrb[0].mxu1 }
 0x103   :  { %v197_v33 = vadd.f32 %v196_v32, %v157_v31  ;;  %v198_v34 = vpop.f32.mrb[1].mxu1 }
 0x104   :  { %v199_v35 = vpop.f32.mrb[2].mxu1 }
 0x105   :  { %v202_v36 = vmul.f32 %v197_v33, %v197_v33  ;;  %v200_v37 = vpop.f32.mrb[3].mxu1 }
 0x107   :  { %v203_v0 = vmul.f32 %v202_v36, %v197_v33 }
 0x109   :  { %v204_v38 = vmul.f32 0.044715, %v203_v0 }
 0x10b   :  { %v205_v39 = vadd.f32 %v204_v38, %v197_v33 }
 0x10d   :  { %v206_v40 = vmul.f32 0.7978846, %v205_v39 }
 0x10f   :  { %251 = vtanh.f32 %v206_v40 }
 0x119   :  { %v252_v41 = vpop.eup %251 }
 0x11a   :  { %v208_v42 = vadd.f32 1.0, %v252_v41 }
 0x11c   :  { %v209_v43 = vmul.f32 0.5, %v208_v42 }
 0x11e   :  { %v210_v44 = vmul.f32 %v209_v43, %v197_v33 }
 0x120   :  { %v211_v45 = vpack.c.bf16 %v210_v44, %v210_v44 }
 0x122   :  { %213 = vst.msk [vmem:[%s462_s3] sm:$0xf] %vm212_vm1, %v211_v45 }

// kernel: vitaev2_vsa_forward.43
= control target key start
LH: loop header
LB: loop body
LE: loop exit
PB: predicated region body
PF: predicated region fallthrough
CT: control target
= control target key end

     0   :  { %s1172_s29 = smov 0   ;;  %s1316_s0 = inlined_call_operand.vmem [shape: bf16[16,48], index: 0, kind: input, shape index: {}]   ;;  %s1317_s1 = inlined_call_operand.vmem [shape: bf16[16,32], index: 1, kind: input, shape index: {}]   ;;  %s1318_s2 = inlined_call_operand.vmem [shape: f32[1,48], index: 2, kind: input, shape index: {}]   ;;  %s1319_s3 = inlined_call_operand.vmem [shape: f32[1,48], index: 3, kind: input, shape index: {}]   ;;  %s1320_s4 = inlined_call_operand.vmem [shape: f32[48,96], index: 4, kind: input, shape index: {}]   ;;  %s1321_s5 = inlined_call_operand.vmem [shape: f32[1,96], index: 5, kind: input, shape index: {}]   ;;  %s1322_s6 = inlined_call_operand.vmem [shape: f32[32,32], index: 6, kind: input, shape index: {}]   ;;  %s1323_s7 = inlined_call_operand.vmem [shape: f32[1,32], index: 7, kind: input, shape index: {}]   ;;  %s1324_s8 = inlined_call_operand.vmem [shape: f32[1,32], index: 8, kind: input, shape index: {}]   ;;  %s1325_s9 = inlined_call_operand.vmem [shape: f32[1,32], index: 9, kind: input, shape index: {}]   ;;  %s1326_s10 = inlined_call_operand.vmem [shape: f32[32,32], index: 10, kind: input, shape index: {}]   ;;  %s1327_s11 = inlined_call_operand.vmem [shape: f32[1,32], index: 11, kind: input, shape index: {}]   ;;  %s1328_s12 = inlined_call_operand.vmem [shape: f32[32,32], index: 12, kind: input, shape index: {}]   ;;  %s1329_s13 = inlined_call_operand.vmem [shape: f32[1,32], index: 13, kind: input, shape index: {}]   ;;  %s1330_s14 = inlined_call_operand.vmem [shape: bf16[16,32], index: 14, kind: output, shape index: {}]  }
   0x1 LB: > { %s976_s30 = sadd.s32 4294967295, %s1091_s29   ;;  %p980_p0 = scmp.ge.s32.totalorder %s1091_s29, 1  ;;  %s1091_s29 = sphi %s1172_s29, %s24_s29  }
   0x2   : > { %p420_p1 = scmp.lt.s32.totalorder %s1091_s29, 3 }
   0x4   : > { %p421_p2 = pnand %p980_p0, %p420_p1 }
   0x5   : > { %p468_p3 = scmp.lt.s32.totalorder (!%p421_p2), %s976_s30, 1  ;;  %vm483_vm0 = vcmask (!%p421_p2), 392192   ;;  %v515_v8 = vld [vmem:[%s1320_s4] sm:$0xff] (!%p421_p2)  ;;  %v516_v9 = vld [vmem:[%s1320_s4 + $0x8] sm:$0xff] (!%p421_p2)  ;;  %v517_v10 = vld [vmem:[%s1320_s4 + $0x10] sm:$0xff] (!%p421_p2)  ;;  %v1093_v11 = vmov (!%p421_p2), 0.0   ;;  %v574_v37 = vlaneseq (!%p421_p2) }
   0x6   : > { %424 = sbr.rel (%p421_p2) target bundleno = 2411 (0x96b), region = 76  ;;  %1017 = vmatprep.subr.bf16.mxu0 (!%p421_p2), %v1093_v11  ;;  %v521_v12 = vpack.c.bf16 (!%p421_p2), %v516_v9, %v515_v8  ;;  %v518_v13 = vld [vmem:[%s1320_s4 + $0x18] sm:$0xff] (!%p421_p2)  ;;  %vm1094_vm1 = vmmov (!%p421_p2), 0   ;;  %1027 = vmatprep.subr.bf16.mxu1 (!%p421_p2), %v1093_v11  ;;  %v519_v15 = vld [vmem:[%s1320_s4 + $0x20] sm:$0xff] (!%p421_p2)  ;;  %v520_v16 = vld [vmem:[%s1320_s4 + $0x28] sm:$0xff] (!%p421_p2)  ;;  %s1095_s23 = smov (!%p421_p2), 96  }
   0x7   : > { %1023 = vmatprep.mubr.msk.bf16.mxu0 (!%p421_p2), %vm1094_vm1, %v1093_v11  ;;  %1029 = vmatprep.mubr.msk.bf16.mxu1 (!%p421_p2), %vm1094_vm1, %v1093_v11  ;;  %v522_v14 = vpack.c.bf16 (!%p421_p2), %v518_v13, %v517_v10  ;;  %v523_v17 = vpack.c.bf16 (!%p421_p2), %v520_v16, %v519_v15  ;;  %v984_v22 = vld [vmem:[%s1318_s2] ss:$0 sm:$0xff] (!%p421_p2)  ;;  %vm581_vm2 = vcmask (!%p421_p2), 261120   ;;  %v575_v38 = vand.u32 (!%p421_p2), 127, %v574_v37  ;;  %s1096_s24 = smov (!%p421_p2), 64   ;;  %v696_v52 = vld [vmem:[%s1322_s6 + $0x8] sm:$0xff] (!%p421_p2) }
   0x8   : > { %1018 = vmatpush3.bf16.msra.mxu0 (!%p421_p2), %v521_v12  ;;  %v985_v24 = vld [vmem:[%s1319_s3] ss:$0 sm:$0xff] (!%p421_p2)  ;;  %vm632_vm4 = vcmask (!%p421_p2), 64512   ;;  %v697_v53 = vld [vmem:[%s1322_s6 + $0x10] sm:$0xff] (!%p421_p2)  ;;  %v698_v55 = vld [vmem:[%s1322_s6 + $0x18] sm:$0xff] (!%p421_p2)  ;;  %vm650_vm5 = vcmask (!%p421_p2), 1043456  }
   0x9   : > { %1019 = vmatprep.subr.bf16.mxu0 (!%p421_p2), %v1093_v11  ;;  %v986_v28 = vld [vmem:[%s1321_s5] ss:$0 sm:$0xff] (!%p421_p2)  ;;  %vm576_vm3 = vcmp.lt.s32.totalorder (!%p421_p2), %v575_v38, 4  ;;  %v700_v56 = vpack.c.bf16 (!%p421_p2), %v698_v55, %v697_v53  ;;  %v852_v37 = vld [vmem:[%s1328_s12 + $0x8] sm:$0xff] (!%p421_p2)  ;;  %vm909_vm6 = vcmask (!%p421_p2), 257024  }
   0xa   : > { %v695_v51 = vld [vmem:[%s1322_s6] sm:$0xff] (!%p421_p2) }
   0xb   : > { %v699_v54 = vpack.c.bf16 (!%p421_p2), %v696_v52, %v695_v51 }
   0xc   : > { %1020 = vmatpush3.bf16.msra.mxu0 (!%p421_p2), %v522_v14 }
   0xd   : > { %s1332_s30 = smov (!%p468_p3, %s976_s30), 1  ;;  %1021 = vmatprep.subr.bf16.mxu0 %v1093_v11 }
   0xe   : > { %s1180_s15 = sshll.u32 %s1332_s30, 2 }
   0xf   : > { %s471_s18 = scalar_lea.vmem %s1316_s0, %s1180_s15  ;;  %s475_s21 = scalar_lea.vmem %s1317_s1, %s1180_s15 }
  0x10   : > { %v481_v0 = vld [vmem:[%s471_s18] sm:$0xf]  ;;  %1022 = vmatpush3.bf16.msra.mxu0 %v523_v17  ;;  %s479_s22 = scalar_lea.vmem %s1330_s14, %s1180_s15 }
  0x11   : > { %v482_v1 = vunpack.c.l.bf16 %v481_v0  ;;  %1039 = vmatprep.subr.bf16.mxu0 %v1093_v11 }
  0x13   : > { %v484_v2 = vsel %vm483_vm0, %v482_v1, 0.0 }
  0x14   : > { %485 = vadd.xlane.f32.xlu0 %v484_v2 }
  0xa1   : > { %v486_v3 = vpop.xlane.xlu0 %485 }
  0xa2   : > { %v488_v4 = vmul.f32 0.020833334, %v486_v3 }
  0xa4   : > { %v489_v5 = vsub.f32 %v482_v1, %v488_v4  ;;  %v751_v4 = vld [vmem:[%s475_s21] sm:$0xf] }
  0xa6   : > { %v490_v6 = vmul.f32 %v489_v5, %v489_v5 }
  0xa8   : > { %v491_v7 = vsel %vm483_vm0, %v490_v6, 0.0  ;;  %v752_v6 = vunpack.c.l.bf16 %v751_v4 }
  0xa9   : > { %492 = vadd.xlane.f32.xlu0 %v491_v7 }
 0x136   : > { %v493_v18 = vpop.xlane.xlu0 %492 }
 0x137   : > { %v494_v19 = vmul.f32 0.020833334, %v493_v18 }
 0x139   : > { %v495_v20 = vadd.f32 1e-06, %v494_v19 }
 0x13b   : > { %1075 = vrsqrt.f32 %v495_v20  ;;  %v785_v20 = vld [vmem:[%s1326_s10] sm:$0xff] }
 0x145   : > { %v1076_v21 = vpop.eup %1075 }
 0x146   : > { %v497_v23 = vmul.f32 %v1076_v21, %v489_v5  ;;  %v990_v5 = vld [vmem:[%s1323_s7] ss:$0 sm:$0xff]  ;;  %v786_v21 = vld [vmem:[%s1326_s10 + $0x8] sm:$0xff] }
 0x148   : > { %v505_v25 = vmul.f32 %v984_v22, %v497_v23  ;;  %v789_v22 = vpack.c.bf16 %v786_v21, %v785_v20  ;;  %v787_v23 = vld [vmem:[%s1326_s10 + $0x10] sm:$0xff] }
 0x14a   : > { %v513_v26 = vadd.f32 %v985_v24, %v505_v25  ;;  %v788_v24 = vld [vmem:[%s1326_s10 + $0x18] sm:$0xff] }
 0x14b   : > { %v790_v25 = vpack.c.bf16 %v788_v24, %v787_v23 }
 0x14c   : > { %v514_v27 = vpack.c.bf16 %v513_v26, %v513_v26 }
 0x14e   : > { %1024 = vmatmul.mubr.msk.bf16.vlgmr.msra.gmra.mrb[0].mxu0 %vm483_vm0, %v514_v27 }
 0x14f   : > { %1043 = vmatprep.mubr.msk.bf16.mxu0 %vm1094_vm1, %v1093_v11  ;;  %1040 = vmatpush3.bf16.msra.mxu0 %v699_v54 }
 0x150   : > { %1041 = vmatprep.subr.bf16.mxu0 %v1093_v11 }
 0x153   : > { %1042 = vmatpush3.bf16.msra.mxu0 %v700_v56 }
 0x154   : > { %1055 = vmatprep.subr.bf16.mxu0 %v1093_v11 }
 0x221   : > { %v568_v29 = vpop.f32.mrb[0].mxu0 }
 0x222   : > { %v569_v30 = vadd.f32 %v986_v28, %v568_v29  ;;  %v1025_v31 = vpop.f32.mrb[1].mxu0 }
 0x223   : > { %v571_v32 = vpop.f32.mrb[2].mxu0 }
 0x224   : > { %v577_v33 = vpack.c.bf16 %v569_v30, %v569_v30  ;;  %v1026_v34 = vpop.f32.mrb[3].mxu0  ;;  %v992_v30 = vld [vmem:[%s1324_s8] ss:$0 sm:$0xff] }
 0x225   : > { %v993_v32 = vld [vmem:[%s1325_s9] ss:$0 sm:$0xff] }
 0x226   : > { %579 = vrot.lane.b32.xlu1 %v577_v33, %s1095_s23 }
 0x298   : > { %v580_v35 = vpop.permute.xlu1 %579 }
 0x299   : > { %v586_v36 = vsel %vm581_vm2, %v580_v35, 0 }
 0x29a   : > { %1028 = vmatpush3.bf16.xpose.msra.mxu1 %v586_v36  ;;  %v851_v36 = vld [vmem:[%s1328_s12] sm:$0xff] }
 0x29b   : > { %1033 = vmatprep.subr.bf16.mxu1 %v1093_v11  ;;  %v855_v38 = vpack.c.bf16 %v852_v37, %v851_v36 }
 0x2a1   : > { %1030 = vmatmul.mubr.msk.bf16.vlgmr.msra.gmra.mrb[0].mxu1 %vm581_vm2, %v577_v33 }
 0x2a2   : > { %1035 = vmatprep.mubr.msk.bf16.mxu1 %vm1094_vm1, %v1093_v11 }
 0x374   : > { %v622_v39 = vpop.f32.mrb[0].mxu1 }
 0x375   : > { %v628_v40 = vmul.f32 0.17677669, %v622_v39  ;;  %v1031_v41 = vpop.f32.mrb[1].mxu1  ;;  %v853_v39 = vld [vmem:[%s1328_s12 + $0x10] sm:$0xff] }
 0x376   : > { %v625_v42 = vpop.f32.mrb[2].mxu1 }
 0x377   : > { %v1032_v43 = vpop.f32.mrb[3].mxu1  ;;  %v631_v44 = vsel %vm576_vm3, %v628_v40, -1e+09  ;;  %v854_v40 = vld [vmem:[%s1328_s12 + $0x18] sm:$0xff]  ;;  %v994_v42 = vld [vmem:[%s1327_s11] ss:$0 sm:$0xff] }
 0x378   : > { %v633_v45 = vsel %vm632_vm4, %v631_v44, -inf  ;;  %v856_v41 = vpack.c.bf16 %v854_v40, %v853_v39 }
 0x379   : > { %634 = vmax.xlane.f32.xlu1 %v633_v45 }
 0x406   : > { %v635_v46 = vpop.xlane.xlu1 %634 }
 0x407   : > { %v636_v47 = vsub.f32 %v631_v44, %v635_v46 }
 0x409   : > { %v637_v48 = vmul.f32 1.442695, %v636_v47 }
 0x40b   : > { %1077 = vpow2.f32 %v637_v48 }
 0x415   : > { %v1078_v49 = vpop.eup %1077 }
 0x416   : > { %v639_v50 = vsel %vm632_vm4, %v1078_v49, 0.0 }
 0x417   : > { %640 = vadd.xlane.f32.xlu0 %v639_v50 }
 0x42d   : > { %645 = vrot.lane.b32.xlu0 %v577_v33, %s1096_s24 }
 0x4a4   : > { %v641_v57 = vpop.xlane.xlu0 %640 }
 0x4a5   : > { %1079 = vrcp.f32 %v641_v57  ;;  %v996_v57 = vld [vmem:[%s1329_s13] ss:$0 sm:$0xff] }
 0x4a8   : > { %v646_v58 = vpop.permute.xlu0 %645 }
 0x4a9   : > { %v652_v59 = vsel %vm650_vm5, %v646_v58, 0 }
 0x4aa   : > { %1034 = vmatpush3.bf16.msra.mxu1 %v652_v59 }
 0x4ab   : > { %1047 = vmatprep.subr.bf16.mxu1 %v1093_v11 }
 0x4af   : > { %v1080_v60 = vpop.eup %1079 }
 0x4b0   : > { %v643_v61 = vmul.f32 %v1080_v60, %v1078_v49 }
 0x4b2   : > { %v644_v62 = vpack.c.bf16 %v643_v61, %v643_v61 }
 0x4b4   : > { %1036 = vmatmul.mubr.msk.bf16.vlgmr.msra.gmra.mrb[4].mxu1 %vm632_vm4, %v644_v62 }
 0x4b5   : > { %1051 = vmatprep.mubr.msk.bf16.mxu1 %vm1094_vm1, %v1093_v11  ;;  %1048 = vmatpush3.bf16.msra.mxu1 %v789_v22 }
 0x4b6   : > { %1049 = vmatprep.subr.bf16.mxu1 %v1093_v11 }
 0x4b9   : > { %1050 = vmatpush3.bf16.msra.mxu1 %v790_v25 }
 0x587   : > { %v688_v63 = vpop.f32.mrb[4].mxu1 }
 0x588   : > { %v694_v0 = vpack.c.bf16 %v688_v63, %v688_v63  ;;  %v1037_v1 = vpop.f32.mrb[5].mxu1 }
 0x589   : > { %v691_v2 = vpop.f32.mrb[6].mxu1 }
 0x58a   : > { %v1038_v3 = vpop.f32.mrb[7].mxu1  ;;  %1044 = vmatmul.mubr.msk.bf16.vlgmr.msra.gmra.mrb[4].mxu0 %vm581_vm2, %v694_v0 }
 0x58b   : > { %1059 = vmatprep.mubr.msk.bf16.mxu0 %vm1094_vm1, %v1093_v11  ;;  %1056 = vmatpush3.bf16.msra.mxu0 %v855_v38 }
 0x58c   : > { %1057 = vmatprep.subr.bf16.mxu0 %v1093_v11 }
 0x58f   : > { %1058 = vmatpush3.bf16.msra.mxu0 %v856_v41 }
 0x65d   : > { %v745_v7 = vpop.f32.mrb[4].mxu0 }
 0x65e   : > { %v746_v8 = vadd.f32 %v990_v5, %v745_v7  ;;  %v1045_v9 = vpop.f32.mrb[5].mxu0 }
 0x65f   : > { %v748_v10 = vpop.f32.mrb[6].mxu0 }
 0x660   : > { %v1262_v12 = vadd.f32 %v752_v6, %v746_v8  ;;  %v1046_v13 = vpop.f32.mrb[7].mxu0 }
 0x662   : > { %v754_v14 = vsel %vm581_vm2, %v1262_v12, 0.0 }
 0x663   : > { %755 = vadd.xlane.f32.xlu0 %v754_v14 }
 0x6f0   : > { %v756_v15 = vpop.xlane.xlu0 %755 }
 0x6f1   : > { %v758_v16 = vmul.f32 0.03125, %v756_v15 }
 0x6f3   : > { %v759_v17 = vsub.f32 %v1262_v12, %v758_v16 }
 0x6f5   : > { %v760_v18 = vmul.f32 %v759_v17, %v759_v17 }
 0x6f7   : > { %v761_v19 = vsel %vm581_vm2, %v760_v18, 0.0 }
 0x6f8   : > { %762 = vadd.xlane.f32.xlu1 %v761_v19 }
 0x785   : > { %v763_v26 = vpop.xlane.xlu1 %762 }
 0x786   : > { %v764_v27 = vmul.f32 0.03125, %v763_v26 }
 0x788   : > { %v765_v28 = vadd.f32 1e-06, %v764_v27 }
 0x78a   : > { %1081 = vrsqrt.f32 %v765_v28 }
 0x794   : > { %v1082_v29 = vpop.eup %1081 }
 0x795   : > { %v767_v31 = vmul.f32 %v1082_v29, %v759_v17 }
 0x797   : > { %v775_v33 = vmul.f32 %v992_v30, %v767_v31 }
 0x799   : > { %v783_v34 = vadd.f32 %v993_v32, %v775_v33 }
 0x79b   : > { %v784_v35 = vpack.c.bf16 %v783_v34, %v783_v34 }
 0x79d   : > { %1052 = vmatmul.mubr.msk.bf16.vlgmr.msra.gmra.mrb[8].mxu1 %vm581_vm2, %v784_v35 }
 0x870   : > { %v835_v43 = vpop.f32.mrb[8].mxu1 }
 0x871   : > { %v836_v44 = vadd.f32 %v994_v42, %v835_v43  ;;  %v1053_v45 = vpop.f32.mrb[9].mxu1 }
 0x872   : > { %v838_v46 = vpop.f32.mrb[10].mxu1 }
 0x873   : > { %v841_v47 = vmul.f32 %v836_v44, %v836_v44  ;;  %v1054_v11 = vpop.f32.mrb[11].mxu1 }
 0x875   : > { %v842_v48 = vmul.f32 %v841_v47, %v836_v44 }
 0x877   : > { %v843_v49 = vmul.f32 0.044715, %v842_v48 }
 0x879   : > { %v844_v50 = vadd.f32 %v843_v49, %v836_v44 }
 0x87b   : > { %v845_v51 = vmul.f32 0.7978846, %v844_v50 }
 0x87d   : > { %1083 = vtanh.f32 %v845_v51 }
 0x887   : > { %v1084_v52 = vpop.eup %1083 }
 0x888   : > { %v847_v53 = vadd.f32 1.0, %v1084_v52 }
 0x88a   : > { %v848_v54 = vmul.f32 0.5, %v847_v53 }
 0x88c   : > { %v849_v55 = vmul.f32 %v848_v54, %v836_v44 }
 0x88e   : > { %v850_v56 = vpack.c.bf16 %v849_v55, %v849_v55 }
 0x890   : > { %1060 = vmatmul.mubr.msk.bf16.vlgmr.msra.gmra.mrb[8].mxu0 %vm581_vm2, %v850_v56 }
 0x963   : > { %v901_v58 = vpop.f32.mrb[8].mxu0 }
 0x964   : > { %v902_v59 = vadd.f32 %v996_v57, %v901_v58  ;;  %v1061_v60 = vpop.f32.mrb[9].mxu0 }
 0x965   : > { %v904_v61 = vpop.f32.mrb[10].mxu0 }
 0x966   : > { %v907_v62 = vadd.f32 %v902_v59, %v1262_v12  ;;  %v1062_v63 = vpop.f32.mrb[11].mxu0 }
 0x968   : > { %v908_v0 = vpack.c.bf16 %v907_v62, %v907_v62 }
 0x96a   : > { %910 = vst.msk [vmem:[%s479_s22] sm:$0xf] %vm909_vm6, %v908_v0 }
 0x96b PF: > { %s24_s29 = sadd.s32 1, %s1091_s29  }
 0x96c   : > { %p21_p4 = scmp.ge.s32.totalorder %s24_s29, 4  }
 0x96e   :  { %23 = sbr.rel (!%p21_p4) target bundleno = 1 (0x1), region = 109 }

// kernel: vitaev2_vsa_forward.44
= control target key start
LH: loop header
LB: loop body
LE: loop exit
PB: predicated region body
PF: predicated region fallthrough
CT: control target
= control target key end

     0   :  { %v233_v3 = vmov 0.0   ;;  %vm234_vm0 = vmmov 0   ;;  %vm88_vm1 = vcmask 261120   ;;  %s375_s1 = inlined_call_operand.vmem [shape: f32[288,128], index: 1, kind: input, shape index: {}]   ;;  %s376_s0 = inlined_call_operand.vmem [shape: bf16[8,288], index: 0, kind: input, shape index: {}]   ;;  %s377_s2 = inlined_call_operand.vmem [shape: f32[1,128], index: 2, kind: input, shape index: {}]   ;;  %s378_s3 = inlined_call_operand.vmem [shape: bf16[8,128], index: 3, kind: output, shape index: {}]  }
   0x1   :  { %v33_v0 = vld [vmem:[%s375_s1 + $0x80] sm:$0xff]  ;;  %v34_v1 = vld [vmem:[%s375_s1 + $0x88] sm:$0xff]  ;;  %216 = vmatprep.subr.bf16.mxu1 %v233_v3  ;;  %220 = vmatprep.mubr.msk.bf16.mxu1 %vm234_vm0, %v233_v3  ;;  %v35_v6 = vld [vmem:[%s375_s1 + $0x90] sm:$0xff] }
   0x2   :  { %v17_v2 = vld [vmem:[%s375_s1] sm:$0xff]  ;;  %v61_v4 = vpack.c.bf16 %v34_v1, %v33_v0  ;;  %v18_v5 = vld [vmem:[%s375_s1 + $0x8] sm:$0xff]  ;;  %v36_v7 = vld [vmem:[%s375_s1 + $0x98] sm:$0xff] }
   0x3   :  { %v53_v8 = vpack.c.bf16 %v18_v5, %v17_v2  ;;  %v62_v9 = vpack.c.bf16 %v36_v7, %v35_v6  ;;  %v19_v10 = vld [vmem:[%s375_s1 + $0x10] sm:$0xff]  ;;  %v20_v11 = vld [vmem:[%s375_s1 + $0x18] sm:$0xff]  ;;  %v37_v12 = vld [vmem:[%s375_s1 + $0xa0] sm:$0xff] }
   0x4   :  { %191 = vmatprep.subr.bf16.mxu0 %v61_v4  ;;  %v38_v13 = vld [vmem:[%s375_s1 + $0xa8] sm:$0xff]  ;;  %v54_v14 = vpack.c.bf16 %v20_v11, %v19_v10  ;;  %v21_v16 = vld [vmem:[%s375_s1 + $0x20] sm:$0xff]  ;;  %v39_v18 = vld [vmem:[%s375_s1 + $0xb0] sm:$0xff] }
   0x5   :  { %192 = vmatpush3.bf16.msra.mxu0 %v53_v8  ;;  %v63_v15 = vpack.c.bf16 %v38_v13, %v37_v12  ;;  %v22_v17 = vld [vmem:[%s375_s1 + $0x28] sm:$0xff]  ;;  %v40_v19 = vld [vmem:[%s375_s1 + $0xb8] sm:$0xff]  ;;  %v23_v21 = vld [vmem:[%s375_s1 + $0x30] sm:$0xff] }
   0x6   :  { %193 = vmatprep.subr.bf16.mxu0 %v62_v9  ;;  %v55_v20 = vpack.c.bf16 %v22_v17, %v21_v16  ;;  %v64_v22 = vpack.c.bf16 %v40_v19, %v39_v18  ;;  %v24_v23 = vld [vmem:[%s375_s1 + $0x38] sm:$0xff]  ;;  %v49_v24 = vld [vmem:[%s375_s1 + $0x100] sm:$0xff]  ;;  %v50_v25 = vld [vmem:[%s375_s1 + $0x108] sm:$0xff] }
   0x7   :  { %v41_v26 = vld [vmem:[%s375_s1 + $0xc0] sm:$0xff]  ;;  %v42_v27 = vld [vmem:[%s375_s1 + $0xc8] sm:$0xff]  ;;  %v69_v28 = vpack.c.bf16 %v50_v25, %v49_v24  ;;  %v56_v30 = vpack.c.bf16 %v24_v23, %v23_v21  ;;  %v51_v32 = vld [vmem:[%s375_s1 + $0x110] sm:$0xff] }
   0x8   :  { %v15_v29 = vld [vmem:[%s376_s0] sm:$0xff]  ;;  %v52_v33 = vld [vmem:[%s375_s1 + $0x118] sm:$0xff]  ;;  %v65_v34 = vpack.c.bf16 %v42_v27, %v41_v26  ;;  %v26_v36 = vld [vmem:[%s375_s1 + $0x48] sm:$0xff] }
   0x9   :  { %194 = vmatpush3.bf16.msra.mxu0 %v54_v14  ;;  %217 = vmatpush3.bf16.msra.mxu1 %v69_v28  ;;  %v187_v31 = vcombine.high %v15_v29, %v15_v29  ;;  %v25_v35 = vld [vmem:[%s375_s1 + $0x40] sm:$0xff]  ;;  %v70_v37 = vpack.c.bf16 %v52_v33, %v51_v32  ;;  %v43_v38 = vld [vmem:[%s375_s1 + $0xd0] sm:$0xff]  ;;  %v44_v39 = vld [vmem:[%s375_s1 + $0xd8] sm:$0xff]  ;;  %v186_v58 = vcombine.low %v15_v29, %v15_v29 }
   0xa   :  { %195 = vmatprep.subr.bf16.mxu0 %v63_v15  ;;  %218 = vmatprep.subr.bf16.mxu1 %v233_v3  ;;  %v228_v40 = vld [vmem:[%s376_s0 + $0x8] ss:$0 sps:$4 sm:$0xff]   ;;  %v57_v41 = vpack.c.bf16 %v26_v36, %v25_v35  ;;  %v66_v42 = vpack.c.bf16 %v44_v39, %v43_v38  ;;  %v27_v43 = vld [vmem:[%s375_s1 + $0x50] sm:$0xff]  ;;  %v28_v44 = vld [vmem:[%s375_s1 + $0x58] sm:$0xff] }
   0xb   :  { %124 = vmatprep.mubr.bf16.mxu0 %v187_v31  ;;  %v45_v45 = vld [vmem:[%s375_s1 + $0xe0] sm:$0xff]  ;;  %v46_v46 = vld [vmem:[%s375_s1 + $0xe8] sm:$0xff]  ;;  %v58_v47 = vpack.c.bf16 %v28_v44, %v27_v43  ;;  %v47_v51 = vld [vmem:[%s375_s1 + $0xf0] sm:$0xff] }
   0xc   :  { %v67_v48 = vpack.c.bf16 %v46_v46, %v45_v45  ;;  %v29_v49 = vld [vmem:[%s375_s1 + $0x60] sm:$0xff]  ;;  %v30_v50 = vld [vmem:[%s375_s1 + $0x68] sm:$0xff]  ;;  %v48_v52 = vld [vmem:[%s375_s1 + $0xf8] sm:$0xff] }
   0xd   :  { %196 = vmatpush3.bf16.msra.mxu0 %v55_v20  ;;  %219 = vmatpush3.bf16.msra.mxu1 %v70_v37  ;;  %v59_v53 = vpack.c.bf16 %v30_v50, %v29_v49  ;;  %v68_v54 = vpack.c.bf16 %v48_v52, %v47_v51  ;;  %v31_v55 = vld [vmem:[%s375_s1 + $0x70] sm:$0xff]  ;;  %v32_v56 = vld [vmem:[%s375_s1 + $0x78] sm:$0xff]  ;;  %v185_v1 = vld [vmem:[%s377_s2] ss:$0 sm:$0xff] }
   0xe   :  { %197 = vmatprep.subr.bf16.mxu0 %v64_v22  ;;  %v60_v57 = vpack.c.bf16 %v32_v56, %v31_v55 }
  0x10   :  { %221 = vmatmul.mubr.msk.bf16.vlgmr.msra.gmra.mrb[0].mxu1 %vm88_vm1, %v228_v40 }
  0x11   :  { %198 = vmatpush3.bf16.msra.mxu0 %v56_v30 }
  0x12   :  { %199 = vmatprep.subr.bf16.mxu0 %v65_v34 }
  0x15   :  { %200 = vmatpush3.bf16.msra.mxu0 %v57_v41 }
  0x16   :  { %201 = vmatprep.subr.bf16.mxu0 %v66_v42 }
  0x19   :  { %202 = vmatpush3.bf16.msra.mxu0 %v58_v47 }
  0x1a   :  { %203 = vmatprep.subr.bf16.mxu0 %v67_v48 }
  0x1d   :  { %204 = vmatpush3.bf16.msra.mxu0 %v59_v53 }
  0x1e   :  { %205 = vmatprep.subr.bf16.mxu0 %v68_v54 }
  0x21   :  { %206 = vmatpush3.bf16.msra.mxu0 %v60_v57 }
  0x24   :  { %125 = vmatmul.mubr.bf16.vlgmr.msra.gmra.mrb[0].mxu0 %v186_v58 }
  0xe3   :  { %v166_v59 = vpop.f32.mrb[0].mxu1 }
  0xe4   :  { %v222_v60 = vpop.f32.mrb[1].mxu1 }
  0xe5   :  { %v169_v61 = vpop.f32.mrb[2].mxu1 }
  0xe6   :  { %v223_v62 = vpop.f32.mrb[3].mxu1 }
  0xf7   :  { %v207_v63 = vpop.f32.mrb[0].mxu0 }
  0xf8   :  { %v208_v0 = vpop.f32.mrb[1].mxu0 }
  0xf9   :  { %v209_v2 = vadd.f32 %v208_v0, %v207_v63  ;;  %v210_v3 = vpop.f32.mrb[2].mxu0 }
  0xfa   :  { %v211_v4 = vpop.f32.mrb[3].mxu0 }
  0xfb   :  { %v127_v5 = vadd.f32 %v209_v2, %v185_v1 }
  0xfd   :  { %v167_v6 = vadd.f32 %v166_v59, %v127_v5 }
  0xff   :  { %v190_v7 = vmul.f32 -1.442695, %v167_v6 }
 0x101   :  { %229 = vpow2.f32 %v190_v7 }
 0x10b   :  { %v230_v8 = vpop.eup %229 }
 0x10c   :  { %v175_v9 = vadd.f32 1.0, %v230_v8 }
 0x10e   :  { %231 = vrcp.f32 %v175_v9 }
 0x118   :  { %v232_v10 = vpop.eup %231 }
 0x119   :  { %v178_v11 = vmul.f32 %v232_v10, %v167_v6 }
 0x11b   :  { %v179_v12 = vpack.c.bf16 %v178_v11, %v178_v11 }
 0x11d   :  { %180 = vst [vmem:[%s378_s3] sm:$0xf] %v179_v12 }

// kernel: vitaev2_vsa_forward.46
= control target key start
LH: loop header
LB: loop body
LE: loop exit
PB: predicated region body
PF: predicated region fallthrough
CT: control target
= control target key end

     0   :  { %v234_v3 = vmov 0.0   ;;  %vm235_vm0 = vmmov 0   ;;  %vm88_vm1 = vcmask 261120   ;;  %vm180_vm2 = vcmask 257024   ;;  %s376_s1 = inlined_call_operand.vmem [shape: f32[288,32], index: 1, kind: input, shape index: {}]   ;;  %s377_s0 = inlined_call_operand.vmem [shape: bf16[8,288], index: 0, kind: input, shape index: {}]   ;;  %s378_s2 = inlined_call_operand.vmem [shape: f32[1,32], index: 2, kind: input, shape index: {}]   ;;  %s379_s3 = inlined_call_operand.vmem [shape: bf16[8,32], index: 3, kind: output, shape index: {}]  }
   0x1   :  { %v33_v0 = vld [vmem:[%s376_s1 + $0x80] sm:$0xff]  ;;  %v34_v1 = vld [vmem:[%s376_s1 + $0x88] sm:$0xff]  ;;  %217 = vmatprep.subr.bf16.mxu1 %v234_v3  ;;  %221 = vmatprep.mubr.msk.bf16.mxu1 %vm235_vm0, %v234_v3  ;;  %v35_v6 = vld [vmem:[%s376_s1 + $0x90] sm:$0xff] }
   0x2   :  { %v17_v2 = vld [vmem:[%s376_s1] sm:$0xff]  ;;  %v61_v4 = vpack.c.bf16 %v34_v1, %v33_v0  ;;  %v18_v5 = vld [vmem:[%s376_s1 + $0x8] sm:$0xff]  ;;  %v36_v7 = vld [vmem:[%s376_s1 + $0x98] sm:$0xff] }
   0x3   :  { %v53_v8 = vpack.c.bf16 %v18_v5, %v17_v2  ;;  %v62_v9 = vpack.c.bf16 %v36_v7, %v35_v6  ;;  %v19_v10 = vld [vmem:[%s376_s1 + $0x10] sm:$0xff]  ;;  %v20_v11 = vld [vmem:[%s376_s1 + $0x18] sm:$0xff]  ;;  %v37_v12 = vld [vmem:[%s376_s1 + $0xa0] sm:$0xff] }
   0x4   :  { %192 = vmatprep.subr.bf16.mxu0 %v61_v4  ;;  %v38_v13 = vld [vmem:[%s376_s1 + $0xa8] sm:$0xff]  ;;  %v54_v14 = vpack.c.bf16 %v20_v11, %v19_v10  ;;  %v21_v16 = vld [vmem:[%s376_s1 + $0x20] sm:$0xff]  ;;  %v39_v18 = vld [vmem:[%s376_s1 + $0xb0] sm:$0xff] }
   0x5   :  { %193 = vmatpush3.bf16.msra.mxu0 %v53_v8  ;;  %v63_v15 = vpack.c.bf16 %v38_v13, %v37_v12  ;;  %v22_v17 = vld [vmem:[%s376_s1 + $0x28] sm:$0xff]  ;;  %v40_v19 = vld [vmem:[%s376_s1 + $0xb8] sm:$0xff]  ;;  %v23_v21 = vld [vmem:[%s376_s1 + $0x30] sm:$0xff] }
   0x6   :  { %194 = vmatprep.subr.bf16.mxu0 %v62_v9  ;;  %v55_v20 = vpack.c.bf16 %v22_v17, %v21_v16  ;;  %v64_v22 = vpack.c.bf16 %v40_v19, %v39_v18  ;;  %v24_v23 = vld [vmem:[%s376_s1 + $0x38] sm:$0xff]  ;;  %v49_v24 = vld [vmem:[%s376_s1 + $0x100] sm:$0xff]  ;;  %v50_v25 = vld [vmem:[%s376_s1 + $0x108] sm:$0xff] }
   0x7   :  { %v41_v26 = vld [vmem:[%s376_s1 + $0xc0] sm:$0xff]  ;;  %v42_v27 = vld [vmem:[%s376_s1 + $0xc8] sm:$0xff]  ;;  %v69_v28 = vpack.c.bf16 %v50_v25, %v49_v24  ;;  %v56_v30 = vpack.c.bf16 %v24_v23, %v23_v21  ;;  %v51_v32 = vld [vmem:[%s376_s1 + $0x110] sm:$0xff] }
   0x8   :  { %v15_v29 = vld [vmem:[%s377_s0] sm:$0xff]  ;;  %v52_v33 = vld [vmem:[%s376_s1 + $0x118] sm:$0xff]  ;;  %v65_v34 = vpack.c.bf16 %v42_v27, %v41_v26  ;;  %v26_v36 = vld [vmem:[%s376_s1 + $0x48] sm:$0xff] }
   0x9   :  { %195 = vmatpush3.bf16.msra.mxu0 %v54_v14  ;;  %218 = vmatpush3.bf16.msra.mxu1 %v69_v28  ;;  %v188_v31 = vcombine.high %v15_v29, %v15_v29  ;;  %v25_v35 = vld [vmem:[%s376_s1 + $0x40] sm:$0xff]  ;;  %v70_v37 = vpack.c.bf16 %v52_v33, %v51_v32  ;;  %v43_v38 = vld [vmem:[%s376_s1 + $0xd0] sm:$0xff]  ;;  %v44_v39 = vld [vmem:[%s376_s1 + $0xd8] sm:$0xff]  ;;  %v187_v58 = vcombine.low %v15_v29, %v15_v29 }
   0xa   :  { %196 = vmatprep.subr.bf16.mxu0 %v63_v15  ;;  %219 = vmatprep.subr.bf16.mxu1 %v234_v3  ;;  %v229_v40 = vld [vmem:[%s377_s0 + $0x8] ss:$0 sps:$4 sm:$0xff]   ;;  %v57_v41 = vpack.c.bf16 %v26_v36, %v25_v35  ;;  %v66_v42 = vpack.c.bf16 %v44_v39, %v43_v38  ;;  %v27_v43 = vld [vmem:[%s376_s1 + $0x50] sm:$0xff]  ;;  %v28_v44 = vld [vmem:[%s376_s1 + $0x58] sm:$0xff] }
   0xb   :  { %124 = vmatprep.mubr.bf16.mxu0 %v188_v31  ;;  %v45_v45 = vld [vmem:[%s376_s1 + $0xe0] sm:$0xff]  ;;  %v46_v46 = vld [vmem:[%s376_s1 + $0xe8] sm:$0xff]  ;;  %v58_v47 = vpack.c.bf16 %v28_v44, %v27_v43  ;;  %v47_v51 = vld [vmem:[%s376_s1 + $0xf0] sm:$0xff] }
   0xc   :  { %v67_v48 = vpack.c.bf16 %v46_v46, %v45_v45  ;;  %v29_v49 = vld [vmem:[%s376_s1 + $0x60] sm:$0xff]  ;;  %v30_v50 = vld [vmem:[%s376_s1 + $0x68] sm:$0xff]  ;;  %v48_v52 = vld [vmem:[%s376_s1 + $0xf8] sm:$0xff] }
   0xd   :  { %197 = vmatpush3.bf16.msra.mxu0 %v55_v20  ;;  %220 = vmatpush3.bf16.msra.mxu1 %v70_v37  ;;  %v59_v53 = vpack.c.bf16 %v30_v50, %v29_v49  ;;  %v68_v54 = vpack.c.bf16 %v48_v52, %v47_v51  ;;  %v31_v55 = vld [vmem:[%s376_s1 + $0x70] sm:$0xff]  ;;  %v32_v56 = vld [vmem:[%s376_s1 + $0x78] sm:$0xff]  ;;  %v186_v1 = vld [vmem:[%s378_s2] ss:$0 sm:$0xff] }
   0xe   :  { %198 = vmatprep.subr.bf16.mxu0 %v64_v22  ;;  %v60_v57 = vpack.c.bf16 %v32_v56, %v31_v55 }
  0x10   :  { %222 = vmatmul.mubr.msk.bf16.vlgmr.msra.gmra.mrb[0].mxu1 %vm88_vm1, %v229_v40 }
  0x11   :  { %199 = vmatpush3.bf16.msra.mxu0 %v56_v30 }
  0x12   :  { %200 = vmatprep.subr.bf16.mxu0 %v65_v34 }
  0x15   :  { %201 = vmatpush3.bf16.msra.mxu0 %v57_v41 }
  0x16   :  { %202 = vmatprep.subr.bf16.mxu0 %v66_v42 }
  0x19   :  { %203 = vmatpush3.bf16.msra.mxu0 %v58_v47 }
  0x1a   :  { %204 = vmatprep.subr.bf16.mxu0 %v67_v48 }
  0x1d   :  { %205 = vmatpush3.bf16.msra.mxu0 %v59_v53 }
  0x1e   :  { %206 = vmatprep.subr.bf16.mxu0 %v68_v54 }
  0x21   :  { %207 = vmatpush3.bf16.msra.mxu0 %v60_v57 }
  0x24   :  { %125 = vmatmul.mubr.bf16.vlgmr.msra.gmra.mrb[0].mxu0 %v187_v58 }
  0xe3   :  { %v166_v59 = vpop.f32.mrb[0].mxu1 }
  0xe4   :  { %v223_v60 = vpop.f32.mrb[1].mxu1 }
  0xe5   :  { %v169_v61 = vpop.f32.mrb[2].mxu1 }
  0xe6   :  { %v224_v62 = vpop.f32.mrb[3].mxu1 }
  0xf7   :  { %v208_v63 = vpop.f32.mrb[0].mxu0 }
  0xf8   :  { %v209_v0 = vpop.f32.mrb[1].mxu0 }
  0xf9   :  { %v210_v2 = vadd.f32 %v209_v0, %v208_v63  ;;  %v211_v3 = vpop.f32.mrb[2].mxu0 }
  0xfa   :  { %v212_v4 = vpop.f32.mrb[3].mxu0 }
  0xfb   :  { %v127_v5 = vadd.f32 %v210_v2, %v186_v1 }
  0xfd   :  { %v167_v6 = vadd.f32 %v166_v59, %v127_v5 }
  0xff   :  { %v191_v7 = vmul.f32 -1.442695, %v167_v6 }
 0x101   :  { %230 = vpow2.f32 %v191_v7 }
 0x10b   :  { %v231_v8 = vpop.eup %230 }
 0x10c   :  { %v175_v9 = vadd.f32 1.0, %v231_v8 }
 0x10e   :  { %232 = vrcp.f32 %v175_v9 }
 0x118   :  { %v233_v10 = vpop.eup %232 }
 0x119   :  { %v178_v11 = vmul.f32 %v233_v10, %v167_v6 }
 0x11b   :  { %v179_v12 = vpack.c.bf16 %v178_v11, %v178_v11 }
 0x11d   :  { %181 = vst.msk [vmem:[%s379_s3] sm:$0xf] %vm180_vm2, %v179_v12 }

// kernel: vitaev2_vsa_forward.45
= control target key start
LH: loop header
LB: loop body
LE: loop exit
PB: predicated region body
PF: predicated region fallthrough
CT: control target
= control target key end

     0   :  { %vm633_vm0 = vmmov 0   ;;  %vm483_vm1 = vcmask 257024   ;;  %s1125_s1 = inlined_call_operand.vmem [shape: f32[1152,32], index: 1, kind: input, shape index: {}]   ;;  %s1126_s0 = inlined_call_operand.vmem [shape: bf16[8,1152], index: 0, kind: input, shape index: {}]   ;;  %s1127_s2 = inlined_call_operand.vmem [shape: f32[1,32], index: 2, kind: input, shape index: {}]   ;;  %s1128_s3 = inlined_call_operand.vmem [shape: bf16[8,32], index: 3, kind: output, shape index: {}]  }
   0x1   :  { %v36_v0 = vld [vmem:[%s1125_s1 + $0x80] sm:$0xff]  ;;  %v37_v1 = vld [vmem:[%s1125_s1 + $0x88] sm:$0xff]  ;;  %v38_v11 = vld [vmem:[%s1125_s1 + $0x90] sm:$0xff] }
   0x2   :  { %v20_v2 = vld [vmem:[%s1125_s1] sm:$0xff]  ;;  %v172_v3 = vpack.c.bf16 %v37_v1, %v36_v0  ;;  %v21_v4 = vld [vmem:[%s1125_s1 + $0x8] sm:$0xff]  ;;  %v39_v13 = vld [vmem:[%s1125_s1 + $0x98] sm:$0xff] }
   0x3   :  { %v68_v5 = vld [vmem:[%s1125_s1 + $0x180] sm:$0xff]  ;;  %v69_v6 = vld [vmem:[%s1125_s1 + $0x188] sm:$0xff]  ;;  %v164_v7 = vpack.c.bf16 %v21_v4, %v20_v2  ;;  %v22_v14 = vld [vmem:[%s1125_s1 + $0x10] sm:$0xff]  ;;  %v173_v16 = vpack.c.bf16 %v39_v13, %v38_v11 }
   0x4   :  { %v188_v8 = vpack.c.bf16 %v69_v6, %v68_v5  ;;  %v52_v9 = vld [vmem:[%s1125_s1 + $0x100] sm:$0xff]  ;;  %v53_v10 = vld [vmem:[%s1125_s1 + $0x108] sm:$0xff]  ;;  %500 = vmatprep.subr.bf16.mxu0 %v172_v3  ;;  %v23_v15 = vld [vmem:[%s1125_s1 + $0x18] sm:$0xff] }
   0x5   :  { %v180_v12 = vpack.c.bf16 %v53_v10, %v52_v9  ;;  %501 = vmatpush3.bf16.msra.mxu0 %v164_v7  ;;  %v165_v17 = vpack.c.bf16 %v23_v15, %v22_v14  ;;  %v70_v18 = vld [vmem:[%s1125_s1 + $0x190] sm:$0xff]  ;;  %v71_v19 = vld [vmem:[%s1125_s1 + $0x198] sm:$0xff]  ;;  %v40_v23 = vld [vmem:[%s1125_s1 + $0xa0] sm:$0xff] }
   0x6   :  { %522 = vmatprep.subr.bf16.mxu1 %v188_v8  ;;  %v54_v20 = vld [vmem:[%s1125_s1 + $0x110] sm:$0xff]  ;;  %v189_v21 = vpack.c.bf16 %v71_v19, %v70_v18  ;;  %v55_v22 = vld [vmem:[%s1125_s1 + $0x118] sm:$0xff]  ;;  %v41_v24 = vld [vmem:[%s1125_s1 + $0xa8] sm:$0xff]  ;;  %502 = vmatprep.subr.bf16.mxu0 %v173_v16 }
   0x7   :  { %523 = vmatpush3.bf16.msra.mxu1 %v180_v12  ;;  %v181_v25 = vpack.c.bf16 %v55_v22, %v54_v20  ;;  %v174_v26 = vpack.c.bf16 %v41_v24, %v40_v23  ;;  %v24_v27 = vld [vmem:[%s1125_s1 + $0x20] sm:$0xff]  ;;  %v25_v28 = vld [vmem:[%s1125_s1 + $0x28] sm:$0xff]  ;;  %v42_v35 = vld [vmem:[%s1125_s1 + $0xb0] sm:$0xff] }
   0x8   :  { %v72_v29 = vld [vmem:[%s1125_s1 + $0x1a0] sm:$0xff]  ;;  %524 = vmatprep.subr.bf16.mxu1 %v189_v21  ;;  %v73_v30 = vld [vmem:[%s1125_s1 + $0x1a8] sm:$0xff]  ;;  %v166_v33 = vpack.c.bf16 %v25_v28, %v24_v27  ;;  %v43_v36 = vld [vmem:[%s1125_s1 + $0xb8] sm:$0xff] }
   0x9   :  { %v56_v31 = vld [vmem:[%s1125_s1 + $0x120] sm:$0xff]  ;;  %v57_v32 = vld [vmem:[%s1125_s1 + $0x128] sm:$0xff]  ;;  %503 = vmatpush3.bf16.msra.mxu0 %v165_v17  ;;  %v190_v34 = vpack.c.bf16 %v73_v30, %v72_v29  ;;  %v26_v37 = vld [vmem:[%s1125_s1 + $0x30] sm:$0xff]  ;;  %v175_v39 = vpack.c.bf16 %v43_v36, %v42_v35 }
   0xa   :  { %504 = vmatprep.subr.bf16.mxu0 %v174_v26  ;;  %v182_v38 = vpack.c.bf16 %v57_v32, %v56_v31  ;;  %v27_v40 = vld [vmem:[%s1125_s1 + $0x38] sm:$0xff]  ;;  %v74_v41 = vld [vmem:[%s1125_s1 + $0x1b0] sm:$0xff]  ;;  %v44_v46 = vld [vmem:[%s1125_s1 + $0xc0] sm:$0xff] }
   0xb   :  { %525 = vmatpush3.bf16.msra.mxu1 %v181_v25  ;;  %v75_v42 = vld [vmem:[%s1125_s1 + $0x1b8] sm:$0xff]  ;;  %v58_v44 = vld [vmem:[%s1125_s1 + $0x130] sm:$0xff]  ;;  %v45_v47 = vld [vmem:[%s1125_s1 + $0xc8] sm:$0xff]  ;;  %v167_v48 = vpack.c.bf16 %v27_v40, %v26_v37 }
   0xc   :  { %526 = vmatprep.subr.bf16.mxu1 %v190_v34  ;;  %v191_v43 = vpack.c.bf16 %v75_v42, %v74_v41  ;;  %v59_v45 = vld [vmem:[%s1125_s1 + $0x138] sm:$0xff]  ;;  %v76_v49 = vld [vmem:[%s1125_s1 + $0x1c0] sm:$0xff]  ;;  %v77_v50 = vld [vmem:[%s1125_s1 + $0x1c8] sm:$0xff]  ;;  %v176_v52 = vpack.c.bf16 %v45_v47, %v44_v46 }
   0xd   :  { %505 = vmatpush3.bf16.msra.mxu0 %v166_v33  ;;  %v183_v51 = vpack.c.bf16 %v59_v45, %v58_v44  ;;  %v28_v53 = vld [vmem:[%s1125_s1 + $0x40] sm:$0xff]  ;;  %v29_v54 = vld [vmem:[%s1125_s1 + $0x48] sm:$0xff]  ;;  %v192_v56 = vpack.c.bf16 %v77_v50, %v76_v49  ;;  %v46_v58 = vld [vmem:[%s1125_s1 + $0xd0] sm:$0xff] }
   0xe   :  { %506 = vmatprep.subr.bf16.mxu0 %v175_v39  ;;  %v60_v55 = vld [vmem:[%s1125_s1 + $0x140] sm:$0xff]  ;;  %v61_v57 = vld [vmem:[%s1125_s1 + $0x148] sm:$0xff]  ;;  %v47_v59 = vld [vmem:[%s1125_s1 + $0xd8] sm:$0xff]  ;;  %v168_v62 = vpack.c.bf16 %v29_v54, %v28_v53 }
   0xf   :  { %527 = vmatpush3.bf16.msra.mxu1 %v182_v38  ;;  %v78_v60 = vld [vmem:[%s1125_s1 + $0x1d0] sm:$0xff]  ;;  %v79_v61 = vld [vmem:[%s1125_s1 + $0x1d8] sm:$0xff]  ;;  %v184_v63 = vpack.c.bf16 %v61_v57, %v60_v55  ;;  %v177_v0 = vpack.c.bf16 %v47_v59, %v46_v58  ;;  %v48_v6 = vld [vmem:[%s1125_s1 + $0xe0] sm:$0xff] }
  0x10   :  { %528 = vmatprep.subr.bf16.mxu1 %v191_v43  ;;  %v30_v1 = vld [vmem:[%s1125_s1 + $0x50] sm:$0xff]  ;;  %v31_v2 = vld [vmem:[%s1125_s1 + $0x58] sm:$0xff]  ;;  %v193_v4 = vpack.c.bf16 %v79_v61, %v78_v60  ;;  %v49_v7 = vld [vmem:[%s1125_s1 + $0xe8] sm:$0xff] }
  0x11   :  { %507 = vmatpush3.bf16.msra.mxu0 %v167_v48  ;;  %v62_v3 = vld [vmem:[%s1125_s1 + $0x150] sm:$0xff]  ;;  %v63_v5 = vld [vmem:[%s1125_s1 + $0x158] sm:$0xff]  ;;  %v80_v8 = vld [vmem:[%s1125_s1 + $0x1e0] sm:$0xff]  ;;  %v169_v10 = vpack.c.bf16 %v31_v2, %v30_v1  ;;  %v178_v14 = vpack.c.bf16 %v49_v7, %v48_v6 }
  0x12   :  { %508 = vmatprep.subr.bf16.mxu0 %v176_v52  ;;  %v81_v9 = vld [vmem:[%s1125_s1 + $0x1e8] sm:$0xff]  ;;  %v32_v11 = vld [vmem:[%s1125_s1 + $0x60] sm:$0xff]  ;;  %v185_v13 = vpack.c.bf16 %v63_v5, %v62_v3  ;;  %v50_v20 = vld [vmem:[%s1125_s1 + $0xf0] sm:$0xff] }
  0x13   :  { %529 = vmatpush3.bf16.msra.mxu1 %v183_v51  ;;  %v816_v12 = vld [vmem:[%s1126_s0] sm:$0xff]  ;;  %v33_v15 = vld [vmem:[%s1125_s1 + $0x68] sm:$0xff]  ;;  %v194_v19 = vpack.c.bf16 %v81_v9, %v80_v8  ;;  %v51_v21 = vld [vmem:[%s1125_s1 + $0xf8] sm:$0xff] }
  0x14   :  { %530 = vmatprep.subr.bf16.mxu1 %v192_v56  ;;  %v64_v16 = vld [vmem:[%s1125_s1 + $0x160] sm:$0xff]  ;;  %v65_v17 = vld [vmem:[%s1125_s1 + $0x168] sm:$0xff]  ;;  %v491_v18 = vcombine.high %v816_v12, %v816_v12  ;;  %v82_v23 = vld [vmem:[%s1125_s1 + $0x1f0] sm:$0xff]  ;;  %v170_v26 = vpack.c.bf16 %v33_v15, %v32_v11  ;;  %v179_v28 = vpack.c.bf16 %v51_v21, %v50_v20  ;;  %v490_v48 = vcombine.low %v816_v12, %v816_v12 }
  0x15   :  { %509 = vmatpush3.bf16.msra.mxu0 %v168_v62  ;;  %v16_v22 = vld [vmem:[%s1126_s0 + $0x8] sm:$0xff]  ;;  %v83_v24 = vld [vmem:[%s1125_s1 + $0x1f8] sm:$0xff]  ;;  %v186_v27 = vpack.c.bf16 %v65_v17, %v64_v16  ;;  %v34_v29 = vld [vmem:[%s1125_s1 + $0x70] sm:$0xff] }
  0x16   :  { %510 = vmatprep.subr.bf16.mxu0 %v177_v0  ;;  %307 = vmatprep.mubr.bf16.mxu0 %v491_v18  ;;  %v493_v25 = vcombine.high %v16_v22, %v16_v22  ;;  %v35_v30 = vld [vmem:[%s1125_s1 + $0x78] sm:$0xff]  ;;  %v66_v31 = vld [vmem:[%s1125_s1 + $0x170] sm:$0xff]  ;;  %v195_v32 = vpack.c.bf16 %v83_v24, %v82_v23  ;;  %v100_v34 = vld [vmem:[%s1125_s1 + $0x280] sm:$0xff]  ;;  %v492_v51 = vcombine.low %v16_v22, %v16_v22 }
  0x17   :  { %531 = vmatpush3.bf16.msra.mxu1 %v184_v63  ;;  %v67_v33 = vld [vmem:[%s1125_s1 + $0x178] sm:$0xff]  ;;  %v101_v35 = vld [vmem:[%s1125_s1 + $0x288] sm:$0xff]  ;;  %v132_v36 = vld [vmem:[%s1125_s1 + $0x380] sm:$0xff]  ;;  %v171_v38 = vpack.c.bf16 %v35_v30, %v34_v29 }
  0x18   :  { %532 = vmatprep.subr.bf16.mxu1 %v193_v4  ;;  %347 = vmatprep.mubr.bf16.mxu1 %v493_v25  ;;  %v133_v37 = vld [vmem:[%s1125_s1 + $0x388] sm:$0xff]  ;;  %v187_v39 = vpack.c.bf16 %v67_v33, %v66_v31  ;;  %v204_v40 = vpack.c.bf16 %v101_v35, %v100_v34  ;;  %v84_v41 = vld [vmem:[%s1125_s1 + $0x200] sm:$0xff]  ;;  %v102_v46 = vld [vmem:[%s1125_s1 + $0x290] sm:$0xff] }
  0x19   :  { %511 = vmatpush3.bf16.msra.mxu0 %v169_v10  ;;  %v85_v42 = vld [vmem:[%s1125_s1 + $0x208] sm:$0xff]  ;;  %v116_v43 = vld [vmem:[%s1125_s1 + $0x300] sm:$0xff]  ;;  %v220_v44 = vpack.c.bf16 %v133_v37, %v132_v36  ;;  %v103_v47 = vld [vmem:[%s1125_s1 + $0x298] sm:$0xff] }
  0x1a   :  { %512 = vmatprep.subr.bf16.mxu0 %v178_v14  ;;  %v117_v45 = vld [vmem:[%s1125_s1 + $0x308] sm:$0xff]  ;;  %v134_v49 = vld [vmem:[%s1125_s1 + $0x390] sm:$0xff]  ;;  %v135_v50 = vld [vmem:[%s1125_s1 + $0x398] sm:$0xff]  ;;  %v196_v52 = vpack.c.bf16 %v85_v42, %v84_v41  ;;  %v205_v54 = vpack.c.bf16 %v103_v47, %v102_v46 }
  0x1b   :  { %533 = vmatpush3.bf16.msra.mxu1 %v185_v13  ;;  %v212_v53 = vpack.c.bf16 %v117_v45, %v116_v43  ;;  %v86_v55 = vld [vmem:[%s1125_s1 + $0x210] sm:$0xff]  ;;  %v87_v56 = vld [vmem:[%s1125_s1 + $0x218] sm:$0xff]  ;;  %v221_v58 = vpack.c.bf16 %v135_v50, %v134_v49  ;;  %v104_v60 = vld [vmem:[%s1125_s1 + $0x2a0] sm:$0xff] }
  0x1c   :  { %534 = vmatprep.subr.bf16.mxu1 %v194_v19  ;;  %v118_v57 = vld [vmem:[%s1125_s1 + $0x310] sm:$0xff]  ;;  %v119_v59 = vld [vmem:[%s1125_s1 + $0x318] sm:$0xff]  ;;  %v105_v61 = vld [vmem:[%s1125_s1 + $0x2a8] sm:$0xff]  ;;  %v197_v0 = vpack.c.bf16 %v87_v56, %v86_v55 }
  0x1d   :  { %513 = vmatpush3.bf16.msra.mxu0 %v170_v26  ;;  %v136_v62 = vld [vmem:[%s1125_s1 + $0x3a0] sm:$0xff]  ;;  %v137_v63 = vld [vmem:[%s1125_s1 + $0x3a8] sm:$0xff]  ;;  %v213_v1 = vpack.c.bf16 %v119_v59, %v118_v57  ;;  %v206_v2 = vpack.c.bf16 %v105_v61, %v104_v60  ;;  %v106_v8 = vld [vmem:[%s1125_s1 + $0x2b0] sm:$0xff] }
  0x1e   :  { %514 = vmatprep.subr.bf16.mxu0 %v179_v28  ;;  %v88_v3 = vld [vmem:[%s1125_s1 + $0x220] sm:$0xff]  ;;  %v89_v4 = vld [vmem:[%s1125_s1 + $0x228] sm:$0xff]  ;;  %v222_v6 = vpack.c.bf16 %v137_v63, %v136_v62  ;;  %v107_v9 = vld [vmem:[%s1125_s1 + $0x2b8] sm:$0xff] }
  0x1f   :  { %535 = vmatpush3.bf16.msra.mxu1 %v186_v27  ;;  %v120_v5 = vld [vmem:[%s1125_s1 + $0x320] sm:$0xff]  ;;  %v121_v7 = vld [vmem:[%s1125_s1 + $0x328] sm:$0xff]  ;;  %v138_v10 = vld [vmem:[%s1125_s1 + $0x3b0] sm:$0xff]  ;;  %v198_v12 = vpack.c.bf16 %v89_v4, %v88_v3  ;;  %v207_v15 = vpack.c.bf16 %v107_v9, %v106_v8 }
  0x20   :  { %536 = vmatprep.subr.bf16.mxu1 %v195_v32  ;;  %v139_v11 = vld [vmem:[%s1125_s1 + $0x3b8] sm:$0xff]  ;;  %v90_v13 = vld [vmem:[%s1125_s1 + $0x230] sm:$0xff]  ;;  %v214_v14 = vpack.c.bf16 %v121_v7, %v120_v5  ;;  %v108_v20 = vld [vmem:[%s1125_s1 + $0x2c0] sm:$0xff] }
  0x21   :  { %515 = vmatpush3.bf16.msra.mxu0 %v171_v38  ;;  %v91_v16 = vld [vmem:[%s1125_s1 + $0x238] sm:$0xff]  ;;  %v122_v17 = vld [vmem:[%s1125_s1 + $0x330] sm:$0xff]  ;;  %v223_v19 = vpack.c.bf16 %v139_v11, %v138_v10  ;;  %v109_v21 = vld [vmem:[%s1125_s1 + $0x2c8] sm:$0xff] }
  0x22   :  { %544 = vmatprep.subr.bf16.mxu0 %v204_v40  ;;  %v123_v18 = vld [vmem:[%s1125_s1 + $0x338] sm:$0xff]  ;;  %v963_v22 = vld [vmem:[%s1126_s0 + $0x10] sm:$0xff]  ;;  %v140_v23 = vld [vmem:[%s1125_s1 + $0x3c0] sm:$0xff]  ;;  %v199_v27 = vpack.c.bf16 %v91_v16, %v90_v13  ;;  %v208_v30 = vpack.c.bf16 %v109_v21, %v108_v20 }
  0x23   :  { %537 = vmatpush3.bf16.msra.mxu1 %v187_v39  ;;  %v141_v24 = vld [vmem:[%s1125_s1 + $0x3c8] sm:$0xff]  ;;  %v495_v25 = vcombine.high %v963_v22, %v963_v22  ;;  %v976_v26 = vld [vmem:[%s1126_s0 + $0x18] sm:$0xff]  ;;  %v215_v29 = vpack.c.bf16 %v123_v18, %v122_v17  ;;  %v92_v31 = vld [vmem:[%s1125_s1 + $0x240] sm:$0xff] }
  0x24   :  { %566 = vmatprep.subr.bf16.mxu1 %v220_v44  ;;  %308 = vmatmul.mubr.bf16.vlgmr.msra.gmra.mrb[0].mxu0 %v490_v48  ;;  %v497_v28 = vcombine.high %v976_v26, %v976_v26  ;;  %v93_v32 = vld [vmem:[%s1125_s1 + $0x248] sm:$0xff]  ;;  %v124_v33 = vld [vmem:[%s1125_s1 + $0x340] sm:$0xff]  ;;  %v224_v34 = vpack.c.bf16 %v141_v24, %v140_v23  ;;  %v110_v36 = vld [vmem:[%s1125_s1 + $0x2d0] sm:$0xff]  ;;  %v496_v13 = vcombine.low %v976_v26, %v976_v26 }
  0x25   :  { %545 = vmatpush3.bf16.msra.mxu0 %v196_v52  ;;  %v125_v35 = vld [vmem:[%s1125_s1 + $0x348] sm:$0xff]  ;;  %v111_v37 = vld [vmem:[%s1125_s1 + $0x2d8] sm:$0xff]  ;;  %387 = vmatprep.mubr.bf16.mxu0 %v495_v25  ;;  %v142_v38 = vld [vmem:[%s1125_s1 + $0x3d0] sm:$0xff]  ;;  %v200_v40 = vpack.c.bf16 %v93_v32, %v92_v31 }
  0x26   :  { %348 = vmatmul.mubr.bf16.vlgmr.msra.gmra.mrb[0].mxu1 %v492_v51  ;;  %546 = vmatprep.subr.bf16.mxu0 %v205_v54  ;;  %v143_v39 = vld [vmem:[%s1125_s1 + $0x3d8] sm:$0xff]  ;;  %v94_v41 = vld [vmem:[%s1125_s1 + $0x250] sm:$0xff]  ;;  %v216_v42 = vpack.c.bf16 %v125_v35, %v124_v33  ;;  %v209_v43 = vpack.c.bf16 %v111_v37, %v110_v36  ;;  %v112_v48 = vld [vmem:[%s1125_s1 + $0x2e0] sm:$0xff] }
  0x27   :  { %567 = vmatpush3.bf16.msra.mxu1 %v212_v53  ;;  %427 = vmatprep.mubr.bf16.mxu1 %v497_v28  ;;  %v95_v44 = vld [vmem:[%s1125_s1 + $0x258] sm:$0xff]  ;;  %v126_v45 = vld [vmem:[%s1125_s1 + $0x350] sm:$0xff]  ;;  %v225_v46 = vpack.c.bf16 %v143_v39, %v142_v38  ;;  %v113_v49 = vld [vmem:[%s1125_s1 + $0x2e8] sm:$0xff] }
  0x28   :  { %568 = vmatprep.subr.bf16.mxu1 %v221_v58  ;;  %v127_v47 = vld [vmem:[%s1125_s1 + $0x358] sm:$0xff]  ;;  %v144_v50 = vld [vmem:[%s1125_s1 + $0x3e0] sm:$0xff]  ;;  %v145_v51 = vld [vmem:[%s1125_s1 + $0x3e8] sm:$0xff]  ;;  %v201_v52 = vpack.c.bf16 %v95_v44, %v94_v41  ;;  %v210_v54 = vpack.c.bf16 %v113_v49, %v112_v48 }
  0x29   :  { %547 = vmatpush3.bf16.msra.mxu0 %v197_v0  ;;  %v217_v53 = vpack.c.bf16 %v127_v47, %v126_v45  ;;  %v96_v55 = vld [vmem:[%s1125_s1 + $0x260] sm:$0xff]  ;;  %v97_v56 = vld [vmem:[%s1125_s1 + $0x268] sm:$0xff]  ;;  %v226_v58 = vpack.c.bf16 %v145_v51, %v144_v50  ;;  %v114_v60 = vld [vmem:[%s1125_s1 + $0x2f0] sm:$0xff] }
  0x2a   :  { %548 = vmatprep.subr.bf16.mxu0 %v206_v2  ;;  %v128_v57 = vld [vmem:[%s1125_s1 + $0x360] sm:$0xff]  ;;  %v129_v59 = vld [vmem:[%s1125_s1 + $0x368] sm:$0xff]  ;;  %v115_v61 = vld [vmem:[%s1125_s1 + $0x2f8] sm:$0xff]  ;;  %v202_v0 = vpack.c.bf16 %v97_v56, %v96_v55 }
  0x2b   :  { %569 = vmatpush3.bf16.msra.mxu1 %v213_v1  ;;  %v146_v62 = vld [vmem:[%s1125_s1 + $0x3f0] sm:$0xff]  ;;  %v147_v63 = vld [vmem:[%s1125_s1 + $0x3f8] sm:$0xff]  ;;  %v218_v1 = vpack.c.bf16 %v129_v59, %v128_v57  ;;  %v211_v2 = vpack.c.bf16 %v115_v61, %v114_v60  ;;  %v148_v10 = vld [vmem:[%s1125_s1 + $0x400] sm:$0xff] }
  0x2c   :  { %570 = vmatprep.subr.bf16.mxu1 %v222_v6  ;;  %v98_v3 = vld [vmem:[%s1125_s1 + $0x270] sm:$0xff]  ;;  %v99_v4 = vld [vmem:[%s1125_s1 + $0x278] sm:$0xff]  ;;  %v227_v5 = vpack.c.bf16 %v147_v63, %v146_v62  ;;  %v149_v11 = vld [vmem:[%s1125_s1 + $0x408] sm:$0xff] }
  0x2d   :  { %549 = vmatpush3.bf16.msra.mxu0 %v198_v12  ;;  %v130_v6 = vld [vmem:[%s1125_s1 + $0x370] sm:$0xff]  ;;  %v131_v7 = vld [vmem:[%s1125_s1 + $0x378] sm:$0xff]  ;;  %v203_v8 = vpack.c.bf16 %v99_v4, %v98_v3  ;;  %v494_v12 = vcombine.low %v963_v22, %v963_v22  ;;  %v153_v20 = vld [vmem:[%s1125_s1 + $0x428] sm:$0xff] }
  0x2e   :  { %550 = vmatprep.subr.bf16.mxu0 %v207_v15  ;;  %v219_v9 = vpack.c.bf16 %v131_v7, %v130_v6  ;;  %v632_v15 = vmov 0.0   ;;  %v150_v16 = vld [vmem:[%s1125_s1 + $0x410] sm:$0xff]  ;;  %v151_v17 = vld [vmem:[%s1125_s1 + $0x418] sm:$0xff]  ;;  %v156_v25 = vld [vmem:[%s1125_s1 + $0x440] sm:$0xff] }
  0x2f   :  { %571 = vmatpush3.bf16.msra.mxu1 %v214_v14  ;;  %v228_v14 = vpack.c.bf16 %v149_v11, %v148_v10  ;;  %v229_v18 = vpack.c.bf16 %v151_v17, %v150_v16  ;;  %v154_v22 = vld [vmem:[%s1125_s1 + $0x430] sm:$0xff]  ;;  %v155_v23 = vld [vmem:[%s1125_s1 + $0x438] sm:$0xff]  ;;  %v157_v26 = vld [vmem:[%s1125_s1 + $0x448] sm:$0xff] }
  0x30   :  { %572 = vmatprep.subr.bf16.mxu1 %v223_v19  ;;  %v152_v19 = vld [vmem:[%s1125_s1 + $0x420] sm:$0xff]  ;;  %v231_v24 = vpack.c.bf16 %v155_v23, %v154_v22  ;;  %v158_v28 = vld [vmem:[%s1125_s1 + $0x450] sm:$0xff]  ;;  %v161_v32 = vld [vmem:[%s1125_s1 + $0x468] sm:$0xff] }
  0x31   :  { %551 = vmatpush3.bf16.msra.mxu0 %v199_v27  ;;  %v230_v21 = vpack.c.bf16 %v153_v20, %v152_v19  ;;  %v232_v27 = vpack.c.bf16 %v157_v26, %v156_v25  ;;  %v160_v31 = vld [vmem:[%s1125_s1 + $0x460] sm:$0xff]  ;;  %v163_v35 = vld [vmem:[%s1125_s1 + $0x478] sm:$0xff] }
  0x32   :  { %552 = vmatprep.subr.bf16.mxu0 %v208_v30  ;;  %v234_v33 = vpack.c.bf16 %v161_v32, %v160_v31  ;;  %v627_v37 = vld [vmem:[%s1126_s0 + $0x20] ss:$0 sps:$4 sm:$0xff]  }
  0x33   :  { %573 = vmatpush3.bf16.msra.mxu1 %v215_v29  ;;  %v159_v29 = vld [vmem:[%s1125_s1 + $0x458] sm:$0xff]  ;;  %v489_v39 = vld [vmem:[%s1127_s2] ss:$0 sm:$0xff] }
  0x34   :  { %574 = vmatprep.subr.bf16.mxu1 %v224_v34  ;;  %v233_v30 = vpack.c.bf16 %v159_v29, %v158_v28  ;;  %v162_v34 = vld [vmem:[%s1125_s1 + $0x470] sm:$0xff] }
  0x35   :  { %553 = vmatpush3.bf16.msra.mxu0 %v200_v40  ;;  %v235_v36 = vpack.c.bf16 %v163_v35, %v162_v34 }
  0x36   :  { %554 = vmatprep.subr.bf16.mxu0 %v209_v43 }
  0x37   :  { %575 = vmatpush3.bf16.msra.mxu1 %v216_v42 }
  0x38   :  { %576 = vmatprep.subr.bf16.mxu1 %v225_v46 }
  0x39   :  { %555 = vmatpush3.bf16.msra.mxu0 %v201_v52 }
  0x3a   :  { %556 = vmatprep.subr.bf16.mxu0 %v210_v54 }
  0x3b   :  { %577 = vmatpush3.bf16.msra.mxu1 %v217_v53 }
  0x3c   :  { %578 = vmatprep.subr.bf16.mxu1 %v226_v58 }
  0x3d   :  { %557 = vmatpush3.bf16.msra.mxu0 %v202_v0 }
  0x3e   :  { %558 = vmatprep.subr.bf16.mxu0 %v211_v2 }
  0x3f   :  { %579 = vmatpush3.bf16.msra.mxu1 %v218_v1 }
  0x40   :  { %580 = vmatprep.subr.bf16.mxu1 %v227_v5 }
  0x41   :  { %559 = vmatpush3.bf16.msra.mxu0 %v203_v8 }
  0x42   :  { %597 = vmatprep.subr.bf16.mxu0 %v632_v15 }
  0x43   :  { %581 = vmatpush3.bf16.msra.mxu1 %v219_v9 }
  0x44   :  { %388 = vmatmul.mubr.bf16.vlgmr.msra.gmra.mrb[4].mxu0 %v494_v12 }
  0x45   :  { %598 = vmatpush3.bf16.msra.mxu0 %v228_v14  ;;  %613 = vmatprep.mubr.msk.bf16.mxu0 %vm633_vm0, %v632_v15 }
  0x46   :  { %428 = vmatmul.mubr.bf16.vlgmr.msra.gmra.mrb[4].mxu1 %v496_v13  ;;  %599 = vmatprep.subr.bf16.mxu0 %v632_v15 }
  0x49   :  { %600 = vmatpush3.bf16.msra.mxu0 %v229_v18 }
  0x4a   :  { %601 = vmatprep.subr.bf16.mxu0 %v632_v15 }
  0x4d   :  { %602 = vmatpush3.bf16.msra.mxu0 %v230_v21 }
  0x4e   :  { %603 = vmatprep.subr.bf16.mxu0 %v632_v15 }
  0x51   :  { %604 = vmatpush3.bf16.msra.mxu0 %v231_v24 }
  0x52   :  { %605 = vmatprep.subr.bf16.mxu0 %v632_v15 }
  0x55   :  { %606 = vmatpush3.bf16.msra.mxu0 %v232_v27 }
  0x56   :  { %607 = vmatprep.subr.bf16.mxu0 %v632_v15 }
  0x59   :  { %608 = vmatpush3.bf16.msra.mxu0 %v233_v30 }
  0x5a   :  { %609 = vmatprep.subr.bf16.mxu0 %v632_v15 }
  0x5d   :  { %610 = vmatpush3.bf16.msra.mxu0 %v234_v33 }
  0x5e   :  { %611 = vmatprep.subr.bf16.mxu0 %v632_v15 }
  0x61   :  { %612 = vmatpush3.bf16.msra.mxu0 %v235_v36 }
  0x64   :  { %614 = vmatmul.mubr.bf16.vlgmr.msra.gmra.mrb[8].mxu0 %v627_v37 }
  0xf7   :  { %v516_v38 = vpop.f32.mrb[0].mxu0 }
  0xf8   :  { %v517_v40 = vpop.f32.mrb[1].mxu0 }
  0xf9   :  { %v538_v41 = vpop.f32.mrb[0].mxu1  ;;  %v518_v42 = vadd.f32 %v517_v40, %v516_v38  ;;  %v519_v43 = vpop.f32.mrb[2].mxu0 }
  0xfa   :  { %v539_v44 = vpop.f32.mrb[1].mxu1  ;;  %v520_v45 = vpop.f32.mrb[3].mxu0 }
  0xfb   :  { %v540_v46 = vadd.f32 %v539_v44, %v538_v41  ;;  %v541_v47 = vpop.f32.mrb[2].mxu1  ;;  %v310_v48 = vadd.f32 %v518_v42, %v489_v39 }
  0xfc   :  { %v542_v49 = vpop.f32.mrb[3].mxu1 }
  0xfd   :  { %v350_v50 = vadd.f32 %v540_v46, %v310_v48 }
 0x117   :  { %v560_v51 = vpop.f32.mrb[4].mxu0 }
 0x118   :  { %v561_v52 = vpop.f32.mrb[5].mxu0 }
 0x119   :  { %v582_v53 = vpop.f32.mrb[4].mxu1  ;;  %v562_v54 = vadd.f32 %v561_v52, %v560_v51  ;;  %v563_v55 = vpop.f32.mrb[6].mxu0 }
 0x11a   :  { %v583_v56 = vpop.f32.mrb[5].mxu1  ;;  %v564_v57 = vpop.f32.mrb[7].mxu0 }
 0x11b   :  { %v584_v58 = vadd.f32 %v583_v56, %v582_v53  ;;  %v585_v59 = vpop.f32.mrb[6].mxu1  ;;  %v390_v60 = vadd.f32 %v562_v54, %v350_v50 }
 0x11c   :  { %v586_v61 = vpop.f32.mrb[7].mxu1 }
 0x11d   :  { %v430_v62 = vadd.f32 %v584_v58, %v390_v60 }
 0x137   :  { %v469_v63 = vpop.f32.mrb[8].mxu0 }
 0x138   :  { %v470_v0 = vadd.f32 %v469_v63, %v430_v62  ;;  %v615_v1 = vpop.f32.mrb[9].mxu0 }
 0x139   :  { %v472_v2 = vpop.f32.mrb[10].mxu0 }
 0x13a   :  { %v499_v3 = vmul.f32 -1.442695, %v470_v0  ;;  %v616_v4 = vpop.f32.mrb[11].mxu0 }
 0x13c   :  { %628 = vpow2.f32 %v499_v3 }
 0x146   :  { %v629_v5 = vpop.eup %628 }
 0x147   :  { %v478_v6 = vadd.f32 1.0, %v629_v5 }
 0x149   :  { %630 = vrcp.f32 %v478_v6 }
 0x153   :  { %v631_v7 = vpop.eup %630 }
 0x154   :  { %v481_v8 = vmul.f32 %v631_v7, %v470_v0 }
 0x156   :  { %v482_v9 = vpack.c.bf16 %v481_v8, %v481_v8 }
 0x158   :  { %484 = vst.msk [vmem:[%s1128_s3] sm:$0xf] %vm483_vm1, %v482_v9 }

// kernel: vitaev2_vsa_forward.47
= control target key start
LH: loop header
LB: loop body
LE: loop exit
PB: predicated region body
PF: predicated region fallthrough
CT: control target
= control target key end

     0   :  { %s1640_s29 = smov 0   ;;  %s1879_s0 = inlined_call_operand.vmem [shape: bf16[16,32], index: 0, kind: input, shape index: {}]   ;;  %s1880_s1 = inlined_call_operand.vmem [shape: bf16[16,32], index: 1, kind: input, shape index: {}]   ;;  %s1881_s2 = inlined_call_operand.vmem [shape: f32[1,32], index: 2, kind: input, shape index: {}]   ;;  %s1882_s3 = inlined_call_operand.vmem [shape: f32[1,32], index: 3, kind: input, shape index: {}]   ;;  %s1883_s4 = inlined_call_operand.vmem [shape: f32[32,96], index: 4, kind: input, shape index: {}]   ;;  %s1884_s5 = inlined_call_operand.vmem [shape: f32[1,96], index: 5, kind: input, shape index: {}]   ;;  %s1885_s6 = inlined_call_operand.vmem [shape: f32[32,32], index: 6, kind: input, shape index: {}]   ;;  %s1886_s7 = inlined_call_operand.vmem [shape: f32[1,32], index: 7, kind: input, shape index: {}]   ;;  %s1887_s8 = inlined_call_operand.vmem [shape: f32[1,32], index: 8, kind: input, shape index: {}]   ;;  %s1888_s9 = inlined_call_operand.vmem [shape: f32[1,32], index: 9, kind: input, shape index: {}]   ;;  %s1889_s10 = inlined_call_operand.vmem [shape: f32[32,128], index: 10, kind: input, shape index: {}]   ;;  %s1890_s11 = inlined_call_operand.vmem [shape: f32[1,128], index: 11, kind: input, shape index: {}]   ;;  %s1891_s12 = inlined_call_operand.vmem [shape: f32[128,32], index: 12, kind: input, shape index: {}]   ;;  %s1892_s13 = inlined_call_operand.vmem [shape: f32[1,32], index: 13, kind: input, shape index: {}]   ;;  %s1893_s14 = inlined_call_operand.vmem [shape: bf16[16,32], index: 14, kind: output, shape index: {}]  }
   0x1 LB: > { %s1340_s30 = sadd.s32 4294967295, %s1547_s29   ;;  %p1344_p0 = scmp.ge.s32.totalorder %s1547_s29, 1  ;;  %s1547_s29 = sphi %s1640_s29, %s24_s29  }
   0x2   : > { %p420_p1 = scmp.lt.s32.totalorder %s1547_s29, 3 }
   0x4   : > { %p421_p2 = pnand %p1344_p0, %p420_p1 }
   0x5   : > { %p468_p3 = scmp.lt.s32.totalorder (!%p421_p2), %s1340_s30, 1  ;;  %vm483_vm0 = vcmask (!%p421_p2), 261120   ;;  %v515_v8 = vld [vmem:[%s1883_s4] sm:$0xff] (!%p421_p2)  ;;  %v516_v9 = vld [vmem:[%s1883_s4 + $0x8] sm:$0xff] (!%p421_p2)  ;;  %v517_v10 = vld [vmem:[%s1883_s4 + $0x10] sm:$0xff] (!%p421_p2)  ;;  %v1549_v11 = vmov (!%p421_p2), 0.0   ;;  %v571_v43 = vlaneseq (!%p421_p2) }
   0x6   : > { %424 = sbr.rel (%p421_p2) target bundleno = 2590 (0xa1e), region = 76  ;;  %1403 = vmatprep.subr.bf16.mxu0 (!%p421_p2), %v1549_v11  ;;  %v519_v12 = vpack.c.bf16 (!%p421_p2), %v516_v9, %v515_v8  ;;  %v518_v13 = vld [vmem:[%s1883_s4 + $0x18] sm:$0xff] (!%p421_p2)  ;;  %vm1550_vm1 = vmmov (!%p421_p2), 0   ;;  %1423 = vmatprep.subr.bf16.mxu1 (!%p421_p2), %v1549_v11  ;;  %v1348_v19 = vld [vmem:[%s1881_s2] ss:$0 sm:$0xff] (!%p421_p2)  ;;  %s1551_s19 = smov (!%p421_p2), 120  }
   0x7   : > { %1407 = vmatprep.mubr.msk.bf16.mxu0 (!%p421_p2), %vm1550_vm1, %v1549_v11  ;;  %1425 = vmatprep.mubr.msk.bf16.mxu1 (!%p421_p2), %vm1550_vm1, %v1549_v11  ;;  %v520_v14 = vpack.c.bf16 (!%p421_p2), %v518_v13, %v517_v10  ;;  %v1349_v21 = vld [vmem:[%s1882_s3] ss:$0 sm:$0xff] (!%p421_p2)  ;;  %s1552_s20 = smov (!%p421_p2), 96   ;;  %s1553_s21 = smov (!%p421_p2), 88   ;;  %vm578_vm2 = vcmask (!%p421_p2), 64512   ;;  %v572_v44 = vand.u32 (!%p421_p2), 127, %v571_v43 }
   0x8   : > { %1404 = vmatpush3.bf16.msra.mxu0 (!%p421_p2), %v519_v12  ;;  %v1350_v25 = vld [vmem:[%s1884_s5] ss:$0 sm:$0xff] (!%p421_p2)  ;;  %s1554_s22 = smov (!%p421_p2), 80   ;;  %s1555_s23 = smov (!%p421_p2), 112   ;;  %vm646_vm4 = vcmask (!%p421_p2), 1043456   ;;  %vm1039_vm5 = vcmask (!%p421_p2), 130048  }
   0x9   : > { %1405 = vmatprep.subr.bf16.mxu0 (!%p421_p2), %v1549_v11  ;;  %s1556_s24 = smov (!%p421_p2), 72   ;;  %s1557_s25 = smov (!%p421_p2), 104   ;;  %vm573_vm3 = vcmp.lt.s32.totalorder (!%p421_p2), %v572_v44, 4  ;;  %vm1041_vm6 = vcmask (!%p421_p2), 195584   ;;  %vm1273_vm7 = vcmask (!%p421_p2), 257024  }
   0xa   : > { %s1558_s26 = smov (!%p421_p2), 64   ;;  %s1559_s27 = smov (!%p421_p2), 56  }
   0xb   : > { %s1560_s28 = smov (!%p421_p2), 48   ;;  %s1562_s16 = smov (!%p421_p2), 8  }
   0xc   : > { %1406 = vmatpush3.bf16.msra.mxu0 (!%p421_p2), %v520_v14 }
   0xd   : > { %s1895_s30 = smov (!%p468_p3, %s1340_s30), 1  ;;  %1411 = vmatprep.subr.bf16.mxu0 %v1549_v11 }
   0xe   : > { %s1648_s15 = sshll.u32 %s1895_s30, 2  ;;  %s1561_s30 = smov 40  }
   0xf   : > { %s471_s18 = scalar_lea.vmem %s1879_s0, %s1648_s15 }
  0x10   : > { %v481_v0 = vld [vmem:[%s471_s18] sm:$0xf] }
  0x11   : > { %v1654_v1 = vunpack.c.l.bf16 %v481_v0 }
  0x13   : > { %v484_v2 = vsel %vm483_vm0, %v1654_v1, 0.0 }
  0x14   : > { %485 = vadd.xlane.f32.xlu0 %v484_v2 }
  0xa1   : > { %v486_v3 = vpop.xlane.xlu0 %485 }
  0xa2   : > { %v488_v4 = vmul.f32 0.03125, %v486_v3 }
  0xa4   : > { %v489_v5 = vsub.f32 %v1654_v1, %v488_v4 }
  0xa6   : > { %v490_v6 = vmul.f32 %v489_v5, %v489_v5 }
  0xa8   : > { %v491_v7 = vsel %vm483_vm0, %v490_v6, 0.0 }
  0xa9   : > { %492 = vadd.xlane.f32.xlu0 %v491_v7 }
 0x136   : > { %v493_v15 = vpop.xlane.xlu0 %492 }
 0x137   : > { %v494_v16 = vmul.f32 0.03125, %v493_v15 }
 0x139   : > { %v495_v17 = vadd.f32 1e-06, %v494_v16 }
 0x13b   : > { %1519 = vrsqrt.f32 %v495_v17 }
 0x145   : > { %v1520_v18 = vpop.eup %1519 }
 0x146   : > { %v497_v20 = vmul.f32 %v1520_v18, %v489_v5 }
 0x148   : > { %v505_v22 = vmul.f32 %v1348_v19, %v497_v20 }
 0x14a   : > { %v513_v23 = vadd.f32 %v1349_v21, %v505_v22 }
 0x14c   : > { %v514_v24 = vpack.c.bf16 %v513_v23, %v513_v23 }
 0x14e   : > { %1408 = vmatmul.mubr.msk.bf16.vlgmr.msra.gmra.mrb[0].mxu0 %vm483_vm0, %v514_v24 }
 0x14f   : > { %1413 = vmatprep.mubr.msk.bf16.mxu0 %vm1550_vm1, %v1549_v11 }
 0x221   : > { %v565_v26 = vpop.f32.mrb[0].mxu0 }
 0x222   : > { %v566_v27 = vadd.f32 %v1350_v25, %v565_v26  ;;  %v1409_v28 = vpop.f32.mrb[1].mxu0 }
 0x223   : > { %v568_v29 = vpop.f32.mrb[2].mxu0 }
 0x224   : > { %v1692_v30 = vpack.c.bf16 %v566_v27, %v566_v27  ;;  %v1410_v31 = vpop.f32.mrb[3].mxu0 }
 0x226   : > { %690 = vrot.lane.b32.xlu0 %v1692_v30, %s1551_s19  ;;  %576 = vrot.lane.b32.xlu1 %v1692_v30, %s1552_s20 }
 0x22a   : > { %692 = vrot.lane.b32.xlu1 %v1692_v30, %s1553_s21 }
 0x22e   : > { %804 = vrot.lane.b32.xlu1 %v1692_v30, %s1554_s22 }
 0x232   : > { %802 = vrot.lane.b32.xlu1 %v1692_v30, %s1555_s23 }
 0x236   : > { %916 = vrot.lane.b32.xlu1 %v1692_v30, %s1556_s24 }
 0x23a   : > { %914 = vrot.lane.b32.xlu1 %v1692_v30, %s1557_s25  ;;  %s1563_s25 = smov 16  }
 0x298   : > { %v577_v32 = vpop.permute.xlu1 %576  ;;  %v691_v37 = vpop.permute.xlu0 %690 }
 0x299   : > { %v583_v33 = vsel %vm578_vm2, %v577_v32, 0 }
 0x29a   : > { %1412 = vmatpush3.bf16.xpose.msra.mxu0 %v583_v33 }
 0x29b   : > { %1417 = vmatprep.subr.bf16.mxu0 %v1549_v11 }
 0x29c   : > { %v693_v34 = vpop.permute.xlu1 %692 }
 0x29d   : > { %v698_v35 = vsel %vm578_vm2, %v693_v34, 0 }
 0x29e   : > { %1424 = vmatpush3.bf16.xpose.msra.mxu1 %v698_v35 }
 0x29f   : > { %1435 = vmatprep.subr.bf16.mxu1 %v1549_v11 }
 0x2a0   : > { %v805_v36 = vpop.permute.xlu1 %804 }
 0x2a1   : > { %1414 = vmatmul.mubr.msk.bf16.vlgmr.msra.gmra.mrb[4].mxu0 %vm578_vm2, %v1692_v30  ;;  %v810_v39 = vsel %vm578_vm2, %v805_v36, 0 }
 0x2a2   : > { %1419 = vmatprep.mubr.msk.bf16.mxu0 %vm1550_vm1, %v1549_v11 }
 0x2a4   : > { %v803_v38 = vpop.permute.xlu1 %802 }
 0x2a5   : > { %1426 = vmatmul.mubr.msk.bf16.vlgmr.msra.gmra.mrb[0].mxu1 %vm578_vm2, %v691_v37 }
 0x2a6   : > { %1436 = vmatpush3.bf16.xpose.msra.mxu1 %v810_v39  ;;  %1437 = vmatprep.mubr.msk.bf16.mxu1 %vm1550_vm1, %v1549_v11 }
 0x2a7   : > { %1447 = vmatprep.subr.bf16.mxu1 %v1549_v11 }
 0x2a8   : > { %v917_v40 = vpop.permute.xlu1 %916 }
 0x2a9   : > { %v922_v41 = vsel %vm578_vm2, %v917_v40, 0 }
 0x2ac   : > { %v915_v42 = vpop.permute.xlu1 %914 }
 0x2ad   : > { %1438 = vmatmul.mubr.msk.bf16.vlgmr.msra.gmra.mrb[4].mxu1 %vm578_vm2, %v803_v38 }
 0x2ae   : > { %1448 = vmatpush3.bf16.xpose.msra.mxu1 %v922_v41  ;;  %1449 = vmatprep.mubr.msk.bf16.mxu1 %vm1550_vm1, %v1549_v11 }
 0x2af   : > { %1459 = vmatprep.subr.bf16.mxu1 %v1549_v11 }
 0x2b5   : > { %1450 = vmatmul.mubr.msk.bf16.vlgmr.msra.gmra.mrb[8].mxu1 %vm578_vm2, %v915_v42 }
 0x2b6   : > { %1463 = vmatprep.mubr.msk.bf16.mxu1 %vm1550_vm1, %v1549_v11 }
 0x374   : > { %v619_v45 = vpop.f32.mrb[4].mxu0 }
 0x375   : > { %v625_v46 = vmul.f32 0.35355338, %v619_v45  ;;  %v1415_v47 = vpop.f32.mrb[5].mxu0 }
 0x376   : > { %v622_v48 = vpop.f32.mrb[6].mxu0 }
 0x377   : > { %v1416_v49 = vpop.f32.mrb[7].mxu0  ;;  %v628_v50 = vsel %vm573_vm3, %v625_v46, -1e+09 }
 0x378   : > { %v734_v51 = vpop.f32.mrb[0].mxu1  ;;  %v629_v52 = vsel %vm578_vm2, %v628_v50, -inf }
 0x379   : > { %v740_v53 = vmul.f32 0.35355338, %v734_v51  ;;  %v1427_v54 = vpop.f32.mrb[1].mxu1  ;;  %630 = vmax.xlane.f32.xlu1 %v629_v52 }
 0x37a   : > { %v737_v55 = vpop.f32.mrb[2].mxu1 }
 0x37b   : > { %v1428_v56 = vpop.f32.mrb[3].mxu1  ;;  %v741_v57 = vsel %vm573_vm3, %v740_v53, -1e+09 }
 0x37c   : > { %v742_v58 = vsel %vm578_vm2, %v741_v57, -inf }
 0x37d   : > { %743 = vmax.xlane.f32.xlu0 %v742_v58 }
 0x380   : > { %v846_v59 = vpop.f32.mrb[4].mxu1 }
 0x381   : > { %v852_v60 = vmul.f32 0.35355338, %v846_v59  ;;  %v1439_v61 = vpop.f32.mrb[5].mxu1 }
 0x382   : > { %v849_v62 = vpop.f32.mrb[6].mxu1 }
 0x383   : > { %v1440_v63 = vpop.f32.mrb[7].mxu1  ;;  %v853_v0 = vsel %vm573_vm3, %v852_v60, -1e+09 }
 0x384   : > { %v854_v2 = vsel %vm578_vm2, %v853_v0, -inf  ;;  %v1044_v63 = vld [vmem:[%s1885_s6] sm:$0xff] }
 0x385   : > { %855 = vmax.xlane.f32.xlu1 %v854_v2 }
 0x388   : > { %v958_v3 = vpop.f32.mrb[8].mxu1 }
 0x389   : > { %v964_v4 = vmul.f32 0.35355338, %v958_v3  ;;  %v1451_v5 = vpop.f32.mrb[9].mxu1  ;;  %v1046_v3 = vld [vmem:[%s1885_s6 + $0x10] sm:$0xff] }
 0x38a   : > { %v961_v6 = vpop.f32.mrb[10].mxu1 }
 0x38b   : > { %v1452_v7 = vpop.f32.mrb[11].mxu1  ;;  %v965_v8 = vsel %vm573_vm3, %v964_v4, -1e+09  ;;  %v1047_v4 = vld [vmem:[%s1885_s6 + $0x18] sm:$0xff] }
 0x38c   : > { %v966_v9 = vsel %vm578_vm2, %v965_v8, -inf  ;;  %v1049_v5 = vpack.c.bf16 %v1047_v4, %v1046_v3  ;;  %v1209_v3 = vld [vmem:[%s1891_s12 + $0x48] sm:$0xff] }
 0x38d   : > { %967 = vmax.xlane.f32.xlu0 %v966_v9 }
 0x406   : > { %v631_v10 = vpop.xlane.xlu1 %630 }
 0x407   : > { %v632_v12 = vsub.f32 %v628_v50, %v631_v10 }
 0x409   : > { %v633_v13 = vmul.f32 1.442695, %v632_v12 }
 0x40a   : > { %v744_v14 = vpop.xlane.xlu0 %743 }
 0x40b   : > { %1521 = vpow2.f32 %v633_v13  ;;  %v745_v15 = vsub.f32 %v741_v57, %v744_v14 }
 0x40d   : > { %v746_v16 = vmul.f32 1.442695, %v745_v15 }
 0x40f   : > { %1523 = vpow2.f32 %v746_v16 }
 0x412   : > { %v856_v26 = vpop.xlane.xlu1 %855 }
 0x413   : > { %v857_v27 = vsub.f32 %v853_v0, %v856_v26  ;;  %v1045_v0 = vld [vmem:[%s1885_s6 + $0x8] sm:$0xff] }
 0x414   : > { %v1048_v2 = vpack.c.bf16 %v1045_v0, %v1044_v63  ;;  %v1207_v63 = vld [vmem:[%s1891_s12 + $0x38] sm:$0xff] }
 0x415   : > { %v1522_v17 = vpop.eup %1521  ;;  %v858_v28 = vmul.f32 1.442695, %v857_v27 }
 0x416   : > { %v635_v18 = vsel %vm578_vm2, %v1522_v17, 0.0  ;;  %1460 = vmatpush3.bf16.msra.mxu1 %v1048_v2  ;;  %v1208_v2 = vld [vmem:[%s1891_s12 + $0x40] sm:$0xff] }
 0x417   : > { %636 = vadd.xlane.f32.xlu1 %v635_v18  ;;  %1461 = vmatprep.subr.bf16.mxu1 %v1549_v11  ;;  %v1220_v4 = vpack.c.bf16 %v1209_v3, %v1208_v2 }
 0x419   : > { %v1524_v19 = vpop.eup %1523 }
 0x41a   : > { %v968_v20 = vpop.xlane.xlu0 %967  ;;  %v748_v21 = vsel %vm578_vm2, %v1524_v19, 0.0  ;;  %1462 = vmatpush3.bf16.msra.mxu1 %v1049_v5  ;;  %v1210_v5 = vld [vmem:[%s1891_s12 + $0x50] sm:$0xff] }
 0x41b   : > { %v969_v22 = vsub.f32 %v965_v8, %v968_v20  ;;  %749 = vadd.xlane.f32.xlu0 %v748_v21  ;;  %1475 = vmatprep.subr.bf16.mxu1 %v1549_v11 }
 0x41d   : > { %v970_v23 = vmul.f32 1.442695, %v969_v22 }
 0x41f   : > { %1525 = vpow2.f32 %v970_v23  ;;  %v1360_v23 = vld [vmem:[%s1886_s7] ss:$0 sm:$0xff] }
 0x420   : > { %1527 = vpow2.f32 %v858_v28 }
 0x428   : > { %641 = vrot.lane.b32.xlu1 %v1692_v30, %s1558_s26  ;;  %s1564_s26 = smov 24  }
 0x429   : > { %v1526_v24 = vpop.eup %1525 }
 0x42a   : > { %v972_v25 = vsel %vm578_vm2, %v1526_v24, 0.0  ;;  %v1528_v29 = vpop.eup %1527 }
 0x42b   : > { %973 = vadd.xlane.f32.xlu0 %v972_v25  ;;  %v860_v31 = vsel %vm578_vm2, %v1528_v29, 0.0 }
 0x441   : > { %754 = vrot.lane.b32.xlu0 %v1692_v30, %s1559_s27 }
 0x44c   : > { %861 = vadd.xlane.f32.xlu1 %v860_v31 }
 0x45d   : > { %866 = vrot.lane.b32.xlu1 %v1692_v30, %s1560_s28 }
 0x461   : > { %978 = vrot.lane.b32.xlu1 %v1692_v30, %s1561_s30  ;;  %s475_s30 = scalar_lea.vmem %s1880_s1, %s1648_s15 }
 0x462   : > { %v1100_v22 = vld [vmem:[%s475_s30] sm:$0xf] }
 0x4a4   : > { %v637_v32 = vpop.xlane.xlu1 %636 }
 0x4a5   : > { %1529 = vrcp.f32 %v637_v32 }
 0x4a8   : > { %v642_v33 = vpop.permute.xlu1 %641  ;;  %v750_v35 = vpop.xlane.xlu0 %749 }
 0x4a9   : > { %v648_v34 = vsel %vm646_vm4, %v642_v33, 0  ;;  %1531 = vrcp.f32 %v750_v35 }
 0x4aa   : > { %1418 = vmatpush3.bf16.msra.mxu0 %v648_v34 }
 0x4ab   : > { %1429 = vmatprep.subr.bf16.mxu0 %v1549_v11 }
 0x4af   : > { %v1530_v36 = vpop.eup %1529 }
 0x4b0   : > { %v639_v37 = vmul.f32 %v1530_v36, %v1522_v17 }
 0x4b2   : > { %v640_v38 = vpack.c.bf16 %v639_v37, %v639_v37 }
 0x4b3   : > { %v1532_v30 = vpop.eup %1531 }
 0x4b4   : > { %1420 = vmatmul.mubr.msk.bf16.vlgmr.msra.gmra.mrb[8].mxu0 %vm578_vm2, %v640_v38  ;;  %v752_v40 = vmul.f32 %v1532_v30, %v1524_v19  ;;  %v1134_v30 = vld [vmem:[%s1889_s10] sm:$0xff] }
 0x4b5   : > { %1431 = vmatprep.mubr.msk.bf16.mxu0 %vm1550_vm1, %v1549_v11 }
 0x4b6   : > { %v753_v43 = vpack.c.bf16 %v752_v40, %v752_v40  ;;  %v1136_v40 = vld [vmem:[%s1889_s10 + $0x10] sm:$0xff] }
 0x4b8   : > { %v974_v39 = vpop.xlane.xlu0 %973 }
 0x4bc   : > { %v755_v41 = vpop.permute.xlu0 %754 }
 0x4bd   : > { %v760_v42 = vsel %vm646_vm4, %v755_v41, 0  ;;  %v1137_v41 = vld [vmem:[%s1889_s10 + $0x18] sm:$0xff] }
 0x4be   : > { %1430 = vmatpush3.bf16.msra.mxu0 %v760_v42  ;;  %v1139_v42 = vpack.c.bf16 %v1137_v41, %v1136_v40 }
 0x4bf   : > { %1441 = vmatprep.subr.bf16.mxu0 %v1549_v11 }
 0x4c1   : > { %1432 = vmatmul.mubr.msk.bf16.vlgmr.msra.gmra.mrb[12].mxu0 %vm578_vm2, %v753_v43 }
 0x4c2   : > { %1443 = vmatprep.mubr.msk.bf16.mxu0 %vm1550_vm1, %v1549_v11 }
 0x4d9   : > { %v862_v44 = vpop.xlane.xlu1 %861 }
 0x4da   : > { %1533 = vrcp.f32 %v862_v44 }
 0x4db   : > { %1535 = vrcp.f32 %v974_v39 }
 0x4dd   : > { %v867_v45 = vpop.permute.xlu1 %866 }
 0x4de   : > { %v872_v46 = vsel %vm646_vm4, %v867_v45, 0 }
 0x4df   : > { %1442 = vmatpush3.bf16.msra.mxu0 %v872_v46 }
 0x4e0   : > { %1453 = vmatprep.subr.bf16.mxu0 %v1549_v11 }
 0x4e1   : > { %v979_v49 = vpop.permute.xlu1 %978 }
 0x4e2   : > { %v984_v52 = vsel %vm646_vm4, %v979_v49, 0  ;;  %v1363_v49 = vld [vmem:[%s1888_s9] ss:$0 sm:$0xff] }
 0x4e4   : > { %v1534_v47 = vpop.eup %1533 }
 0x4e5   : > { %v864_v48 = vmul.f32 %v1534_v47, %v1528_v29  ;;  %v1536_v51 = vpop.eup %1535  ;;  %v1362_v47 = vld [vmem:[%s1887_s8] ss:$0 sm:$0xff] }
 0x4e6   : > { %v976_v53 = vmul.f32 %v1536_v51, %v1526_v24  ;;  %v1101_v24 = vunpack.c.l.bf16 %v1100_v22 }
 0x4e7   : > { %v865_v50 = vpack.c.bf16 %v864_v48, %v864_v48 }
 0x4e8   : > { %v977_v54 = vpack.c.bf16 %v976_v53, %v976_v53  ;;  %v1200_v53 = vld [vmem:[%s1891_s12] sm:$0xff] }
 0x4e9   : > { %1444 = vmatmul.mubr.msk.bf16.vlgmr.msra.gmra.mrb[16].mxu0 %vm578_vm2, %v865_v50 }
 0x4ea   : > { %1454 = vmatpush3.bf16.msra.mxu0 %v984_v52  ;;  %1455 = vmatprep.mubr.msk.bf16.mxu0 %vm1550_vm1, %v1549_v11 }
 0x4eb   : > { %1467 = vmatprep.subr.bf16.mxu0 %v1549_v11 }
 0x4f1   : > { %1456 = vmatmul.mubr.msk.bf16.vlgmr.msra.gmra.mrb[20].mxu0 %vm578_vm2, %v977_v54  ;;  %v1201_v54 = vld [vmem:[%s1891_s12 + $0x8] sm:$0xff] }
 0x4f2   : > { %1471 = vmatprep.mubr.msk.bf16.mxu0 %vm1550_vm1, %v1549_v11 }
 0x587   : > { %v684_v55 = vpop.f32.mrb[8].mxu0 }
 0x588   : > { %v1421_v56 = vpop.f32.mrb[9].mxu0 }
 0x589   : > { %v687_v57 = vpop.f32.mrb[10].mxu0  ;;  %v1202_v56 = vld [vmem:[%s1891_s12 + $0x10] sm:$0xff] }
 0x58a   : > { %v1422_v58 = vpop.f32.mrb[11].mxu0  ;;  %v1203_v57 = vld [vmem:[%s1891_s12 + $0x18] sm:$0xff] }
 0x58b   : > { %v1217_v58 = vpack.c.bf16 %v1203_v57, %v1202_v56 }
 0x594   : > { %v796_v59 = vpop.f32.mrb[12].mxu0 }
 0x595   : > { %1027 = vrot.lane.b32.xlu0 %v796_v59, %s1562_s16  ;;  %v1433_v60 = vpop.f32.mrb[13].mxu0  ;;  %v1204_v59 = vld [vmem:[%s1891_s12 + $0x20] sm:$0xff] }
 0x596   : > { %v799_v61 = vpop.f32.mrb[14].mxu0  ;;  %v1205_v60 = vld [vmem:[%s1891_s12 + $0x28] sm:$0xff] }
 0x597   : > { %v1434_v62 = vpop.f32.mrb[15].mxu0  ;;  %v1218_v61 = vpack.c.bf16 %v1205_v60, %v1204_v59 }
 0x598   : > { %v1206_v62 = vld [vmem:[%s1891_s12 + $0x30] sm:$0xff] }
 0x599   : > { %v1219_v0 = vpack.c.bf16 %v1207_v63, %v1206_v62 }
 0x5bc   : > { %v908_v6 = vpop.f32.mrb[16].mxu0 }
 0x5bd   : > { %1031 = vrot.lane.b32.xlu1 %v908_v6, %s1563_s25  ;;  %v1445_v7 = vpop.f32.mrb[17].mxu0  ;;  %v1211_v6 = vld [vmem:[%s1891_s12 + $0x58] sm:$0xff] }
 0x5be   : > { %v911_v8 = vpop.f32.mrb[18].mxu0  ;;  %v1221_v7 = vpack.c.bf16 %v1211_v6, %v1210_v5 }
 0x5bf   : > { %v1446_v9 = vpop.f32.mrb[19].mxu0  ;;  %v1212_v8 = vld [vmem:[%s1891_s12 + $0x60] sm:$0xff] }
 0x5c0   : > { %v1213_v9 = vld [vmem:[%s1891_s12 + $0x68] sm:$0xff] }
 0x5c4   : > { %v1020_v10 = vpop.f32.mrb[20].mxu0 }
 0x5c5   : > { %1035 = vrot.lane.b32.xlu0 %v1020_v10, %s1564_s26  ;;  %v1457_v12 = vpop.f32.mrb[21].mxu0  ;;  %v1222_v10 = vpack.c.bf16 %v1213_v9, %v1212_v8  ;;  %s479_s26 = scalar_lea.vmem %s1893_s14, %s1648_s15 }
 0x5c6   : > { %v1023_v13 = vpop.f32.mrb[22].mxu0  ;;  %v1214_v12 = vld [vmem:[%s1891_s12 + $0x70] sm:$0xff] }
 0x5c7   : > { %v1458_v14 = vpop.f32.mrb[23].mxu0  ;;  %v1215_v13 = vld [vmem:[%s1891_s12 + $0x78] sm:$0xff] }
 0x5c8   : > { %v1223_v14 = vpack.c.bf16 %v1215_v13, %v1214_v12 }
 0x607   : > { %v1028_v15 = vpop.permute.xlu0 %1027 }
 0x608   : > { %v1038_v17 = vsel %vm578_vm2, %v684_v55, %v1028_v15  ;;  %v1216_v55 = vpack.c.bf16 %v1201_v54, %v1200_v53  ;;  %v1364_v15 = vld [vmem:[%s1890_s11] ss:$0 sm:$0xff] }
 0x62f   : > { %v1032_v16 = vpop.permute.xlu1 %1031 }
 0x630   : > { %v1040_v18 = vsel %vm1039_vm5, %v1038_v17, %v1032_v16 }
 0x637   : > { %v1036_v19 = vpop.permute.xlu0 %1035 }
 0x638   : > { %v1042_v20 = vsel %vm1041_vm6, %v1040_v18, %v1036_v19 }
 0x639   : > { %v1043_v21 = vpack.c.bf16 %v1042_v20, %v1042_v20 }
 0x63b   : > { %1464 = vmatmul.mubr.msk.bf16.vlgmr.msra.gmra.mrb[12].mxu1 %vm483_vm0, %v1043_v21 }
 0x63c   : > { %1491 = vmatprep.mubr.msk.bf16.mxu1 %vm1550_vm1, %v1549_v11  ;;  %1476 = vmatpush3.bf16.msra.mxu1 %v1216_v55 }
 0x63d   : > { %1477 = vmatprep.subr.bf16.mxu1 %v1549_v11 }
 0x640   : > { %1478 = vmatpush3.bf16.msra.mxu1 %v1217_v58 }
 0x641   : > { %1479 = vmatprep.subr.bf16.mxu1 %v1549_v11 }
 0x644   : > { %1480 = vmatpush3.bf16.msra.mxu1 %v1218_v61 }
 0x645   : > { %1481 = vmatprep.subr.bf16.mxu1 %v1549_v11 }
 0x648   : > { %1482 = vmatpush3.bf16.msra.mxu1 %v1219_v0 }
 0x649   : > { %1483 = vmatprep.subr.bf16.mxu1 %v1549_v11 }
 0x64c   : > { %1484 = vmatpush3.bf16.msra.mxu1 %v1220_v4 }
 0x64d   : > { %1485 = vmatprep.subr.bf16.mxu1 %v1549_v11 }
 0x650   : > { %1486 = vmatpush3.bf16.msra.mxu1 %v1221_v7 }
 0x651   : > { %1487 = vmatprep.subr.bf16.mxu1 %v1549_v11 }
 0x654   : > { %1488 = vmatpush3.bf16.msra.mxu1 %v1222_v10 }
 0x655   : > { %1489 = vmatprep.subr.bf16.mxu1 %v1549_v11 }
 0x658   : > { %1490 = vmatpush3.bf16.msra.mxu1 %v1223_v14 }
 0x70e   : > { %v1094_v25 = vpop.f32.mrb[12].mxu1 }
 0x70f   : > { %v1095_v26 = vadd.f32 %v1360_v23, %v1094_v25  ;;  %v1465_v27 = vpop.f32.mrb[13].mxu1 }
 0x710   : > { %v1097_v28 = vpop.f32.mrb[14].mxu1 }
 0x711   : > { %v1102_v29 = vadd.f32 %v1101_v24, %v1095_v26  ;;  %v1466_v31 = vpop.f32.mrb[15].mxu1 }
 0x712   : > { %v1366_v31 = vld [vmem:[%s1892_s13] ss:$0 sm:$0xff] }
 0x713   : > { %v1784_v32 = vadd.f32 %v1102_v29, %v1654_v1  ;;  %v1135_v1 = vld [vmem:[%s1889_s10 + $0x8] sm:$0xff] }
 0x714   : > { %v1138_v39 = vpack.c.bf16 %v1135_v1, %v1134_v30 }
 0x715   : > { %v1104_v33 = vsel %vm483_vm0, %v1784_v32, 0.0 }
 0x716   : > { %1105 = vadd.xlane.f32.xlu1 %v1104_v33  ;;  %1468 = vmatpush3.bf16.msra.mxu0 %v1138_v39 }
 0x717   : > { %1469 = vmatprep.subr.bf16.mxu0 %v1549_v11 }
 0x71a   : > { %1470 = vmatpush3.bf16.msra.mxu0 %v1139_v42 }
 0x7a3   : > { %v1106_v34 = vpop.xlane.xlu1 %1105 }
 0x7a4   : > { %v1107_v35 = vmul.f32 0.03125, %v1106_v34 }
 0x7a6   : > { %v1108_v36 = vsub.f32 %v1784_v32, %v1107_v35 }
 0x7a8   : > { %v1109_v37 = vmul.f32 %v1108_v36, %v1108_v36 }
 0x7aa   : > { %v1110_v38 = vsel %vm483_vm0, %v1109_v37, 0.0 }
 0x7ab   : > { %1111 = vadd.xlane.f32.xlu0 %v1110_v38 }
 0x838   : > { %v1112_v43 = vpop.xlane.xlu0 %1111 }
 0x839   : > { %v1113_v44 = vmul.f32 0.03125, %v1112_v43 }
 0x83b   : > { %v1114_v45 = vadd.f32 1e-06, %v1113_v44 }
 0x83d   : > { %1537 = vrsqrt.f32 %v1114_v45 }
 0x847   : > { %v1538_v46 = vpop.eup %1537 }
 0x848   : > { %v1116_v48 = vmul.f32 %v1538_v46, %v1108_v36 }
 0x84a   : > { %v1124_v50 = vmul.f32 %v1362_v47, %v1116_v48 }
 0x84c   : > { %v1132_v51 = vadd.f32 %v1363_v49, %v1124_v50 }
 0x84e   : > { %v1133_v52 = vpack.c.bf16 %v1132_v51, %v1132_v51 }
 0x850   : > { %1472 = vmatmul.mubr.msk.bf16.vlgmr.msra.gmra.mrb[24].mxu0 %vm483_vm0, %v1133_v52 }
 0x923   : > { %v1184_v16 = vpop.f32.mrb[24].mxu0 }
 0x924   : > { %v1185_v17 = vadd.f32 %v1364_v15, %v1184_v16  ;;  %v1473_v18 = vpop.f32.mrb[25].mxu0 }
 0x925   : > { %v1187_v19 = vpop.f32.mrb[26].mxu0 }
 0x926   : > { %v1190_v20 = vmul.f32 %v1185_v17, %v1185_v17  ;;  %v1474_v21 = vpop.f32.mrb[27].mxu0 }
 0x928   : > { %v1191_v22 = vmul.f32 %v1190_v20, %v1185_v17 }
 0x92a   : > { %v1192_v23 = vmul.f32 0.044715, %v1191_v22 }
 0x92c   : > { %v1193_v24 = vadd.f32 %v1192_v23, %v1185_v17 }
 0x92e   : > { %v1194_v25 = vmul.f32 0.7978846, %v1193_v24 }
 0x930   : > { %1539 = vtanh.f32 %v1194_v25 }
 0x93a   : > { %v1540_v26 = vpop.eup %1539 }
 0x93b   : > { %v1196_v27 = vadd.f32 1.0, %v1540_v26 }
 0x93d   : > { %v1197_v11 = vmul.f32 0.5, %v1196_v27 }
 0x93f   : > { %v1198_v28 = vmul.f32 %v1197_v11, %v1185_v17 }
 0x941   : > { %v1199_v29 = vpack.c.bf16 %v1198_v28, %v1198_v28 }
 0x943   : > { %1492 = vmatmul.mubr.bf16.vlgmr.msra.gmra.mrb[16].mxu1 %v1199_v29 }
 0xa16   : > { %v1265_v33 = vpop.f32.mrb[16].mxu1 }
 0xa17   : > { %v1266_v34 = vadd.f32 %v1366_v31, %v1265_v33  ;;  %v1493_v35 = vpop.f32.mrb[17].mxu1 }
 0xa18   : > { %v1268_v36 = vpop.f32.mrb[18].mxu1 }
 0xa19   : > { %v1271_v37 = vadd.f32 %v1266_v34, %v1784_v32  ;;  %v1494_v38 = vpop.f32.mrb[19].mxu1 }
 0xa1b   : > { %v1272_v30 = vpack.c.bf16 %v1271_v37, %v1271_v37 }
 0xa1d   : > { %1274 = vst.msk [vmem:[%s479_s26] sm:$0xf] %vm1273_vm7, %v1272_v30 }
 0xa1e PF: > { %s24_s29 = sadd.s32 1, %s1547_s29  }
 0xa1f   : > { %p21_p4 = scmp.ge.s32.totalorder %s24_s29, 4  }
 0xa21   :  { %23 = sbr.rel (!%p21_p4) target bundleno = 1 (0x1), region = 109 }

</bundles_post_ra>
